<compile_context>
chip_gen: v6e
topology: v6e:2x2x1
jax: 0.10.0
libtpu: 0.0.40
codegen_flags: <defaults>
</compile_context>

<pallas_src>
import functools

import jax
import jax.numpy as jnp
from jax.experimental import pallas as pl
from jax.experimental.pallas import tpu as pltpu


_CPARAMS = pltpu.CompilerParams(
    dimension_semantics=("parallel",),
    vmem_limit_bytes=48 * 1024 * 1024,
)


# ----------------------------------------------------------------------------
# In-kernel conv helpers (operate on values; activations are [C, H*W]).
# ----------------------------------------------------------------------------
def _col_masks(S, W):
    """{0,1} bf16 masks computed once per kernel body (col==0 / col==W-1 zeroed)."""
    col = jax.lax.broadcasted_iota(jnp.int32, (1, S), 1) % W
    m_first = (col != 0).astype(jnp.bfloat16)       # applied to dw == -1 taps
    m_last = (col != W - 1).astype(jnp.bfloat16)    # applied to dw == +1 taps
    return m_first, m_last


def _taps_s1(xb, W, m_first, m_last, pad):
    """Stride-1 'same' 3x3 tap matrix: xb [Cin, S] (bf16) -> [9*Cin, S] (bf16)."""
    Cin, S = xb.shape
    z = jnp.zeros((Cin, pad), xb.dtype)
    xp = jnp.concatenate([z, xb, z], axis=1)        # [Cin, S + 2*pad]
    taps = []
    for kh in range(3):
        dh = kh - 1
        for kw in range(3):
            dw = kw - 1
            d = dh * W + dw
            t = xb if d == 0 else xp[:, pad + d:pad + d + S]
            if dw == 1:
                t = t * m_last
            elif dw == -1:
                t = t * m_first
            taps.append(t)
    return jnp.concatenate(taps, axis=0)            # [9*Cin, S]


def _taps_s2(xphb, Wh, m_first, pad):
    """Stride-2 'same' 3x3 tap matrix computed directly at half resolution.
    xphb: [4, Cin, Hh*Wh] bf16 phase planes (plane 2*pr+pc = x_full[:, 2i+pr, 2j+pc]).
    Returns [9*Cin, Hh*Wh] bf16."""
    Cin, S = xphb.shape[1], xphb.shape[2]
    z = jnp.zeros((Cin, pad), xphb.dtype)
    padded = {}

    def pp(p):
        if p not in padded:
            padded[p] = jnp.concatenate([z, xphb[p]], axis=1)   # left pad only (d <= 0)
        return padded[p]

    taps = []
    for kh in range(3):
        dh = kh - 1
        pr, sr = (1, -1) if dh == -1 else ((0, 0) if dh == 0 else (1, 0))
        for kw in range(3):
            dw = kw - 1
            pc, sc = (1, -1) if dw == -1 else ((0, 0) if dw == 0 else (1, 0))
            p = 2 * pr + pc
            d = sr * Wh + sc
            t = xphb[p] if d == 0 else pp(p)[:, pad + d:pad + d + S]
            if sc == -1:
                t = t * m_first
            taps.append(t)
    return jnp.concatenate(taps, axis=0)


def _conv3x3(x, w, b, W, m_first, m_last, pad):
    """One-matmul 3x3 conv. x [Cin, S] (f32 or bf16), w [Cout, 9*Cin] bf16, b [Cout,1]|None."""
    taps = _taps_s1(x.astype(jnp.bfloat16), W, m_first, m_last, pad)
    y = jnp.dot(w, taps, preferred_element_type=jnp.float32)
    return y if b is None else y + b


# ----------------------------------------------------------------------------
# Kernel bodies (one grid step == one image; N dim squeezed via None block dims).
# ----------------------------------------------------------------------------
def _head_kernel(x_ref, w_ref, b_ref, o_ref, *, W):
    S = x_ref.shape[-1]
    m_first, m_last = _col_masks(S, W)
    o_ref[...] = jnp.maximum(
        _conv3x3(x_ref[...], w_ref[...], b_ref[...], W, m_first, m_last, W + 1), 0.0)


def _encoder_kernel(xph_ref, prev_ref, wc_ref, bc_ref, wx_ref, wrzh_ref, brz_ref,
                    wqh_ref, bq_ref, *rest, Wh, C, n_res, emit_y):
    """RecurrentConvLayer (stride-2 conv + ReLU + ConvGRU); optionally followed by
    the residual blocks and the innermost skip-sum (out 1 = GRU state, out 2 = y)."""
    rb_refs = rest[:4 * n_res]
    out_refs = rest[4 * n_res:]

    xphb = xph_ref[...].astype(jnp.bfloat16)
    S = xphb.shape[-1]
    pad = Wh + 1
    m_first, m_last = _col_masks(S, Wh)

    # stride-2 ConvLayer (+ReLU): one matmul on the phase-plane tap matrix.
    c = jnp.dot(wc_ref[...], _taps_s2(xphb, Wh, m_first, pad),
                preferred_element_type=jnp.float32) + bc_ref[...]
    c = jnp.maximum(c, 0.0)

    prev = prev_ref[...]

    # ConvGRU: x-side (reset|update|out) stacked -> one matmul on c's taps;
    # h-side (reset|update) stacked -> one matmul on prev's taps.
    gx = jnp.dot(wx_ref[...],
                 _taps_s1(c.astype(jnp.bfloat16), Wh, m_first, m_last, pad),
                 preferred_element_type=jnp.float32)            # [3C, S]
    gh = jnp.dot(wrzh_ref[...],
                 _taps_s1(prev.astype(jnp.bfloat16), Wh, m_first, m_last, pad),
                 preferred_element_type=jnp.float32)            # [2C, S]
    rz = jax.nn.sigmoid(gx[:2 * C] + gh + brz_ref[...])
    r = rz[:C]
    z = rz[C:]
    qh = jnp.dot(wqh_ref[...],
                 _taps_s1((r * prev).astype(jnp.bfloat16), Wh, m_first, m_last, pad),
                 preferred_element_type=jnp.float32)            # [C, S]
    q = jnp.tanh(gx[2 * C:] + qh + bq_ref[...])
    h = prev * (1.0 - z) + q * z                                # f32 state update
    out_refs[0][...] = h

    if emit_y:
        x = h
        for ri in range(n_res):
            w1, b1, w2, b2 = rb_refs[4 * ri:4 * ri + 4]
            t = jnp.maximum(_conv3x3(x, w1[...], b1[...], Wh, m_first, m_last, pad), 0.0)
            t = _conv3x3(t, w2[...], b2[...], Wh, m_first, m_last, pad)
            x = jnp.maximum(t + x, 0.0)
        out_refs[1][...] = x + h                                # skip_sum with blocks[ne-1]


def _decoder_mid_kernel(up_ref, skip_ref, w_ref, b_ref, o_ref, *, W):
    """UpsampleConvLayer conv (+ReLU) + the NEXT decoder stage's skip-sum, fused."""
    S = up_ref.shape[-1]
    m_first, m_last = _col_masks(S, W)
    y = jnp.maximum(_conv3x3(up_ref[...], w_ref[...], b_ref[...], W, m_first, m_last, W + 1), 0.0)
    o_ref[...] = y + skip_ref[...]


def _decoder_final_kernel(up_ref, head_ref, w_ref, b_ref, wp_ref, bp_ref, img_ref, *, W):
    """Last UpsampleConvLayer conv (+ReLU) + head skip-sum + 1x1 prediction conv, fused."""
    S = up_ref.shape[-1]
    m_first, m_last = _col_masks(S, W)
    t = jnp.maximum(_conv3x3(up_ref[...], w_ref[...], b_ref[...], W, m_first, m_last, W + 1), 0.0)
    t = t + head_ref[...]
    img_ref[...] = (jnp.dot(wp_ref[...], t.astype(jnp.bfloat16),
                            preferred_element_type=jnp.float32) + bp_ref[...])


# ----------------------------------------------------------------------------
# pallas_call wrappers.
# ----------------------------------------------------------------------------
def _img_spec(c, s):
    return pl.BlockSpec((None, c, s), lambda n: (n, 0, 0))


def _shared(arr):
    zeros = (0,) * arr.ndim
    return pl.BlockSpec(arr.shape, lambda n, _z=zeros: _z)


def head_conv(x, hp, W):
    N, Cin, S = x.shape
    Cout = hp["w"].shape[0]
    return pl.pallas_call(
        functools.partial(_head_kernel, W=W),
        out_shape=jax.ShapeDtypeStruct((N, Cout, S), jnp.float32),
        grid=(N,),
        in_specs=[_img_spec(Cin, S), _shared(hp["w"]), _shared(hp["b"])],
        out_specs=_img_spec(Cout, S),
        compiler_params=_CPARAMS,
    )(x, hp["w"], hp["b"])


def encoder_stage(xph, prev, enc_p, rbs_p, Wh, *, emit_y):
    N, _, Cin, S = xph.shape
    C = enc_p["wc"].shape[0]
    n_res = len(rbs_p)

    rb_in, rb_specs = [], []
    for rb in rbs_p:
        for k in ("w1", "b1", "w2", "b2"):
            rb_in.append(rb[k])
            rb_specs.append(_shared(rb[k]))

    base_in = [xph, prev, enc_p["wc"], enc_p["bc"], enc_p["wx"], enc_p["wrzh"],
               enc_p["brz"], enc_p["wqh"], enc_p["bq"]]
    base_specs = [pl.BlockSpec((None, 4, Cin, S), lambda n: (n, 0, 0, 0)),
                  _img_spec(C, S)] + [_shared(a) for a in base_in[2:]]

    st = jax.ShapeDtypeStruct((N, C, S), jnp.float32)
    if emit_y:
        out_shape = (st, st)
        out_specs = [_img_spec(C, S), _img_spec(C, S)]
    else:
        out_shape = st
        out_specs = _img_spec(C, S)

    return pl.pallas_call(
        functools.partial(_encoder_kernel, Wh=Wh, C=C, n_res=n_res, emit_y=emit_y),
        out_shape=out_shape,
        grid=(N,),
        in_specs=base_specs + rb_specs,
        out_specs=out_specs,
        compiler_params=_CPARAMS,
    )(*base_in, *rb_in)


def decoder_mid(up, skip, dp, W):
    N, Cin, S = up.shape
    Cout = dp["w"].shape[0]
    return pl.pallas_call(
        functools.partial(_decoder_mid_kernel, W=W),
        out_shape=jax.ShapeDtypeStruct((N, Cout, S), jnp.float32),
        grid=(N,),
        in_specs=[_img_spec(Cin, S), _img_spec(Cout, S), _shared(dp["w"]), _shared(dp["b"])],
        out_specs=_img_spec(Cout, S),
        compiler_params=_CPARAMS,
    )(up, skip, dp["w"], dp["b"])


def decoder_final(up, head, dp, predp, W):
    N, Cin, S = up.shape
    Cout = dp["w"].shape[0]
    Cimg = predp["w"].shape[0]
    return pl.pallas_call(
        functools.partial(_decoder_final_kernel, W=W),
        out_shape=jax.ShapeDtypeStruct((N, Cimg, S), jnp.float32),
        grid=(N,),
        in_specs=[_img_spec(Cin, S), _img_spec(Cout, S),
                  _shared(dp["w"]), _shared(dp["b"]),
                  _shared(predp["w"]), _shared(predp["b"])],
        out_specs=_img_spec(Cimg, S),
        compiler_params=_CPARAMS,
    )(up, head, dp["w"], dp["b"], predp["w"], predp["b"])


# ----------------------------------------------------------------------------
# Tiny XLA glue (rearranges only; all compute lives in the Pallas kernels).
# ----------------------------------------------------------------------------
def _phase_split(x, H, W):
    # TODO(synk): could become a strided HBM->VMEM DMA (memory_space=pl.ANY) instead.
    N, C, _ = x.shape
    x6 = x.reshape(N, C, H // 2, 2, W // 2, 2)
    x6 = jnp.transpose(x6, (0, 3, 5, 1, 2, 4))
    return x6.reshape(N, 4, C, (H // 2) * (W // 2))


def _upsample2x_bilinear(x, H, W):
    # F.interpolate(scale_factor=2, mode='bilinear', align_corners=False)
    # TODO(synk): fold into the decoder conv as 4 phase convs to avoid this 4x-area tensor.
    N, C, S = x.shape
    y = x.reshape(N, C, H, W)
    prv = jnp.concatenate([y[..., :1], y[..., :-1]], axis=-1)
    nxt = jnp.concatenate([y[..., 1:], y[..., -1:]], axis=-1)
    y = jnp.stack([0.25 * prv + 0.75 * y, 0.75 * y + 0.25 * nxt], axis=-1)
    y = y.reshape(N, C, H, 2 * W)
    prv = jnp.concatenate([y[:, :, :1], y[:, :, :-1]], axis=2)
    nxt = jnp.concatenate([y[:, :, 1:], y[:, :, -1:]], axis=2)
    y = jnp.stack([0.25 * prv + 0.75 * y, 0.75 * y + 0.25 * nxt], axis=3)
    return y.reshape(N, C, 4 * S)


# ----------------------------------------------------------------------------
# Deterministic parameter init (shapes follow the PyTorch module's __init__).
# ----------------------------------------------------------------------------
def _conv_init(key, kh, kw, cin, cout, zero_bias=False, scale=0.1):
    kw_, kb = jax.random.split(key)
    w = scale * jax.random.normal(kw_, (kh, kw, cin, cout), jnp.float32)
    if zero_bias:  # ConvGRU gates: init.constant_(bias, 0.)
        b = jnp.zeros((cout,), jnp.float32)
    else:
        b = scale * jax.random.normal(kb, (cout,), jnp.float32)
    return {"w": w, "b": b}


def init_e2vid_params(key, cfg):
    base, ne = cfg["base_num_channels"], cfg["num_encoders"]
    cm, k = cfg["channel_multiplier"], cfg["kernel_size"]
    enc_in = [int(base * cm ** i) for i in range(ne)]
    enc_out = [int(base * cm ** (i + 1)) for i in range(ne)]
    keys = iter(jax.random.split(key, 64))

    params = {"head": _conv_init(next(keys), k, k, cfg["num_bins"], base)}

    encoders = []
    for cin, cout in zip(enc_in, enc_out):
        enc = {"conv": _conv_init(next(keys), k, k, cin, cout)}
        enc["gru"] = {g: _conv_init(next(keys), 3, 3, 2 * cout, cout, zero_bias=True)
                      for g in ("reset", "update", "out")}
        encoders.append(enc)
    params["encoders"] = encoders

    cmax = enc_out[-1]
    params["resblocks"] = [
        {"conv1": _conv_init(next(keys), 3, 3, cmax, cmax),
         "conv2": _conv_init(next(keys), 3, 3, cmax, cmax)}
        for _ in range(cfg["num_residual_blocks"])
    ]
    dec_in, dec_out = list(reversed(enc_out)), list(reversed(enc_in))
    params["decoders"] = [_conv_init(next(keys), k, k, ci, co)
                          for ci, co in zip(dec_in, dec_out)]
    params["pred"] = _conv_init(next(keys), 1, 1, base, cfg["num_output_channels"])
    return params


# ----------------------------------------------------------------------------
# One-time weight packing into the kernel layout (done OUTSIDE the per-frame path).
# ----------------------------------------------------------------------------
def _w_stack(w):
    """HWIO [3,3,Cin,Cout] -> tap-stacked [Cout, 9*Cin] bf16 (tap k*Cin+ci = w[kh,kw,ci,:])."""
    KH, KW, Cin, Cout = w.shape
    return jnp.transpose(w.reshape(KH * KW, Cin, Cout), (2, 0, 1)).reshape(
        Cout, KH * KW * Cin).astype(jnp.bfloat16)


def _bcol(b):
    return b.reshape(-1, 1).astype(jnp.float32)


def prepare_params(params, cfg):
    pk = {"head": {"w": _w_stack(params["head"]["w"]), "b": _bcol(params["head"]["b"])}}

    encs = []
    for enc in params["encoders"]:
        C = enc["conv"]["w"].shape[-1]

        def split(g, _enc=enc, _C=C):
            wg = _enc["gru"][g]["w"]                       # [3,3,2C,C]; input order [x; h]
            return _w_stack(wg[:, :, :_C, :]), _w_stack(wg[:, :, _C:, :])

        rx, rh = split("reset")
        ux, uh = split("update")
        ox, oh = split("out")
        encs.append({
            "wc": _w_stack(enc["conv"]["w"]), "bc": _bcol(enc["conv"]["b"]),
            "wx": jnp.concatenate([rx, ux, ox], axis=0),   # [3C, 9C]
            "wrzh": jnp.concatenate([rh, uh], axis=0),     # [2C, 9C]
            "brz": _bcol(jnp.concatenate([enc["gru"]["reset"]["b"],
                                          enc["gru"]["update"]["b"]])),
            "wqh": oh,                                     # [C, 9C]
            "bq": _bcol(enc["gru"]["out"]["b"]),
        })
    pk["encoders"] = encs

    pk["resblocks"] = [{"w1": _w_stack(rb["conv1"]["w"]), "b1": _bcol(rb["conv1"]["b"]),
                        "w2": _w_stack(rb["conv2"]["w"]), "b2": _bcol(rb["conv2"]["b"])}
                       for rb in params["resblocks"]]
    pk["decoders"] = [{"w": _w_stack(d["w"]), "b": _bcol(d["b"])} for d in params["decoders"]]

    pw = params["pred"]["w"]                               # [1,1,Cin,Cout]
    pk["pred"] = {"w": jnp.transpose(pw.reshape(pw.shape[2], pw.shape[3]),
                                     (1, 0)).astype(jnp.bfloat16),
                  "b": _bcol(params["pred"]["b"])}
    return pk


# ----------------------------------------------------------------------------
# E2VIDRecurrent.forward (== UNetRecurrent.forward); states start as [None]*ne.
# ----------------------------------------------------------------------------
def e2vid_forward(pk, event_tensor, states=None, *, cfg):
    ne = cfg["num_encoders"]
    assert cfg["kernel_size"] == 3, "tap-stacked conv helper is specialised to 3x3"
    if states is None:
        states = [None] * ne

    N, nbins, H, W = event_tensor.shape
    assert H % (2 ** ne) == 0 and W % (2 ** ne) == 0

    x = event_tensor.reshape(N, nbins, H * W).astype(jnp.float32)

    # head: ConvLayer(num_bins -> base, k=3, s=1, p=1, relu)
    head = head_conv(x, pk["head"], W)
    x = head

    blocks, new_states = [], []
    h, w = H, W
    y = None
    for i, enc in enumerate(pk["encoders"]):
        C = enc["wc"].shape[0]
        hh, wh = h // 2, w // 2
        xph = _phase_split(x, h, w)
        prev = states[i] if states[i] is not None else jnp.zeros((N, C, hh * wh), jnp.float32)
        last = (i == ne - 1)
        rbs = pk["resblocks"] if last else []
        out = encoder_stage(xph, prev, enc, rbs, wh, emit_y=last)
        if last:
            state, y = out                 # y = resblocks(state) + state (fused skip_sum)
        else:
            state = out
            x = state
        blocks.append(state)
        new_states.append(state)
        h, w = hh, wh

    # decoders: upsample (XLA) -> [conv + next skip] or [conv + head skip + pred] (fused)
    for i in range(ne - 1):
        up = _upsample2x_bilinear(y, h, w)
        h, w = 2 * h, 2 * w
        y = decoder_mid(up, blocks[ne - 2 - i], pk["decoders"][i], w)
    up = _upsample2x_bilinear(y, h, w)
    h, w = 2 * h, 2 * w
    img = decoder_final(up, head, pk["decoders"][ne - 1], pk["pred"], w)

    img = img.reshape(N, cfg["num_output_channels"], H, W)
    return {"image": img}, new_states


# ----------------------------------------------------------------------------
if __name__ == "__main__":
    cfg = dict(
        base_num_channels=8,
        num_encoders=2,
        num_residual_blocks=1,
        num_output_channels=1,
        kernel_size=3,
        skip_type="sum",
        norm=None,
        num_bins=4,
        recurrent_block_type="convgru",
        use_upsample_conv=True,
        channel_multiplier=2,
    )

    key = jax.random.PRNGKey(0)
    k_params, k_input = jax.random.split(key)
    params = init_e2vid_params(k_params, cfg)
    packed = prepare_params(params, cfg)      # one-time weight packing (not per frame)

    N, H, W = 2, 32, 32
    event_tensor = jax.random.normal(k_input, (N, cfg["num_bins"], H, W), jnp.float32)

    fwd = jax.jit(functools.partial(e2vid_forward, cfg=cfg))
    out_dict, new_states = fwd(packed, event_tensor)
    img = jax.block_until_ready(out_dict["image"])
    assert img.shape == (N, cfg["num_output_channels"], H, W), img.shape
    assert all(s.shape[0] == N for s in new_states)

    # second step exercises the recurrent (non-zero state) path
    out_dict2, _ = fwd(packed, event_tensor, new_states)
    jax.block_until_ready(out_dict2["image"])

    print("KERNEL_OK")
</pallas_src>

<mosaic_0001>
module attributes {stable_mosaic.version = 11 : i64} {
  func.func @_head_kernel(%arg0: i32, %arg1: memref<1x4x1024xf32, #tpu.memory_space<vmem>>, %arg2: memref<8x36xbf16, #tpu.memory_space<vmem>>, %arg3: memref<8x1xf32, #tpu.memory_space<vmem>>, %arg4: memref<1x8x1024xf32, #tpu.memory_space<vmem>>) attributes {dimension_semantics = [#tpu.dimension_semantics<parallel>], iteration_bounds = array<i64: 2>, scalar_prefetch = 0 : i64, scratch_operands = 0 : i64, tpu.core_type = #tpu.core_type<tc>, window_params = [{transform_indices = @transform_0, window_bounds = array<i64: 1, 4, 1024>}, {pipeline_mode = #tpu.pipeline_mode<synchronous>, transform_indices = @transform_1, window_bounds = array<i64: 8, 36>}, {pipeline_mode = #tpu.pipeline_mode<synchronous>, transform_indices = @transform_2, window_bounds = array<i64: 8, 1>}, {transform_indices = @transform_3, window_bounds = array<i64: 1, 8, 1024>}]} {
    %0 = tpu.iota {dimensions = array<i32: 1>} : vector<1x1024xi32>
    %c32_i32 = arith.constant 32 : i32
    %c0_i32 = arith.constant 0 : i32
    %1 = arith.cmpi eq, %c32_i32, %c0_i32 : i32
    %c1_i32 = arith.constant 1 : i32
    %2 = arith.select %1, %c1_i32, %c32_i32 : i32
    %3 = vector.broadcast %2 : i32 to vector<1x1024xi32>
    %4 = arith.remsi %0, %3 : vector<1x1024xi32>
    %c0_i32_0 = arith.constant 0 : i32
    %5 = vector.broadcast %c0_i32_0 : i32 to vector<1x1024xi32>
    %6 = arith.cmpi ne, %4, %5 : vector<1x1024xi32>
    %c0_i32_1 = arith.constant 0 : i32
    %7 = vector.broadcast %c0_i32_1 : i32 to vector<1x1024xi32>
    %8 = arith.cmpi slt, %4, %7 : vector<1x1024xi32>
    %c0_i32_2 = arith.constant 0 : i32
    %9 = arith.cmpi slt, %2, %c0_i32_2 : i32
    %10 = vector.broadcast %9 : i1 to vector<1x1024xi1>
    %11 = vector.broadcast %10 : vector<1x1024xi1> to vector<1x1024xi1>
    %12 = arith.xori %8, %11 : vector<1x1024xi1>
    %13 = arith.andi %12, %6 : vector<1x1024xi1>
    %14 = vector.broadcast %2 : i32 to vector<1x1024xi32>
    %15 = arith.addi %4, %14 : vector<1x1024xi32>
    %16 = arith.select %13, %15, %4 : vector<1x1024xi1>, vector<1x1024xi32>
    %c0_i32_3 = arith.constant 0 : i32
    %17 = vector.broadcast %c0_i32_3 : i32 to vector<1x1024xi32>
    %18 = arith.cmpi ne, %16, %17 : vector<1x1024xi32>
    %19 = arith.extui %18 : vector<1x1024xi1> to vector<1x1024xi32>
    %20 = arith.sitofp %19 : vector<1x1024xi32> to vector<1x1024xf32>
    %21 = arith.truncf %20 : vector<1x1024xf32> to vector<1x1024xbf16>
    %c31_i32 = arith.constant 31 : i32
    %22 = vector.broadcast %c31_i32 : i32 to vector<1x1024xi32>
    %23 = arith.cmpi ne, %16, %22 : vector<1x1024xi32>
    %24 = arith.extui %23 : vector<1x1024xi1> to vector<1x1024xi32>
    %25 = arith.sitofp %24 : vector<1x1024xi32> to vector<1x1024xf32>
    %26 = arith.truncf %25 : vector<1x1024xf32> to vector<1x1024xbf16>
    %c0 = arith.constant 0 : index
    %c0_4 = arith.constant 0 : index
    %c0_5 = arith.constant 0 : index
    %27 = vector.load %arg1[%c0, %c0_4, %c0_5] : memref<1x4x1024xf32, #tpu.memory_space<vmem>>, vector<1x4x1024xf32>
    %28 = vector.shape_cast %27 : vector<1x4x1024xf32> to vector<4x1024xf32>
    %c0_6 = arith.constant 0 : index
    %c0_7 = arith.constant 0 : index
    %29 = vector.load %arg2[%c0_6, %c0_7] : memref<8x36xbf16, #tpu.memory_space<vmem>>, vector<8x36xbf16>
    %c0_8 = arith.constant 0 : index
    %c0_9 = arith.constant 0 : index
    %30 = vector.load %arg3[%c0_8, %c0_9] : memref<8x1xf32, #tpu.memory_space<vmem>>, vector<8x1xf32>
    %31 = arith.truncf %28 : vector<4x1024xf32> to vector<4x1024xbf16>
    %cst = arith.constant 0.000000e+00 : bf16
    %32 = vector.broadcast %cst : bf16 to vector<4x33xbf16>
    %33 = tpu.concatenate %32, %31, %32 in 1 : vector<4x33xbf16>, vector<4x1024xbf16>, vector<4x33xbf16> -> vector<4x1090xbf16>
    %34 = vector.extract_strided_slice %33 {offsets = [0, 0], sizes = [4, 1024], strides = [1, 1]} : vector<4x1090xbf16> to vector<4x1024xbf16>
    %35 = vector.broadcast %21 : vector<1x1024xbf16> to vector<4x1024xbf16>
    %36 = arith.mulf %34, %35 : vector<4x1024xbf16>
    %37 = vector.extract_strided_slice %33 {offsets = [0, 1], sizes = [4, 1024], strides = [1, 1]} : vector<4x1090xbf16> to vector<4x1024xbf16>
    %38 = vector.extract_strided_slice %33 {offsets = [0, 2], sizes = [4, 1024], strides = [1, 1]} : vector<4x1090xbf16> to vector<4x1024xbf16>
    %39 = vector.broadcast %26 : vector<1x1024xbf16> to vector<4x1024xbf16>
    %40 = arith.mulf %38, %39 : vector<4x1024xbf16>
    %41 = vector.extract_strided_slice %33 {offsets = [0, 32], sizes = [4, 1024], strides = [1, 1]} : vector<4x1090xbf16> to vector<4x1024xbf16>
    %42 = vector.broadcast %21 : vector<1x1024xbf16> to vector<4x1024xbf16>
    %43 = arith.mulf %41, %42 : vector<4x1024xbf16>
    %44 = vector.extract_strided_slice %33 {offsets = [0, 34], sizes = [4, 1024], strides = [1, 1]} : vector<4x1090xbf16> to vector<4x1024xbf16>
    %45 = vector.broadcast %26 : vector<1x1024xbf16> to vector<4x1024xbf16>
    %46 = arith.mulf %44, %45 : vector<4x1024xbf16>
    %47 = vector.extract_strided_slice %33 {offsets = [0, 64], sizes = [4, 1024], strides = [1, 1]} : vector<4x1090xbf16> to vector<4x1024xbf16>
    %48 = vector.broadcast %21 : vector<1x1024xbf16> to vector<4x1024xbf16>
    %49 = arith.mulf %47, %48 : vector<4x1024xbf16>
    %50 = vector.extract_strided_slice %33 {offsets = [0, 65], sizes = [4, 1024], strides = [1, 1]} : vector<4x1090xbf16> to vector<4x1024xbf16>
    %51 = vector.extract_strided_slice %33 {offsets = [0, 66], sizes = [4, 1024], strides = [1, 1]} : vector<4x1090xbf16> to vector<4x1024xbf16>
    %52 = vector.broadcast %26 : vector<1x1024xbf16> to vector<4x1024xbf16>
    %53 = arith.mulf %51, %52 : vector<4x1024xbf16>
    %54 = tpu.concatenate %36, %37, %40, %43, %31, %46, %49, %50, %53 in 0 : vector<4x1024xbf16>, vector<4x1024xbf16>, vector<4x1024xbf16>, vector<4x1024xbf16>, vector<4x1024xbf16>, vector<4x1024xbf16>, vector<4x1024xbf16>, vector<4x1024xbf16>, vector<4x1024xbf16> -> vector<36x1024xbf16>
    %cst_10 = arith.constant dense<0.000000e+00> : vector<8x1024xf32>
    %55 = tpu.matmul %29, %54, %cst_10 {dimension_numbers = #tpu.dot_dimension_numbers<[1], [0], [0], [1], [0, 0, 1, 1], [], []>} : vector<8x36xbf16>, vector<36x1024xbf16>, vector<8x1024xf32> -> vector<8x1024xf32>
    %56 = vector.broadcast %30 : vector<8x1xf32> to vector<8x1024xf32>
    %57 = arith.addf %55, %56 : vector<8x1024xf32>
    %cst_11 = arith.constant 0.000000e+00 : f32
    %58 = vector.broadcast %cst_11 : f32 to vector<8x1024xf32>
    %59 = arith.maximumf %57, %58 : vector<8x1024xf32>
    %c0_12 = arith.constant 0 : index
    %c0_13 = arith.constant 0 : index
    %c0_14 = arith.constant 0 : index
    %60 = vector.load %arg4[%c0_12, %c0_13, %c0_14] : memref<1x8x1024xf32, #tpu.memory_space<vmem>>, vector<1x8x1024xf32>
    %61 = vector.shape_cast %60 : vector<1x8x1024xf32> to vector<8x1024xf32>
    %62 = vector.shape_cast %59 : vector<8x1024xf32> to vector<1x8x1024xf32>
    tpu.vector_store %arg4[%c0_12, %c0_13, %c0_14], %62 {strides = array<i32>} : memref<1x8x1024xf32, #tpu.memory_space<vmem>>, vector<1x8x1024xf32>,
    return
  }
  func.func @transform_0(%arg0: i32) -> (i32, i32, i32) {
    %c0_i32 = arith.constant 0 : i32
    %c0_i32_0 = arith.constant 0 : i32
    %c0_i32_1 = arith.constant 0 : i32
    return %arg0, %c0_i32, %c0_i32_0 : i32, i32, i32
  }
  func.func @transform_1(%arg0: i32) -> (i32, i32) {
    %c0_i32 = arith.constant 0 : i32
    %c0_i32_0 = arith.constant 0 : i32
    %c0_i32_1 = arith.constant 0 : i32
    return %c0_i32, %c0_i32_0 : i32, i32
  }
  func.func @transform_2(%arg0: i32) -> (i32, i32) {
    %c0_i32 = arith.constant 0 : i32
    %c0_i32_0 = arith.constant 0 : i32
    %c0_i32_1 = arith.constant 0 : i32
    return %c0_i32, %c0_i32_0 : i32, i32
  }
  func.func @transform_3(%arg0: i32) -> (i32, i32, i32) {
    %c0_i32 = arith.constant 0 : i32
    %c0_i32_0 = arith.constant 0 : i32
    %c0_i32_1 = arith.constant 0 : i32
    return %arg0, %c0_i32, %c0_i32_0 : i32, i32, i32
  }
}

module attributes {stable_mosaic.version = 11 : i64} {
  func.func @_encoder_kernel(%arg0: i32, %arg1: memref<1x4x8x256xf32, #tpu.memory_space<vmem>>, %arg2: memref<1x16x256xf32, #tpu.memory_space<vmem>>, %arg3: memref<16x72xbf16, #tpu.memory_space<vmem>>, %arg4: memref<16x1xf32, #tpu.memory_space<vmem>>, %arg5: memref<48x144xbf16, #tpu.memory_space<vmem>>, %arg6: memref<32x144xbf16, #tpu.memory_space<vmem>>, %arg7: memref<32x1xf32, #tpu.memory_space<vmem>>, %arg8: memref<16x144xbf16, #tpu.memory_space<vmem>>, %arg9: memref<16x1xf32, #tpu.memory_space<vmem>>, %arg10: memref<1x16x256xf32, #tpu.memory_space<vmem>>) attributes {dimension_semantics = [#tpu.dimension_semantics<parallel>], iteration_bounds = array<i64: 2>, scalar_prefetch = 0 : i64, scratch_operands = 0 : i64, tpu.core_type = #tpu.core_type<tc>, window_params = [{transform_indices = @transform_0, window_bounds = array<i64: 1, 4, 8, 256>}, {transform_indices = @transform_1, window_bounds = array<i64: 1, 16, 256>}, {pipeline_mode = #tpu.pipeline_mode<synchronous>, transform_indices = @transform_2, window_bounds = array<i64: 16, 72>}, {pipeline_mode = #tpu.pipeline_mode<synchronous>, transform_indices = @transform_3, window_bounds = array<i64: 16, 1>}, {pipeline_mode = #tpu.pipeline_mode<synchronous>, transform_indices = @transform_4, window_bounds = array<i64: 48, 144>}, {pipeline_mode = #tpu.pipeline_mode<synchronous>, transform_indices = @transform_5, window_bounds = array<i64: 32, 144>}, {pipeline_mode = #tpu.pipeline_mode<synchronous>, transform_indices = @transform_6, window_bounds = array<i64: 32, 1>}, {pipeline_mode = #tpu.pipeline_mode<synchronous>, transform_indices = @transform_7, window_bounds = array<i64: 16, 144>}, {pipeline_mode = #tpu.pipeline_mode<synchronous>, transform_indices = @transform_8, window_bounds = array<i64: 16, 1>}, {transform_indices = @transform_9, window_bounds = array<i64: 1, 16, 256>}]} {
    %c0 = arith.constant 0 : index
    %c0_0 = arith.constant 0 : index
    %c0_1 = arith.constant 0 : index
    %c0_2 = arith.constant 0 : index
    %0 = vector.load %arg1[%c0, %c0_0, %c0_1, %c0_2] : memref<1x4x8x256xf32, #tpu.memory_space<vmem>>, vector<1x4x8x256xf32>
    %1 = vector.shape_cast %0 : vector<1x4x8x256xf32> to vector<4x8x256xf32>
    %2 = arith.truncf %1 : vector<4x8x256xf32> to vector<4x8x256xbf16>
    %3 = tpu.iota {dimensions = array<i32: 1>} : vector<1x256xi32>
    %c16_i32 = arith.constant 16 : i32
    %c0_i32 = arith.constant 0 : i32
    %4 = arith.cmpi eq, %c16_i32, %c0_i32 : i32
    %c1_i32 = arith.constant 1 : i32
    %5 = arith.select %4, %c1_i32, %c16_i32 : i32
    %6 = vector.broadcast %5 : i32 to vector<1x256xi32>
    %7 = arith.remsi %3, %6 : vector<1x256xi32>
    %c0_i32_3 = arith.constant 0 : i32
    %8 = vector.broadcast %c0_i32_3 : i32 to vector<1x256xi32>
    %9 = arith.cmpi ne, %7, %8 : vector<1x256xi32>
    %c0_i32_4 = arith.constant 0 : i32
    %10 = vector.broadcast %c0_i32_4 : i32 to vector<1x256xi32>
    %11 = arith.cmpi slt, %7, %10 : vector<1x256xi32>
    %c0_i32_5 = arith.constant 0 : i32
    %12 = arith.cmpi slt, %5, %c0_i32_5 : i32
    %13 = vector.broadcast %12 : i1 to vector<1x256xi1>
    %14 = vector.broadcast %13 : vector<1x256xi1> to vector<1x256xi1>
    %15 = arith.xori %11, %14 : vector<1x256xi1>
    %16 = arith.andi %15, %9 : vector<1x256xi1>
    %17 = vector.broadcast %5 : i32 to vector<1x256xi32>
    %18 = arith.addi %7, %17 : vector<1x256xi32>
    %19 = arith.select %16, %18, %7 : vector<1x256xi1>, vector<1x256xi32>
    %c0_i32_6 = arith.constant 0 : i32
    %20 = vector.broadcast %c0_i32_6 : i32 to vector<1x256xi32>
    %21 = arith.cmpi ne, %19, %20 : vector<1x256xi32>
    %22 = arith.extui %21 : vector<1x256xi1> to vector<1x256xi32>
    %23 = arith.sitofp %22 : vector<1x256xi32> to vector<1x256xf32>
    %24 = arith.truncf %23 : vector<1x256xf32> to vector<1x256xbf16>
    %c15_i32 = arith.constant 15 : i32
    %25 = vector.broadcast %c15_i32 : i32 to vector<1x256xi32>
    %26 = arith.cmpi ne, %19, %25 : vector<1x256xi32>
    %27 = arith.extui %26 : vector<1x256xi1> to vector<1x256xi32>
    %28 = arith.sitofp %27 : vector<1x256xi32> to vector<1x256xf32>
    %29 = arith.truncf %28 : vector<1x256xf32> to vector<1x256xbf16>
    %c0_7 = arith.constant 0 : index
    %c0_8 = arith.constant 0 : index
    %30 = vector.load %arg3[%c0_7, %c0_8] : memref<16x72xbf16, #tpu.memory_space<vmem>>, vector<16x72xbf16>
    %cst = arith.constant 0.000000e+00 : bf16
    %31 = vector.broadcast %cst : bf16 to vector<8x17xbf16>
    %32 = vector.extract_strided_slice %2 {offsets = [3, 0, 0], sizes = [1, 8, 256], strides = [1, 1, 1]} : vector<4x8x256xbf16> to vector<1x8x256xbf16>
    %33 = vector.shape_cast %32 : vector<1x8x256xbf16> to vector<8x256xbf16>
    %34 = tpu.concatenate %31, %33 in 1 : vector<8x17xbf16>, vector<8x256xbf16> -> vector<8x273xbf16>
    %35 = vector.extract_strided_slice %34 {offsets = [0, 0], sizes = [8, 256], strides = [1, 1]} : vector<8x273xbf16> to vector<8x256xbf16>
    %36 = vector.broadcast %24 : vector<1x256xbf16> to vector<8x256xbf16>
    %37 = arith.mulf %35, %36 : vector<8x256xbf16>
    %38 = vector.extract_strided_slice %2 {offsets = [2, 0, 0], sizes = [1, 8, 256], strides = [1, 1, 1]} : vector<4x8x256xbf16> to vector<1x8x256xbf16>
    %39 = vector.shape_cast %38 : vector<1x8x256xbf16> to vector<8x256xbf16>
    %40 = tpu.concatenate %31, %39 in 1 : vector<8x17xbf16>, vector<8x256xbf16> -> vector<8x273xbf16>
    %41 = vector.extract_strided_slice %40 {offsets = [0, 1], sizes = [8, 256], strides = [1, 1]} : vector<8x273xbf16> to vector<8x256xbf16>
    %42 = vector.extract_strided_slice %34 {offsets = [0, 1], sizes = [8, 256], strides = [1, 1]} : vector<8x273xbf16> to vector<8x256xbf16>
    %43 = vector.extract_strided_slice %2 {offsets = [1, 0, 0], sizes = [1, 8, 256], strides = [1, 1, 1]} : vector<4x8x256xbf16> to vector<1x8x256xbf16>
    %44 = vector.shape_cast %43 : vector<1x8x256xbf16> to vector<8x256xbf16>
    %45 = tpu.concatenate %31, %44 in 1 : vector<8x17xbf16>, vector<8x256xbf16> -> vector<8x273xbf16>
    %46 = vector.extract_strided_slice %45 {offsets = [0, 16], sizes = [8, 256], strides = [1, 1]} : vector<8x273xbf16> to vector<8x256xbf16>
    %47 = vector.broadcast %24 : vector<1x256xbf16> to vector<8x256xbf16>
    %48 = arith.mulf %46, %47 : vector<8x256xbf16>
    %49 = vector.extract_strided_slice %2 {offsets = [0, 0, 0], sizes = [1, 8, 256], strides = [1, 1, 1]} : vector<4x8x256xbf16> to vector<1x8x256xbf16>
    %50 = vector.shape_cast %49 : vector<1x8x256xbf16> to vector<8x256xbf16>
    %51 = vector.extract_strided_slice %2 {offsets = [1, 0, 0], sizes = [1, 8, 256], strides = [1, 1, 1]} : vector<4x8x256xbf16> to vector<1x8x256xbf16>
    %52 = vector.shape_cast %51 : vector<1x8x256xbf16> to vector<8x256xbf16>
    %53 = vector.extract_strided_slice %34 {offsets = [0, 16], sizes = [8, 256], strides = [1, 1]} : vector<8x273xbf16> to vector<8x256xbf16>
    %54 = vector.broadcast %24 : vector<1x256xbf16> to vector<8x256xbf16>
    %55 = arith.mulf %53, %54 : vector<8x256xbf16>
    %56 = vector.extract_strided_slice %2 {offsets = [2, 0, 0], sizes = [1, 8, 256], strides = [1, 1, 1]} : vector<4x8x256xbf16> to vector<1x8x256xbf16>
    %57 = vector.shape_cast %56 : vector<1x8x256xbf16> to vector<8x256xbf16>
    %58 = vector.extract_strided_slice %2 {offsets = [3, 0, 0], sizes = [1, 8, 256], strides = [1, 1, 1]} : vector<4x8x256xbf16> to vector<1x8x256xbf16>
    %59 = vector.shape_cast %58 : vector<1x8x256xbf16> to vector<8x256xbf16>
    %60 = tpu.concatenate %37, %41, %42, %48, %50, %52, %55, %57, %59 in 0 : vector<8x256xbf16>, vector<8x256xbf16>, vector<8x256xbf16>, vector<8x256xbf16>, vector<8x256xbf16>, vector<8x256xbf16>, vector<8x256xbf16>, vector<8x256xbf16>, vector<8x256xbf16> -> vector<72x256xbf16>
    %cst_9 = arith.constant dense<0.000000e+00> : vector<16x256xf32>
    %61 = tpu.matmul %30, %60, %cst_9 {dimension_numbers = #tpu.dot_dimension_numbers<[1], [0], [0], [1], [0, 0, 1, 1], [], []>} : vector<16x72xbf16>, vector<72x256xbf16>, vector<16x256xf32> -> vector<16x256xf32>
    %c0_10 = arith.constant 0 : index
    %c0_11 = arith.constant 0 : index
    %62 = vector.load %arg4[%c0_10, %c0_11] : memref<16x1xf32, #tpu.memory_space<vmem>>, vector<16x1xf32>
    %63 = vector.broadcast %62 : vector<16x1xf32> to vector<16x256xf32>
    %64 = arith.addf %61, %63 : vector<16x256xf32>
    %cst_12 = arith.constant 0.000000e+00 : f32
    %65 = vector.broadcast %cst_12 : f32 to vector<16x256xf32>
    %66 = arith.maximumf %64, %65 : vector<16x256xf32>
    %c0_13 = arith.constant 0 : index
    %c0_14 = arith.constant 0 : index
    %c0_15 = arith.constant 0 : index
    %67 = vector.load %arg2[%c0_13, %c0_14, %c0_15] : memref<1x16x256xf32, #tpu.memory_space<vmem>>, vector<1x16x256xf32>
    %68 = vector.shape_cast %67 : vector<1x16x256xf32> to vector<16x256xf32>
    %c0_16 = arith.constant 0 : index
    %c0_17 = arith.constant 0 : index
    %69 = vector.load %arg5[%c0_16, %c0_17] : memref<48x144xbf16, #tpu.memory_space<vmem>>, vector<48x144xbf16>
    %70 = arith.truncf %66 : vector<16x256xf32> to vector<16x256xbf16>
    %cst_18 = arith.constant 0.000000e+00 : bf16
    %71 = vector.broadcast %cst_18 : bf16 to vector<16x17xbf16>
    %72 = tpu.concatenate %71, %70, %71 in 1 : vector<16x17xbf16>, vector<16x256xbf16>, vector<16x17xbf16> -> vector<16x290xbf16>
    %73 = vector.extract_strided_slice %72 {offsets = [0, 0], sizes = [16, 256], strides = [1, 1]} : vector<16x290xbf16> to vector<16x256xbf16>
    %74 = vector.broadcast %24 : vector<1x256xbf16> to vector<16x256xbf16>
    %75 = arith.mulf %73, %74 : vector<16x256xbf16>
    %76 = vector.extract_strided_slice %72 {offsets = [0, 1], sizes = [16, 256], strides = [1, 1]} : vector<16x290xbf16> to vector<16x256xbf16>
    %77 = vector.extract_strided_slice %72 {offsets = [0, 2], sizes = [16, 256], strides = [1, 1]} : vector<16x290xbf16> to vector<16x256xbf16>
    %78 = vector.broadcast %29 : vector<1x256xbf16> to vector<16x256xbf16>
    %79 = arith.mulf %77, %78 : vector<16x256xbf16>
    %80 = vector.extract_strided_slice %72 {offsets = [0, 16], sizes = [16, 256], strides = [1, 1]} : vector<16x290xbf16> to vector<16x256xbf16>
    %81 = vector.broadcast %24 : vector<1x256xbf16> to vector<16x256xbf16>
    %82 = arith.mulf %80, %81 : vector<16x256xbf16>
    %83 = vector.extract_strided_slice %72 {offsets = [0, 18], sizes = [16, 256], strides = [1, 1]} : vector<16x290xbf16> to vector<16x256xbf16>
    %84 = vector.broadcast %29 : vector<1x256xbf16> to vector<16x256xbf16>
    %85 = arith.mulf %83, %84 : vector<16x256xbf16>
    %86 = vector.extract_strided_slice %72 {offsets = [0, 32], sizes = [16, 256], strides = [1, 1]} : vector<16x290xbf16> to vector<16x256xbf16>
    %87 = vector.broadcast %24 : vector<1x256xbf16> to vector<16x256xbf16>
    %88 = arith.mulf %86, %87 : vector<16x256xbf16>
    %89 = vector.extract_strided_slice %72 {offsets = [0, 33], sizes = [16, 256], strides = [1, 1]} : vector<16x290xbf16> to vector<16x256xbf16>
    %90 = vector.extract_strided_slice %72 {offsets = [0, 34], sizes = [16, 256], strides = [1, 1]} : vector<16x290xbf16> to vector<16x256xbf16>
    %91 = vector.broadcast %29 : vector<1x256xbf16> to vector<16x256xbf16>
    %92 = arith.mulf %90, %91 : vector<16x256xbf16>
    %93 = tpu.concatenate %75, %76, %79, %82, %70, %85, %88, %89, %92 in 0 : vector<16x256xbf16>, vector<16x256xbf16>, vector<16x256xbf16>, vector<16x256xbf16>, vector<16x256xbf16>, vector<16x256xbf16>, vector<16x256xbf16>, vector<16x256xbf16>, vector<16x256xbf16> -> vector<144x256xbf16>
    %cst_19 = arith.constant dense<0.000000e+00> : vector<48x256xf32>
    %94 = tpu.matmul %69, %93, %cst_19 {dimension_numbers = #tpu.dot_dimension_numbers<[1], [0], [0], [1], [0, 0, 1, 1], [], []>} : vector<48x144xbf16>, vector<144x256xbf16>, vector<48x256xf32> -> vector<48x256xf32>
    %c0_20 = arith.constant 0 : index
    %c0_21 = arith.constant 0 : index
    %95 = vector.load %arg6[%c0_20, %c0_21] : memref<32x144xbf16, #tpu.memory_space<vmem>>, vector<32x144xbf16>
    %96 = arith.truncf %68 : vector<16x256xf32> to vector<16x256xbf16>
    %cst_22 = arith.constant 0.000000e+00 : bf16
    %97 = vector.broadcast %cst_22 : bf16 to vector<16x17xbf16>
    %98 = tpu.concatenate %97, %96, %97 in 1 : vector<16x17xbf16>, vector<16x256xbf16>, vector<16x17xbf16> -> vector<16x290xbf16>
    %99 = vector.extract_strided_slice %98 {offsets = [0, 0], sizes = [16, 256], strides = [1, 1]} : vector<16x290xbf16> to vector<16x256xbf16>
    %100 = vector.broadcast %24 : vector<1x256xbf16> to vector<16x256xbf16>
    %101 = arith.mulf %99, %100 : vector<16x256xbf16>
    %102 = vector.extract_strided_slice %98 {offsets = [0, 1], sizes = [16, 256], strides = [1, 1]} : vector<16x290xbf16> to vector<16x256xbf16>
    %103 = vector.extract_strided_slice %98 {offsets = [0, 2], sizes = [16, 256], strides = [1, 1]} : vector<16x290xbf16> to vector<16x256xbf16>
    %104 = vector.broadcast %29 : vector<1x256xbf16> to vector<16x256xbf16>
    %105 = arith.mulf %103, %104 : vector<16x256xbf16>
    %106 = vector.extract_strided_slice %98 {offsets = [0, 16], sizes = [16, 256], strides = [1, 1]} : vector<16x290xbf16> to vector<16x256xbf16>
    %107 = vector.broadcast %24 : vector<1x256xbf16> to vector<16x256xbf16>
    %108 = arith.mulf %106, %107 : vector<16x256xbf16>
    %109 = vector.extract_strided_slice %98 {offsets = [0, 18], sizes = [16, 256], strides = [1, 1]} : vector<16x290xbf16> to vector<16x256xbf16>
    %110 = vector.broadcast %29 : vector<1x256xbf16> to vector<16x256xbf16>
    %111 = arith.mulf %109, %110 : vector<16x256xbf16>
    %112 = vector.extract_strided_slice %98 {offsets = [0, 32], sizes = [16, 256], strides = [1, 1]} : vector<16x290xbf16> to vector<16x256xbf16>
    %113 = vector.broadcast %24 : vector<1x256xbf16> to vector<16x256xbf16>
    %114 = arith.mulf %112, %113 : vector<16x256xbf16>
    %115 = vector.extract_strided_slice %98 {offsets = [0, 33], sizes = [16, 256], strides = [1, 1]} : vector<16x290xbf16> to vector<16x256xbf16>
    %116 = vector.extract_strided_slice %98 {offsets = [0, 34], sizes = [16, 256], strides = [1, 1]} : vector<16x290xbf16> to vector<16x256xbf16>
    %117 = vector.broadcast %29 : vector<1x256xbf16> to vector<16x256xbf16>
    %118 = arith.mulf %116, %117 : vector<16x256xbf16>
    %119 = tpu.concatenate %101, %102, %105, %108, %96, %111, %114, %115, %118 in 0 : vector<16x256xbf16>, vector<16x256xbf16>, vector<16x256xbf16>, vector<16x256xbf16>, vector<16x256xbf16>, vector<16x256xbf16>, vector<16x256xbf16>, vector<16x256xbf16>, vector<16x256xbf16> -> vector<144x256xbf16>
    %cst_23 = arith.constant dense<0.000000e+00> : vector<32x256xf32>
    %120 = tpu.matmul %95, %119, %cst_23 {dimension_numbers = #tpu.dot_dimension_numbers<[1], [0], [0], [1], [0, 0, 1, 1], [], []>} : vector<32x144xbf16>, vector<144x256xbf16>, vector<32x256xf32> -> vector<32x256xf32>
    %121 = vector.extract_strided_slice %94 {offsets = [0, 0], sizes = [32, 256], strides = [1, 1]} : vector<48x256xf32> to vector<32x256xf32>
    %122 = arith.addf %121, %120 : vector<32x256xf32>
    %c0_24 = arith.constant 0 : index
    %c0_25 = arith.constant 0 : index
    %123 = vector.load %arg7[%c0_24, %c0_25] : memref<32x1xf32, #tpu.memory_space<vmem>>, vector<32x1xf32>
    %124 = vector.broadcast %123 : vector<32x1xf32> to vector<32x256xf32>
    %125 = arith.addf %122, %124 : vector<32x256xf32>
    %126 = arith.negf %125 : vector<32x256xf32>
    %127 = math.exp %126 : vector<32x256xf32>
    %cst_26 = arith.constant 1.000000e+00 : f32
    %128 = vector.broadcast %cst_26 : f32 to vector<32x256xf32>
    %129 = arith.addf %128, %127 : vector<32x256xf32>
    %130 = arith.divf %128, %129 : vector<32x256xf32>
    %131 = vector.extract_strided_slice %130 {offsets = [0, 0], sizes = [16, 256], strides = [1, 1]} : vector<32x256xf32> to vector<16x256xf32>
    %132 = vector.extract_strided_slice %130 {offsets = [16, 0], sizes = [16, 256], strides = [1, 1]} : vector<32x256xf32> to vector<16x256xf32>
    %c0_27 = arith.constant 0 : index
    %c0_28 = arith.constant 0 : index
    %133 = vector.load %arg8[%c0_27, %c0_28] : memref<16x144xbf16, #tpu.memory_space<vmem>>, vector<16x144xbf16>
    %134 = arith.mulf %131, %68 : vector<16x256xf32>
    %135 = arith.truncf %134 : vector<16x256xf32> to vector<16x256xbf16>
    %cst_29 = arith.constant 0.000000e+00 : bf16
    %136 = vector.broadcast %cst_29 : bf16 to vector<16x17xbf16>
    %137 = tpu.concatenate %136, %135, %136 in 1 : vector<16x17xbf16>, vector<16x256xbf16>, vector<16x17xbf16> -> vector<16x290xbf16>
    %138 = vector.extract_strided_slice %137 {offsets = [0, 0], sizes = [16, 256], strides = [1, 1]} : vector<16x290xbf16> to vector<16x256xbf16>
    %139 = vector.broadcast %24 : vector<1x256xbf16> to vector<16x256xbf16>
    %140 = arith.mulf %138, %139 : vector<16x256xbf16>
    %141 = vector.extract_strided_slice %137 {offsets = [0, 1], sizes = [16, 256], strides = [1, 1]} : vector<16x290xbf16> to vector<16x256xbf16>
    %142 = vector.extract_strided_slice %137 {offsets = [0, 2], sizes = [16, 256], strides = [1, 1]} : vector<16x290xbf16> to vector<16x256xbf16>
    %143 = vector.broadcast %29 : vector<1x256xbf16> to vector<16x256xbf16>
    %144 = arith.mulf %142, %143 : vector<16x256xbf16>
    %145 = vector.extract_strided_slice %137 {offsets = [0, 16], sizes = [16, 256], strides = [1, 1]} : vector<16x290xbf16> to vector<16x256xbf16>
    %146 = vector.broadcast %24 : vector<1x256xbf16> to vector<16x256xbf16>
    %147 = arith.mulf %145, %146 : vector<16x256xbf16>
    %148 = vector.extract_strided_slice %137 {offsets = [0, 18], sizes = [16, 256], strides = [1, 1]} : vector<16x290xbf16> to vector<16x256xbf16>
    %149 = vector.broadcast %29 : vector<1x256xbf16> to vector<16x256xbf16>
    %150 = arith.mulf %148, %149 : vector<16x256xbf16>
    %151 = vector.extract_strided_slice %137 {offsets = [0, 32], sizes = [16, 256], strides = [1, 1]} : vector<16x290xbf16> to vector<16x256xbf16>
    %152 = vector.broadcast %24 : vector<1x256xbf16> to vector<16x256xbf16>
    %153 = arith.mulf %151, %152 : vector<16x256xbf16>
    %154 = vector.extract_strided_slice %137 {offsets = [0, 33], sizes = [16, 256], strides = [1, 1]} : vector<16x290xbf16> to vector<16x256xbf16>
    %155 = vector.extract_strided_slice %137 {offsets = [0, 34], sizes = [16, 256], strides = [1, 1]} : vector<16x290xbf16> to vector<16x256xbf16>
    %156 = vector.broadcast %29 : vector<1x256xbf16> to vector<16x256xbf16>
    %157 = arith.mulf %155, %156 : vector<16x256xbf16>
    %158 = tpu.concatenate %140, %141, %144, %147, %135, %150, %153, %154, %157 in 0 : vector<16x256xbf16>, vector<16x256xbf16>, vector<16x256xbf16>, vector<16x256xbf16>, vector<16x256xbf16>, vector<16x256xbf16>, vector<16x256xbf16>, vector<16x256xbf16>, vector<16x256xbf16> -> vector<144x256xbf16>
    %cst_30 = arith.constant dense<0.000000e+00> : vector<16x256xf32>
    %159 = tpu.matmul %133, %158, %cst_30 {dimension_numbers = #tpu.dot_dimension_numbers<[1], [0], [0], [1], [0, 0, 1, 1], [], []>} : vector<16x144xbf16>, vector<144x256xbf16>, vector<16x256xf32> -> vector<16x256xf32>
    %160 = vector.extract_strided_slice %94 {offsets = [32, 0], sizes = [16, 256], strides = [1, 1]} : vector<48x256xf32> to vector<16x256xf32>
    %161 = arith.addf %160, %159 : vector<16x256xf32>
    %c0_31 = arith.constant 0 : index
    %c0_32 = arith.constant 0 : index
    %162 = vector.load %arg9[%c0_31, %c0_32] : memref<16x1xf32, #tpu.memory_space<vmem>>, vector<16x1xf32>
    %163 = vector.broadcast %162 : vector<16x1xf32> to vector<16x256xf32>
    %164 = arith.addf %161, %163 : vector<16x256xf32>
    %165 = math.tanh %164 : vector<16x256xf32>
    %cst_33 = arith.constant 1.000000e+00 : f32
    %166 = vector.broadcast %cst_33 : f32 to vector<16x256xf32>
    %167 = arith.subf %166, %132 : vector<16x256xf32>
    %168 = arith.mulf %68, %167 : vector<16x256xf32>
    %169 = arith.mulf %165, %132 : vector<16x256xf32>
    %170 = arith.addf %168, %169 : vector<16x256xf32>
    %c0_34 = arith.constant 0 : index
    %c0_35 = arith.constant 0 : index
    %c0_36 = arith.constant 0 : index
    %171 = vector.load %arg10[%c0_34, %c0_35, %c0_36] : memref<1x16x256xf32, #tpu.memory_space<vmem>>, vector<1x16x256xf32>
    %172 = vector.shape_cast %171 : vector<1x16x256xf32> to vector<16x256xf32>
    %173 = vector.shape_cast %170 : vector<16x256xf32> to vector<1x16x256xf32>
    tpu.vector_store %arg10[%c0_34, %c0_35, %c0_36], %173 {strides = array<i32>} : memref<1x16x256xf32, #tpu.memory_space<vmem>>, vector<1x16x256xf32>,
    return
  }
  func.func @transform_0(%arg0: i32) -> (i32, i32, i32, i32) {
    %c0_i32 = arith.constant 0 : i32
    %c0_i32_0 = arith.constant 0 : i32
    %c0_i32_1 = arith.constant 0 : i32
    %c0_i32_2 = arith.constant 0 : i32
    return %arg0, %c0_i32, %c0_i32_0, %c0_i32_1 : i32, i32, i32, i32
  }
  func.func @transform_1(%arg0: i32) -> (i32, i32, i32) {
    %c0_i32 = arith.constant 0 : i32
    %c0_i32_0 = arith.constant 0 : i32
    %c0_i32_1 = arith.constant 0 : i32
    return %arg0, %c0_i32, %c0_i32_0 : i32, i32, i32
  }
  func.func @transform_2(%arg0: i32) -> (i32, i32) {
    %c0_i32 = arith.constant 0 : i32
    %c0_i32_0 = arith.constant 0 : i32
    %c0_i32_1 = arith.constant 0 : i32
    return %c0_i32, %c0_i32_0 : i32, i32
  }
  func.func @transform_3(%arg0: i32) -> (i32, i32) {
    %c0_i32 = arith.constant 0 : i32
    %c0_i32_0 = arith.constant 0 : i32
    %c0_i32_1 = arith.constant 0 : i32
    return %c0_i32, %c0_i32_0 : i32, i32
  }
  func.func @transform_4(%arg0: i32) -> (i32, i32) {
    %c0_i32 = arith.constant 0 : i32
    %c0_i32_0 = arith.constant 0 : i32
    %c0_i32_1 = arith.constant 0 : i32
    return %c0_i32, %c0_i32_0 : i32, i32
  }
  func.func @transform_5(%arg0: i32) -> (i32, i32) {
    %c0_i32 = arith.constant 0 : i32
    %c0_i32_0 = arith.constant 0 : i32
    %c0_i32_1 = arith.constant 0 : i32
    return %c0_i32, %c0_i32_0 : i32, i32
  }
  func.func @transform_6(%arg0: i32) -> (i32, i32) {
    %c0_i32 = arith.constant 0 : i32
    %c0_i32_0 = arith.constant 0 : i32
    %c0_i32_1 = arith.constant 0 : i32
    return %c0_i32, %c0_i32_0 : i32, i32
  }
  func.func @transform_7(%arg0: i32) -> (i32, i32) {
    %c0_i32 = arith.constant 0 : i32
    %c0_i32_0 = arith.constant 0 : i32
    %c0_i32_1 = arith.constant 0 : i32
    return %c0_i32, %c0_i32_0 : i32, i32
  }
  func.func @transform_8(%arg0: i32) -> (i32, i32) {
    %c0_i32 = arith.constant 0 : i32
    %c0_i32_0 = arith.constant 0 : i32
    %c0_i32_1 = arith.constant 0 : i32
    return %c0_i32, %c0_i32_0 : i32, i32
  }
  func.func @transform_9(%arg0: i32) -> (i32, i32, i32) {
    %c0_i32 = arith.constant 0 : i32
    %c0_i32_0 = arith.constant 0 : i32
    %c0_i32_1 = arith.constant 0 : i32
    return %arg0, %c0_i32, %c0_i32_0 : i32, i32, i32
  }
}

module attributes {stable_mosaic.version = 11 : i64} {
  func.func @_encoder_kernel(%arg0: i32, %arg1: memref<1x4x16x64xf32, #tpu.memory_space<vmem>>, %arg2: memref<1x32x64xf32, #tpu.memory_space<vmem>>, %arg3: memref<32x144xbf16, #tpu.memory_space<vmem>>, %arg4: memref<32x1xf32, #tpu.memory_space<vmem>>, %arg5: memref<96x288xbf16, #tpu.memory_space<vmem>>, %arg6: memref<64x288xbf16, #tpu.memory_space<vmem>>, %arg7: memref<64x1xf32, #tpu.memory_space<vmem>>, %arg8: memref<32x288xbf16, #tpu.memory_space<vmem>>, %arg9: memref<32x1xf32, #tpu.memory_space<vmem>>, %arg10: memref<32x288xbf16, #tpu.memory_space<vmem>>, %arg11: memref<32x1xf32, #tpu.memory_space<vmem>>, %arg12: memref<32x288xbf16, #tpu.memory_space<vmem>>, %arg13: memref<32x1xf32, #tpu.memory_space<vmem>>, %arg14: memref<1x32x64xf32, #tpu.memory_space<vmem>>, %arg15: memref<1x32x64xf32, #tpu.memory_space<vmem>>) attributes {dimension_semantics = [#tpu.dimension_semantics<parallel>], iteration_bounds = array<i64: 2>, scalar_prefetch = 0 : i64, scratch_operands = 0 : i64, tpu.core_type = #tpu.core_type<tc>, window_params = [{transform_indices = @transform_0, window_bounds = array<i64: 1, 4, 16, 64>}, {transform_indices = @transform_1, window_bounds = array<i64: 1, 32, 64>}, {pipeline_mode = #tpu.pipeline_mode<synchronous>, transform_indices = @transform_2, window_bounds = array<i64: 32, 144>}, {pipeline_mode = #tpu.pipeline_mode<synchronous>, transform_indices = @transform_3, window_bounds = array<i64: 32, 1>}, {pipeline_mode = #tpu.pipeline_mode<synchronous>, transform_indices = @transform_4, window_bounds = array<i64: 96, 288>}, {pipeline_mode = #tpu.pipeline_mode<synchronous>, transform_indices = @transform_5, window_bounds = array<i64: 64, 288>}, {pipeline_mode = #tpu.pipeline_mode<synchronous>, transform_indices = @transform_6, window_bounds = array<i64: 64, 1>}, {pipeline_mode = #tpu.pipeline_mode<synchronous>, transform_indices = @transform_7, window_bounds = array<i64: 32, 288>}, {pipeline_mode = #tpu.pipeline_mode<synchronous>, transform_indices = @transform_8, window_bounds = array<i64: 32, 1>}, {pipeline_mode = #tpu.pipeline_mode<synchronous>, transform_indices = @transform_9, window_bounds = array<i64: 32, 288>}, {pipeline_mode = #tpu.pipeline_mode<synchronous>, transform_indices = @transform_10, window_bounds = array<i64: 32, 1>}, {pipeline_mode = #tpu.pipeline_mode<synchronous>, transform_indices = @transform_11, window_bounds = array<i64: 32, 288>}, {pipeline_mode = #tpu.pipeline_mode<synchronous>, transform_indices = @transform_12, window_bounds = array<i64: 32, 1>}, {transform_indices = @transform_13, window_bounds = array<i64: 1, 32, 64>}, {transform_indices = @transform_14, window_bounds = array<i64: 1, 32, 64>}]} {
    %c0 = arith.constant 0 : index
    %c0_0 = arith.constant 0 : index
    %c0_1 = arith.constant 0 : index
    %c0_2 = arith.constant 0 : index
    %0 = vector.load %arg1[%c0, %c0_0, %c0_1, %c0_2] : memref<1x4x16x64xf32, #tpu.memory_space<vmem>>, vector<1x4x16x64xf32>
    %1 = vector.shape_cast %0 : vector<1x4x16x64xf32> to vector<4x16x64xf32>
    %2 = arith.truncf %1 : vector<4x16x64xf32> to vector<4x16x64xbf16>
    %3 = tpu.iota {dimensions = array<i32: 1>} : vector<1x64xi32>
    %c8_i32 = arith.constant 8 : i32
    %c0_i32 = arith.constant 0 : i32
    %4 = arith.cmpi eq, %c8_i32, %c0_i32 : i32
    %c1_i32 = arith.constant 1 : i32
    %5 = arith.select %4, %c1_i32, %c8_i32 : i32
    %6 = vector.broadcast %5 : i32 to vector<1x64xi32>
    %7 = arith.remsi %3, %6 : vector<1x64xi32>
    %c0_i32_3 = arith.constant 0 : i32
    %8 = vector.broadcast %c0_i32_3 : i32 to vector<1x64xi32>
    %9 = arith.cmpi ne, %7, %8 : vector<1x64xi32>
    %c0_i32_4 = arith.constant 0 : i32
    %10 = vector.broadcast %c0_i32_4 : i32 to vector<1x64xi32>
    %11 = arith.cmpi slt, %7, %10 : vector<1x64xi32>
    %c0_i32_5 = arith.constant 0 : i32
    %12 = arith.cmpi slt, %5, %c0_i32_5 : i32
    %13 = vector.broadcast %12 : i1 to vector<1x64xi1>
    %14 = vector.broadcast %13 : vector<1x64xi1> to vector<1x64xi1>
    %15 = arith.xori %11, %14 : vector<1x64xi1>
    %16 = arith.andi %15, %9 : vector<1x64xi1>
    %17 = vector.broadcast %5 : i32 to vector<1x64xi32>
    %18 = arith.addi %7, %17 : vector<1x64xi32>
    %19 = arith.select %16, %18, %7 : vector<1x64xi1>, vector<1x64xi32>
    %c0_i32_6 = arith.constant 0 : i32
    %20 = vector.broadcast %c0_i32_6 : i32 to vector<1x64xi32>
    %21 = arith.cmpi ne, %19, %20 : vector<1x64xi32>
    %22 = arith.extui %21 : vector<1x64xi1> to vector<1x64xi32>
    %23 = arith.sitofp %22 : vector<1x64xi32> to vector<1x64xf32>
    %24 = arith.truncf %23 : vector<1x64xf32> to vector<1x64xbf16>
    %c7_i32 = arith.constant 7 : i32
    %25 = vector.broadcast %c7_i32 : i32 to vector<1x64xi32>
    %26 = arith.cmpi ne, %19, %25 : vector<1x64xi32>
    %27 = arith.extui %26 : vector<1x64xi1> to vector<1x64xi32>
    %28 = arith.sitofp %27 : vector<1x64xi32> to vector<1x64xf32>
    %29 = arith.truncf %28 : vector<1x64xf32> to vector<1x64xbf16>
    %c0_7 = arith.constant 0 : index
    %c0_8 = arith.constant 0 : index
    %30 = vector.load %arg3[%c0_7, %c0_8] : memref<32x144xbf16, #tpu.memory_space<vmem>>, vector<32x144xbf16>
    %cst = arith.constant 0.000000e+00 : bf16
    %31 = vector.broadcast %cst : bf16 to vector<16x9xbf16>
    %32 = vector.extract_strided_slice %2 {offsets = [3, 0, 0], sizes = [1, 16, 64], strides = [1, 1, 1]} : vector<4x16x64xbf16> to vector<1x16x64xbf16>
    %33 = vector.shape_cast %32 : vector<1x16x64xbf16> to vector<16x64xbf16>
    %34 = tpu.concatenate %31, %33 in 1 : vector<16x9xbf16>, vector<16x64xbf16> -> vector<16x73xbf16>
    %35 = vector.extract_strided_slice %34 {offsets = [0, 0], sizes = [16, 64], strides = [1, 1]} : vector<16x73xbf16> to vector<16x64xbf16>
    %36 = vector.broadcast %24 : vector<1x64xbf16> to vector<16x64xbf16>
    %37 = arith.mulf %35, %36 : vector<16x64xbf16>
    %38 = vector.extract_strided_slice %2 {offsets = [2, 0, 0], sizes = [1, 16, 64], strides = [1, 1, 1]} : vector<4x16x64xbf16> to vector<1x16x64xbf16>
    %39 = vector.shape_cast %38 : vector<1x16x64xbf16> to vector<16x64xbf16>
    %40 = tpu.concatenate %31, %39 in 1 : vector<16x9xbf16>, vector<16x64xbf16> -> vector<16x73xbf16>
    %41 = vector.extract_strided_slice %40 {offsets = [0, 1], sizes = [16, 64], strides = [1, 1]} : vector<16x73xbf16> to vector<16x64xbf16>
    %42 = vector.extract_strided_slice %34 {offsets = [0, 1], sizes = [16, 64], strides = [1, 1]} : vector<16x73xbf16> to vector<16x64xbf16>
    %43 = vector.extract_strided_slice %2 {offsets = [1, 0, 0], sizes = [1, 16, 64], strides = [1, 1, 1]} : vector<4x16x64xbf16> to vector<1x16x64xbf16>
    %44 = vector.shape_cast %43 : vector<1x16x64xbf16> to vector<16x64xbf16>
    %45 = tpu.concatenate %31, %44 in 1 : vector<16x9xbf16>, vector<16x64xbf16> -> vector<16x73xbf16>
    %46 = vector.extract_strided_slice %45 {offsets = [0, 8], sizes = [16, 64], strides = [1, 1]} : vector<16x73xbf16> to vector<16x64xbf16>
    %47 = vector.broadcast %24 : vector<1x64xbf16> to vector<16x64xbf16>
    %48 = arith.mulf %46, %47 : vector<16x64xbf16>
    %49 = vector.extract_strided_slice %2 {offsets = [0, 0, 0], sizes = [1, 16, 64], strides = [1, 1, 1]} : vector<4x16x64xbf16> to vector<1x16x64xbf16>
    %50 = vector.shape_cast %49 : vector<1x16x64xbf16> to vector<16x64xbf16>
    %51 = vector.extract_strided_slice %2 {offsets = [1, 0, 0], sizes = [1, 16, 64], strides = [1, 1, 1]} : vector<4x16x64xbf16> to vector<1x16x64xbf16>
    %52 = vector.shape_cast %51 : vector<1x16x64xbf16> to vector<16x64xbf16>
    %53 = vector.extract_strided_slice %34 {offsets = [0, 8], sizes = [16, 64], strides = [1, 1]} : vector<16x73xbf16> to vector<16x64xbf16>
    %54 = vector.broadcast %24 : vector<1x64xbf16> to vector<16x64xbf16>
    %55 = arith.mulf %53, %54 : vector<16x64xbf16>
    %56 = vector.extract_strided_slice %2 {offsets = [2, 0, 0], sizes = [1, 16, 64], strides = [1, 1, 1]} : vector<4x16x64xbf16> to vector<1x16x64xbf16>
    %57 = vector.shape_cast %56 : vector<1x16x64xbf16> to vector<16x64xbf16>
    %58 = vector.extract_strided_slice %2 {offsets = [3, 0, 0], sizes = [1, 16, 64], strides = [1, 1, 1]} : vector<4x16x64xbf16> to vector<1x16x64xbf16>
    %59 = vector.shape_cast %58 : vector<1x16x64xbf16> to vector<16x64xbf16>
    %60 = tpu.concatenate %37, %41, %42, %48, %50, %52, %55, %57, %59 in 0 : vector<16x64xbf16>, vector<16x64xbf16>, vector<16x64xbf16>, vector<16x64xbf16>, vector<16x64xbf16>, vector<16x64xbf16>, vector<16x64xbf16>, vector<16x64xbf16>, vector<16x64xbf16> -> vector<144x64xbf16>
    %cst_9 = arith.constant dense<0.000000e+00> : vector<32x64xf32>
    %61 = tpu.matmul %30, %60, %cst_9 {dimension_numbers = #tpu.dot_dimension_numbers<[1], [0], [0], [1], [0, 0, 1, 1], [], []>} : vector<32x144xbf16>, vector<144x64xbf16>, vector<32x64xf32> -> vector<32x64xf32>
    %c0_10 = arith.constant 0 : index
    %c0_11 = arith.constant 0 : index
    %62 = vector.load %arg4[%c0_10, %c0_11] : memref<32x1xf32, #tpu.memory_space<vmem>>, vector<32x1xf32>
    %63 = vector.broadcast %62 : vector<32x1xf32> to vector<32x64xf32>
    %64 = arith.addf %61, %63 : vector<32x64xf32>
    %cst_12 = arith.constant 0.000000e+00 : f32
    %65 = vector.broadcast %cst_12 : f32 to vector<32x64xf32>
    %66 = arith.maximumf %64, %65 : vector<32x64xf32>
    %c0_13 = arith.constant 0 : index
    %c0_14 = arith.constant 0 : index
    %c0_15 = arith.constant 0 : index
    %67 = vector.load %arg2[%c0_13, %c0_14, %c0_15] : memref<1x32x64xf32, #tpu.memory_space<vmem>>, vector<1x32x64xf32>
    %68 = vector.shape_cast %67 : vector<1x32x64xf32> to vector<32x64xf32>
    %c0_16 = arith.constant 0 : index
    %c0_17 = arith.constant 0 : index
    %69 = vector.load %arg5[%c0_16, %c0_17] : memref<96x288xbf16, #tpu.memory_space<vmem>>, vector<96x288xbf16>
    %70 = arith.truncf %66 : vector<32x64xf32> to vector<32x64xbf16>
    %cst_18 = arith.constant 0.000000e+00 : bf16
    %71 = vector.broadcast %cst_18 : bf16 to vector<32x9xbf16>
    %72 = tpu.concatenate %71, %70, %71 in 1 : vector<32x9xbf16>, vector<32x64xbf16>, vector<32x9xbf16> -> vector<32x82xbf16>
    %73 = vector.extract_strided_slice %72 {offsets = [0, 0], sizes = [32, 64], strides = [1, 1]} : vector<32x82xbf16> to vector<32x64xbf16>
    %74 = vector.broadcast %24 : vector<1x64xbf16> to vector<32x64xbf16>
    %75 = arith.mulf %73, %74 : vector<32x64xbf16>
    %76 = vector.extract_strided_slice %72 {offsets = [0, 1], sizes = [32, 64], strides = [1, 1]} : vector<32x82xbf16> to vector<32x64xbf16>
    %77 = vector.extract_strided_slice %72 {offsets = [0, 2], sizes = [32, 64], strides = [1, 1]} : vector<32x82xbf16> to vector<32x64xbf16>
    %78 = vector.broadcast %29 : vector<1x64xbf16> to vector<32x64xbf16>
    %79 = arith.mulf %77, %78 : vector<32x64xbf16>
    %80 = vector.extract_strided_slice %72 {offsets = [0, 8], sizes = [32, 64], strides = [1, 1]} : vector<32x82xbf16> to vector<32x64xbf16>
    %81 = vector.broadcast %24 : vector<1x64xbf16> to vector<32x64xbf16>
    %82 = arith.mulf %80, %81 : vector<32x64xbf16>
    %83 = vector.extract_strided_slice %72 {offsets = [0, 10], sizes = [32, 64], strides = [1, 1]} : vector<32x82xbf16> to vector<32x64xbf16>
    %84 = vector.broadcast %29 : vector<1x64xbf16> to vector<32x64xbf16>
    %85 = arith.mulf %83, %84 : vector<32x64xbf16>
    %86 = vector.extract_strided_slice %72 {offsets = [0, 16], sizes = [32, 64], strides = [1, 1]} : vector<32x82xbf16> to vector<32x64xbf16>
    %87 = vector.broadcast %24 : vector<1x64xbf16> to vector<32x64xbf16>
    %88 = arith.mulf %86, %87 : vector<32x64xbf16>
    %89 = vector.extract_strided_slice %72 {offsets = [0, 17], sizes = [32, 64], strides = [1, 1]} : vector<32x82xbf16> to vector<32x64xbf16>
    %90 = vector.extract_strided_slice %72 {offsets = [0, 18], sizes = [32, 64], strides = [1, 1]} : vector<32x82xbf16> to vector<32x64xbf16>
    %91 = vector.broadcast %29 : vector<1x64xbf16> to vector<32x64xbf16>
    %92 = arith.mulf %90, %91 : vector<32x64xbf16>
    %93 = tpu.concatenate %75, %76, %79, %82, %70, %85, %88, %89, %92 in 0 : vector<32x64xbf16>, vector<32x64xbf16>, vector<32x64xbf16>, vector<32x64xbf16>, vector<32x64xbf16>, vector<32x64xbf16>, vector<32x64xbf16>, vector<32x64xbf16>, vector<32x64xbf16> -> vector<288x64xbf16>
    %cst_19 = arith.constant dense<0.000000e+00> : vector<96x64xf32>
    %94 = tpu.matmul %69, %93, %cst_19 {dimension_numbers = #tpu.dot_dimension_numbers<[1], [0], [0], [1], [0, 0, 1, 1], [], []>} : vector<96x288xbf16>, vector<288x64xbf16>, vector<96x64xf32> -> vector<96x64xf32>
    %c0_20 = arith.constant 0 : index
    %c0_21 = arith.constant 0 : index
    %95 = vector.load %arg6[%c0_20, %c0_21] : memref<64x288xbf16, #tpu.memory_space<vmem>>, vector<64x288xbf16>
    %96 = arith.truncf %68 : vector<32x64xf32> to vector<32x64xbf16>
    %cst_22 = arith.constant 0.000000e+00 : bf16
    %97 = vector.broadcast %cst_22 : bf16 to vector<32x9xbf16>
    %98 = tpu.concatenate %97, %96, %97 in 1 : vector<32x9xbf16>, vector<32x64xbf16>, vector<32x9xbf16> -> vector<32x82xbf16>
    %99 = vector.extract_strided_slice %98 {offsets = [0, 0], sizes = [32, 64], strides = [1, 1]} : vector<32x82xbf16> to vector<32x64xbf16>
    %100 = vector.broadcast %24 : vector<1x64xbf16> to vector<32x64xbf16>
    %101 = arith.mulf %99, %100 : vector<32x64xbf16>
    %102 = vector.extract_strided_slice %98 {offsets = [0, 1], sizes = [32, 64], strides = [1, 1]} : vector<32x82xbf16> to vector<32x64xbf16>
    %103 = vector.extract_strided_slice %98 {offsets = [0, 2], sizes = [32, 64], strides = [1, 1]} : vector<32x82xbf16> to vector<32x64xbf16>
    %104 = vector.broadcast %29 : vector<1x64xbf16> to vector<32x64xbf16>
    %105 = arith.mulf %103, %104 : vector<32x64xbf16>
    %106 = vector.extract_strided_slice %98 {offsets = [0, 8], sizes = [32, 64], strides = [1, 1]} : vector<32x82xbf16> to vector<32x64xbf16>
    %107 = vector.broadcast %24 : vector<1x64xbf16> to vector<32x64xbf16>
    %108 = arith.mulf %106, %107 : vector<32x64xbf16>
    %109 = vector.extract_strided_slice %98 {offsets = [0, 10], sizes = [32, 64], strides = [1, 1]} : vector<32x82xbf16> to vector<32x64xbf16>
    %110 = vector.broadcast %29 : vector<1x64xbf16> to vector<32x64xbf16>
    %111 = arith.mulf %109, %110 : vector<32x64xbf16>
    %112 = vector.extract_strided_slice %98 {offsets = [0, 16], sizes = [32, 64], strides = [1, 1]} : vector<32x82xbf16> to vector<32x64xbf16>
    %113 = vector.broadcast %24 : vector<1x64xbf16> to vector<32x64xbf16>
    %114 = arith.mulf %112, %113 : vector<32x64xbf16>
    %115 = vector.extract_strided_slice %98 {offsets = [0, 17], sizes = [32, 64], strides = [1, 1]} : vector<32x82xbf16> to vector<32x64xbf16>
    %116 = vector.extract_strided_slice %98 {offsets = [0, 18], sizes = [32, 64], strides = [1, 1]} : vector<32x82xbf16> to vector<32x64xbf16>
    %117 = vector.broadcast %29 : vector<1x64xbf16> to vector<32x64xbf16>
    %118 = arith.mulf %116, %117 : vector<32x64xbf16>
    %119 = tpu.concatenate %101, %102, %105, %108, %96, %111, %114, %115, %118 in 0 : vector<32x64xbf16>, vector<32x64xbf16>, vector<32x64xbf16>, vector<32x64xbf16>, vector<32x64xbf16>, vector<32x64xbf16>, vector<32x64xbf16>, vector<32x64xbf16>, vector<32x64xbf16> -> vector<288x64xbf16>
    %cst_23 = arith.constant dense<0.000000e+00> : vector<64x64xf32>
    %120 = tpu.matmul %95, %119, %cst_23 {dimension_numbers = #tpu.dot_dimension_numbers<[1], [0], [0], [1], [0, 0, 1, 1], [], []>} : vector<64x288xbf16>, vector<288x64xbf16>, vector<64x64xf32> -> vector<64x64xf32>
    %121 = vector.extract_strided_slice %94 {offsets = [0, 0], sizes = [64, 64], strides = [1, 1]} : vector<96x64xf32> to vector<64x64xf32>
    %122 = arith.addf %121, %120 : vector<64x64xf32>
    %c0_24 = arith.constant 0 : index
    %c0_25 = arith.constant 0 : index
    %123 = vector.load %arg7[%c0_24, %c0_25] : memref<64x1xf32, #tpu.memory_space<vmem>>, vector<64x1xf32>
    %124 = vector.broadcast %123 : vector<64x1xf32> to vector<64x64xf32>
    %125 = arith.addf %122, %124 : vector<64x64xf32>
    %126 = arith.negf %125 : vector<64x64xf32>
    %127 = math.exp %126 : vector<64x64xf32>
    %cst_26 = arith.constant 1.000000e+00 : f32
    %128 = vector.broadcast %cst_26 : f32 to vector<64x64xf32>
    %129 = arith.addf %128, %127 : vector<64x64xf32>
    %130 = arith.divf %128, %129 : vector<64x64xf32>
    %131 = vector.extract_strided_slice %130 {offsets = [0, 0], sizes = [32, 64], strides = [1, 1]} : vector<64x64xf32> to vector<32x64xf32>
    %132 = vector.extract_strided_slice %130 {offsets = [32, 0], sizes = [32, 64], strides = [1, 1]} : vector<64x64xf32> to vector<32x64xf32>
    %c0_27 = arith.constant 0 : index
    %c0_28 = arith.constant 0 : index
    %133 = vector.load %arg8[%c0_27, %c0_28] : memref<32x288xbf16, #tpu.memory_space<vmem>>, vector<32x288xbf16>
    %134 = arith.mulf %131, %68 : vector<32x64xf32>
    %135 = arith.truncf %134 : vector<32x64xf32> to vector<32x64xbf16>
    %cst_29 = arith.constant 0.000000e+00 : bf16
    %136 = vector.broadcast %cst_29 : bf16 to vector<32x9xbf16>
    %137 = tpu.concatenate %136, %135, %136 in 1 : vector<32x9xbf16>, vector<32x64xbf16>, vector<32x9xbf16> -> vector<32x82xbf16>
    %138 = vector.extract_strided_slice %137 {offsets = [0, 0], sizes = [32, 64], strides = [1, 1]} : vector<32x82xbf16> to vector<32x64xbf16>
    %139 = vector.broadcast %24 : vector<1x64xbf16> to vector<32x64xbf16>
    %140 = arith.mulf %138, %139 : vector<32x64xbf16>
    %141 = vector.extract_strided_slice %137 {offsets = [0, 1], sizes = [32, 64], strides = [1, 1]} : vector<32x82xbf16> to vector<32x64xbf16>
    %142 = vector.extract_strided_slice %137 {offsets = [0, 2], sizes = [32, 64], strides = [1, 1]} : vector<32x82xbf16> to vector<32x64xbf16>
    %143 = vector.broadcast %29 : vector<1x64xbf16> to vector<32x64xbf16>
    %144 = arith.mulf %142, %143 : vector<32x64xbf16>
    %145 = vector.extract_strided_slice %137 {offsets = [0, 8], sizes = [32, 64], strides = [1, 1]} : vector<32x82xbf16> to vector<32x64xbf16>
    %146 = vector.broadcast %24 : vector<1x64xbf16> to vector<32x64xbf16>
    %147 = arith.mulf %145, %146 : vector<32x64xbf16>
    %148 = vector.extract_strided_slice %137 {offsets = [0, 10], sizes = [32, 64], strides = [1, 1]} : vector<32x82xbf16> to vector<32x64xbf16>
    %149 = vector.broadcast %29 : vector<1x64xbf16> to vector<32x64xbf16>
    %150 = arith.mulf %148, %149 : vector<32x64xbf16>
    %151 = vector.extract_strided_slice %137 {offsets = [0, 16], sizes = [32, 64], strides = [1, 1]} : vector<32x82xbf16> to vector<32x64xbf16>
    %152 = vector.broadcast %24 : vector<1x64xbf16> to vector<32x64xbf16>
    %153 = arith.mulf %151, %152 : vector<32x64xbf16>
    %154 = vector.extract_strided_slice %137 {offsets = [0, 17], sizes = [32, 64], strides = [1, 1]} : vector<32x82xbf16> to vector<32x64xbf16>
    %155 = vector.extract_strided_slice %137 {offsets = [0, 18], sizes = [32, 64], strides = [1, 1]} : vector<32x82xbf16> to vector<32x64xbf16>
    %156 = vector.broadcast %29 : vector<1x64xbf16> to vector<32x64xbf16>
    %157 = arith.mulf %155, %156 : vector<32x64xbf16>
    %158 = tpu.concatenate %140, %141, %144, %147, %135, %150, %153, %154, %157 in 0 : vector<32x64xbf16>, vector<32x64xbf16>, vector<32x64xbf16>, vector<32x64xbf16>, vector<32x64xbf16>, vector<32x64xbf16>, vector<32x64xbf16>, vector<32x64xbf16>, vector<32x64xbf16> -> vector<288x64xbf16>
    %cst_30 = arith.constant dense<0.000000e+00> : vector<32x64xf32>
    %159 = tpu.matmul %133, %158, %cst_30 {dimension_numbers = #tpu.dot_dimension_numbers<[1], [0], [0], [1], [0, 0, 1, 1], [], []>} : vector<32x288xbf16>, vector<288x64xbf16>, vector<32x64xf32> -> vector<32x64xf32>
    %160 = vector.extract_strided_slice %94 {offsets = [64, 0], sizes = [32, 64], strides = [1, 1]} : vector<96x64xf32> to vector<32x64xf32>
    %161 = arith.addf %160, %159 : vector<32x64xf32>
    %c0_31 = arith.constant 0 : index
    %c0_32 = arith.constant 0 : index
    %162 = vector.load %arg9[%c0_31, %c0_32] : memref<32x1xf32, #tpu.memory_space<vmem>>, vector<32x1xf32>
    %163 = vector.broadcast %162 : vector<32x1xf32> to vector<32x64xf32>
    %164 = arith.addf %161, %163 : vector<32x64xf32>
    %165 = math.tanh %164 : vector<32x64xf32>
    %cst_33 = arith.constant 1.000000e+00 : f32
    %166 = vector.broadcast %cst_33 : f32 to vector<32x64xf32>
    %167 = arith.subf %166, %132 : vector<32x64xf32>
    %168 = arith.mulf %68, %167 : vector<32x64xf32>
    %169 = arith.mulf %165, %132 : vector<32x64xf32>
    %170 = arith.addf %168, %169 : vector<32x64xf32>
    %c0_34 = arith.constant 0 : index
    %c0_35 = arith.constant 0 : index
    %c0_36 = arith.constant 0 : index
    %171 = vector.load %arg14[%c0_34, %c0_35, %c0_36] : memref<1x32x64xf32, #tpu.memory_space<vmem>>, vector<1x32x64xf32>
    %172 = vector.shape_cast %171 : vector<1x32x64xf32> to vector<32x64xf32>
    %173 = vector.shape_cast %170 : vector<32x64xf32> to vector<1x32x64xf32>
    tpu.vector_store %arg14[%c0_34, %c0_35, %c0_36], %173 {strides = array<i32>} : memref<1x32x64xf32, #tpu.memory_space<vmem>>, vector<1x32x64xf32>,
    %c0_37 = arith.constant 0 : index
    %c0_38 = arith.constant 0 : index
    %174 = vector.load %arg10[%c0_37, %c0_38] : memref<32x288xbf16, #tpu.memory_space<vmem>>, vector<32x288xbf16>
    %c0_39 = arith.constant 0 : index
    %c0_40 = arith.constant 0 : index
    %175 = vector.load %arg11[%c0_39, %c0_40] : memref<32x1xf32, #tpu.memory_space<vmem>>, vector<32x1xf32>
    %176 = arith.truncf %170 : vector<32x64xf32> to vector<32x64xbf16>
    %cst_41 = arith.constant 0.000000e+00 : bf16
    %177 = vector.broadcast %cst_41 : bf16 to vector<32x9xbf16>
    %178 = tpu.concatenate %177, %176, %177 in 1 : vector<32x9xbf16>, vector<32x64xbf16>, vector<32x9xbf16> -> vector<32x82xbf16>
    %179 = vector.extract_strided_slice %178 {offsets = [0, 0], sizes = [32, 64], strides = [1, 1]} : vector<32x82xbf16> to vector<32x64xbf16>
    %180 = vector.broadcast %24 : vector<1x64xbf16> to vector<32x64xbf16>
    %181 = arith.mulf %179, %180 : vector<32x64xbf16>
    %182 = vector.extract_strided_slice %178 {offsets = [0, 1], sizes = [32, 64], strides = [1, 1]} : vector<32x82xbf16> to vector<32x64xbf16>
    %183 = vector.extract_strided_slice %178 {offsets = [0, 2], sizes = [32, 64], strides = [1, 1]} : vector<32x82xbf16> to vector<32x64xbf16>
    %184 = vector.broadcast %29 : vector<1x64xbf16> to vector<32x64xbf16>
    %185 = arith.mulf %183, %184 : vector<32x64xbf16>
    %186 = vector.extract_strided_slice %178 {offsets = [0, 8], sizes = [32, 64], strides = [1, 1]} : vector<32x82xbf16> to vector<32x64xbf16>
    %187 = vector.broadcast %24 : vector<1x64xbf16> to vector<32x64xbf16>
    %188 = arith.mulf %186, %187 : vector<32x64xbf16>
    %189 = vector.extract_strided_slice %178 {offsets = [0, 10], sizes = [32, 64], strides = [1, 1]} : vector<32x82xbf16> to vector<32x64xbf16>
    %190 = vector.broadcast %29 : vector<1x64xbf16> to vector<32x64xbf16>
    %191 = arith.mulf %189, %190 : vector<32x64xbf16>
    %192 = vector.extract_strided_slice %178 {offsets = [0, 16], sizes = [32, 64], strides = [1, 1]} : vector<32x82xbf16> to vector<32x64xbf16>
    %193 = vector.broadcast %24 : vector<1x64xbf16> to vector<32x64xbf16>
    %194 = arith.mulf %192, %193 : vector<32x64xbf16>
    %195 = vector.extract_strided_slice %178 {offsets = [0, 17], sizes = [32, 64], strides = [1, 1]} : vector<32x82xbf16> to vector<32x64xbf16>
    %196 = vector.extract_strided_slice %178 {offsets = [0, 18], sizes = [32, 64], strides = [1, 1]} : vector<32x82xbf16> to vector<32x64xbf16>
    %197 = vector.broadcast %29 : vector<1x64xbf16> to vector<32x64xbf16>
    %198 = arith.mulf %196, %197 : vector<32x64xbf16>
    %199 = tpu.concatenate %181, %182, %185, %188, %176, %191, %194, %195, %198 in 0 : vector<32x64xbf16>, vector<32x64xbf16>, vector<32x64xbf16>, vector<32x64xbf16>, vector<32x64xbf16>, vector<32x64xbf16>, vector<32x64xbf16>, vector<32x64xbf16>, vector<32x64xbf16> -> vector<288x64xbf16>
    %cst_42 = arith.constant dense<0.000000e+00> : vector<32x64xf32>
    %200 = tpu.matmul %174, %199, %cst_42 {dimension_numbers = #tpu.dot_dimension_numbers<[1], [0], [0], [1], [0, 0, 1, 1], [], []>} : vector<32x288xbf16>, vector<288x64xbf16>, vector<32x64xf32> -> vector<32x64xf32>
    %201 = vector.broadcast %175 : vector<32x1xf32> to vector<32x64xf32>
    %202 = arith.addf %200, %201 : vector<32x64xf32>
    %cst_43 = arith.constant 0.000000e+00 : f32
    %203 = vector.broadcast %cst_43 : f32 to vector<32x64xf32>
    %204 = arith.maximumf %202, %203 : vector<32x64xf32>
    %c0_44 = arith.constant 0 : index
    %c0_45 = arith.constant 0 : index
    %205 = vector.load %arg12[%c0_44, %c0_45] : memref<32x288xbf16, #tpu.memory_space<vmem>>, vector<32x288xbf16>
    %c0_46 = arith.constant 0 : index
    %c0_47 = arith.constant 0 : index
    %206 = vector.load %arg13[%c0_46, %c0_47] : memref<32x1xf32, #tpu.memory_space<vmem>>, vector<32x1xf32>
    %207 = arith.truncf %204 : vector<32x64xf32> to vector<32x64xbf16>
    %cst_48 = arith.constant 0.000000e+00 : bf16
    %208 = vector.broadcast %cst_48 : bf16 to vector<32x9xbf16>
    %209 = tpu.concatenate %208, %207, %208 in 1 : vector<32x9xbf16>, vector<32x64xbf16>, vector<32x9xbf16> -> vector<32x82xbf16>
    %210 = vector.extract_strided_slice %209 {offsets = [0, 0], sizes = [32, 64], strides = [1, 1]} : vector<32x82xbf16> to vector<32x64xbf16>
    %211 = vector.broadcast %24 : vector<1x64xbf16> to vector<32x64xbf16>
    %212 = arith.mulf %210, %211 : vector<32x64xbf16>
    %213 = vector.extract_strided_slice %209 {offsets = [0, 1], sizes = [32, 64], strides = [1, 1]} : vector<32x82xbf16> to vector<32x64xbf16>
    %214 = vector.extract_strided_slice %209 {offsets = [0, 2], sizes = [32, 64], strides = [1, 1]} : vector<32x82xbf16> to vector<32x64xbf16>
    %215 = vector.broadcast %29 : vector<1x64xbf16> to vector<32x64xbf16>
    %216 = arith.mulf %214, %215 : vector<32x64xbf16>
    %217 = vector.extract_strided_slice %209 {offsets = [0, 8], sizes = [32, 64], strides = [1, 1]} : vector<32x82xbf16> to vector<32x64xbf16>
    %218 = vector.broadcast %24 : vector<1x64xbf16> to vector<32x64xbf16>
    %219 = arith.mulf %217, %218 : vector<32x64xbf16>
    %220 = vector.extract_strided_slice %209 {offsets = [0, 10], sizes = [32, 64], strides = [1, 1]} : vector<32x82xbf16> to vector<32x64xbf16>
    %221 = vector.broadcast %29 : vector<1x64xbf16> to vector<32x64xbf16>
    %222 = arith.mulf %220, %221 : vector<32x64xbf16>
    %223 = vector.extract_strided_slice %209 {offsets = [0, 16], sizes = [32, 64], strides = [1, 1]} : vector<32x82xbf16> to vector<32x64xbf16>
    %224 = vector.broadcast %24 : vector<1x64xbf16> to vector<32x64xbf16>
    %225 = arith.mulf %223, %224 : vector<32x64xbf16>
    %226 = vector.extract_strided_slice %209 {offsets = [0, 17], sizes = [32, 64], strides = [1, 1]} : vector<32x82xbf16> to vector<32x64xbf16>
    %227 = vector.extract_strided_slice %209 {offsets = [0, 18], sizes = [32, 64], strides = [1, 1]} : vector<32x82xbf16> to vector<32x64xbf16>
    %228 = vector.broadcast %29 : vector<1x64xbf16> to vector<32x64xbf16>
    %229 = arith.mulf %227, %228 : vector<32x64xbf16>
    %230 = tpu.concatenate %212, %213, %216, %219, %207, %222, %225, %226, %229 in 0 : vector<32x64xbf16>, vector<32x64xbf16>, vector<32x64xbf16>, vector<32x64xbf16>, vector<32x64xbf16>, vector<32x64xbf16>, vector<32x64xbf16>, vector<32x64xbf16>, vector<32x64xbf16> -> vector<288x64xbf16>
    %cst_49 = arith.constant dense<0.000000e+00> : vector<32x64xf32>
    %231 = tpu.matmul %205, %230, %cst_49 {dimension_numbers = #tpu.dot_dimension_numbers<[1], [0], [0], [1], [0, 0, 1, 1], [], []>} : vector<32x288xbf16>, vector<288x64xbf16>, vector<32x64xf32> -> vector<32x64xf32>
    %232 = vector.broadcast %206 : vector<32x1xf32> to vector<32x64xf32>
    %233 = arith.addf %231, %232 : vector<32x64xf32>
    %234 = arith.addf %233, %170 : vector<32x64xf32>
    %cst_50 = arith.constant 0.000000e+00 : f32
    %235 = vector.broadcast %cst_50 : f32 to vector<32x64xf32>
    %236 = arith.maximumf %234, %235 : vector<32x64xf32>
    %237 = arith.addf %236, %170 : vector<32x64xf32>
    %c0_51 = arith.constant 0 : index
    %c0_52 = arith.constant 0 : index
    %c0_53 = arith.constant 0 : index
    %238 = vector.load %arg15[%c0_51, %c0_52, %c0_53] : memref<1x32x64xf32, #tpu.memory_space<vmem>>, vector<1x32x64xf32>
    %239 = vector.shape_cast %238 : vector<1x32x64xf32> to vector<32x64xf32>
    %240 = vector.shape_cast %237 : vector<32x64xf32> to vector<1x32x64xf32>
    tpu.vector_store %arg15[%c0_51, %c0_52, %c0_53], %240 {strides = array<i32>} : memref<1x32x64xf32, #tpu.memory_space<vmem>>, vector<1x32x64xf32>,
    return
  }
  func.func @transform_0(%arg0: i32) -> (i32, i32, i32, i32) {
    %c0_i32 = arith.constant 0 : i32
    %c0_i32_0 = arith.constant 0 : i32
    %c0_i32_1 = arith.constant 0 : i32
    %c0_i32_2 = arith.constant 0 : i32
    return %arg0, %c0_i32, %c0_i32_0, %c0_i32_1 : i32, i32, i32, i32
  }
  func.func @transform_1(%arg0: i32) -> (i32, i32, i32) {
    %c0_i32 = arith.constant 0 : i32
    %c0_i32_0 = arith.constant 0 : i32
    %c0_i32_1 = arith.constant 0 : i32
    return %arg0, %c0_i32, %c0_i32_0 : i32, i32, i32
  }
  func.func @transform_2(%arg0: i32) -> (i32, i32) {
    %c0_i32 = arith.constant 0 : i32
    %c0_i32_0 = arith.constant 0 : i32
    %c0_i32_1 = arith.constant 0 : i32
    return %c0_i32, %c0_i32_0 : i32, i32
  }
  func.func @transform_3(%arg0: i32) -> (i32, i32) {
    %c0_i32 = arith.constant 0 : i32
    %c0_i32_0 = arith.constant 0 : i32
    %c0_i32_1 = arith.constant 0 : i32
    return %c0_i32, %c0_i32_0 : i32, i32
  }
  func.func @transform_4(%arg0: i32) -> (i32, i32) {
    %c0_i32 = arith.constant 0 : i32
    %c0_i32_0 = arith.constant 0 : i32
    %c0_i32_1 = arith.constant 0 : i32
    return %c0_i32, %c0_i32_0 : i32, i32
  }
  func.func @transform_5(%arg0: i32) -> (i32, i32) {
    %c0_i32 = arith.constant 0 : i32
    %c0_i32_0 = arith.constant 0 : i32
    %c0_i32_1 = arith.constant 0 : i32
    return %c0_i32, %c0_i32_0 : i32, i32
  }
  func.func @transform_6(%arg0: i32) -> (i32, i32) {
    %c0_i32 = arith.constant 0 : i32
    %c0_i32_0 = arith.constant 0 : i32
    %c0_i32_1 = arith.constant 0 : i32
    return %c0_i32, %c0_i32_0 : i32, i32
  }
  func.func @transform_7(%arg0: i32) -> (i32, i32) {
    %c0_i32 = arith.constant 0 : i32
    %c0_i32_0 = arith.constant 0 : i32
    %c0_i32_1 = arith.constant 0 : i32
    return %c0_i32, %c0_i32_0 : i32, i32
  }
  func.func @transform_8(%arg0: i32) -> (i32, i32) {
    %c0_i32 = arith.constant 0 : i32
    %c0_i32_0 = arith.constant 0 : i32
    %c0_i32_1 = arith.constant 0 : i32
    return %c0_i32, %c0_i32_0 : i32, i32
  }
  func.func @transform_9(%arg0: i32) -> (i32, i32) {
    %c0_i32 = arith.constant 0 : i32
    %c0_i32_0 = arith.constant 0 : i32
    %c0_i32_1 = arith.constant 0 : i32
    return %c0_i32, %c0_i32_0 : i32, i32
  }
  func.func @transform_10(%arg0: i32) -> (i32, i32) {
    %c0_i32 = arith.constant 0 : i32
    %c0_i32_0 = arith.constant 0 : i32
    %c0_i32_1 = arith.constant 0 : i32
    return %c0_i32, %c0_i32_0 : i32, i32
  }
  func.func @transform_11(%arg0: i32) -> (i32, i32) {
    %c0_i32 = arith.constant 0 : i32
    %c0_i32_0 = arith.constant 0 : i32
    %c0_i32_1 = arith.constant 0 : i32
    return %c0_i32, %c0_i32_0 : i32, i32
  }
  func.func @transform_12(%arg0: i32) -> (i32, i32) {
    %c0_i32 = arith.constant 0 : i32
    %c0_i32_0 = arith.constant 0 : i32
    %c0_i32_1 = arith.constant 0 : i32
    return %c0_i32, %c0_i32_0 : i32, i32
  }
  func.func @transform_13(%arg0: i32) -> (i32, i32, i32) {
    %c0_i32 = arith.constant 0 : i32
    %c0_i32_0 = arith.constant 0 : i32
    %c0_i32_1 = arith.constant 0 : i32
    return %arg0, %c0_i32, %c0_i32_0 : i32, i32, i32
  }
  func.func @transform_14(%arg0: i32) -> (i32, i32, i32) {
    %c0_i32 = arith.constant 0 : i32
    %c0_i32_0 = arith.constant 0 : i32
    %c0_i32_1 = arith.constant 0 : i32
    return %arg0, %c0_i32, %c0_i32_0 : i32, i32, i32
  }
}

module attributes {stable_mosaic.version = 11 : i64} {
  func.func @_decoder_mid_kernel(%arg0: i32, %arg1: memref<1x32x256xf32, #tpu.memory_space<vmem>>, %arg2: memref<1x16x256xf32, #tpu.memory_space<vmem>>, %arg3: memref<16x288xbf16, #tpu.memory_space<vmem>>, %arg4: memref<16x1xf32, #tpu.memory_space<vmem>>, %arg5: memref<1x16x256xf32, #tpu.memory_space<vmem>>) attributes {dimension_semantics = [#tpu.dimension_semantics<parallel>], iteration_bounds = array<i64: 2>, scalar_prefetch = 0 : i64, scratch_operands = 0 : i64, tpu.core_type = #tpu.core_type<tc>, window_params = [{transform_indices = @transform_0, window_bounds = array<i64: 1, 32, 256>}, {transform_indices = @transform_1, window_bounds = array<i64: 1, 16, 256>}, {pipeline_mode = #tpu.pipeline_mode<synchronous>, transform_indices = @transform_2, window_bounds = array<i64: 16, 288>}, {pipeline_mode = #tpu.pipeline_mode<synchronous>, transform_indices = @transform_3, window_bounds = array<i64: 16, 1>}, {transform_indices = @transform_4, window_bounds = array<i64: 1, 16, 256>}]} {
    %0 = tpu.iota {dimensions = array<i32: 1>} : vector<1x256xi32>
    %c16_i32 = arith.constant 16 : i32
    %c0_i32 = arith.constant 0 : i32
    %1 = arith.cmpi eq, %c16_i32, %c0_i32 : i32
    %c1_i32 = arith.constant 1 : i32
    %2 = arith.select %1, %c1_i32, %c16_i32 : i32
    %3 = vector.broadcast %2 : i32 to vector<1x256xi32>
    %4 = arith.remsi %0, %3 : vector<1x256xi32>
    %c0_i32_0 = arith.constant 0 : i32
    %5 = vector.broadcast %c0_i32_0 : i32 to vector<1x256xi32>
    %6 = arith.cmpi ne, %4, %5 : vector<1x256xi32>
    %c0_i32_1 = arith.constant 0 : i32
    %7 = vector.broadcast %c0_i32_1 : i32 to vector<1x256xi32>
    %8 = arith.cmpi slt, %4, %7 : vector<1x256xi32>
    %c0_i32_2 = arith.constant 0 : i32
    %9 = arith.cmpi slt, %2, %c0_i32_2 : i32
    %10 = vector.broadcast %9 : i1 to vector<1x256xi1>
    %11 = vector.broadcast %10 : vector<1x256xi1> to vector<1x256xi1>
    %12 = arith.xori %8, %11 : vector<1x256xi1>
    %13 = arith.andi %12, %6 : vector<1x256xi1>
    %14 = vector.broadcast %2 : i32 to vector<1x256xi32>
    %15 = arith.addi %4, %14 : vector<1x256xi32>
    %16 = arith.select %13, %15, %4 : vector<1x256xi1>, vector<1x256xi32>
    %c0_i32_3 = arith.constant 0 : i32
    %17 = vector.broadcast %c0_i32_3 : i32 to vector<1x256xi32>
    %18 = arith.cmpi ne, %16, %17 : vector<1x256xi32>
    %19 = arith.extui %18 : vector<1x256xi1> to vector<1x256xi32>
    %20 = arith.sitofp %19 : vector<1x256xi32> to vector<1x256xf32>
    %21 = arith.truncf %20 : vector<1x256xf32> to vector<1x256xbf16>
    %c15_i32 = arith.constant 15 : i32
    %22 = vector.broadcast %c15_i32 : i32 to vector<1x256xi32>
    %23 = arith.cmpi ne, %16, %22 : vector<1x256xi32>
    %24 = arith.extui %23 : vector<1x256xi1> to vector<1x256xi32>
    %25 = arith.sitofp %24 : vector<1x256xi32> to vector<1x256xf32>
    %26 = arith.truncf %25 : vector<1x256xf32> to vector<1x256xbf16>
    %c0 = arith.constant 0 : index
    %c0_4 = arith.constant 0 : index
    %c0_5 = arith.constant 0 : index
    %27 = vector.load %arg1[%c0, %c0_4, %c0_5] : memref<1x32x256xf32, #tpu.memory_space<vmem>>, vector<1x32x256xf32>
    %28 = vector.shape_cast %27 : vector<1x32x256xf32> to vector<32x256xf32>
    %c0_6 = arith.constant 0 : index
    %c0_7 = arith.constant 0 : index
    %29 = vector.load %arg3[%c0_6, %c0_7] : memref<16x288xbf16, #tpu.memory_space<vmem>>, vector<16x288xbf16>
    %c0_8 = arith.constant 0 : index
    %c0_9 = arith.constant 0 : index
    %30 = vector.load %arg4[%c0_8, %c0_9] : memref<16x1xf32, #tpu.memory_space<vmem>>, vector<16x1xf32>
    %31 = arith.truncf %28 : vector<32x256xf32> to vector<32x256xbf16>
    %cst = arith.constant 0.000000e+00 : bf16
    %32 = vector.broadcast %cst : bf16 to vector<32x17xbf16>
    %33 = tpu.concatenate %32, %31, %32 in 1 : vector<32x17xbf16>, vector<32x256xbf16>, vector<32x17xbf16> -> vector<32x290xbf16>
    %34 = vector.extract_strided_slice %33 {offsets = [0, 0], sizes = [32, 256], strides = [1, 1]} : vector<32x290xbf16> to vector<32x256xbf16>
    %35 = vector.broadcast %21 : vector<1x256xbf16> to vector<32x256xbf16>
    %36 = arith.mulf %34, %35 : vector<32x256xbf16>
    %37 = vector.extract_strided_slice %33 {offsets = [0, 1], sizes = [32, 256], strides = [1, 1]} : vector<32x290xbf16> to vector<32x256xbf16>
    %38 = vector.extract_strided_slice %33 {offsets = [0, 2], sizes = [32, 256], strides = [1, 1]} : vector<32x290xbf16> to vector<32x256xbf16>
    %39 = vector.broadcast %26 : vector<1x256xbf16> to vector<32x256xbf16>
    %40 = arith.mulf %38, %39 : vector<32x256xbf16>
    %41 = vector.extract_strided_slice %33 {offsets = [0, 16], sizes = [32, 256], strides = [1, 1]} : vector<32x290xbf16> to vector<32x256xbf16>
    %42 = vector.broadcast %21 : vector<1x256xbf16> to vector<32x256xbf16>
    %43 = arith.mulf %41, %42 : vector<32x256xbf16>
    %44 = vector.extract_strided_slice %33 {offsets = [0, 18], sizes = [32, 256], strides = [1, 1]} : vector<32x290xbf16> to vector<32x256xbf16>
    %45 = vector.broadcast %26 : vector<1x256xbf16> to vector<32x256xbf16>
    %46 = arith.mulf %44, %45 : vector<32x256xbf16>
    %47 = vector.extract_strided_slice %33 {offsets = [0, 32], sizes = [32, 256], strides = [1, 1]} : vector<32x290xbf16> to vector<32x256xbf16>
    %48 = vector.broadcast %21 : vector<1x256xbf16> to vector<32x256xbf16>
    %49 = arith.mulf %47, %48 : vector<32x256xbf16>
    %50 = vector.extract_strided_slice %33 {offsets = [0, 33], sizes = [32, 256], strides = [1, 1]} : vector<32x290xbf16> to vector<32x256xbf16>
    %51 = vector.extract_strided_slice %33 {offsets = [0, 34], sizes = [32, 256], strides = [1, 1]} : vector<32x290xbf16> to vector<32x256xbf16>
    %52 = vector.broadcast %26 : vector<1x256xbf16> to vector<32x256xbf16>
    %53 = arith.mulf %51, %52 : vector<32x256xbf16>
    %54 = tpu.concatenate %36, %37, %40, %43, %31, %46, %49, %50, %53 in 0 : vector<32x256xbf16>, vector<32x256xbf16>, vector<32x256xbf16>, vector<32x256xbf16>, vector<32x256xbf16>, vector<32x256xbf16>, vector<32x256xbf16>, vector<32x256xbf16>, vector<32x256xbf16> -> vector<288x256xbf16>
    %cst_10 = arith.constant dense<0.000000e+00> : vector<16x256xf32>
    %55 = tpu.matmul %29, %54, %cst_10 {dimension_numbers = #tpu.dot_dimension_numbers<[1], [0], [0], [1], [0, 0, 1, 1], [], []>} : vector<16x288xbf16>, vector<288x256xbf16>, vector<16x256xf32> -> vector<16x256xf32>
    %56 = vector.broadcast %30 : vector<16x1xf32> to vector<16x256xf32>
    %57 = arith.addf %55, %56 : vector<16x256xf32>
    %cst_11 = arith.constant 0.000000e+00 : f32
    %58 = vector.broadcast %cst_11 : f32 to vector<16x256xf32>
    %59 = arith.maximumf %57, %58 : vector<16x256xf32>
    %c0_12 = arith.constant 0 : index
    %c0_13 = arith.constant 0 : index
    %c0_14 = arith.constant 0 : index
    %60 = vector.load %arg2[%c0_12, %c0_13, %c0_14] : memref<1x16x256xf32, #tpu.memory_space<vmem>>, vector<1x16x256xf32>
    %61 = vector.shape_cast %60 : vector<1x16x256xf32> to vector<16x256xf32>
    %62 = arith.addf %59, %61 : vector<16x256xf32>
    %c0_15 = arith.constant 0 : index
    %c0_16 = arith.constant 0 : index
    %c0_17 = arith.constant 0 : index
    %63 = vector.load %arg5[%c0_15, %c0_16, %c0_17] : memref<1x16x256xf32, #tpu.memory_space<vmem>>, vector<1x16x256xf32>
    %64 = vector.shape_cast %63 : vector<1x16x256xf32> to vector<16x256xf32>
    %65 = vector.shape_cast %62 : vector<16x256xf32> to vector<1x16x256xf32>
    tpu.vector_store %arg5[%c0_15, %c0_16, %c0_17], %65 {strides = array<i32>} : memref<1x16x256xf32, #tpu.memory_space<vmem>>, vector<1x16x256xf32>,
    return
  }
  func.func @transform_0(%arg0: i32) -> (i32, i32, i32) {
    %c0_i32 = arith.constant 0 : i32
    %c0_i32_0 = arith.constant 0 : i32
    %c0_i32_1 = arith.constant 0 : i32
    return %arg0, %c0_i32, %c0_i32_0 : i32, i32, i32
  }
  func.func @transform_1(%arg0: i32) -> (i32, i32, i32) {
    %c0_i32 = arith.constant 0 : i32
    %c0_i32_0 = arith.constant 0 : i32
    %c0_i32_1 = arith.constant 0 : i32
    return %arg0, %c0_i32, %c0_i32_0 : i32, i32, i32
  }
  func.func @transform_2(%arg0: i32) -> (i32, i32) {
    %c0_i32 = arith.constant 0 : i32
    %c0_i32_0 = arith.constant 0 : i32
    %c0_i32_1 = arith.constant 0 : i32
    return %c0_i32, %c0_i32_0 : i32, i32
  }
  func.func @transform_3(%arg0: i32) -> (i32, i32) {
    %c0_i32 = arith.constant 0 : i32
    %c0_i32_0 = arith.constant 0 : i32
    %c0_i32_1 = arith.constant 0 : i32
    return %c0_i32, %c0_i32_0 : i32, i32
  }
  func.func @transform_4(%arg0: i32) -> (i32, i32, i32) {
    %c0_i32 = arith.constant 0 : i32
    %c0_i32_0 = arith.constant 0 : i32
    %c0_i32_1 = arith.constant 0 : i32
    return %arg0, %c0_i32, %c0_i32_0 : i32, i32, i32
  }
}

module attributes {stable_mosaic.version = 11 : i64} {
  func.func @_decoder_final_kernel(%arg0: i32, %arg1: memref<1x16x1024xf32, #tpu.memory_space<vmem>>, %arg2: memref<1x8x1024xf32, #tpu.memory_space<vmem>>, %arg3: memref<8x144xbf16, #tpu.memory_space<vmem>>, %arg4: memref<8x1xf32, #tpu.memory_space<vmem>>, %arg5: memref<1x8xbf16, #tpu.memory_space<vmem>>, %arg6: memref<1x1xf32, #tpu.memory_space<vmem>>, %arg7: memref<1x1x1024xf32, #tpu.memory_space<vmem>>) attributes {dimension_semantics = [#tpu.dimension_semantics<parallel>], iteration_bounds = array<i64: 2>, scalar_prefetch = 0 : i64, scratch_operands = 0 : i64, tpu.core_type = #tpu.core_type<tc>, window_params = [{transform_indices = @transform_0, window_bounds = array<i64: 1, 16, 1024>}, {transform_indices = @transform_1, window_bounds = array<i64: 1, 8, 1024>}, {pipeline_mode = #tpu.pipeline_mode<synchronous>, transform_indices = @transform_2, window_bounds = array<i64: 8, 144>}, {pipeline_mode = #tpu.pipeline_mode<synchronous>, transform_indices = @transform_3, window_bounds = array<i64: 8, 1>}, {pipeline_mode = #tpu.pipeline_mode<synchronous>, transform_indices = @transform_4, window_bounds = array<i64: 1, 8>}, {pipeline_mode = #tpu.pipeline_mode<synchronous>, transform_indices = @transform_5, window_bounds = array<i64: 1, 1>}, {transform_indices = @transform_6, window_bounds = array<i64: 1, 1, 1024>}]} {
    %0 = tpu.iota {dimensions = array<i32: 1>} : vector<1x1024xi32>
    %c32_i32 = arith.constant 32 : i32
    %c0_i32 = arith.constant 0 : i32
    %1 = arith.cmpi eq, %c32_i32, %c0_i32 : i32
    %c1_i32 = arith.constant 1 : i32
    %2 = arith.select %1, %c1_i32, %c32_i32 : i32
    %3 = vector.broadcast %2 : i32 to vector<1x1024xi32>
    %4 = arith.remsi %0, %3 : vector<1x1024xi32>
    %c0_i32_0 = arith.constant 0 : i32
    %5 = vector.broadcast %c0_i32_0 : i32 to vector<1x1024xi32>
    %6 = arith.cmpi ne, %4, %5 : vector<1x1024xi32>
    %c0_i32_1 = arith.constant 0 : i32
    %7 = vector.broadcast %c0_i32_1 : i32 to vector<1x1024xi32>
    %8 = arith.cmpi slt, %4, %7 : vector<1x1024xi32>
    %c0_i32_2 = arith.constant 0 : i32
    %9 = arith.cmpi slt, %2, %c0_i32_2 : i32
    %10 = vector.broadcast %9 : i1 to vector<1x1024xi1>
    %11 = vector.broadcast %10 : vector<1x1024xi1> to vector<1x1024xi1>
    %12 = arith.xori %8, %11 : vector<1x1024xi1>
    %13 = arith.andi %12, %6 : vector<1x1024xi1>
    %14 = vector.broadcast %2 : i32 to vector<1x1024xi32>
    %15 = arith.addi %4, %14 : vector<1x1024xi32>
    %16 = arith.select %13, %15, %4 : vector<1x1024xi1>, vector<1x1024xi32>
    %c0_i32_3 = arith.constant 0 : i32
    %17 = vector.broadcast %c0_i32_3 : i32 to vector<1x1024xi32>
    %18 = arith.cmpi ne, %16, %17 : vector<1x1024xi32>
    %19 = arith.extui %18 : vector<1x1024xi1> to vector<1x1024xi32>
    %20 = arith.sitofp %19 : vector<1x1024xi32> to vector<1x1024xf32>
    %21 = arith.truncf %20 : vector<1x1024xf32> to vector<1x1024xbf16>
    %c31_i32 = arith.constant 31 : i32
    %22 = vector.broadcast %c31_i32 : i32 to vector<1x1024xi32>
    %23 = arith.cmpi ne, %16, %22 : vector<1x1024xi32>
    %24 = arith.extui %23 : vector<1x1024xi1> to vector<1x1024xi32>
    %25 = arith.sitofp %24 : vector<1x1024xi32> to vector<1x1024xf32>
    %26 = arith.truncf %25 : vector<1x1024xf32> to vector<1x1024xbf16>
    %c0 = arith.constant 0 : index
    %c0_4 = arith.constant 0 : index
    %c0_5 = arith.constant 0 : index
    %27 = vector.load %arg1[%c0, %c0_4, %c0_5] : memref<1x16x1024xf32, #tpu.memory_space<vmem>>, vector<1x16x1024xf32>
    %28 = vector.shape_cast %27 : vector<1x16x1024xf32> to vector<16x1024xf32>
    %c0_6 = arith.constant 0 : index
    %c0_7 = arith.constant 0 : index
    %29 = vector.load %arg3[%c0_6, %c0_7] : memref<8x144xbf16, #tpu.memory_space<vmem>>, vector<8x144xbf16>
    %c0_8 = arith.constant 0 : index
    %c0_9 = arith.constant 0 : index
    %30 = vector.load %arg4[%c0_8, %c0_9] : memref<8x1xf32, #tpu.memory_space<vmem>>, vector<8x1xf32>
    %31 = arith.truncf %28 : vector<16x1024xf32> to vector<16x1024xbf16>
    %cst = arith.constant 0.000000e+00 : bf16
    %32 = vector.broadcast %cst : bf16 to vector<16x33xbf16>
    %33 = tpu.concatenate %32, %31, %32 in 1 : vector<16x33xbf16>, vector<16x1024xbf16>, vector<16x33xbf16> -> vector<16x1090xbf16>
    %34 = vector.extract_strided_slice %33 {offsets = [0, 0], sizes = [16, 1024], strides = [1, 1]} : vector<16x1090xbf16> to vector<16x1024xbf16>
    %35 = vector.broadcast %21 : vector<1x1024xbf16> to vector<16x1024xbf16>
    %36 = arith.mulf %34, %35 : vector<16x1024xbf16>
    %37 = vector.extract_strided_slice %33 {offsets = [0, 1], sizes = [16, 1024], strides = [1, 1]} : vector<16x1090xbf16> to vector<16x1024xbf16>
    %38 = vector.extract_strided_slice %33 {offsets = [0, 2], sizes = [16, 1024], strides = [1, 1]} : vector<16x1090xbf16> to vector<16x1024xbf16>
    %39 = vector.broadcast %26 : vector<1x1024xbf16> to vector<16x1024xbf16>
    %40 = arith.mulf %38, %39 : vector<16x1024xbf16>
    %41 = vector.extract_strided_slice %33 {offsets = [0, 32], sizes = [16, 1024], strides = [1, 1]} : vector<16x1090xbf16> to vector<16x1024xbf16>
    %42 = vector.broadcast %21 : vector<1x1024xbf16> to vector<16x1024xbf16>
    %43 = arith.mulf %41, %42 : vector<16x1024xbf16>
    %44 = vector.extract_strided_slice %33 {offsets = [0, 34], sizes = [16, 1024], strides = [1, 1]} : vector<16x1090xbf16> to vector<16x1024xbf16>
    %45 = vector.broadcast %26 : vector<1x1024xbf16> to vector<16x1024xbf16>
    %46 = arith.mulf %44, %45 : vector<16x1024xbf16>
    %47 = vector.extract_strided_slice %33 {offsets = [0, 64], sizes = [16, 1024], strides = [1, 1]} : vector<16x1090xbf16> to vector<16x1024xbf16>
    %48 = vector.broadcast %21 : vector<1x1024xbf16> to vector<16x1024xbf16>
    %49 = arith.mulf %47, %48 : vector<16x1024xbf16>
    %50 = vector.extract_strided_slice %33 {offsets = [0, 65], sizes = [16, 1024], strides = [1, 1]} : vector<16x1090xbf16> to vector<16x1024xbf16>
    %51 = vector.extract_strided_slice %33 {offsets = [0, 66], sizes = [16, 1024], strides = [1, 1]} : vector<16x1090xbf16> to vector<16x1024xbf16>
    %52 = vector.broadcast %26 : vector<1x1024xbf16> to vector<16x1024xbf16>
    %53 = arith.mulf %51, %52 : vector<16x1024xbf16>
    %54 = tpu.concatenate %36, %37, %40, %43, %31, %46, %49, %50, %53 in 0 : vector<16x1024xbf16>, vector<16x1024xbf16>, vector<16x1024xbf16>, vector<16x1024xbf16>, vector<16x1024xbf16>, vector<16x1024xbf16>, vector<16x1024xbf16>, vector<16x1024xbf16>, vector<16x1024xbf16> -> vector<144x1024xbf16>
    %cst_10 = arith.constant dense<0.000000e+00> : vector<8x1024xf32>
    %55 = tpu.matmul %29, %54, %cst_10 {dimension_numbers = #tpu.dot_dimension_numbers<[1], [0], [0], [1], [0, 0, 1, 1], [], []>} : vector<8x144xbf16>, vector<144x1024xbf16>, vector<8x1024xf32> -> vector<8x1024xf32>
    %56 = vector.broadcast %30 : vector<8x1xf32> to vector<8x1024xf32>
    %57 = arith.addf %55, %56 : vector<8x1024xf32>
    %cst_11 = arith.constant 0.000000e+00 : f32
    %58 = vector.broadcast %cst_11 : f32 to vector<8x1024xf32>
    %59 = arith.maximumf %57, %58 : vector<8x1024xf32>
    %c0_12 = arith.constant 0 : index
    %c0_13 = arith.constant 0 : index
    %c0_14 = arith.constant 0 : index
    %60 = vector.load %arg2[%c0_12, %c0_13, %c0_14] : memref<1x8x1024xf32, #tpu.memory_space<vmem>>, vector<1x8x1024xf32>
    %61 = vector.shape_cast %60 : vector<1x8x1024xf32> to vector<8x1024xf32>
    %62 = arith.addf %59, %61 : vector<8x1024xf32>
    %c0_15 = arith.constant 0 : index
    %c0_16 = arith.constant 0 : index
    %63 = vector.load %arg5[%c0_15, %c0_16] : memref<1x8xbf16, #tpu.memory_space<vmem>>, vector<1x8xbf16>
    %64 = arith.truncf %62 : vector<8x1024xf32> to vector<8x1024xbf16>
    %cst_17 = arith.constant dense<0.000000e+00> : vector<1x1024xf32>
    %65 = tpu.matmul %63, %64, %cst_17 {dimension_numbers = #tpu.dot_dimension_numbers<[1], [0], [0], [1], [0, 0, 1, 1], [], []>} : vector<1x8xbf16>, vector<8x1024xbf16>, vector<1x1024xf32> -> vector<1x1024xf32>
    %c0_18 = arith.constant 0 : index
    %c0_19 = arith.constant 0 : index
    %66 = vector.load %arg6[%c0_18, %c0_19] : memref<1x1xf32, #tpu.memory_space<vmem>>, vector<1x1xf32>
    %67 = vector.broadcast %66 : vector<1x1xf32> to vector<1x1024xf32>
    %68 = arith.addf %65, %67 : vector<1x1024xf32>
    %c0_20 = arith.constant 0 : index
    %c0_21 = arith.constant 0 : index
    %c0_22 = arith.constant 0 : index
    %69 = vector.load %arg7[%c0_20, %c0_21, %c0_22] : memref<1x1x1024xf32, #tpu.memory_space<vmem>>, vector<1x1x1024xf32>
    %70 = vector.shape_cast %69 : vector<1x1x1024xf32> to vector<1x1024xf32>
    %71 = vector.shape_cast %68 : vector<1x1024xf32> to vector<1x1x1024xf32>
    tpu.vector_store %arg7[%c0_20, %c0_21, %c0_22], %71 {strides = array<i32>} : memref<1x1x1024xf32, #tpu.memory_space<vmem>>, vector<1x1x1024xf32>,
    return
  }
  func.func @transform_0(%arg0: i32) -> (i32, i32, i32) {
    %c0_i32 = arith.constant 0 : i32
    %c0_i32_0 = arith.constant 0 : i32
    %c0_i32_1 = arith.constant 0 : i32
    return %arg0, %c0_i32, %c0_i32_0 : i32, i32, i32
  }
  func.func @transform_1(%arg0: i32) -> (i32, i32, i32) {
    %c0_i32 = arith.constant 0 : i32
    %c0_i32_0 = arith.constant 0 : i32
    %c0_i32_1 = arith.constant 0 : i32
    return %arg0, %c0_i32, %c0_i32_0 : i32, i32, i32
  }
  func.func @transform_2(%arg0: i32) -> (i32, i32) {
    %c0_i32 = arith.constant 0 : i32
    %c0_i32_0 = arith.constant 0 : i32
    %c0_i32_1 = arith.constant 0 : i32
    return %c0_i32, %c0_i32_0 : i32, i32
  }
  func.func @transform_3(%arg0: i32) -> (i32, i32) {
    %c0_i32 = arith.constant 0 : i32
    %c0_i32_0 = arith.constant 0 : i32
    %c0_i32_1 = arith.constant 0 : i32
    return %c0_i32, %c0_i32_0 : i32, i32
  }
  func.func @transform_4(%arg0: i32) -> (i32, i32) {
    %c0_i32 = arith.constant 0 : i32
    %c0_i32_0 = arith.constant 0 : i32
    %c0_i32_1 = arith.constant 0 : i32
    return %c0_i32, %c0_i32_0 : i32, i32
  }
  func.func @transform_5(%arg0: i32) -> (i32, i32) {
    %c0_i32 = arith.constant 0 : i32
    %c0_i32_0 = arith.constant 0 : i32
    %c0_i32_1 = arith.constant 0 : i32
    return %c0_i32, %c0_i32_0 : i32, i32
  }
  func.func @transform_6(%arg0: i32) -> (i32, i32, i32) {
    %c0_i32 = arith.constant 0 : i32
    %c0_i32_0 = arith.constant 0 : i32
    %c0_i32_1 = arith.constant 0 : i32
    return %arg0, %c0_i32, %c0_i32_0 : i32, i32, i32
  }
}

</mosaic_0001>

<bundles_post_ra>
// kernel: e2vid_forward.5
= control target key start
LH: loop header
LB: loop body
LE: loop exit
PB: predicated region body
PF: predicated region fallthrough
CT: control target
= control target key end

     0   :  { %s1443_s12 = smov 0   ;;  %s2148_s0 = inlined_call_operand.vmem [shape: f32[2,4,1024], index: 0, kind: input, shape index: {}]   ;;  %s2149_s1 = inlined_call_operand.vmem [shape: bf16[8,36], index: 1, kind: input, shape index: {}]   ;;  %s2150_s2 = inlined_call_operand.vmem [shape: f32[8,1], index: 2, kind: input, shape index: {}]   ;;  %s2151_s3 = inlined_call_operand.vmem [shape: f32[2,8,1024], index: 3, kind: output, shape index: {}]  }
   0x1 LB: > { %s1336_s13 = sadd.s32 4294967295, %s1407_s12   ;;  %p1340_p0 = scmp.ge.s32.totalorder %s1407_s12, 1  ;;  %s1407_s12 = sphi %s1443_s12, %s13_s12  }
   0x2   : > { %p137_p1 = scmp.lt.s32.totalorder %s1407_s12, 3 }
   0x4   : > { %p138_p2 = pnand %p1340_p0, %p137_p1 }
   0x5   : > { %p161_p3 = scmp.lt.s32.totalorder (!%p138_p2), %s1336_s13, 1  ;;  %s1410_s18 = smov (!%p138_p2), 33  }
   0x6   : > { %141 = sbr.rel (%p138_p2) target bundleno = 608 (0x260), region = 32  ;;  %s1411_s19 = smov (!%p138_p2), 34  }
   0x7   : > { %s1412_s20 = smov (!%p138_p2), 64   ;;  %s1413_s21 = smov (!%p138_p2), 66  }
   0x8   : > { %s1414_s22 = smov (!%p138_p2), 2   ;;  %s1415_s23 = smov (!%p138_p2), 32  }
   0x9   : > { %s1416_s24 = smov (!%p138_p2), 63   ;;  %s1417_s25 = smov (!%p138_p2), 94  }
   0xa   : > { %s1418_s26 = smov (!%p138_p2), 62   ;;  %s1419_s27 = smov (!%p138_p2), 127  }
   0xb   : > { %v172_v0 = vlaneseq  ;;  %s2153_s13 = smov (!%p161_p3, %s1336_s13), 1  ;;  %v1409_v15 = vmov 0.0   ;;  %s1420_s28 = smov 126  }
   0xc   : > { %s1371_s14 = sshll.u32 %s2153_s13, 5  ;;  %s1421_s29 = smov 96  }
   0xd   : > { %v1453_v1 = vand.u32 127, %v172_v0  ;;  %s1462_s17 = scalar_lea.vmem %s2148_s0, %s1371_s14  ;;  %s1372_s7 = sshll.u32 %s2153_s13, 6 }
   0xe   : > { %v342_v5 = vld [vmem:[%s1462_s17 + $0x8] sm:$0xff]  ;;  %v341_v6 = vld [vmem:[%s1462_s17] sm:$0xff]  ;;  %v1467_v7 = vld [vmem:[%s1462_s17 + $0x10] sm:$0xff]  ;;  %s2135_s10 = scalar_lea.vmem %s2151_s3, %s1372_s7 }
   0xf   : > { %v185_v2 = vand.u32 31, %v1453_v1  ;;  %v175_v3 = vadd.s32 256, %v1453_v1  ;;  %v174_v4 = vadd.s32 128, %v1453_v1  ;;  %v177_v8 = vadd.s32 512, %v1453_v1  ;;  %v344_v47 = vld [vmem:[%s1462_s17 + $0x18] sm:$0xff] }
  0x10   : > { %v176_v9 = vadd.s32 384, %v1453_v1  ;;  %v1471_v10 = vpack.c.bf16 %v342_v5, %v342_v5  ;;  %v1473_v11 = vpack.c.bf16 %v341_v6, %v341_v6  ;;  %v352_v14 = vcombine.high %v342_v5, %v342_v5 }
  0x11   : > { %vm309_vm0 = vcmp.ne.s32.totalorder %v185_v2, 31  ;;  %v199_v12 = vand.u32 31, %v175_v3  ;;  %v192_v13 = vand.u32 31, %v174_v4  ;;  %v351_v17 = vcombine.high %v341_v6, %v341_v6 }
  0x12   : > { %v1353_v16 = vsel %vm309_vm0, 1.0, %v1409_v15  ;;  %379 = vrot.lane.b32.xlu1 %v1471_v10, %s1410_s18  ;;  %375 = vrot.lane.b32.xlu0 %v1473_v11, %s1410_s18  ;;  %v1482_v19 = vpack.c.bf16 %v1467_v7, %v1467_v7  ;;  %v213_v20 = vand.u32 31, %v177_v8  ;;  %v206_v21 = vand.u32 31, %v176_v9 }
  0x13   : > { %v333_v18 = vpack.c.bf16 %v1353_v16, %v1353_v16  ;;  %vm311_vm1 = vcmp.ne.s32.totalorder %v199_v12, 31  ;;  %vm310_vm2 = vcmp.ne.s32.totalorder %v192_v13, 31  ;;  %v1487_v22 = vpack.c.bf16 %v352_v14, %v352_v14 }
  0x14   : > { %v1489_v23 = vpack.c.bf16 %v351_v17, %v351_v17  ;;  %v1355_v24 = vsel %vm311_vm1, 1.0, %v1409_v15  ;;  %v1354_v25 = vsel %vm310_vm2, 1.0, %v1409_v15  ;;  %vm313_vm3 = vcmp.ne.s32.totalorder %v213_v20, 31 }
  0x15   : > { %vm312_vm4 = vcmp.ne.s32.totalorder %v206_v21, 31  ;;  %v335_v26 = vpack.c.bf16 %v1355_v24, %v1355_v24  ;;  %v334_v27 = vpack.c.bf16 %v1354_v25, %v1354_v25  ;;  %v1357_v28 = vsel %vm313_vm3, 1.0, %v1409_v15 }
  0x16   : > { %522 = vrot.lane.b32.xlu1 %v333_v18, %s1411_s19  ;;  %383 = vrot.lane.b32.xlu0 %v1482_v19, %s1410_s18  ;;  %v1356_v29 = vsel %vm312_vm4, 1.0, %v1409_v15  ;;  %vm278_vm5 = vcmp.ne.s32.totalorder %v192_v13, 0  ;;  %vm277_vm6 = vcmp.ne.s32.totalorder %v185_v2, 0  ;;  %v337_v30 = vpack.c.bf16 %v1357_v28, %v1357_v28 }
  0x17   : > { %v336_v31 = vpack.c.bf16 %v1356_v29, %v1356_v29  ;;  %v1346_v32 = vsel %vm278_vm5, 1.0, %v1409_v15  ;;  %v1345_v33 = vsel %vm277_vm6, 1.0, %v1409_v15  ;;  %vm280_vm7 = vcmp.ne.s32.totalorder %v206_v21, 0 }
  0x18   : > { %vm279_vm8 = vcmp.ne.s32.totalorder %v199_v12, 0  ;;  %v1505_v34 = vpack.c.bf16 %v1346_v32, %v1346_v32  ;;  %v1507_v35 = vpack.c.bf16 %v1345_v33, %v1345_v33  ;;  %v1348_v36 = vsel %vm280_vm7, 1.0, %v1409_v15 }
  0x19   : > { %v1347_v37 = vsel %vm279_vm8, 1.0, %v1409_v15  ;;  %vm281_vm9 = vcmp.ne.s32.totalorder %v213_v20, 0  ;;  %v1515_v38 = vpack.c.bf16 %v1348_v36, %v1348_v36  ;;  %v178_v42 = vadd.s32 640, %v1453_v1 }
  0x1a   : > { %381 = vrot.lane.b32.xlu1 %v1487_v22, %s1410_s18  ;;  %377 = vrot.lane.b32.xlu0 %v1489_v23, %s1410_s18  ;;  %v1517_v39 = vpack.c.bf16 %v1347_v37, %v1347_v37  ;;  %v1349_v40 = vsel %vm281_vm9, 1.0, %v1409_v15  ;;  %v180_v44 = vadd.s32 896, %v1453_v1  ;;  %v179_v45 = vadd.s32 768, %v1453_v1 }
  0x1b   : > { %v1524_v41 = vpack.c.bf16 %v1349_v40, %v1349_v40  ;;  %v220_v43 = vand.u32 31, %v178_v42  ;;  %v353_v46 = vcombine.high %v1467_v7, %v1467_v7  ;;  %v1554_v50 = vpack.c.bf16 %v344_v47, %v344_v47 }
  0x1c   : > { %v234_v48 = vand.u32 31, %v180_v44  ;;  %v227_v49 = vand.u32 31, %v179_v45  ;;  %v354_v52 = vcombine.high %v344_v47, %v344_v47  ;;  %vm391_vm0 = vcmask 269312  }
  0x1d   : > { %vm314_vm10 = vcmp.ne.s32.totalorder %v220_v43, 31  ;;  %v1556_v51 = vpack.c.bf16 %v353_v46, %v353_v46  ;;  %vm282_vm14 = vcmp.ne.s32.totalorder %v220_v43, 0  ;;  %vm622_vm1 = vcmask 539648  }
  0x1e   : > { %526 = vrot.lane.b32.xlu1 %v335_v26, %s1411_s19  ;;  %524 = vrot.lane.b32.xlu0 %v334_v27, %s1411_s19  ;;  %v1358_v53 = vsel %vm314_vm10, 1.0, %v1409_v15  ;;  %vm316_vm11 = vcmp.ne.s32.totalorder %v234_v48, 31  ;;  %vm315_vm12 = vcmp.ne.s32.totalorder %v227_v49, 31  ;;  %v1563_v55 = vpack.c.bf16 %v354_v52, %v354_v52 }
  0x1f   : > { %v338_v54 = vpack.c.bf16 %v1358_v53, %v1358_v53  ;;  %v1360_v56 = vsel %vm316_vm11, 1.0, %v1409_v15  ;;  %v1359_v57 = vsel %vm315_vm12, 1.0, %v1409_v15  ;;  %vm283_vm13 = vcmp.ne.s32.totalorder %v227_v49, 0 }
  0x20   : > { %v340_v58 = vpack.c.bf16 %v1360_v56, %v1360_v56  ;;  %v339_v59 = vpack.c.bf16 %v1359_v57, %v1359_v57  ;;  %v1351_v60 = vsel %vm283_vm13, 1.0, %v1409_v15  ;;  %v1350_v61 = vsel %vm282_vm14, 1.0, %v1409_v15 }
  0x21   : > { %vm284_vm15 = vcmp.ne.s32.totalorder %v234_v48, 0  ;;  %v1574_v62 = vpack.c.bf16 %v1351_v60, %v1351_v60  ;;  %v1576_v63 = vpack.c.bf16 %v1350_v61, %v1350_v61  ;;  %vm538_vm2 = vcmask 277504  }
  0x22   : > { %530 = vrot.lane.b32.xlu1 %v337_v30, %s1411_s19  ;;  %528 = vrot.lane.b32.xlu0 %v336_v31, %s1411_s19  ;;  %v1352_v0 = vsel %vm284_vm15, 1.0, %v1409_v15  ;;  %vm580_vm3 = vcmask 523264   ;;  %vm446_vm4 = vcmask 15360   ;;  %vm496_vm5 = vcmask 261120  }
  0x23   : > { %v1583_v1 = vpack.c.bf16 %v1352_v0, %v1352_v0  ;;  %vm928_vm6 = vcmask 506880   ;;  %vm937_vm7 = vcmask 1041408   ;;  %vm812_vm8 = vcmask 769024  }
  0x24   : > { %vm892_vm9 = vcmask 515072   ;;  %vm962_vm10 = vcmask 1043456   ;;  %vm979_vm11 = vcmask 1045504   ;;  %vm677_vm12 = vcmask 1039360  }
  0x25   : > { %vm722_vm13 = vcmask 1031168   ;;  %vm767_vm14 = vcmask 785408   ;;  %vm1073_vm15 = vcmask 293888  }
  0x26   : > { %566 = vrot.lane.b32.xlu1 %v1505_v34, %s1412_s20  ;;  %564 = vrot.lane.b32.xlu0 %v1507_v35, %s1412_s20 }
  0x2a   : > { %570 = vrot.lane.b32.xlu1 %v1515_v38, %s1412_s20  ;;  %568 = vrot.lane.b32.xlu0 %v1517_v39, %s1412_s20 }
  0x2e   : > { %606 = vrot.lane.b32.xlu1 %v333_v18, %s1413_s21  ;;  %572 = vrot.lane.b32.xlu0 %v1524_v41, %s1412_s20 }
  0x32   : > { %610 = vrot.lane.b32.xlu1 %v335_v26, %s1413_s21  ;;  %608 = vrot.lane.b32.xlu0 %v334_v27, %s1413_s21 }
  0x36   : > { %614 = vrot.lane.b32.xlu1 %v337_v30, %s1413_s21  ;;  %612 = vrot.lane.b32.xlu0 %v336_v31, %s1413_s21 }
  0x3a   : > { %432 = vrot.lane.b32.xlu1 %v334_v27, %s1414_s22  ;;  %430 = vrot.lane.b32.xlu0 %v333_v18, %s1414_s22 }
  0x3e   : > { %436 = vrot.lane.b32.xlu1 %v336_v31, %s1414_s22  ;;  %434 = vrot.lane.b32.xlu0 %v335_v26, %s1414_s22 }
  0x42   : > { %480 = vrot.lane.b32.xlu1 %v1507_v35, %s1415_s23  ;;  %438 = vrot.lane.b32.xlu0 %v337_v30, %s1414_s22 }
  0x46   : > { %484 = vrot.lane.b32.xlu1 %v1517_v39, %s1415_s23  ;;  %482 = vrot.lane.b32.xlu0 %v1505_v34, %s1415_s23 }
  0x4a   : > { %488 = vrot.lane.b32.xlu1 %v1524_v41, %s1415_s23  ;;  %486 = vrot.lane.b32.xlu0 %v1515_v38, %s1415_s23 }
  0x4e   : > { %387 = vrot.lane.b32.xlu1 %v1554_v50, %s1410_s18  ;;  %385 = vrot.lane.b32.xlu0 %v1556_v51, %s1410_s18 }
  0x52   : > { %532 = vrot.lane.b32.xlu1 %v338_v54, %s1411_s19  ;;  %389 = vrot.lane.b32.xlu0 %v1563_v55, %s1410_s18 }
  0x56   : > { %536 = vrot.lane.b32.xlu1 %v340_v58, %s1411_s19  ;;  %534 = vrot.lane.b32.xlu0 %v339_v59, %s1411_s19 }
  0x5a   : > { %576 = vrot.lane.b32.xlu1 %v1574_v62, %s1412_s20  ;;  %574 = vrot.lane.b32.xlu0 %v1576_v63, %s1412_s20 }
  0x5e   : > { %616 = vrot.lane.b32.xlu1 %v338_v54, %s1413_s21  ;;  %578 = vrot.lane.b32.xlu0 %v1583_v1, %s1412_s20 }
  0x62   : > { %620 = vrot.lane.b32.xlu1 %v340_v58, %s1413_s21  ;;  %618 = vrot.lane.b32.xlu0 %v339_v59, %s1413_s21 }
  0x66   : > { %442 = vrot.lane.b32.xlu1 %v339_v59, %s1414_s22  ;;  %440 = vrot.lane.b32.xlu0 %v338_v54, %s1414_s22 }
  0x6a   : > { %490 = vrot.lane.b32.xlu1 %v1576_v63, %s1415_s23  ;;  %444 = vrot.lane.b32.xlu0 %v340_v58, %s1414_s22 }
  0x6e   : > { %494 = vrot.lane.b32.xlu1 %v1583_v1, %s1415_s23  ;;  %492 = vrot.lane.b32.xlu0 %v1574_v62, %s1415_s23 }
  0x84   : > { %v380_v2 = vpop.permute.xlu1 %379  ;;  %v376_v3 = vpop.permute.xlu0 %375 }
  0x85   : > { %v1600_v4 = vsel %vm391_vm0, 0, %v376_v3 }
  0x86   : > { %v865_v5 = vrot.slane %v1600_v4, 2 }
  0x88   : > { %v523_v6 = vpop.permute.xlu1 %522  ;;  %v1603_v7 = vpop.permute.xlu0 %383  ;;  %874 = vrot.lane.b32.xlu1 %v865_v5, %s1416_s24 }
  0x89   : > { %v555_v8 = vmul.bf16 %v523_v6, %v1600_v4 }
  0x8b   : > { %v785_v9 = vrot.slane %v555_v8, 6 }
  0x8c   : > { %v382_v12 = vpop.permute.xlu1 %381  ;;  %v378_v13 = vpop.permute.xlu0 %377 }
  0x8d   : > { %v1608_v14 = vsel %vm391_vm0, %v376_v3, %v378_v13  ;;  %794 = vrot.lane.b32.xlu1 %v785_v9, %s1417_s25  ;;  %v1613_v16 = vsel %vm391_vm0, %v380_v2, %v382_v12  ;;  %v1636_v42 = vsel %vm391_vm0, %v378_v13, %v380_v2  ;;  %v1648_v49 = vsel %vm391_vm0, %v382_v12, %v1603_v7 }
  0x8e   : > { %v866_v15 = vrot.slane %v1608_v14, 2  ;;  %v868_v20 = vrot.slane %v1613_v16, 2  ;;  %v867_v48 = vrot.slane %v1636_v42, 2  ;;  %v869_v58 = vrot.slane %v1648_v49, 2 }
  0x90   : > { %v527_v17 = vpop.permute.xlu1 %526  ;;  %v525_v18 = vpop.permute.xlu0 %524 }
  0x91   : > { %876 = vrot.lane.b32.xlu1 %v866_v15, %s1416_s24  ;;  %v539_v44 = vsel %vm538_vm2, %v523_v6, %v525_v18  ;;  %v540_v6 = vsel %vm538_vm2, %v525_v18, %v527_v17 }
  0x92   : > { %v556_v53 = vmul.bf16 %v539_v44, %v1608_v14  ;;  %v557_v18 = vmul.bf16 %v540_v6, %v1636_v42 }
  0x94   : > { %v1617_v21 = vpop.permute.xlu1 %530  ;;  %v529_v24 = vpop.permute.xlu0 %528  ;;  %v786_v60 = vrot.slane %v556_v53, 6  ;;  %v652_v53 = vrot.slane %v1636_v42, 6 }
  0x95   : > { %880 = vrot.lane.b32.xlu1 %v868_v20, %s1416_s24  ;;  %v541_v54 = vsel %vm538_vm2, %v527_v17, %v529_v24 }
  0x96   : > { %v558_v61 = vmul.bf16 %v541_v54, %v1613_v16 }
  0x98   : > { %v1620_v25 = vpop.permute.xlu1 %566  ;;  %v1622_v26 = vpop.permute.xlu0 %564  ;;  %v788_v9 = vrot.slane %v558_v61, 6 }
  0x99   : > { %v597_v31 = vmul.bf16 %v1622_v26, %v1600_v4 }
  0x9b   : > { %v830_v40 = vrot.slane %v597_v31, 4 }
  0x9c   : > { %v1624_v27 = vpop.permute.xlu1 %570  ;;  %v1626_v28 = vpop.permute.xlu0 %568 }
  0x9d   : > { %v582_v0 = vsel %vm580_vm3, %v1620_v25, %v1626_v28 }
  0x9e   : > { %v599_v12 = vmul.bf16 %v582_v0, %v1636_v42 }
  0xa0   : > { %v607_v29 = vpop.permute.xlu1 %606  ;;  %v1628_v30 = vpop.permute.xlu0 %572 }
  0xa1   : > { %v639_v32 = vmul.bf16 %v607_v29, %v1600_v4  ;;  %v584_v13 = vsel %vm580_vm3, %v1624_v27, %v1628_v30 }
  0xa2   : > { %v601_v31 = vmul.bf16 %v584_v13, %v1648_v49 }
  0xa3   : > { %910 = vrot.lane.b32.xlu0 %v639_v32, %s1418_s26  ;;  %v832_v32 = vrot.slane %v599_v12, 4 }
  0xa4   : > { %v611_v33 = vpop.permute.xlu1 %610  ;;  %v609_v36 = vpop.permute.xlu0 %608  ;;  %v834_v44 = vrot.slane %v601_v31, 4 }
  0xa5   : > { %v623_v37 = vsel %vm622_vm1, %v607_v29, %v609_v36  ;;  %v624_v59 = vsel %vm622_vm1, %v609_v36, %v611_v33  ;;  %v542_v29 = vsel %vm538_vm2, %v529_v24, %v1617_v21 }
  0xa6   : > { %v640_v43 = vmul.bf16 %v623_v37, %v1608_v14  ;;  %v641_v5 = vmul.bf16 %v624_v59, %v1636_v42  ;;  %v787_v37 = vrot.slane %v557_v18, 6  ;;  %v651_v18 = vrot.slane %v1608_v14, 6 }
  0xa7   : > { %839 = vrot.lane.b32.xlu0 %v830_v40, %s1412_s20  ;;  %v559_v40 = vmul.bf16 %v542_v29, %v1648_v49 }
  0xa8   : > { %v1641_v45 = vpop.permute.xlu1 %614  ;;  %912 = vrot.lane.b32.xlu1 %v640_v43, %s1418_s26  ;;  %v613_v46 = vpop.permute.xlu0 %612  ;;  %v581_v43 = vsel %vm580_vm3, %v1622_v26, %v1620_v25 }
  0xa9   : > { %v625_v47 = vsel %vm622_vm1, %v611_v33, %v613_v46  ;;  %v626_v8 = vsel %vm622_vm1, %v613_v46, %v1641_v45 }
  0xaa   : > { %v642_v52 = vmul.bf16 %v625_v47, %v1613_v16  ;;  %v643_v17 = vmul.bf16 %v626_v8, %v1648_v49  ;;  %v789_v47 = vrot.slane %v559_v40, 6 }
  0xab   : > { %878 = vrot.lane.b32.xlu0 %v867_v48, %s1416_s24  ;;  %v598_v48 = vmul.bf16 %v581_v43, %v1608_v14 }
  0xac   : > { %v1654_v56 = vpop.permute.xlu1 %432  ;;  %916 = vrot.lane.b32.xlu1 %v642_v52, %s1418_s26  ;;  %v1657_v57 = vpop.permute.xlu0 %430  ;;  %v583_v52 = vsel %vm580_vm3, %v1626_v28, %v1624_v27  ;;  %v654_v27 = vrot.slane %v1648_v49, 6 }
  0xad   : > { %v447_v25 = vsel %vm446_vm4, %v1657_v57, %v1654_v56  ;;  %v600_v59 = vmul.bf16 %v583_v52, %v1613_v16  ;;  %v463_v29 = vmul.bf16 %v1657_v57, %v1600_v4 }
  0xaf   : > { %882 = vrot.lane.b32.xlu0 %v869_v58, %s1416_s24  ;;  %v831_v58 = vrot.slane %v598_v48, 4  ;;  %v695_v48 = vrot.slane %v463_v29, 4 }
  0xb0   : > { %v1666_v2 = vpop.permute.xlu1 %436  ;;  %796 = vrot.lane.b32.xlu1 %v786_v60, %s1417_s25  ;;  %v1669_v3 = vpop.permute.xlu0 %434  ;;  %v464_v60 = vmul.bf16 %v447_v25, %v1608_v14 }
  0xb1   : > { %v449_v28 = vsel %vm446_vm4, %v1669_v3, %v1666_v2  ;;  %v448_v52 = vsel %vm446_vm4, %v1654_v56, %v1669_v3  ;;  %v650_v56 = vrot.slane %v1600_v4, 6 }
  0xb2   : > { %v696_v6 = vrot.slane %v464_v60, 4  ;;  %v466_v8 = vmul.bf16 %v449_v28, %v1613_v16 }
  0xb3   : > { %914 = vrot.lane.b32.xlu0 %v641_v5, %s1418_s26  ;;  %v833_v5 = vrot.slane %v600_v59, 4 }
  0xb4   : > { %v1680_v15 = vpop.permute.xlu1 %480  ;;  %800 = vrot.lane.b32.xlu1 %v788_v9, %s1417_s25  ;;  %v1683_v20 = vpop.permute.xlu0 %438  ;;  %v698_v31 = vrot.slane %v466_v8, 4 }
  0xb5   : > { %v450_v3 = vsel %vm446_vm4, %v1666_v2, %v1683_v20 }
  0xb7   : > { %918 = vrot.lane.b32.xlu0 %v643_v17, %s1418_s26 }
  0xb8   : > { %v1691_v33 = vpop.permute.xlu1 %484  ;;  %843 = vrot.lane.b32.xlu1 %v832_v32, %s1412_s20  ;;  %v1694_v36 = vpop.permute.xlu0 %482 }
  0xb9   : > { %v497_v2 = vsel %vm496_vm5, %v1680_v15, %v1694_v36 }
  0xbb   : > { %798 = vrot.lane.b32.xlu0 %v787_v37, %s1417_s25  ;;  %v498_v37 = vsel %vm496_vm5, %v1694_v36, %v1691_v33 }
  0xbc   : > { %v1701_v24 = vpop.permute.xlu1 %488  ;;  %847 = vrot.lane.b32.xlu1 %v834_v44, %s1412_s20  ;;  %v1704_v46 = vpop.permute.xlu0 %486 }
  0xbf   : > { %802 = vrot.lane.b32.xlu0 %v789_v47, %s1417_s25  ;;  %v653_v47 = vrot.slane %v1613_v16, 6 }
  0xc0   : > { %v1715_v26 = vpop.permute.xlu1 %387  ;;  %663 = vrot.lane.b32.xlu1 %v652_v53, %s1419_s27  ;;  %v386_v54 = vpop.permute.xlu0 %385  ;;  %v515_v53 = vmul.bf16 %v498_v37, %v1636_v42 }
  0xc1   : > { %v1733_v9 = vsel %vm391_vm0, %v386_v54, %v1715_v26  ;;  %v1762_v44 = vsel %vm391_vm0, %v1603_v7, %v386_v54  ;;  %v500_v7 = vsel %vm496_vm5, %v1704_v46, %v1701_v24 }
  0xc2   : > { %v742_v59 = vrot.slane %v515_v53, 2  ;;  %v517_v60 = vmul.bf16 %v500_v7, %v1648_v49 }
  0xc3   : > { %841 = vrot.lane.b32.xlu0 %v831_v58, %s1412_s20  ;;  %v465_v58 = vmul.bf16 %v448_v52, %v1636_v42  ;;  %v514_v52 = vmul.bf16 %v497_v2, %v1608_v14  ;;  %v513_v2 = vmul.bf16 %v1680_v15, %v1600_v4 }
  0xc4   : > { %v1725_v61 = vpop.permute.xlu1 %532  ;;  %667 = vrot.lane.b32.xlu1 %v654_v27, %s1419_s27  ;;  %v1728_v0 = vpop.permute.xlu0 %389 }
  0xc5   : > { %v740_v15 = vrot.slane %v513_v2, 2 }
  0xc7   : > { %845 = vrot.lane.b32.xlu0 %v833_v5, %s1412_s20  ;;  %v697_v5 = vrot.slane %v465_v58, 4 }
  0xc8   : > { %v1736_v12 = vpop.permute.xlu1 %536  ;;  %706 = vrot.lane.b32.xlu1 %v696_v6, %s1420_s28  ;;  %v1739_v13 = vpop.permute.xlu0 %534  ;;  %v467_v6 = vmul.bf16 %v450_v3, %v1648_v49 }
  0xc9   : > { %v1744_v17 = vsel %vm538_vm2, %v1725_v61, %v1739_v13 }
  0xca   : > { %v561_v32 = vmul.bf16 %v1744_v17, %v1733_v9 }
  0xcb   : > { %661 = vrot.lane.b32.xlu0 %v651_v18, %s1419_s27  ;;  %v744_v18 = vrot.slane %v517_v60, 2 }
  0xcc   : > { %v1755_v40 = vpop.permute.xlu1 %576  ;;  %710 = vrot.lane.b32.xlu1 %v698_v31, %s1420_s28  ;;  %v1758_v43 = vpop.permute.xlu0 %574 }
  0xcd   : > { %v1767_v57 = vsel %vm580_vm3, %v1628_v30, %v1758_v43 }
  0xce   : > { %v602_v25 = vmul.bf16 %v1767_v57, %v1762_v44  ;;  %v791_v57 = vrot.slane %v561_v32, 6  ;;  %v655_v32 = vrot.slane %v1762_v44, 6 }
  0xcf   : > { %665 = vrot.lane.b32.xlu0 %v653_v47, %s1419_s27 }
  0xd0   : > { %v617_v30 = vpop.permute.xlu1 %616  ;;  %704 = vrot.lane.b32.xlu1 %v695_v48, %s1420_s28  ;;  %v1781_v54 = vpop.permute.xlu0 %578  ;;  %v699_v48 = vrot.slane %v467_v6, 4 }
  0xd1   : > { %v627_v31 = vsel %vm622_vm1, %v1641_v45, %v617_v30  ;;  %v499_v45 = vsel %vm496_vm5, %v1691_v33, %v1704_v46 }
  0xd2   : > { %v644_v7 = vmul.bf16 %v627_v31, %v1762_v44  ;;  %v516_v60 = vmul.bf16 %v499_v45, %v1613_v16  ;;  %v587_v45 = vsel %vm580_vm3, %v1755_v40, %v1781_v54 }
  0xd3   : > { %659 = vrot.lane.b32.xlu0 %v650_v56, %s1419_s27  ;;  %v1825_v56 = vsel %vm391_vm0, %v1715_v26, %v1728_v0 }
  0xd4   : > { %v1790_v27 = vpop.permute.xlu1 %620  ;;  %753 = vrot.lane.b32.xlu1 %v742_v59, %s1421_s29  ;;  %v619_v28 = vpop.permute.xlu0 %618  ;;  %v741_v59 = vrot.slane %v514_v52, 2 }
  0xd5   : > { %v628_v8 = vsel %vm622_vm1, %v617_v30, %v619_v28  ;;  %v629_v33 = vsel %vm622_vm1, %v619_v28, %v1790_v27 }
  0xd6   : > { %v645_v29 = vmul.bf16 %v628_v8, %v1733_v9  ;;  %v646_v28 = vmul.bf16 %v629_v33, %v1825_v56  ;;  %v545_v8 = vsel %vm538_vm2, %v1739_v13, %v1736_v12  ;;  %v604_v33 = vmul.bf16 %v587_v45, %v1825_v56 }
  0xd7   : > { %708 = vrot.lane.b32.xlu0 %v697_v5, %s1420_s28  ;;  %v562_v13 = vmul.bf16 %v545_v8, %v1825_v56 }
  0xd8   : > { %v443_v37 = vpop.permute.xlu1 %442  ;;  %757 = vrot.lane.b32.xlu1 %v744_v18, %s1421_s29  ;;  %v441_v47 = vpop.permute.xlu0 %440  ;;  %v743_v18 = vrot.slane %v516_v60, 2 }
  0xd9   : > { %v1806_v53 = vsel %vm446_vm4, %v1683_v20, %v441_v47  ;;  %v1809_v36 = vsel %vm446_vm4, %v441_v47, %v443_v37  ;;  %v543_v20 = vsel %vm538_vm2, %v1617_v21, %v1725_v61  ;;  %v792_v52 = vrot.slane %v562_v13, 6 }
  0xda   : > { %v468_v30 = vmul.bf16 %v1806_v53, %v1762_v44  ;;  %v469_v58 = vmul.bf16 %v1809_v36, %v1733_v9  ;;  %v560_v61 = vmul.bf16 %v543_v20, %v1762_v44  ;;  %v835_v20 = vrot.slane %v602_v25, 4 }
  0xdb   : > { %712 = vrot.lane.b32.xlu0 %v699_v48, %s1420_s28  ;;  %v586_v25 = vsel %vm580_vm3, %v1758_v43, %v1755_v40  ;;  %v657_v43 = vrot.slane %v1825_v56, 6  ;;  %v656_v13 = vrot.slane %v1733_v9, 6 }
  0xdc   : > { %v491_v46 = vpop.permute.xlu1 %490  ;;  %920 = vrot.lane.b32.xlu1 %v644_v7, %s1418_s26  ;;  %v1831_v3 = vpop.permute.xlu0 %444  ;;  %v790_v47 = vrot.slane %v560_v61, 6  ;;  %v1874_v7 = vsel %vm391_vm0, %v1728_v0, 0  ;;  %v603_v60 = vmul.bf16 %v586_v25, %v1733_v9 }
  0xdd   : > { %v1836_v21 = vsel %vm496_vm5, %v1701_v24, %v491_v46  ;;  %v1840_v26 = vsel %vm446_vm4, %v443_v37, %v1831_v3  ;;  %v1422_v37 = vmov 0   ;;  %v563_v0 = vmul.bf16 %v1736_v12, %v1874_v7 }
  0xde   : > { %v518_v5 = vmul.bf16 %v1836_v21, %v1762_v44  ;;  %v470_v6 = vmul.bf16 %v1840_v26, %v1825_v56  ;;  %1133 = vmatprep.mubr.bf16.mxu0 %v1422_v37  ;;  %1174 = vmatprep.mubr.bf16.mxu1 %v1422_v37  ;;  %v872_v26 = vrot.slane %v1825_v56, 2  ;;  %v836_v12 = vrot.slane %v603_v60, 4 }
  0xdf   : > { %751 = vrot.lane.b32.xlu0 %v741_v59, %s1421_s29  ;;  %1395 = vset.pattern.permute.xlu1 %v1422_v37  ;;  %v837_v59 = vrot.slane %v604_v33, 4  ;;  %v605_v17 = vmul.bf16 %v1781_v54, %v1874_v7  ;;  %v700_v54 = vrot.slane %v468_v30, 4  ;;  %v873_v2 = vrot.slane %v1874_v7, 2 }
  0xe0   : > { %924 = vrot.lane.b32.xlu1 %v646_v28, %s1418_s26  ;;  %v493_v24 = vpop.permute.xlu0 %492  ;;  %1396 = vset.pattern.permute.xlu0 %v1422_v37  ;;  %v495_v61 = vpop.permute.xlu1 %494  ;;  %v871_v28 = vrot.slane %v1733_v9, 2  ;;  %v745_v53 = vrot.slane %v518_v5, 2  ;;  %v701_v21 = vrot.slane %v469_v58, 4  ;;  %v471_v5 = vmul.bf16 %v1831_v3, %v1874_v7 }
  0xe1   : > { %v1856_v31 = vsel %vm496_vm5, %v491_v46, %v493_v24  ;;  %v647_v46 = vmul.bf16 %v1790_v27, %v1874_v7  ;;  %v793_v27 = vrot.slane %v563_v0, 6  ;;  %v838_v40 = vrot.slane %v605_v17, 4 }
  0xe2   : > { %v519_v48 = vmul.bf16 %v1856_v31, %v1733_v9  ;;  %v703_v45 = vrot.slane %v471_v5, 4 }
  0xe3   : > { %755 = vrot.lane.b32.xlu0 %v743_v18, %s1421_s29  ;;  %v702_v18 = vrot.slane %v470_v6, 4  ;;  %v658_v6 = vrot.slane %v1874_v7, 6 }
  0xe4   : > { %804 = vrot.lane.b32.xlu1 %v790_v47, %s1417_s25  ;;  %v503_v47 = vsel %vm496_vm5, %v493_v24, %v495_v61  ;;  %v746_v36 = vrot.slane %v519_v48, 2 }
  0xe5   : > { %v520_v30 = vmul.bf16 %v503_v47, %v1825_v56 }
  0xe7   : > { %749 = vrot.lane.b32.xlu0 %v740_v15, %s1421_s29  ;;  %v747_v24 = vrot.slane %v520_v30, 2 }
  0xe8   : > { %808 = vrot.lane.b32.xlu1 %v792_v52, %s1417_s25 }
  0xeb   : > { %922 = vrot.lane.b32.xlu0 %v645_v29, %s1418_s26  ;;  %v870_v29 = vrot.slane %v1762_v44, 2 }
  0xec   : > { %849 = vrot.lane.b32.xlu1 %v835_v20, %s1412_s20 }
  0xef   : > { %926 = vrot.lane.b32.xlu0 %v647_v46, %s1418_s26  ;;  %v346_v46 = vld [vmem:[%s2150_s2] sm:$0xff] }
  0xf0   : > { %853 = vrot.lane.b32.xlu1 %v837_v59, %s1412_s20  ;;  %v521_v59 = vmul.bf16 %v495_v61, %v1874_v7 }
  0xf2   : > { %v748_v0 = vrot.slane %v521_v59, 2 }
  0xf3   : > { %806 = vrot.lane.b32.xlu0 %v791_v57, %s1417_s25 }
  0xf4   : > { %884 = vrot.lane.b32.xlu1 %v870_v29, %s1416_s24 }
  0xf7   : > { %810 = vrot.lane.b32.xlu0 %v793_v27, %s1417_s25 }
  0xf8   : > { %888 = vrot.lane.b32.xlu1 %v872_v26, %s1416_s24 }
  0xfa   : > { %v1914_v8 = vpop.permute.xlu1 %874 }
  0xfb   : > { %851 = vrot.lane.b32.xlu0 %v836_v12, %s1412_s20 }
  0xfc   : > { %669 = vrot.lane.b32.xlu1 %v655_v32, %s1419_s27 }
  0xff   : > { %855 = vrot.lane.b32.xlu0 %v838_v40, %s1412_s20  ;;  %v795_v15 = vpop.permute.xlu1 %794 }
 0x100   : > { %673 = vrot.lane.b32.xlu1 %v657_v43, %s1419_s27 }
 0x103   : > { %886 = vrot.lane.b32.xlu0 %v871_v28, %s1416_s24  ;;  %v877_v52 = vpop.permute.xlu1 %876 }
 0x104   : > { %714 = vrot.lane.b32.xlu1 %v700_v54, %s1420_s28 }
 0x107   : > { %890 = vrot.lane.b32.xlu0 %v873_v2, %s1416_s24  ;;  %v1937_v33 = vpop.permute.xlu1 %880 }
 0x108   : > { %718 = vrot.lane.b32.xlu1 %v702_v18, %s1420_s28 }
 0x10b   : > { %671 = vrot.lane.b32.xlu0 %v656_v13, %s1419_s27  ;;  %v893_v13 = vsel %vm892_vm9, %v1914_v8, %v877_v52 }
 0x10c   : > { %759 = vrot.lane.b32.xlu1 %v745_v53, %s1421_s29 }
 0x10f   : > { %675 = vrot.lane.b32.xlu0 %v658_v6, %s1419_s27 }
 0x110   : > { %763 = vrot.lane.b32.xlu1 %v747_v24, %s1421_s29 }
 0x113   : > { %716 = vrot.lane.b32.xlu0 %v701_v21, %s1420_s28 }
 0x114   : > { %1070 = vperm.xlu1 %1395, %v346_v46  }
 0x115   : > { %v911_v20 = vpop.permute.xlu0 %910 }
 0x117   : > { %720 = vrot.lane.b32.xlu0 %v703_v45, %s1420_s28 }
 0x119   : > { %v840_v58 = vpop.permute.xlu0 %839 }
 0x11a   : > { %v913_v3 = vpop.permute.xlu1 %912 }
 0x11b   : > { %761 = vrot.lane.b32.xlu0 %v746_v36, %s1421_s29  ;;  %v929_v7 = vsel %vm928_vm6, %v911_v20, %v913_v3 }
 0x11c   : > { %v1078_v26 = vsel %vm937_vm7, %v929_v7, 0 }
 0x11d   : > { %v879_v57 = vpop.permute.xlu0 %878 }
 0x11e   : > { %v917_v25 = vpop.permute.xlu1 %916  ;;  %v894_v53 = vsel %vm892_vm9, %v877_v52, %v879_v57 }
 0x11f   : > { %765 = vrot.lane.b32.xlu0 %v748_v0, %s1421_s29 }
 0x121   : > { %v1949_v29 = vpop.permute.xlu0 %882 }
 0x122   : > { %v797_v27 = vpop.permute.xlu1 %796 }
 0x123   : > { %v813_v18 = vsel %vm812_vm8, %v795_v15, %v797_v27 }
 0x124   : > { %v1006_v6 = vsel %vm937_vm7, %v1473_v11, %v813_v18 }
 0x125   : > { %v915_v60 = vpop.permute.xlu0 %914 }
 0x126   : > { %v801_v31 = vpop.permute.xlu1 %800  ;;  %v930_v48 = vsel %vm928_vm6, %v913_v3, %v915_v60  ;;  %v931_v12 = vsel %vm928_vm6, %v915_v60, %v917_v25 }
 0x127   : > { %1361 = vmatprep.subr.msk.bf16.mxu0 %vm937_vm7, %v930_v48  ;;  %v1084_v43 = vsel %vm937_vm7, %v931_v12, 0 }
 0x128   : > { %1112 = vmatpush1.bf16.msra.mxu0 %v1078_v26 }
 0x129   : > { %v1956_v17 = vpop.permute.xlu0 %918 }
 0x12a   : > { %v844_v32 = vpop.permute.xlu1 %843  ;;  %v932_v40 = vsel %vm928_vm6, %v917_v25, %v1956_v17  ;;  %v895_v25 = vsel %vm892_vm9, %v879_v57, %v1937_v33 }
 0x12b   : > { %1363 = vmatprep.subr.msk.bf16.mxu1 %vm937_vm7, %v932_v40 }
 0x12c   : > { %1153 = vmatpush1.bf16.msra.mxu1 %v1084_v43 }
 0x12d   : > { %v799_v61 = vpop.permute.xlu0 %798 }
 0x12e   : > { %v1962_v28 = vpop.permute.xlu1 %847  ;;  %v814_v47 = vsel %vm812_vm8, %v797_v27, %v799_v61  ;;  %v815_v45 = vsel %vm812_vm8, %v799_v61, %v801_v31  ;;  %v896_v27 = vsel %vm892_vm9, %v1937_v33, %v1949_v29 }
 0x12f   : > { %v1009_v24 = vsel %vm937_vm7, %v1489_v23, %v814_v47  ;;  %v1012_v59 = vsel %vm937_vm7, %v1471_v10, %v815_v45  ;;  %v415_v47 = vmul.bf16 %v1608_v14, %v1505_v34  ;;  %v417_v34 = vmul.bf16 %v1613_v16, %v1515_v38 }
 0x131   : > { %v1964_v54 = vpop.permute.xlu0 %802 }
 0x132   : > { %v664_v2 = vpop.permute.xlu1 %663  ;;  %v816_v8 = vsel %vm812_vm8, %v801_v31, %v1964_v54 }
 0x133   : > { %v1015_v36 = vsel %vm937_vm7, %v1487_v22, %v816_v8 }
 0x135   : > { %v842_v30 = vpop.permute.xlu0 %841 }
 0x136   : > { %v857_v21 = vsel %vm580_vm3, %v840_v58, %v842_v30  ;;  %v858_v15 = vsel %vm580_vm3, %v842_v30, %v844_v32  ;;  %v1977_v5 = vpop.permute.xlu1 %667  ;;  %v416_v30 = vmul.bf16 %v1636_v42, %v1517_v39 }
 0x137   : > { %v1031_v52 = vsel %vm962_vm10, %v1009_v24, %v858_v15  ;;  %v1029_v20 = vsel %vm962_vm10, %v1006_v6, %v857_v21 }
 0x138   : > { %v1048_v11 = vsel %vm979_vm11, %v1031_v52, %v894_v53  ;;  %v1045_v46 = vsel %vm979_vm11, %v1029_v20, %v893_v13 }
 0x139   : > { %1113 = vmatprep.subr.bf16.mxu0 %v1048_v11  ;;  %v846_v23 = vpop.permute.xlu0 %845  ;;  %v414_v11 = vmul.bf16 %v1600_v4, %v1507_v35 }
 0x13a   : > { %v859_v58 = vsel %vm580_vm3, %v844_v32, %v846_v23  ;;  %v860_v3 = vsel %vm580_vm3, %v846_v23, %v1962_v28  ;;  %v707_v0 = vpop.permute.xlu1 %706  ;;  %1114 = vmatpush1.bf16.msra.mxu0 %v1045_v46 }
 0x13b   : > { %v1035_v7 = vsel %vm962_vm10, %v1015_v36, %v860_v3  ;;  %v1033_v10 = vsel %vm962_vm10, %v1012_v59, %v859_v58 }
 0x13c   : > { %v1054_v22 = vsel %vm979_vm11, %v1035_v7, %v896_v27  ;;  %v1051_v60 = vsel %vm979_vm11, %v1033_v10, %v895_v25 }
 0x13d   : > { %1154 = vmatprep.subr.bf16.mxu1 %v1054_v22  ;;  %v662_v31 = vpop.permute.xlu0 %661 }
 0x13e   : > { %v711_v48 = vpop.permute.xlu1 %710  ;;  %1155 = vmatpush1.bf16.msra.mxu1 %v1051_v60  ;;  %v679_v61 = vsel %vm677_vm12, %v662_v31, %v664_v2  ;;  %v2044_v60 = vld [vmem:[%s2149_s1] sm:$0xf] }
 0x13f   : > { %v943_v53 = vsel %vm937_vm7, %v415_v47, %v679_v61 }
 0x141   : > { %v666_v26 = vpop.permute.xlu0 %665 }
 0x142   : > { %v705_v12 = vpop.permute.xlu1 %704  ;;  %v680_v24 = vsel %vm677_vm12, %v664_v2, %v666_v26  ;;  %v681_v21 = vsel %vm677_vm12, %v666_v26, %v1977_v5 }
 0x143   : > { %v946_v2 = vsel %vm937_vm7, %v416_v30, %v680_v24  ;;  %v949_v20 = vsel %vm937_vm7, %v417_v34, %v681_v21  ;;  %v723_v35 = vsel %vm722_vm13, %v705_v12, %v707_v0 }
 0x145   : > { %v660_v32 = vpop.permute.xlu0 %659 }
 0x146   : > { %v754_v57 = vpop.permute.xlu1 %753  ;;  %v678_v42 = vsel %vm677_vm12, %v660_v32, %v662_v31 }
 0x147   : > { %v940_v58 = vsel %vm937_vm7, %v414_v11, %v678_v42 }
 0x148   : > { %v964_v10 = vsel %vm962_vm10, %v940_v58, %v723_v35 }
 0x149   : > { %v709_v40 = vpop.permute.xlu0 %708 }
 0x14a   : > { %v2002_v43 = vpop.permute.xlu1 %757  ;;  %v724_v13 = vsel %vm722_vm13, %v707_v0, %v709_v40  ;;  %v725_v14 = vsel %vm722_vm13, %v709_v40, %v711_v48 }
 0x14b   : > { %v966_v8 = vsel %vm962_vm10, %v943_v53, %v724_v13  ;;  %v968_v36 = vsel %vm962_vm10, %v946_v2, %v725_v14 }
 0x14d   : > { %v2004_v33 = vpop.permute.xlu0 %712 }
 0x14e   : > { %v921_v18 = vpop.permute.xlu1 %920  ;;  %v726_v52 = vsel %vm722_vm13, %v711_v48, %v2004_v33 }
 0x14f   : > { %v970_v59 = vsel %vm962_vm10, %v949_v20, %v726_v52  ;;  %v933_v31 = vsel %vm928_vm6, %v1956_v17, %v921_v18 }
 0x150   : > { %v1090_v12 = vsel %vm937_vm7, %v933_v31, 0 }
 0x151   : > { %v752_v6 = vpop.permute.xlu0 %751 }
 0x152   : > { %v769_v15 = vsel %vm767_vm14, %v752_v6, %v754_v57  ;;  %v925_v45 = vpop.permute.xlu1 %924 }
 0x153   : > { %v984_v39 = vsel %vm979_vm11, %v966_v8, %v769_v15 }
 0x154   : > { %1115 = vmatprep.subr.bf16.mxu0 %v984_v39 }
 0x155   : > { %v756_v46 = vpop.permute.xlu0 %755 }
 0x156   : > { %v770_v38 = vsel %vm767_vm14, %v754_v57, %v756_v46  ;;  %v771_v16 = vsel %vm767_vm14, %v756_v46, %v2002_v43  ;;  %v805_v23 = vpop.permute.xlu1 %804 }
 0x157   : > { %v990_v3 = vsel %vm979_vm11, %v970_v59, %v771_v16  ;;  %v987_v25 = vsel %vm979_vm11, %v968_v36, %v770_v38 }
 0x158   : > { %1156 = vmatprep.subr.bf16.mxu1 %v990_v3 }
 0x159   : > { %1157 = vmatpush1.bf16.msra.mxu1 %v987_v25  ;;  %v750_v4 = vpop.permute.xlu0 %749 }
 0x15a   : > { %v768_v27 = vsel %vm767_vm14, %v750_v4, %v752_v6  ;;  %v809_v7 = vpop.permute.xlu1 %808  ;;  %v418_v6 = vmul.bf16 %v1648_v49, %v1524_v41 }
 0x15b   : > { %v981_v22 = vsel %vm979_vm11, %v964_v10, %v768_v27 }
 0x15c   : > { %1116 = vmatpush1.bf16.msra.mxu0 %v981_v22  ;;  %1364 = vmatmul.mubr.msk.bf16.vlgmr.msra.gmra.mxu1 %vm1073_vm15, %v2044_v60 }
 0x15d   : > { %v923_v0 = vpop.permute.xlu0 %922  ;;  %1256 = vmatprep.mubr.bf16.mxu1 %v1422_v37 }
 0x15e   : > { %v934_v48 = vsel %vm928_vm6, %v921_v18, %v923_v0  ;;  %v850_v26 = vpop.permute.xlu1 %849  ;;  %v935_v32 = vsel %vm928_vm6, %v923_v0, %v925_v45 }
 0x15f   : > { %1365 = vmatprep.subr.msk.bf16.mxu0 %vm937_vm7, %v934_v48  ;;  %1362 = vmatmul.mubr.msk.bf16.vlgmr.msra.gmra.mxu0 %vm1073_vm15, %v2044_v60  ;;  %v1096_v61 = vsel %vm937_vm7, %v935_v32, 0  ;;  %v861_v14 = vsel %vm580_vm3, %v1962_v28, %v850_v26  ;;  %v419_v48 = vmul.bf16 %v1762_v44, %v1576_v63 }
 0x160   : > { %1194 = vmatpush1.bf16.msra.mxu0 %v1090_v12  ;;  %1215 = vmatprep.mubr.bf16.mxu0 %v1422_v37 }
 0x161   : > { %v927_v17 = vpop.permute.xlu0 %926 }
 0x162   : > { %v936_v57 = vsel %vm928_vm6, %v925_v45, %v927_v17  ;;  %v854_v40 = vpop.permute.xlu1 %853  ;;  %v817_v45 = vsel %vm812_vm8, %v1964_v54, %v805_v23 }
 0x163   : > { %1367 = vmatprep.subr.msk.bf16.mxu1 %vm937_vm7, %v936_v57  ;;  %v1018_v41 = vsel %vm937_vm7, %v1482_v19, %v817_v45 }
 0x164   : > { %1235 = vmatpush1.bf16.msra.mxu1 %v1096_v61  ;;  %v1037_v54 = vsel %vm962_vm10, %v1018_v41, %v861_v14 }
 0x165   : > { %v807_v18 = vpop.permute.xlu0 %806 }
 0x166   : > { %v885_v47 = vpop.permute.xlu1 %884  ;;  %v818_v8 = vsel %vm812_vm8, %v805_v23, %v807_v18  ;;  %v819_v11 = vsel %vm812_vm8, %v807_v18, %v809_v7 }
 0x167   : > { %v1021_v49 = vsel %vm937_vm7, %v1556_v51, %v818_v8  ;;  %v1024_v58 = vsel %vm937_vm7, %v1554_v50, %v819_v11 }
 0x169   : > { %v811_v13 = vpop.permute.xlu0 %810 }
 0x16a   : > { %v889_v53 = vpop.permute.xlu1 %888  ;;  %v820_v42 = vsel %vm812_vm8, %v809_v7, %v811_v13  ;;  %v421_v13 = vmul.bf16 %v1825_v56, %v1583_v1 }
 0x16b   : > { %v1027_v23 = vsel %vm937_vm7, %v1563_v55, %v820_v42 }
 0x16d   : > { %v852_v30 = vpop.permute.xlu0 %851 }
 0x16e   : > { %v670_v24 = vpop.permute.xlu1 %669  ;;  %v862_v52 = vsel %vm580_vm3, %v850_v26, %v852_v30  ;;  %v420_v26 = vmul.bf16 %v1733_v9, %v1574_v62 }
 0x16f   : > { %v682_v37 = vsel %vm677_vm12, %v1977_v5, %v670_v24  ;;  %v897_v5 = vsel %vm892_vm9, %v1949_v29, %v885_v47  ;;  %v1039_v28 = vsel %vm962_vm10, %v1021_v49, %v862_v52  ;;  %v863_v29 = vsel %vm580_vm3, %v852_v30, %v854_v40 }
 0x170   : > { %v952_v21 = vsel %vm937_vm7, %v418_v6, %v682_v37  ;;  %v1057_v16 = vsel %vm979_vm11, %v1037_v54, %v897_v5  ;;  %v1041_v25 = vsel %vm962_vm10, %v1024_v58, %v863_v29 }
 0x171   : > { %v856_v15 = vpop.permute.xlu0 %855 }
 0x172   : > { %v674_v34 = vpop.permute.xlu1 %673  ;;  %v864_v19 = vsel %vm580_vm3, %v854_v40, %v856_v15 }
 0x173   : > { %v1043_v3 = vsel %vm962_vm10, %v1027_v23, %v864_v19 }
 0x175   : > { %v887_v39 = vpop.permute.xlu0 %886 }
 0x176   : > { %v898_v2 = vsel %vm892_vm9, %v885_v47, %v887_v39  ;;  %v715_v20 = vpop.permute.xlu1 %714  ;;  %v899_v59 = vsel %vm892_vm9, %v887_v39, %v889_v53 }
 0x177   : > { %v727_v51 = vsel %vm722_vm13, %v2004_v33, %v715_v20  ;;  %v1060_v46 = vsel %vm979_vm11, %v1039_v28, %v898_v2  ;;  %v1063_v4 = vsel %vm979_vm11, %v1041_v25, %v899_v59 }
 0x178   : > { %v972_v38 = vsel %vm962_vm10, %v952_v21, %v727_v51  ;;  %1195 = vmatprep.subr.bf16.mxu0 %v1060_v46 }
 0x179   : > { %1196 = vmatpush1.bf16.msra.mxu0 %v1057_v16  ;;  %v891_v36 = vpop.permute.xlu0 %890 }
 0x17a   : > { %v900_v33 = vsel %vm892_vm9, %v889_v53, %v891_v36  ;;  %v719_v27 = vpop.permute.xlu1 %718 }
 0x17b   : > { %v1066_v35 = vsel %vm979_vm11, %v1043_v3, %v900_v33 }
 0x17c   : > { %1236 = vmatprep.subr.bf16.mxu1 %v1066_v35 }
 0x17d   : > { %1237 = vmatpush1.bf16.msra.mxu1 %v1063_v4  ;;  %v672_v55 = vpop.permute.xlu0 %671 }
 0x17e   : > { %v760_v22 = vpop.permute.xlu1 %759  ;;  %v683_v50 = vsel %vm677_vm12, %v670_v24, %v672_v55  ;;  %v684_v0 = vsel %vm677_vm12, %v672_v55, %v674_v34 }
 0x17f   : > { %v955_v17 = vsel %vm937_vm7, %v419_v48, %v683_v50  ;;  %v958_v57 = vsel %vm937_vm7, %v420_v26, %v684_v0  ;;  %v772_v40 = vsel %vm767_vm14, %v2002_v43, %v760_v22 }
 0x180   : > { %v993_v6 = vsel %vm979_vm11, %v972_v38, %v772_v40 }
 0x181   : > { %v676_v7 = vpop.permute.xlu0 %675 }
 0x182   : > { %v685_v61 = vsel %vm677_vm12, %v674_v34, %v676_v7  ;;  %v764_v18 = vpop.permute.xlu1 %763 }
 0x183   : > { %v961_v24 = vsel %vm937_vm7, %v421_v13, %v685_v61 }
 0x185   : > { %v717_v10 = vpop.permute.xlu0 %716 }
 0x186   : > { %v728_v12 = vsel %vm722_vm13, %v715_v20, %v717_v10  ;;  %v729_v32 = vsel %vm722_vm13, %v717_v10, %v719_v27 }
 0x187   : > { %v976_v63 = vsel %vm962_vm10, %v958_v57, %v729_v32  ;;  %v974_v9 = vsel %vm962_vm10, %v955_v17, %v728_v12 }
 0x189   : > { %v721_v31 = vpop.permute.xlu0 %720 }
 0x18a   : > { %v730_v53 = vsel %vm722_vm13, %v719_v27, %v721_v31 }
 0x18b   : > { %v978_v15 = vsel %vm962_vm10, %v961_v24, %v730_v53 }
 0x18d   : > { %v762_v47 = vpop.permute.xlu0 %761 }
 0x18e   : > { %v773_v44 = vsel %vm767_vm14, %v760_v22, %v762_v47  ;;  %v774_v62 = vsel %vm767_vm14, %v762_v47, %v764_v18 }
 0x18f   : > { %v996_v43 = vsel %vm979_vm11, %v974_v9, %v773_v44  ;;  %v999_v30 = vsel %vm979_vm11, %v976_v63, %v774_v62  ;;  %v1071_v56 = vpop.permute.xlu1 %1070 }
 0x190   : > { %1197 = vmatprep.subr.bf16.mxu0 %v996_v43 }
 0x191   : > { %1198 = vmatpush1.bf16.msra.mxu0 %v993_v6  ;;  %v766_v37 = vpop.permute.xlu0 %765 }
 0x192   : > { %v775_v21 = vsel %vm767_vm14, %v764_v18, %v766_v37 }
 0x193   : > { %v1002_v1 = vsel %vm979_vm11, %v978_v15, %v775_v21 }
 0x194   : > { %1366 = vmatmul.mubr.msk.bf16.vlgmr.msra.gmra.mxu0 %vm1073_vm15, %v2044_v60  ;;  %1238 = vmatprep.subr.bf16.mxu1 %v1002_v1 }
 0x195   : > { %1239 = vmatpush1.bf16.msra.mxu1 %v999_v30 }
 0x198   : > { %1368 = vmatmul.mubr.msk.bf16.vlgmr.msra.gmra.mxu1 %vm1073_vm15, %v2044_v60 }
 0x21c   : > { %v1176_v45 = vpop.f32.mrf.mxu1 }
 0x21d   : > { %v1177_v8 = vadd.f32 %v1176_v45, %v1071_v56 }
 0x21e   : > { %v1178_v34 = vpop.f32.mrf.mxu1 }
 0x21f   : > { %v1135_v14 = vpop.f32.mrf.mxu0  ;;  %v1179_v52 = vadd.f32 %v1178_v34, %v1071_v56  ;;  %v1267_v41 = vmax.f32 %v1177_v8, 0.0 }
 0x220   : > { %v1180_v49 = vpop.f32.mrf.mxu1  ;;  %v1136_v5 = vadd.f32 %v1135_v14, %v1071_v56 }
 0x221   : > { %v1137_v60 = vpop.f32.mrf.mxu0  ;;  %v1268_v39 = vmax.f32 %v1179_v52, 0.0  ;;  %1275 = vst [vmem:[%s2135_s10 + $0x10] sm:$0xff] %v1267_v41 }
 0x222   : > { %v1138_v54 = vadd.f32 %v1137_v60, %v1071_v56  ;;  %v1265_v42 = vmax.f32 %v1136_v5, 0.0  ;;  %v1181_v2 = vpop.f32.mrf.mxu1 }
 0x223   : > { %v1139_v20 = vpop.f32.mrf.mxu0  ;;  %1276 = vst [vmem:[%s2135_s10 + $0x18] sm:$0xff] %v1268_v39 }
 0x224   : > { %v1266_v28 = vmax.f32 %v1138_v54, 0.0  ;;  %1273 = vst [vmem:[%s2135_s10] sm:$0xff] %v1265_v42 }
 0x225   : > { %v1140_v11 = vpop.f32.mrf.mxu0 }
 0x226   : > { %1274 = vst [vmem:[%s2135_s10 + $0x8] sm:$0xff] %v1266_v28 }
 0x254   : > { %v1217_v19 = vpop.f32.mrf.mxu0 }
 0x255   : > { %v1218_v51 = vadd.f32 %v1217_v19, %v1071_v56 }
 0x256   : > { %v1219_v46 = vpop.f32.mrf.mxu0 }
 0x257   : > { %v1269_v29 = vmax.f32 %v1218_v51, 0.0  ;;  %v1220_v38 = vadd.f32 %v1219_v46, %v1071_v56 }
 0x258   : > { %v1221_v16 = vpop.f32.mrf.mxu0  ;;  %v1258_v23 = vpop.f32.mrf.mxu1 }
 0x259   : > { %1277 = vst [vmem:[%s2135_s10 + $0x20] sm:$0xff] %v1269_v29  ;;  %v1270_v59 = vmax.f32 %v1220_v38, 0.0  ;;  %v1259_v36 = vadd.f32 %v1258_v23, %v1071_v56 }
 0x25a   : > { %v1222_v58 = vpop.f32.mrf.mxu0  ;;  %v1260_v33 = vpop.f32.mrf.mxu1 }
 0x25b   : > { %1278 = vst [vmem:[%s2135_s10 + $0x28] sm:$0xff] %v1270_v59  ;;  %v1271_v3 = vmax.f32 %v1259_v36, 0.0  ;;  %v1261_v25 = vadd.f32 %v1260_v33, %v1071_v56 }
 0x25c   : > { %v1262_v35 = vpop.f32.mrf.mxu1 }
 0x25d   : > { %1279 = vst [vmem:[%s2135_s10 + $0x30] sm:$0xff] %v1271_v3  ;;  %v1272_v4 = vmax.f32 %v1261_v25, 0.0 }
 0x25e   : > { %v1263_v55 = vpop.f32.mrf.mxu1 }
 0x25f   : > { %1280 = vst [vmem:[%s2135_s10 + $0x38] sm:$0xff] %v1272_v4 }
 0x260 PF: > { %s13_s12 = sadd.s32 1, %s1407_s12  }
 0x261   : > { %p10_p4 = scmp.ge.s32.totalorder %s13_s12, 4  }
 0x263   :  { %12 = sbr.rel (!%p10_p4) target bundleno = 1 (0x1), region = 62 }

// kernel: e2vid_forward.6
= control target key start
LH: loop header
LB: loop body
LE: loop exit
PB: predicated region body
PF: predicated region fallthrough
CT: control target
= control target key end

     0   :  { %s1693_s30 = smov 0   ;;  %s2253_s0 = inlined_call_operand.vmem [shape: f32[2,4,8,256], index: 0, kind: input, shape index: {}]   ;;  %s2254_s1 = inlined_call_operand.vmem [shape: f32[2,16,256], index: 1, kind: input, shape index: {}]   ;;  %s2255_s2 = inlined_call_operand.vmem [shape: bf16[16,72], index: 2, kind: input, shape index: {}]   ;;  %s2256_s3 = inlined_call_operand.vmem [shape: f32[16,1], index: 3, kind: input, shape index: {}]   ;;  %s2257_s4 = inlined_call_operand.vmem [shape: bf16[48,144], index: 4, kind: input, shape index: {}]   ;;  %s2258_s5 = inlined_call_operand.vmem [shape: bf16[32,144], index: 5, kind: input, shape index: {}]   ;;  %s2259_s6 = inlined_call_operand.vmem [shape: f32[32,1], index: 6, kind: input, shape index: {}]   ;;  %s2260_s7 = inlined_call_operand.vmem [shape: bf16[16,144], index: 7, kind: input, shape index: {}]   ;;  %s2261_s8 = inlined_call_operand.vmem [shape: f32[16,1], index: 8, kind: input, shape index: {}]   ;;  %s2262_s9 = inlined_call_operand.vmem [shape: f32[2,16,256], index: 9, kind: output, shape index: {}]  }
   0x1 LB: > { %s1483_s10 = sadd.s32 4294967295, %s1626_s30   ;;  %p1487_p0 = scmp.ge.s32.totalorder %s1626_s30, 1  ;;  %s1626_s30 = sphi %s1693_s30, %s19_s30  }
   0x2   : > { %p297_p1 = scmp.lt.s32.totalorder %s1626_s30, 3 }
   0x4   : > { %p298_p2 = pnand %p1487_p0, %p297_p1 }
   0x5   : > { %p338_p3 = scmp.lt.s32.totalorder (!%p298_p2), %s1483_s10, 1  ;;  %s1629_s15 = smov (!%p298_p2), 17  }
   0x6   : > { %301 = sbr.rel (%p298_p2) target bundleno = 1524 (0x5f4), region = 56  ;;  %s1630_s16 = smov (!%p298_p2), 16  }
   0x7   : > { %s1632_s17 = smov (!%p298_p2), 127   ;;  %s1633_s18 = smov (!%p298_p2), 112  }
   0x8   : > { %s1634_s27 = smov (!%p298_p2), 32   ;;  %s1635_s28 = smov (!%p298_p2), 18  }
   0x9   : > { %s1636_s12 = smov (!%p298_p2), 2   ;;  %s1637_s13 = smov (!%p298_p2), 34  }
   0xa   : > { %s1640_s20 = smov (!%p298_p2), 110   ;;  %s1641_s21 = smov (!%p298_p2), 126  }
   0xb   : > { %v370_v0 = vlaneseq  ;;  %s2266_s10 = smov (!%p338_p3, %s1483_s10), 1  ;;  %v1628_v8 = vmov 0.0   ;;  %v1631_v22 = vmov 0   ;;  %vm522_vm2 = vcmask 1043456   ;;  %v555_v51 = vld [vmem:[%s2256_s3] sm:$0xff]  ;;  %v556_v54 = vld [vmem:[%s2256_s3 + $0x8] sm:$0xff] }
   0xc   : > { %s1529_s11 = sshll.u32 %s2266_s10, 6  ;;  %1555 = vset.pattern.permute.xlu0 %v1631_v22  ;;  %1556 = vset.pattern.permute.xlu1 %v1631_v22  ;;  %vm421_vm3 = vcmask 138240   ;;  %vm459_vm4 = vcmask 130048   ;;  %s2263_s19 = sshll.u32 %s2266_s10, 5  ;;  %vm504_vm7 = vcmask 916480   ;;  %vm480_vm8 = vcmask 1039360  }
   0xd   : > { %v1703_v1 = vand.u32 127, %v370_v0  ;;  %s1713_s14 = scalar_lea.vmem %s2253_s0, %s1529_s11  ;;  %614 = vmatprep.mubr.bf16.mxu0 %v1631_v22  ;;  %s1799_s22 = scalar_lea.vmem %s2254_s1, %s2263_s19  ;;  %vm572_vm9 = vcmask 588800   ;;  %vm690_vm10 = vcmask 261120   ;;  %vm678_vm11 = vcmask 146432  }
   0xe   : > { %v360_v4 = vld [vmem:[%s1713_s14 + $0x30] sm:$0xff]  ;;  %v361_v5 = vld [vmem:[%s1713_s14 + $0x38] sm:$0xff]  ;;  %v358_v18 = vld [vmem:[%s1713_s14 + $0x20] sm:$0xff]  ;;  %vm663_vm12 = vcmask 15360   ;;  %vm783_vm13 = vcmask 777216   ;;  %vm772_vm14 = vcmask 785408  }
   0xf   : > { %v377_v2 = vand.u32 15, %v1703_v1  ;;  %v1708_v3 = vadd.s32 128, %v1703_v1  ;;  %v368_v7 = vpack.c.bf16 %v360_v4, %v360_v4  ;;  %v369_v11 = vpack.c.bf16 %v361_v5, %v361_v5  ;;  %v356_v14 = vld [vmem:[%s1713_s14 + $0x10] sm:$0xff]  ;;  %v357_v15 = vld [vmem:[%s1713_s14 + $0x18] sm:$0xff]  ;;  %v359_v19 = vld [vmem:[%s1713_s14 + $0x28] sm:$0xff]  ;;  %s1642_s23 = smov 94  }
  0x10   : > { %v1733_v16 = vpack.c.bf16 %v356_v14, %v356_v14  ;;  %v1736_v17 = vpack.c.bf16 %v357_v15, %v357_v15  ;;  %v1742_v20 = vpack.c.bf16 %v358_v18, %v358_v18  ;;  %v1746_v21 = vpack.c.bf16 %v359_v19, %v359_v19  ;;  %v1807_v52 = vld [vmem:[%s1799_s22 + $0x8] sm:$0xff]  ;;  %v1810_v53 = vld [vmem:[%s1799_s22 + $0x18] sm:$0xff]  ;;  %v1816_v55 = vld [vmem:[%s1799_s22] sm:$0xff] }
  0x11   : > { %vm397_vm0 = vcmp.ne.s32.totalorder %v377_v2, 0  ;;  %v384_v6 = vand.u32 15, %v1708_v3  ;;  %417 = vrot.lane.b32.xlu0 %v368_v7, %s1629_s15  ;;  %1499 = vmatprep.subr.msk.bf16.mxu0 %vm522_vm2, %v369_v11  ;;  %v577_v23 = vsel %vm522_vm2, %v368_v7, 0  ;;  %v1819_v56 = vld [vmem:[%s1799_s22 + $0x10] sm:$0xff]  ;;  %v1823_v57 = vpack.c.bf16 %v1810_v53, %v1807_v52  ;;  %v355_v1 = vld [vmem:[%s1713_s14 + $0x8] sm:$0xff] }
  0x12   : > { %v1494_v9 = vsel %vm397_vm0, 1.0, %v1628_v8  ;;  %589 = vmatpush1.bf16.msra.mxu0 %v577_v23  ;;  %v1827_v58 = vpack.c.bf16 %v1819_v56, %v1816_v55  ;;  %vm405_vm6 = vcmp.ne.s32.totalorder %v377_v2, 15  ;;  %v508_v3 = vrot.slane %v1736_v17, 4 }
  0x13   : > { %v1721_v10 = vpack.c.bf16 %v1494_v9, %v1494_v9  ;;  %vm398_vm1 = vcmp.ne.s32.totalorder %v384_v6, 0  ;;  %vm406_vm5 = vcmp.ne.s32.totalorder %v384_v6, 15  ;;  %v1496_v60 = vsel %vm405_vm6, 1.0, %v1628_v8 }
  0x14   : > { %v1495_v12 = vsel %vm398_vm1, 1.0, %v1628_v8  ;;  %v1497_v59 = vsel %vm406_vm5, 1.0, %v1628_v8  ;;  %v1843_v62 = vpack.c.bf16 %v1496_v60, %v1496_v60  ;;  %v521_v5 = vrot.slane %v1746_v21, 4  ;;  %v354_v8 = vld [vmem:[%s1713_s14] sm:$0xff]  ;;  %s1638_s14 = smov 95  }
  0x15   : > { %455 = vrot.lane.b32.xlu1 %v1721_v10, %s1630_s16  ;;  %v1728_v13 = vpack.c.bf16 %v1495_v12, %v1495_v12  ;;  %419 = vrot.lane.b32.xlu0 %v369_v11, %s1629_s15  ;;  %v1840_v61 = vpack.c.bf16 %v1497_v59, %v1497_v59  ;;  %v520_v6 = vrot.slane %v1742_v20, 4  ;;  %v363_v7 = vpack.c.bf16 %v355_v1, %v355_v1 }
  0x16   : > { %v507_v11 = vrot.slane %v1733_v16, 4  ;;  %v362_v18 = vpack.c.bf16 %v354_v8, %v354_v8  ;;  %vm758_vm15 = vcmask 900096   ;;  %vm702_vm0 = vcmask 277504  }
  0x17   : > { %vm731_vm1 = vcmask 1031168  }
  0x18   : > { %v541_v23 = vsel %vm522_vm2, %v362_v18, %v507_v11 }
  0x19   : > { %457 = vrot.lane.b32.xlu1 %v1728_v13, %s1630_s16  ;;  %443 = vrot.lane.b32.xlu0 %v1733_v16, %s1629_s15  ;;  %s1639_s16 = smov 96  }
  0x1d   : > { %445 = vrot.lane.b32.xlu1 %v1736_v17, %s1629_s15  ;;  %434 = vrot.lane.b32.xlu0 %v1742_v20, %s1629_s15 }
  0x21   : > { %436 = vrot.lane.b32.xlu1 %v1746_v21, %s1629_s15  ;;  %v545_v21 = vsel %vm522_vm2, %v363_v7, %v508_v3 }
  0x83   : > { %v418_v24 = vpop.permute.xlu0 %417 }
  0x84   : > { %v1757_v26 = vsel %vm421_vm3, 0, %v418_v24 }
  0x87   : > { %v1754_v25 = vpop.permute.xlu1 %455  ;;  %v420_v27 = vpop.permute.xlu0 %419 }
  0x88   : > { %488 = vrot.lane.b32.xlu0 %v420_v27, %s1632_s17  ;;  %v1763_v29 = vsel %vm421_vm3, %v418_v24, %v420_v27  ;;  %v467_v30 = vmul.bf16 %v1754_v25, %v1757_v26 }
  0x89   : > { %486 = vrot.lane.b32.xlu1 %v1763_v29, %s1632_s17 }
  0x8b   : > { %v1759_v28 = vpop.permute.xlu1 %457  ;;  %v444_v31 = vpop.permute.xlu0 %443 }
  0x8c   : > { %v469_v32 = vmul.bf16 %v1759_v28, %v420_v27  ;;  %v1773_v33 = vsel %vm459_vm4, %v1754_v25, %v1759_v28  ;;  %v451_v34 = vsel %vm421_vm3, 0, %v444_v31  ;;  %512 = vrot.lane.b32.xlu0 %v467_v30, %s1633_s18 }
  0x8d   : > { %v468_v37 = vmul.bf16 %v1773_v33, %v1763_v29  ;;  %v464_v38 = vmul.bf16 %v1754_v25, %v451_v34 }
  0x8e   : > { %516 = vrot.lane.b32.xlu1 %v469_v32, %s1633_s18 }
  0x8f   : > { %v446_v35 = vpop.permute.xlu1 %445  ;;  %v435_v40 = vpop.permute.xlu0 %434  ;;  %v495_v43 = vrot.slane %v464_v38, 4  ;;  %v430_v38 = vmul.bf16 %v1757_v26, %v1721_v10 }
  0x90   : > { %v447_v36 = vsel %vm421_vm3, %v444_v31, %v446_v35  ;;  %514 = vrot.lane.b32.xlu0 %v468_v37, %s1633_s18  ;;  %v466_v42 = vmul.bf16 %v1759_v28, %v446_v35  ;;  %v440_v48 = vsel %vm421_vm3, 0, %v435_v40 }
  0x91   : > { %v465_v39 = vmul.bf16 %v1773_v33, %v447_v36  ;;  %v471_v50 = vrot.slane %v440_v48, 4  ;;  %v431_v36 = vmul.bf16 %v1763_v29, %v1728_v13 }
  0x92   : > { %484 = vrot.lane.b32.xlu1 %v1757_v26, %s1632_s17  ;;  %v497_v47 = vrot.slane %v466_v42, 4 }
  0x93   : > { %v437_v41 = vpop.permute.xlu1 %436  ;;  %v496_v45 = vrot.slane %v465_v39, 4 }
  0x94   : > { %v438_v44 = vsel %vm421_vm3, %v435_v40, %v437_v41  ;;  %498 = vrot.lane.b32.xlu0 %v495_v43, %s1633_s18  ;;  %v473_v49 = vrot.slane %v437_v41, 4 }
  0x95   : > { %v472_v46 = vrot.slane %v438_v44, 4  ;;  %v1557_v44 = vld [vmem:[%s2255_s2] sm:$0xff]  }
  0x96   : > { %500 = vrot.lane.b32.xlu1 %v496_v45, %s1633_s18 }
  0x98   : > { %502 = vrot.lane.b32.xlu0 %v497_v47, %s1633_s18 }
  0x9a   : > { %476 = vrot.lane.b32.xlu1 %v472_v46, %s1632_s17 }
  0x9c   : > { %478 = vrot.lane.b32.xlu0 %v473_v49, %s1632_s17 }
  0x9e   : > { %474 = vrot.lane.b32.xlu1 %v471_v50, %s1632_s17 }
  0xa0   : > { %559 = vperm.xlu0 %1555, %v555_v51  }
  0xa2   : > { %564 = vperm.xlu1 %1556, %v556_v54  }
  0xa4   : > { %912 = vrot.lane.b32.xlu0 %v1823_v57, %s1629_s15 }
  0xa6   : > { %910 = vrot.lane.b32.xlu1 %v1827_v58, %s1629_s15 }
  0xa8   : > { %688 = vrot.lane.b32.xlu0 %v1728_v13, %s1634_s27 }
  0xaa   : > { %686 = vrot.lane.b32.xlu1 %v1721_v10, %s1634_s27 }
  0xac   : > { %676 = vrot.lane.b32.xlu0 %v1840_v61, %s1635_s28 }
  0xae   : > { %674 = vrot.lane.b32.xlu1 %v1843_v62, %s1635_s28 }
  0xfa   : > { %v489_v63 = vpop.permute.xlu0 %488 }
  0xfb   : > { %v487_v0 = vpop.permute.xlu1 %486 }
  0xfc   : > { %v491_v27 = vsel %vm480_vm8, %v487_v0, %v489_v63 }
  0xfe   : > { %v513_v2 = vpop.permute.xlu0 %512 }
 0x100   : > { %v517_v4 = vpop.permute.xlu1 %516 }
 0x102   : > { %v515_v9 = vpop.permute.xlu0 %514 }
 0x103   : > { %v518_v12 = vsel %vm504_vm7, %v513_v2, %v515_v9  ;;  %v519_v14 = vsel %vm504_vm7, %v515_v9, %v517_v4 }
 0x104   : > { %v485_v15 = vpop.permute.xlu1 %484  ;;  %v553_v19 = vsel %vm522_vm2, %v519_v14, %v521_v5  ;;  %v549_v17 = vsel %vm522_vm2, %v518_v12, %v520_v6 }
 0x105   : > { %590 = vmatprep.subr.bf16.mxu0 %v553_v19  ;;  %v490_v32 = vsel %vm480_vm8, %v485_v15, %v487_v0 }
 0x106   : > { %591 = vmatpush1.bf16.msra.mxu0 %v549_v17  ;;  %v499_v20 = vpop.permute.xlu0 %498 }
 0x107   : > { %592 = vmatprep.subr.bf16.mxu0 %v545_v21 }
 0x108   : > { %v501_v22 = vpop.permute.xlu1 %500 }
 0x109   : > { %v505_v16 = vsel %vm504_vm7, %v499_v20, %v501_v22 }
 0x10a   : > { %v503_v24 = vpop.permute.xlu0 %502  ;;  %593 = vmatpush1.bf16.msra.mxu0 %v541_v23  ;;  %v533_v35 = vsel %vm522_vm2, %v490_v32, %v505_v16 }
 0x10b   : > { %v506_v30 = vsel %vm504_vm7, %v501_v22, %v503_v24 }
 0x10c   : > { %v477_v31 = vpop.permute.xlu1 %476  ;;  %v537_v34 = vsel %vm522_vm2, %v491_v27, %v506_v30 }
 0x10d   : > { %594 = vmatprep.subr.bf16.mxu0 %v537_v34 }
 0x10e   : > { %v479_v37 = vpop.permute.xlu0 %478  ;;  %595 = vmatpush1.bf16.msra.mxu0 %v533_v35 }
 0x10f   : > { %v482_v39 = vsel %vm480_vm8, %v477_v31, %v479_v37 }
 0x110   : > { %v475_v40 = vpop.permute.xlu1 %474  ;;  %v529_v42 = vsel %vm522_vm2, %v431_v36, %v482_v39 }
 0x111   : > { %v481_v41 = vsel %vm480_vm8, %v475_v40, %v477_v31  ;;  %596 = vmatprep.subr.bf16.mxu0 %v529_v42 }
 0x112   : > { %v525_v43 = vsel %vm522_vm2, %v430_v38, %v481_v41  ;;  %vm797_vm2 = vcmask 769024  }
 0x113   : > { %597 = vmatpush1.bf16.msra.mxu0 %v525_v43 }
 0x116   : > { %1500 = vmatmul.mubr.msk.bf16.vlgmr.msra.gmra.mxu0 %vm572_vm9, %v1557_v44 }
 0x11b   : > { %v560_v45 = vpop.permute.xlu0 %559 }
 0x11d   : > { %v565_v47 = vpop.permute.xlu1 %564 }
 0x11f   : > { %v913_v2 = vpop.permute.xlu0 %912 }
 0x120   : > { %v1908_v12 = vsel %vm421_vm3, %v913_v2, 0 }
 0x121   : > { %v911_v3 = vpop.permute.xlu1 %910  ;;  %v929_v22 = vmul.bf16 %v1908_v12, %v1759_v28 }
 0x122   : > { %v1901_v11 = vsel %vm421_vm3, %v911_v3, %v913_v2  ;;  %v1920_v15 = vsel %vm421_vm3, 0, %v911_v3 }
 0x123   : > { %v1887_v6 = vpop.permute.xlu0 %688  ;;  %v928_v19 = vmul.bf16 %v1901_v11, %v1773_v33  ;;  %v927_v23 = vmul.bf16 %v1920_v15, %v1754_v25 }
 0x124   : > { %v935_v18 = vmul.bf16 %v1908_v12, %v1887_v6 }
 0x125   : > { %v1885_v5 = vpop.permute.xlu1 %686 }
 0x126   : > { %v1893_v7 = vsel %vm690_vm10, %v1885_v5, %v1887_v6  ;;  %v933_v17 = vmul.bf16 %v1920_v15, %v1885_v5 }
 0x127   : > { %v1898_v9 = vpop.permute.xlu0 %676 }
 0x128   : > { %v932_v21 = vmul.bf16 %v1908_v12, %v1898_v9 }
 0x129   : > { %v1896_v8 = vpop.permute.xlu1 %674 }
 0x12a   : > { %v930_v20 = vmul.bf16 %v1920_v15, %v1896_v8 }
 0x1d6   : > { %v616_v29 = vpop.f32.mrf.mxu0 }
 0x1d7   : > { %v617_v46 = vadd.f32 %v616_v29, %v560_v45 }
 0x1d8   : > { %v618_v26 = vpop.f32.mrf.mxu0 }
 0x1d9   : > { %v619_v49 = vadd.f32 %v618_v26, %v560_v45  ;;  %v625_v54 = vmax.f32 %v617_v46, 0.0 }
 0x1da   : > { %v620_v48 = vpop.f32.mrf.mxu0 }
 0x1db   : > { %v621_v50 = vadd.f32 %v620_v48, %v565_v47  ;;  %v626_v63 = vmax.f32 %v619_v49, 0.0 }
 0x1dc   : > { %v622_v51 = vpop.f32.mrf.mxu0 }
 0x1dd   : > { %v627_v59 = vmax.f32 %v621_v50, 0.0  ;;  %v623_v60 = vadd.f32 %v622_v51, %v565_v47 }
 0x1df   : > { %v1876_v0 = vpack.c.bf16 %v627_v59, %v625_v54  ;;  %v628_v1 = vmax.f32 %v623_v60, 0.0 }
 0x1e1   : > { %v1878_v4 = vpack.c.bf16 %v628_v1, %v626_v63  ;;  %643 = vrot.lane.b32.xlu1 %v1876_v0, %s1629_s15 }
 0x1e3   : > { %645 = vrot.lane.b32.xlu0 %v1878_v4, %s1629_s15 }
 0x1e5   : > { %659 = vrot.lane.b32.xlu1 %v1843_v62, %s1636_s12 }
 0x1e7   : > { %661 = vrot.lane.b32.xlu0 %v1840_v61, %s1636_s12 }
 0x1e9   : > { %698 = vrot.lane.b32.xlu1 %v1843_v62, %s1637_s13  ;;  %v934_v62 = vmul.bf16 %v1901_v11, %v1893_v7 }
 0x1eb   : > { %700 = vrot.lane.b32.xlu0 %v1840_v61, %s1637_s13  ;;  %v1912_v61 = vsel %vm678_vm11, %v1896_v8, %v1898_v9  ;;  %s2264_s13 = sshll.u32 %s2266_s10, 5 }
 0x1ec   : > { %v931_v14 = vmul.bf16 %v1901_v11, %v1912_v61  ;;  %s352_s19 = scalar_lea.vmem %s2262_s9, %s2264_s13 }
 0x1ed   : > { %1005 = vrot.lane.b32.xlu1 %v1901_v11, %s1638_s14 }
 0x1ef   : > { %1007 = vrot.lane.b32.xlu0 %v1908_v12, %s1638_s14 }
 0x1f1   : > { %995 = vrot.lane.b32.xlu1 %v934_v62, %s1639_s16 }
 0x1f3   : > { %1003 = vrot.lane.b32.xlu0 %v1920_v15, %s1638_s14 }
 0x1f5   : > { %982 = vrot.lane.b32.xlu1 %v931_v14, %s1640_s20 }
 0x1f7   : > { %997 = vrot.lane.b32.xlu0 %v935_v18, %s1639_s16 }
 0x1f9   : > { %969 = vrot.lane.b32.xlu1 %v928_v19, %s1633_s18 }
 0x1fb   : > { %993 = vrot.lane.b32.xlu0 %v933_v17, %s1639_s16 }
 0x1ff   : > { %984 = vrot.lane.b32.xlu0 %v932_v21, %s1640_s20 }
 0x203   : > { %980 = vrot.lane.b32.xlu0 %v930_v20, %s1640_s20 }
 0x207   : > { %971 = vrot.lane.b32.xlu0 %v929_v22, %s1633_s18 }
 0x20b   : > { %967 = vrot.lane.b32.xlu0 %v927_v23, %s1633_s18 }
 0x253   : > { %v644_v16 = vpop.permute.xlu1 %643 }
 0x254   : > { %v1967_v38 = vsel %vm421_vm3, 0, %v644_v16 }
 0x255   : > { %v646_v24 = vpop.permute.xlu0 %645  ;;  %v695_v45 = vmul.bf16 %v1885_v5, %v1967_v38  ;;  %v683_v49 = vmul.bf16 %v1896_v8, %v1967_v38  ;;  %v671_v59 = vmul.bf16 %v1967_v38, %v1754_v25 }
 0x256   : > { %v1974_v42 = vsel %vm421_vm3, %v646_v24, 0  ;;  %v1977_v43 = vsel %vm421_vm3, %v644_v16, %v646_v24 }
 0x257   : > { %v1946_v27 = vpop.permute.xlu1 %659  ;;  %v697_v47 = vmul.bf16 %v1887_v6, %v1974_v42  ;;  %v685_v54 = vmul.bf16 %v1898_v9, %v1974_v42  ;;  %v673_v14 = vmul.bf16 %v1974_v42, %v1759_v28  ;;  %v696_v20 = vmul.bf16 %v1893_v7, %v1977_v43 }
 0x258   : > { %v924_v37 = vmul.bf16 %v1920_v15, %v1946_v27  ;;  %v668_v2 = vmul.bf16 %v1946_v27, %v1967_v38  ;;  %v684_v23 = vmul.bf16 %v1912_v61, %v1977_v43  ;;  %v672_v24 = vmul.bf16 %v1977_v43, %v1773_v33 }
 0x259   : > { %v1948_v30 = vpop.permute.xlu0 %661 }
 0x25a   : > { %v1952_v31 = vsel %vm663_vm12, %v1946_v27, %v1948_v30  ;;  %v926_v32 = vmul.bf16 %v1908_v12, %v1948_v30  ;;  %v670_v17 = vmul.bf16 %v1948_v30, %v1974_v42 }
 0x25b   : > { %v1956_v34 = vpop.permute.xlu1 %698  ;;  %v925_v35 = vmul.bf16 %v1901_v11, %v1952_v31 }
 0x25c   : > { %958 = vrot.lane.b32.xlu0 %v926_v32, %s1641_s21  ;;  %v936_v32 = vmul.bf16 %v1920_v15, %v1956_v34 }
 0x25d   : > { %v1961_v36 = vpop.permute.xlu0 %700  ;;  %956 = vrot.lane.b32.xlu1 %v925_v35, %s1641_s21  ;;  %v1112_v35 = vld [vmem:[%s2259_s6 + $0x8] sm:$0xff] }
 0x25e   : > { %v709_v16 = vmul.bf16 %v1961_v36, %v1974_v42 }
 0x25f   : > { %v1006_v39 = vpop.permute.xlu1 %1005 }
 0x260   : > { %954 = vrot.lane.b32.xlu0 %v924_v37, %s1641_s21  ;;  %v1558_v37 = vld [vmem:[%s2258_s5 + $0x4] ss:$8 sps:$4 sm:$0xff]  }
 0x261   : > { %v1008_v40 = vpop.permute.xlu0 %1007  ;;  %777 = vrot.lane.b32.xlu1 %v1967_v38, %s1638_s14  ;;  %1514 = vmatprep.mubr.msk.bf16.mxu0 %vm459_vm4, %v1558_v37  ;;  %v923_v37 = vmul.bf16 %v1901_v11, %v1728_v13 }
 0x262   : > { %v1010_v41 = vsel %vm783_vm13, %v1006_v39, %v1008_v40  ;;  %v1563_v40 = vld [vmem:[%s2257_s4 + $0x4] ss:$8 sps:$4 sm:$0xff]  }
 0x263   : > { %1050 = vmatprep.subr.bf16.mxu0 %v1010_v41  ;;  %v996_v26 = vpop.permute.xlu1 %995  ;;  %1507 = vmatprep.mubr.msk.bf16.mxu1 %vm459_vm4, %v1563_v40 }
 0x264   : > { %781 = vrot.lane.b32.xlu0 %v1974_v42, %s1638_s14 }
 0x265   : > { %v1004_v44 = vpop.permute.xlu0 %1003  ;;  %779 = vrot.lane.b32.xlu1 %v1977_v43, %s1638_s14 }
 0x266   : > { %v1009_v29 = vsel %vm783_vm13, %v1004_v44, %v1006_v39  ;;  %v2056_v39 = vsel %vm702_vm0, %v1956_v34, %v1961_v36  ;;  %v707_v44 = vmul.bf16 %v1956_v34, %v1967_v38 }
 0x267   : > { %1051 = vmatpush1.bf16.msra.mxu0 %v1009_v29  ;;  %v983_v60 = vpop.permute.xlu1 %982  ;;  %v937_v41 = vmul.bf16 %v1901_v11, %v2056_v39  ;;  %v1111_v29 = vld [vmem:[%s2259_s6] sm:$0xff] }
 0x268   : > { %716 = vrot.lane.b32.xlu0 %v1974_v42, %s1632_s17  ;;  %v708_v42 = vmul.bf16 %v2056_v39, %v1977_v43 }
 0x269   : > { %v998_v46 = vpop.permute.xlu0 %997  ;;  %766 = vrot.lane.b32.xlu1 %v695_v45, %s1639_s16 }
 0x26a   : > { %v1000_v48 = vsel %vm772_vm14, %v996_v26, %v998_v46 }
 0x26b   : > { %1052 = vmatprep.subr.bf16.mxu0 %v1000_v48  ;;  %v970_v18 = vpop.permute.xlu1 %969 }
 0x26c   : > { %770 = vrot.lane.b32.xlu0 %v697_v47, %s1639_s16 }
 0x26d   : > { %v994_v50 = vpop.permute.xlu0 %993  ;;  %752 = vrot.lane.b32.xlu1 %v683_v49, %s1640_s20 }
 0x26e   : > { %v999_v51 = vsel %vm772_vm14, %v994_v50, %v996_v26 }
 0x26f   : > { %1053 = vmatpush1.bf16.msra.mxu0 %v999_v51 }
 0x270   : > { %756 = vrot.lane.b32.xlu0 %v685_v54, %s1640_s20 }
 0x271   : > { %v985_v63 = vpop.permute.xlu0 %984  ;;  %739 = vrot.lane.b32.xlu1 %v671_v59, %s1633_s18 }
 0x272   : > { %v987_v1 = vsel %vm758_vm15, %v983_v60, %v985_v63 }
 0x273   : > { %1054 = vmatprep.subr.bf16.mxu0 %v987_v1 }
 0x274   : > { %945 = vrot.lane.b32.xlu0 %v1908_v12, %s1632_s17 }
 0x275   : > { %v981_v3 = vpop.permute.xlu0 %980  ;;  %725 = vrot.lane.b32.xlu1 %v668_v2, %s1641_s21 }
 0x276   : > { %v986_v62 = vsel %vm758_vm15, %v981_v3, %v983_v60 }
 0x277   : > { %1055 = vmatpush1.bf16.msra.mxu0 %v986_v62 }
 0x278   : > { %743 = vrot.lane.b32.xlu0 %v673_v14, %s1633_s18  ;;  %1056 = vmatprep.subr.bf16.mxu0 %v1823_v57 }
 0x279   : > { %v972_v19 = vpop.permute.xlu0 %971  ;;  %714 = vrot.lane.b32.xlu1 %v1977_v43, %s1632_s17 }
 0x27a   : > { %v974_v21 = vsel %vm504_vm7, %v970_v18, %v972_v19 }
 0x27b   : > { %1057 = vmatpush1.bf16.msra.mxu0 %v1827_v58  ;;  %v938_v58 = vmul.bf16 %v1908_v12, %v1961_v36  ;;  %v669_v12 = vmul.bf16 %v1952_v31, %v1977_v43 }
 0x27c   : > { %729 = vrot.lane.b32.xlu0 %v670_v17, %s1641_s21  ;;  %1058 = vmatprep.subr.bf16.mxu0 %v974_v21 }
 0x27d   : > { %v968_v22 = vpop.permute.xlu0 %967  ;;  %768 = vrot.lane.b32.xlu1 %v696_v20, %s1639_s16 }
 0x27e   : > { %v973_v57 = vsel %vm504_vm7, %v968_v22, %v970_v18 }
 0x27f   : > { %1059 = vmatpush1.bf16.msra.mxu0 %v973_v57 }
 0x280   : > { %941 = vrot.lane.b32.xlu0 %v1920_v15, %s1632_s17 }
 0x281   : > { %754 = vrot.lane.b32.xlu1 %v684_v23, %s1640_s20 }
 0x284   : > { %1020 = vrot.lane.b32.xlu0 %v938_v58, %s1642_s23 }
 0x285   : > { %943 = vrot.lane.b32.xlu1 %v1901_v11, %s1632_s17 }
 0x288   : > { %795 = vrot.lane.b32.xlu0 %v709_v16, %s1642_s23 }
 0x289   : > { %741 = vrot.lane.b32.xlu1 %v672_v24, %s1633_s18 }
 0x28c   : > { %1016 = vrot.lane.b32.xlu0 %v936_v32, %s1642_s23 }
 0x28d   : > { %727 = vrot.lane.b32.xlu1 %v669_v12, %s1641_s21 }
 0x290   : > { %1122 = vperm.xlu0 %1555, %v1112_v35  }
 0x291   : > { %712 = vrot.lane.b32.xlu1 %v1967_v38, %s1632_s17 }
 0x295   : > { %1018 = vrot.lane.b32.xlu1 %v937_v41, %s1642_s23 }
 0x299   : > { %793 = vrot.lane.b32.xlu1 %v708_v42, %s1642_s23 }
 0x29d   : > { %791 = vrot.lane.b32.xlu1 %v707_v44, %s1642_s23 }
 0x2a1   : > { %1117 = vperm.xlu1 %1556, %v1111_v29  }
 0x2ce   : > { %v959_v45 = vpop.permute.xlu0 %958 }
 0x2cf   : > { %v957_v26 = vpop.permute.xlu1 %956 }
 0x2d0   : > { %v961_v46 = vsel %vm731_vm1, %v957_v26, %v959_v45 }
 0x2d1   : > { %1060 = vmatprep.subr.bf16.mxu0 %v961_v46 }
 0x2d2   : > { %v955_v47 = vpop.permute.xlu0 %954 }
 0x2d3   : > { %v960_v48 = vsel %vm731_vm1, %v955_v47, %v957_v26  ;;  %v778_v49 = vpop.permute.xlu1 %777 }
 0x2d4   : > { %1061 = vmatpush1.bf16.msra.mxu0 %v960_v48 }
 0x2d6   : > { %v782_v50 = vpop.permute.xlu0 %781 }
 0x2d7   : > { %v780_v51 = vpop.permute.xlu1 %779 }
 0x2d8   : > { %v785_v54 = vsel %vm783_vm13, %v780_v51, %v782_v50  ;;  %v784_v59 = vsel %vm783_vm13, %v778_v49, %v780_v51 }
 0x2d9   : > { %839 = vmatprep.subr.bf16.mxu1 %v785_v54  ;;  %v655_v54 = vmul.bf16 %v1967_v38, %v1721_v10  ;;  %v1564_v38 = vld [vmem:[%s2257_s4 + $0x14] ss:$8 sps:$4 sm:$0xff]  }
 0x2da   : > { %v717_v60 = vpop.permute.xlu0 %716  ;;  %840 = vmatpush1.bf16.msra.mxu1 %v784_v59  ;;  %v1560_v59 = vld [vmem:[%s2258_s5] ss:$8 sps:$4 sm:$0xff]  }
 0x2db   : > { %v767_v63 = vpop.permute.xlu1 %766 }
 0x2de   : > { %v771_v1 = vpop.permute.xlu0 %770 }
 0x2df   : > { %v753_v2 = vpop.permute.xlu1 %752 }
 0x2e2   : > { %v757_v3 = vpop.permute.xlu0 %756 }
 0x2e3   : > { %v740_v62 = vpop.permute.xlu1 %739 }
 0x2e6   : > { %v946_v14 = vpop.permute.xlu0 %945 }
 0x2e7   : > { %v726_v18 = vpop.permute.xlu1 %725 }
 0x2ea   : > { %v744_v19 = vpop.permute.xlu0 %743 }
 0x2eb   : > { %v715_v17 = vpop.permute.xlu1 %714 }
 0x2ec   : > { %v719_v26 = vsel %vm480_vm8, %v715_v17, %v717_v60 }
 0x2ee   : > { %v730_v21 = vpop.permute.xlu0 %729 }
 0x2ef   : > { %v769_v20 = vpop.permute.xlu1 %768 }
 0x2f0   : > { %v774_v22 = vsel %vm772_vm14, %v769_v20, %v771_v1  ;;  %v773_v57 = vsel %vm772_vm14, %v767_v63, %v769_v20 }
 0x2f1   : > { %841 = vmatprep.subr.bf16.mxu1 %v774_v22 }
 0x2f2   : > { %842 = vmatpush1.bf16.msra.mxu1 %v773_v57  ;;  %v942_v24 = vpop.permute.xlu0 %941 }
 0x2f3   : > { %v755_v23 = vpop.permute.xlu1 %754 }
 0x2f4   : > { %v760_v58 = vsel %vm758_vm15, %v755_v23, %v757_v3  ;;  %v759_v16 = vsel %vm758_vm15, %v753_v2, %v755_v23  ;;  %v1561_v2 = vld [vmem:[%s2257_s4] ss:$8 sps:$4 sm:$0xff]   ;;  %v1566_v3 = vld [vmem:[%s2258_s5 + $0x14] ss:$8 sps:$4 sm:$0xff]  }
 0x2f5   : > { %843 = vmatprep.subr.bf16.mxu1 %v760_v58 }
 0x2f6   : > { %844 = vmatpush1.bf16.msra.mxu1 %v759_v16  ;;  %v1021_v40 = vpop.permute.xlu0 %1020 }
 0x2f7   : > { %845 = vmatprep.subr.bf16.mxu1 %v1878_v4  ;;  %v944_v32 = vpop.permute.xlu1 %943  ;;  %v922_v4 = vmul.bf16 %v1920_v15, %v1721_v10  ;;  %v656_v15 = vmul.bf16 %v1977_v43, %v1728_v13 }
 0x2f8   : > { %v947_v12 = vsel %vm480_vm8, %v942_v24, %v944_v32  ;;  %v948_v35 = vsel %vm480_vm8, %v944_v32, %v946_v14  ;;  %v1569_v14 = vld [vmem:[%s2258_s5 + $0x10] ss:$8 sps:$4 sm:$0xff]  }
 0x2f9   : > { %1062 = vmatprep.subr.bf16.mxu0 %v948_v35 }
 0x2fa   : > { %846 = vmatpush1.bf16.msra.mxu1 %v1876_v0  ;;  %1063 = vmatpush1.bf16.msra.mxu0 %v947_v12  ;;  %v796_v0 = vpop.permute.xlu0 %795 }
 0x2fb   : > { %1064 = vmatprep.subr.bf16.mxu0 %v923_v37  ;;  %v742_v41 = vpop.permute.xlu1 %741 }
 0x2fc   : > { %v746_v42 = vsel %vm504_vm7, %v742_v41, %v744_v19  ;;  %v745_v44 = vsel %vm504_vm7, %v740_v62, %v742_v41  ;;  %v1568_v62 = vld [vmem:[%s2257_s4 + $0x10] ss:$8 sps:$4 sm:$0xff]  }
 0x2fd   : > { %847 = vmatprep.subr.bf16.mxu1 %v746_v42 }
 0x2fe   : > { %848 = vmatpush1.bf16.msra.mxu1 %v745_v44  ;;  %1065 = vmatpush1.bf16.msra.mxu0 %v922_v4  ;;  %v1017_v48 = vpop.permute.xlu0 %1016 }
 0x2ff   : > { %v728_v29 = vpop.permute.xlu1 %727 }
 0x300   : > { %v733_v45 = vsel %vm731_vm1, %v728_v29, %v730_v21  ;;  %v732_v11 = vsel %vm731_vm1, %v726_v18, %v728_v29 }
 0x301   : > { %849 = vmatprep.subr.bf16.mxu1 %v733_v45 }
 0x302   : > { %850 = vmatpush1.bf16.msra.mxu1 %v732_v11 }
 0x303   : > { %851 = vmatprep.subr.bf16.mxu1 %v719_v26  ;;  %v713_v46 = vpop.permute.xlu1 %712 }
 0x304   : > { %v718_v47 = vsel %vm480_vm8, %v713_v46, %v715_v17 }
 0x306   : > { %852 = vmatpush1.bf16.msra.mxu1 %v718_v47 }
 0x307   : > { %853 = vmatprep.subr.bf16.mxu1 %v656_v15  ;;  %v1019_v49 = vpop.permute.xlu1 %1018 }
 0x308   : > { %v1022_v50 = vsel %vm797_vm2, %v1017_v48, %v1019_v49  ;;  %v1023_v51 = vsel %vm797_vm2, %v1019_v49, %v1021_v40 }
 0x309   : > { %1080 = vmatprep.subr.bf16.mxu0 %v1023_v51 }
 0x30a   : > { %854 = vmatpush1.bf16.msra.mxu1 %v655_v54  ;;  %1081 = vmatpush2.bf16.msra.mxu0 %v1022_v50 }
 0x30b   : > { %v794_v43 = vpop.permute.xlu1 %793  ;;  %v1123_v24 = vpop.permute.xlu0 %1122 }
 0x30c   : > { %v799_v60 = vsel %vm797_vm2, %v794_v43, %v796_v0 }
 0x30d   : > { %869 = vmatprep.subr.bf16.mxu1 %v799_v60  ;;  %1083 = vmatmul.mubr.bf16.vlgmr.msra.gmra.mxu0 %v1560_v59 }
 0x30e   : > { %1515 = vmatprep.mubr.msk.bf16.mxu0 %vm459_vm4, %v1566_v3 }
 0x30f   : > { %v792_v63 = vpop.permute.xlu1 %791 }
 0x310   : > { %v798_v1 = vsel %vm797_vm2, %v792_v63, %v794_v43 }
 0x311   : > { %870 = vmatpush2.bf16.msra.mxu1 %v798_v1 }
 0x314   : > { %872 = vmatmul.mubr.bf16.vlgmr.msra.gmra.mxu1 %v1561_v2 }
 0x315   : > { %1508 = vmatprep.mubr.msk.bf16.mxu1 %vm459_vm4, %v1564_v38  ;;  %1093 = vmatmul.mubr.bf16.gmra.mxu0 %v1569_v14 }
 0x31c   : > { %882 = vmatmul.mubr.bf16.gmra.mxu1 %v1568_v62  ;;  %v1118_v21 = vpop.permute.xlu1 %1117 }
 0x3cd   : > { %v1084_v18 = vpop.f32.mrf.mxu0 }
 0x3cf   : > { %v1086_v19 = vpop.f32.mrf.mxu0 }
 0x3d1   : > { %v1088_v22 = vpop.f32.mrf.mxu0 }
 0x3d3   : > { %v1090_v37 = vpop.f32.mrf.mxu0 }
 0x3d4   : > { %v873_v17 = vpop.f32.mrf.mxu1 }
 0x3d5   : > { %v1103_v20 = vadd.f32 %v1084_v18, %v873_v17 }
 0x3d6   : > { %v875_v57 = vpop.f32.mrf.mxu1 }
 0x3d7   : > { %v1135_v23 = vadd.f32 %v1118_v21, %v1103_v20  ;;  %v1104_v58 = vadd.f32 %v1086_v19, %v875_v57  ;;  %v1113_v20 = vld [vmem:[%s2259_s6 + $0x10] sm:$0xff] }
 0x3d8   : > { %v877_v16 = vpop.f32.mrf.mxu1 }
 0x3d9   : > { %v1516_v32 = vmul.f32 -1.442695, %v1135_v23  ;;  %v1136_v12 = vadd.f32 %v1118_v21, %v1104_v58  ;;  %v1105_v35 = vadd.f32 %v1088_v22, %v877_v16  ;;  %v1114_v22 = vld [vmem:[%s2259_s6 + $0x18] sm:$0xff] }
 0x3da   : > { %v879_v40 = vpop.f32.mrf.mxu1 }
 0x3db   : > { %1576 = vpow2.f32 %v1516_v32  ;;  %v1517_v41 = vmul.f32 -1.442695, %v1136_v12  ;;  %v1137_v42 = vadd.f32 %v1123_v24, %v1105_v35  ;;  %v1106_v44 = vadd.f32 %v1090_v37, %v879_v40 }
 0x3dd   : > { %1578 = vpow2.f32 %v1517_v41  ;;  %v1518_v4 = vmul.f32 -1.442695, %v1137_v42  ;;  %v1138_v29 = vadd.f32 %v1123_v24, %v1106_v44 }
 0x3df   : > { %1580 = vpow2.f32 %v1518_v4  ;;  %v1519_v45 = vmul.f32 -1.442695, %v1138_v29 }
 0x3e1   : > { %1582 = vpow2.f32 %v1519_v45 }
 0x3e8   : > { %v1577_v11 = vpop.eup %1576 }
 0x3e9   : > { %v1167_v0 = vadd.f32 1.0, %v1577_v11 }
 0x3ea   : > { %v1579_v26 = vpop.eup %1578 }
 0x3eb   : > { %v1168_v46 = vadd.f32 1.0, %v1579_v26  ;;  %1584 = vrcp.f32 %v1167_v0 }
 0x3ec   : > { %v1581_v47 = vpop.eup %1580 }
 0x3ed   : > { %v1169_v15 = vadd.f32 1.0, %v1581_v47  ;;  %1586 = vrcp.f32 %v1168_v46 }
 0x3ee   : > { %v1583_v48 = vpop.eup %1582 }
 0x3ef   : > { %1588 = vrcp.f32 %v1169_v15  ;;  %v1170_v49 = vadd.f32 1.0, %v1583_v48 }
 0x3f1   : > { %1590 = vrcp.f32 %v1170_v49 }
 0x3f8   : > { %v1585_v50 = vpop.eup %1584 }
 0x3f9   : > { %v1193_v59 = vmul.f32 %v1585_v50, %v1816_v55 }
 0x3fa   : > { %v1587_v51 = vpop.eup %1586 }
 0x3fb   : > { %v1194_v1 = vmul.f32 %v1587_v51, %v1807_v52 }
 0x3fc   : > { %v1589_v54 = vpop.eup %1588 }
 0x3fd   : > { %v1195_v43 = vmul.f32 %v1589_v54, %v1819_v56 }
 0x3fe   : > { %v1591_v60 = vpop.eup %1590 }
 0x3ff   : > { %v2128_v63 = vpack.c.bf16 %v1195_v43, %v1193_v59  ;;  %v1196_v2 = vmul.f32 %v1591_v60, %v1810_v53 }
 0x401   : > { %1201 = vrot.lane.b32.xlu1 %v2128_v63, %s1629_s15  ;;  %v2134_v38 = vpack.c.bf16 %v1196_v2, %v1194_v1 }
 0x403   : > { %1203 = vrot.lane.b32.xlu0 %v2134_v38, %s1629_s15 }
 0x473   : > { %v1202_v3 = vpop.permute.xlu1 %1201 }
 0x474   : > { %v2139_v55 = vsel %vm421_vm3, 0, %v1202_v3 }
 0x475   : > { %v1204_v56 = vpop.permute.xlu0 %1203  ;;  %1294 = vrot.lane.b32.xlu1 %v2139_v55, %s1638_s14  ;;  %v1224_v62 = vmul.bf16 %v2139_v55, %v1885_v5  ;;  %v1221_v14 = vmul.bf16 %v2139_v55, %v1896_v8  ;;  %v1218_v8 = vmul.bf16 %v2139_v55, %v1754_v25  ;;  %v1213_v2 = vmul.bf16 %v2139_v55, %v1721_v10 }
 0x476   : > { %v1211_v52 = vsel %vm421_vm3, %v1204_v56, 0  ;;  %v2146_v53 = vsel %vm421_vm3, %v1202_v3, %v1204_v56 }
 0x477   : > { %1298 = vrot.lane.b32.xlu0 %v1211_v52, %s1638_s14  ;;  %v1225_v18 = vmul.bf16 %v2146_v53, %v1893_v7  ;;  %v1226_v19 = vmul.bf16 %v1211_v52, %v1887_v6  ;;  %v1223_v17 = vmul.bf16 %v1211_v52, %v1898_v9  ;;  %v1222_v5 = vmul.bf16 %v2146_v53, %v1912_v61  ;;  %v1570_v7 = vld [vmem:[%s2257_s4 + $0x24] ss:$8 sps:$4 sm:$0xff]   ;;  %v1572_v9 = vld [vmem:[%s2257_s4 + $0x20] ss:$8 sps:$4 sm:$0xff]  }
 0x478   : > { %v1215_v6 = vmul.bf16 %v2139_v55, %v1946_v27  ;;  %1509 = vmatprep.mubr.msk.bf16.mxu1 %vm459_vm4, %v1570_v7  ;;  %v1219_v25 = vmul.bf16 %v2146_v53, %v1773_v33  ;;  %v1220_v61 = vmul.bf16 %v1211_v52, %v1759_v28  ;;  %v1217_v27 = vmul.bf16 %v1211_v52, %v1948_v30  ;;  %v1575_v33 = vld [vmem:[%s2260_s7 + $0x4] ss:$8 sps:$4 sm:$0xff]  }
 0x479   : > { %1296 = vrot.lane.b32.xlu1 %v2146_v53, %s1638_s14  ;;  %892 = vmatmul.mubr.bf16.gmra.mxu1 %v1572_v9  ;;  %v1216_v21 = vmul.bf16 %v2146_v53, %v1952_v31  ;;  %v1228_v28 = vmul.bf16 %v2146_v53, %v2056_v39  ;;  %v1229_v30 = vmul.bf16 %v1211_v52, %v1961_v36  ;;  %v1376_v36 = vld [vmem:[%s2261_s8] sm:$0xff] }
 0x47a   : > { %1526 = vmatprep.mubr.msk.bf16.mxu1 %vm459_vm4, %v1575_v33  ;;  %v1227_v31 = vmul.bf16 %v2139_v55, %v1956_v34  ;;  %v1377_v34 = vld [vmem:[%s2261_s8 + $0x8] sm:$0xff]  ;;  %v1214_v60 = vmul.bf16 %v2146_v53, %v1728_v13  ;;  %v883_v13 = vpop.f32.mrf.mxu1 }
 0x47b   : > { %1284 = vrot.lane.b32.xlu0 %v1224_v62, %s1639_s16 }
 0x47c   : > { %v885_v62 = vpop.f32.mrf.mxu1 }
 0x47d   : > { %1271 = vrot.lane.b32.xlu1 %v1221_v14, %s1640_s20 }
 0x47f   : > { %1286 = vrot.lane.b32.xlu0 %v1225_v18, %s1639_s16  ;;  %v887_v18 = vpop.f32.mrf.mxu1 }
 0x481   : > { %1288 = vrot.lane.b32.xlu1 %v1226_v19, %s1639_s16 }
 0x483   : > { %1275 = vrot.lane.b32.xlu0 %v1223_v17, %s1640_s20 }
 0x485   : > { %1273 = vrot.lane.b32.xlu1 %v1222_v5, %s1640_s20  ;;  %v889_v5 = vpop.f32.mrf.mxu1 }
 0x487   : > { %1258 = vrot.lane.b32.xlu0 %v1218_v8, %s1633_s18 }
 0x489   : > { %1245 = vrot.lane.b32.xlu1 %v1215_v6, %s1641_s21 }
 0x48b   : > { %1260 = vrot.lane.b32.xlu0 %v1219_v25, %s1633_s18 }
 0x48d   : > { %1262 = vrot.lane.b32.xlu1 %v1220_v61, %s1633_s18 }
 0x48f   : > { %1249 = vrot.lane.b32.xlu0 %v1217_v27, %s1641_s21 }
 0x491   : > { %1247 = vrot.lane.b32.xlu1 %v1216_v21, %s1641_s21 }
 0x493   : > { %1234 = vrot.lane.b32.xlu0 %v2146_v53, %s1632_s17  ;;  %v1094_v53 = vpop.f32.mrf.mxu0 }
 0x494   : > { %v1107_v10 = vadd.f32 %v1094_v53, %v883_v13 }
 0x495   : > { %1236 = vrot.lane.b32.xlu1 %v1211_v52, %s1632_s17  ;;  %v1573_v52 = vld [vmem:[%s2260_s7] ss:$8 sps:$4 sm:$0xff]   ;;  %v1096_v14 = vpop.f32.mrf.mxu0 }
 0x496   : > { %v1108_v17 = vadd.f32 %v1096_v14, %v885_v62  ;;  %v1618_v14 = vld [vmem:[%s1799_s22 + $0x10] sm:$0xff] }
 0x497   : > { %1232 = vrot.lane.b32.xlu0 %v2139_v55, %s1632_s17  ;;  %v1098_v19 = vpop.f32.mrf.mxu0 }
 0x498   : > { %v1109_v7 = vadd.f32 %v1098_v19, %v887_v18 }
 0x499   : > { %1309 = vrot.lane.b32.xlu1 %v1228_v28, %s1642_s23  ;;  %v1100_v8 = vpop.f32.mrf.mxu0 }
 0x49a   : > { %v1110_v9 = vadd.f32 %v1100_v8, %v889_v5 }
 0x49b   : > { %1311 = vrot.lane.b32.xlu0 %v1229_v30, %s1642_s23 }
 0x49d   : > { %1307 = vrot.lane.b32.xlu1 %v1227_v31, %s1642_s23 }
 0x49f   : > { %1127 = vperm.xlu0 %1555, %v1113_v20  }
 0x4a1   : > { %1132 = vperm.xlu1 %1556, %v1114_v22  }
 0x4a3   : > { %1380 = vperm.xlu0 %1555, %v1376_v36  }
 0x4a5   : > { %1385 = vperm.xlu1 %1556, %v1377_v34  }
 0x4e7   : > { %v1295_v39 = vpop.permute.xlu1 %1294 }
 0x4e9   : > { %v1299_v57 = vpop.permute.xlu0 %1298 }
 0x4eb   : > { %v1297_v23 = vpop.permute.xlu1 %1296 }
 0x4ec   : > { %v1300_v58 = vsel %vm783_vm13, %v1295_v39, %v1297_v23  ;;  %v1301_v16 = vsel %vm783_vm13, %v1297_v23, %v1299_v57 }
 0x4ed   : > { %v1285_v24 = vpop.permute.xlu0 %1284  ;;  %1329 = vmatprep.subr.bf16.mxu1 %v1301_v16 }
 0x4ee   : > { %1330 = vmatpush1.bf16.msra.mxu1 %v1300_v58 }
 0x4ef   : > { %v1272_v32 = vpop.permute.xlu1 %1271 }
 0x4f1   : > { %v1287_v12 = vpop.permute.xlu0 %1286 }
 0x4f2   : > { %v1290_v40 = vsel %vm772_vm14, %v1285_v24, %v1287_v12 }
 0x4f3   : > { %v1289_v35 = vpop.permute.xlu1 %1288 }
 0x4f4   : > { %v1291_v37 = vsel %vm772_vm14, %v1287_v12, %v1289_v35 }
 0x4f5   : > { %1331 = vmatprep.subr.bf16.mxu1 %v1291_v37  ;;  %v1276_v41 = vpop.permute.xlu0 %1275 }
 0x4f6   : > { %1332 = vmatpush1.bf16.msra.mxu1 %v1290_v40 }
 0x4f7   : > { %v1274_v42 = vpop.permute.xlu1 %1273 }
 0x4f8   : > { %v1277_v44 = vsel %vm758_vm15, %v1272_v32, %v1274_v42  ;;  %v1278_v4 = vsel %vm758_vm15, %v1274_v42, %v1276_v41 }
 0x4f9   : > { %v1259_v29 = vpop.permute.xlu0 %1258  ;;  %1333 = vmatprep.subr.bf16.mxu1 %v1278_v4 }
 0x4fa   : > { %1334 = vmatpush1.bf16.msra.mxu1 %v1277_v44 }
 0x4fb   : > { %1335 = vmatprep.subr.bf16.mxu1 %v2134_v38  ;;  %v1246_v45 = vpop.permute.xlu1 %1245 }
 0x4fd   : > { %v1261_v11 = vpop.permute.xlu0 %1260 }
 0x4fe   : > { %1336 = vmatpush1.bf16.msra.mxu1 %v2128_v63  ;;  %v1264_v46 = vsel %vm504_vm7, %v1259_v29, %v1261_v11 }
 0x4ff   : > { %v1263_v0 = vpop.permute.xlu1 %1262 }
 0x500   : > { %v1265_v26 = vsel %vm504_vm7, %v1261_v11, %v1263_v0 }
 0x501   : > { %1337 = vmatprep.subr.bf16.mxu1 %v1265_v26  ;;  %v1250_v47 = vpop.permute.xlu0 %1249 }
 0x502   : > { %1338 = vmatpush1.bf16.msra.mxu1 %v1264_v46 }
 0x503   : > { %v1248_v15 = vpop.permute.xlu1 %1247 }
 0x504   : > { %v1251_v48 = vsel %vm731_vm1, %v1246_v45, %v1248_v15  ;;  %v1252_v49 = vsel %vm731_vm1, %v1248_v15, %v1250_v47 }
 0x505   : > { %v1235_v50 = vpop.permute.xlu0 %1234  ;;  %1339 = vmatprep.subr.bf16.mxu1 %v1252_v49 }
 0x506   : > { %1340 = vmatpush1.bf16.msra.mxu1 %v1251_v48 }
 0x507   : > { %v1237_v51 = vpop.permute.xlu1 %1236 }
 0x508   : > { %v1239_v54 = vsel %vm480_vm8, %v1235_v50, %v1237_v51 }
 0x509   : > { %v1233_v59 = vpop.permute.xlu0 %1232  ;;  %1341 = vmatprep.subr.bf16.mxu1 %v1239_v54 }
 0x50a   : > { %v1238_v43 = vsel %vm480_vm8, %v1233_v59, %v1235_v50 }
 0x50b   : > { %1342 = vmatpush1.bf16.msra.mxu1 %v1238_v43  ;;  %v1310_v63 = vpop.permute.xlu1 %1309 }
 0x50c   : > { %1343 = vmatprep.subr.bf16.mxu1 %v1214_v60  ;;  %v1616_v60 = vld [vmem:[%s1799_s22] sm:$0xff] }
 0x50d   : > { %v1312_v1 = vpop.permute.xlu0 %1311 }
 0x50e   : > { %v1314_v38 = vsel %vm797_vm2, %v1310_v63, %v1312_v1 }
 0x50f   : > { %v1308_v3 = vpop.permute.xlu1 %1307  ;;  %1344 = vmatpush1.bf16.msra.mxu1 %v1213_v2 }
 0x510   : > { %1359 = vmatprep.subr.bf16.mxu1 %v1314_v38  ;;  %v1313_v56 = vsel %vm797_vm2, %v1308_v3, %v1310_v63 }
 0x513   : > { %1360 = vmatpush2.bf16.msra.mxu1 %v1313_v56  ;;  %v1617_v56 = vld [vmem:[%s1799_s22 + $0x8] sm:$0xff] }
 0x516   : > { %1362 = vmatmul.mubr.bf16.vlgmr.msra.gmra.mxu1 %v1573_v52 }
 0x51a   : > { %v1128_v55 = vpop.permute.xlu0 %1127 }
 0x51b   : > { %v1139_v6 = vadd.f32 %v1128_v55, %v1107_v10  ;;  %v1140_v61 = vadd.f32 %v1128_v55, %v1108_v17  ;;  %v1619_v17 = vld [vmem:[%s1799_s22 + $0x18] sm:$0xff] }
 0x51c   : > { %v1133_v25 = vpop.permute.xlu1 %1132 }
 0x51d   : > { %v1520_v27 = vmul.f32 -1.442695, %v1139_v6  ;;  %v1141_v21 = vadd.f32 %v1133_v25, %v1109_v7  ;;  %v1142_v33 = vadd.f32 %v1133_v25, %v1110_v9  ;;  %v1521_v28 = vmul.f32 -1.442695, %v1140_v61 }
 0x51e   : > { %v1381_v40 = vpop.permute.xlu0 %1380 }
 0x51f   : > { %1592 = vpow2.f32 %v1520_v27  ;;  %v1522_v30 = vmul.f32 -1.442695, %v1141_v21  ;;  %v1523_v31 = vmul.f32 -1.442695, %v1142_v33 }
 0x520   : > { %1594 = vpow2.f32 %v1521_v28  ;;  %v1386_v11 = vpop.permute.xlu1 %1385 }
 0x521   : > { %1596 = vpow2.f32 %v1522_v30 }
 0x522   : > { %1598 = vpow2.f32 %v1523_v31 }
 0x52c   : > { %v1593_v36 = vpop.eup %1592 }
 0x52d   : > { %v1595_v34 = vpop.eup %1594  ;;  %v1171_v57 = vadd.f32 1.0, %v1593_v36 }
 0x52e   : > { %v1597_v23 = vpop.eup %1596  ;;  %v1172_v16 = vadd.f32 1.0, %v1595_v34 }
 0x52f   : > { %v1599_v58 = vpop.eup %1598  ;;  %1600 = vrcp.f32 %v1171_v57  ;;  %v1173_v32 = vadd.f32 1.0, %v1597_v23 }
 0x530   : > { %v1174_v12 = vadd.f32 1.0, %v1599_v58  ;;  %1602 = vrcp.f32 %v1172_v16 }
 0x531   : > { %1604 = vrcp.f32 %v1173_v32 }
 0x532   : > { %1606 = vrcp.f32 %v1174_v12 }
 0x539   : > { %v893_v20 = vpop.f32.mrf.mxu1 }
 0x53b   : > { %v895_v22 = vpop.f32.mrf.mxu1 }
 0x53c   : > { %v1601_v15 = vpop.eup %1600 }
 0x53d   : > { %v897_v39 = vpop.f32.mrf.mxu1  ;;  %v1603_v48 = vpop.eup %1602  ;;  %v1396_v49 = vsub.f32 1.0, %v1601_v15 }
 0x53e   : > { %v1605_v50 = vpop.eup %1604  ;;  %v1397_v54 = vsub.f32 1.0, %v1603_v48 }
 0x53f   : > { %v899_v24 = vpop.f32.mrf.mxu1  ;;  %v1607_v51 = vpop.eup %1606  ;;  %v1398_v43 = vsub.f32 1.0, %v1605_v50  ;;  %v1400_v63 = vmul.f32 %v1616_v60, %v1396_v49 }
 0x540   : > { %v1399_v38 = vsub.f32 1.0, %v1607_v51  ;;  %v1401_v52 = vmul.f32 %v1617_v56, %v1397_v54 }
 0x541   : > { %v1402_v18 = vmul.f32 %v1618_v14, %v1398_v43 }
 0x542   : > { %v1403_v5 = vmul.f32 %v1619_v17, %v1399_v38 }
 0x5d6   : > { %v1363_v35 = vpop.f32.mrf.mxu1 }
 0x5d7   : > { %v1372_v37 = vadd.f32 %v1363_v35, %v893_v20 }
 0x5d8   : > { %v1365_v41 = vpop.f32.mrf.mxu1 }
 0x5d9   : > { %v1388_v42 = vadd.f32 %v1381_v40, %v1372_v37  ;;  %v1373_v44 = vadd.f32 %v1365_v41, %v895_v22 }
 0x5da   : > { %v1367_v4 = vpop.f32.mrf.mxu1 }
 0x5db   : > { %1608 = vtanh.f32 %v1388_v42  ;;  %v1389_v29 = vadd.f32 %v1381_v40, %v1373_v44  ;;  %v1374_v45 = vadd.f32 %v1367_v4, %v897_v39 }
 0x5dc   : > { %v1369_v0 = vpop.f32.mrf.mxu1 }
 0x5dd   : > { %1610 = vtanh.f32 %v1389_v29  ;;  %v1390_v26 = vadd.f32 %v1386_v11, %v1374_v45  ;;  %v1375_v46 = vadd.f32 %v1369_v0, %v899_v24 }
 0x5df   : > { %1612 = vtanh.f32 %v1390_v26  ;;  %v1391_v47 = vadd.f32 %v1386_v11, %v1375_v46 }
 0x5e1   : > { %1614 = vtanh.f32 %v1391_v47 }
 0x5e8   : > { %v1609_v59 = vpop.eup %1608 }
 0x5e9   : > { %v1404_v1 = vmul.f32 %v1609_v59, %v1601_v15 }
 0x5ea   : > { %v1611_v2 = vpop.eup %1610 }
 0x5eb   : > { %v1408_v3 = vadd.f32 %v1404_v1, %v1400_v63  ;;  %v1405_v13 = vmul.f32 %v1611_v2, %v1603_v48 }
 0x5ec   : > { %v1613_v53 = vpop.eup %1612 }
 0x5ed   : > { %1412 = vst [vmem:[%s352_s19] sm:$0xff] %v1408_v3  ;;  %v1409_v62 = vadd.f32 %v1405_v13, %v1401_v52  ;;  %v1406_v19 = vmul.f32 %v1613_v53, %v1605_v50 }
 0x5ee   : > { %v1615_v10 = vpop.eup %1614 }
 0x5ef   : > { %1413 = vst [vmem:[%s352_s19 + $0x8] sm:$0xff] %v1409_v62  ;;  %v1410_v55 = vadd.f32 %v1406_v19, %v1402_v18  ;;  %v1407_v8 = vmul.f32 %v1615_v10, %v1607_v51 }
 0x5f1   : > { %1414 = vst [vmem:[%s352_s19 + $0x10] sm:$0xff] %v1410_v55  ;;  %v1411_v7 = vadd.f32 %v1407_v8, %v1403_v5 }
 0x5f3   : > { %1415 = vst [vmem:[%s352_s19 + $0x18] sm:$0xff] %v1411_v7 }
 0x5f4 PF: > { %s19_s30 = sadd.s32 1, %s1626_s30  }
 0x5f5   : > { %p16_p4 = scmp.ge.s32.totalorder %s19_s30, 4  }
 0x5f7   :  { %18 = sbr.rel (!%p16_p4) target bundleno = 1 (0x1), region = 89 }

// kernel: e2vid_forward.7
= control target key start
LH: loop header
LB: loop body
LE: loop exit
PB: predicated region body
PF: predicated region fallthrough
CT: control target
= control target key end

     0   :  { %s3921_s0 = inlined_call_operand.vmem [shape: f32[2,4,16,64], index: 0, kind: input, shape index: {}]   ;;  %s3922_s1 = inlined_call_operand.vmem [shape: f32[2,32,64], index: 1, kind: input, shape index: {}]   ;;  %s3923_s2 = inlined_call_operand.vmem [shape: bf16[32,144], index: 2, kind: input, shape index: {}]   ;;  %s3924_s3 = inlined_call_operand.vmem [shape: f32[32,1], index: 3, kind: input, shape index: {}]   ;;  %s3925_s4 = inlined_call_operand.vmem [shape: bf16[96,288], index: 4, kind: input, shape index: {}]   ;;  %s3926_s5 = inlined_call_operand.vmem [shape: bf16[64,288], index: 5, kind: input, shape index: {}]   ;;  %s3927_s6 = inlined_call_operand.vmem [shape: f32[64,1], index: 6, kind: input, shape index: {}]   ;;  %s3928_s7 = inlined_call_operand.vmem [shape: bf16[32,288], index: 7, kind: input, shape index: {}]   ;;  %s3929_s8 = inlined_call_operand.vmem [shape: f32[32,1], index: 8, kind: input, shape index: {}]   ;;  %s3930_s9 = inlined_call_operand.vmem [shape: bf16[32,288], index: 9, kind: input, shape index: {}]   ;;  %s3931_s10 = inlined_call_operand.vmem [shape: f32[32,1], index: 10, kind: input, shape index: {}]   ;;  %s3932_s11 = inlined_call_operand.vmem [shape: bf16[32,288], index: 11, kind: input, shape index: {}]   ;;  %s3933_s12 = inlined_call_operand.vmem [shape: f32[32,1], index: 12, kind: input, shape index: {}]   ;;  %s3934_s13 = inlined_call_operand.hbm [shape: f32[2,32,64], index: 13, kind: output, shape index: {0}]   ;;  %s3935_s14 = inlined_call_operand.vmem [shape: f32[2,32,64], index: 14, kind: output, shape index: {1}]  }
   0x1   :  { %3960 = sst [smem:[#allocation11_spill]] %s3921_s0 }
   0x2   :  { %3961 = sst [smem:[#allocation12_spill]] %s3922_s1 }
   0x3   :  { %3962 = sst [smem:[#allocation13_spill]] %s3923_s2 }
   0x4   :  { %3963 = sst [smem:[#allocation14_spill]] %s3924_s3 }
   0x5   :  { %3964 = sst [smem:[#allocation15_spill]] %s3925_s4 }
   0x6   :  { %3965 = sst [smem:[#allocation16_spill]] %s3926_s5 }
   0x7   :  { %3966 = sst [smem:[#allocation17_spill]] %s3935_s14 }
   0x8   :  { %20 = vsyncpa [#allocation3], 0 }
   0x9   :  { %22 = vsyncpa [#allocation3 + $0x1], 0  ;;  %s3090_s29 = smov 0   ;;  %s3092_s30 = smov 0  }
   0xa   :  { %s3094_s15 = smov 0   ;;  %s3096_s16 = smov 0  }
   0xb LB: > { %3967 = sst [smem:[#allocation5_spill]] %s2984_s29  ;;  %s3111_s17 = sadd.s32 4294967295, %s2996_s16   ;;  %s2996_s16 = sphi %s3096_s16, %s3995_s16   ;;  %s2992_s15 = sphi %s3094_s15, %s3997_s15   ;;  %s2988_s30 = sphi %s3092_s30, %s3999_s30   ;;  %s2984_s29 = sphi %s3090_s29, %s3998_s29  }
   0xc   : > { %3968 = sst [smem:[#allocation6_spill]] %s2992_s15  ;;  %s2411_s18 = sadd.s32 4294967294, %s2996_s16  }
   0xd   : > { %3969 = sst [smem:[#allocation7_spill]] %s2996_s16  ;;  %s3115_s19 = sadd.s32 1, %s2996_s16  }
   0xe   : > { %3970 = sst [smem:[#allocation8_spill]] %s3115_s19  ;;  %s318_s20 = sadd.s32 1, %s2992_s15 }
   0xf   : > { %s315_s21 = ssub.s32 %s2996_s16, %s3115_s19  ;;  %p328_p0 = scmp.ne.s32.totalorder %s2992_s15, %s2988_s30 }
  0x10   : > { %p316_p1 = scmp.eq.s32.totalorder %s315_s21, 0  ;;  %p329_p2 = scmp.eq.s32.totalorder %s3111_s17, 1 }
  0x11   : > { %p334_p3 = scmp.ne.s32.totalorder %s2988_s30, %s2984_s29  ;;  %p335_p4 = scmp.eq.s32.totalorder %s2411_s18, 1 }
  0x12   : > { %s3126_s22 = scalar_select %p316_p1, %s2992_s15, %s318_s20  }
  0x13   : > { %p3128_p5 = por %p329_p2, %p328_p0  ;;  %p3132_p6 = por %p335_p4, %p334_p3 }
  0x14   : > { %3971 = sst [smem:[#allocation9_spill]] %s3126_s22  ;;  %p2414_p7 = scmp.ge.s32.totalorder %s2996_s16, 1 }
  0x15   : > { %s3973_s24 = scalar_select %p3132_p6, 1, 0 }
  0x16   : > { %p428_p8 = scmp.lt.s32.totalorder %s2996_s16, 3 }
  0x17   : > { %3974 = sst [smem:[#allocation10_spill]] %s3973_s24 }
  0x18   : > { %p429_p9 = pnand %p2414_p7, %p428_p8 }
  0x19   : > { %p484_p10 = scmp.lt.s32.totalorder (!%p429_p9), %s3111_s17, 1  ;;  %s3975_s0 = sld [smem:[#allocation11_spill]] (!%p429_p9) }
  0x1a   : > { %432 = sbr.rel (%p429_p9) target bundleno = 2547 (0x9f3), region = 72  ;;  %s3937_s20 = smov (!%p429_p9), 9  }
  0x1b   : > { %s3936_s21 = smov (!%p429_p9), 8   ;;  %s3942_s27 = smov (!%p429_p9), 127  }
  0x1c   : > { %s3976_s2 = sld [smem:[#allocation13_spill]] (!%p429_p9)  ;;  %s3979_s15 = smov (!%p429_p9), 9  }
  0x1d   : > { %s3977_s3 = sld [smem:[#allocation14_spill]] (!%p429_p9)  ;;  %s3004_s22 = smov (!%p429_p9), 2  }
  0x1e   : > { %s3978_s1 = sld [smem:[#allocation12_spill]] (!%p429_p9)  ;;  %s3980_s28 = smov (!%p429_p9), 120  }
  0x1f   : > { %v512_v0 = vlaneseq  ;;  %s3140_s25 = scalar_select %p484_p10, %s3111_s17, 1  ;;  %v2998_v8 = vmov 0.0   ;;  %v2999_v12 = vmov 0   ;;  %vm541_vm1 = vcmask 72704  }
  0x20   : > { %629 = vmatprep.subr.bf16.mxu0 %v2999_v12  ;;  %2821 = vset.pattern.permute.xlu1 %v2999_v12  ;;  %vm622_vm2 = vcmask 130048   ;;  %vm722_vm4 = vcmask 596992   ;;  %s3982_s4 = sld [smem:[#allocation15_spill]]  ;;  %vm896_vm5 = vcmask 261120   ;;  %vm1769_vm6 = vcmask 523264  }
  0x21   : > { %v3142_v1 = vand.u32 127, %v512_v0  ;;  %s2507_s26 = sshll.u32 %s3140_s25, 6  ;;  %2820 = vset.pattern.permute.xlu0 %v2999_v12  ;;  %s3985_s5 = sld [smem:[#allocation16_spill]] }
  0x22   : > { %s3149_s18 = scalar_lea.vmem %s3975_s0, %s2507_s26  ;;  %s3939_s26 = smov 120   ;;  %v2824_v25 = vld [vmem:[%s3976_s2 + $0x4] ss:$8 sps:$4 sm:$0xff]   ;;  %v2822_v38 = vld [vmem:[%s3976_s2] ss:$8 sps:$4 sm:$0xff]  }
  0x23   : > { %v518_v2 = vand.u32 7, %v3142_v1  ;;  %v506_v3 = vld [vmem:[%s3149_s18 + $0x30] sm:$0xff]  ;;  %v507_v4 = vld [vmem:[%s3149_s18 + $0x38] sm:$0xff]  ;;  %v504_v10 = vld [vmem:[%s3149_s18 + $0x20] sm:$0xff]  ;;  %2428 = vmatprep.mubr.msk.bf16.mxu0 %vm622_vm2, %v2824_v25 }
  0x24   : > { %v502_v5 = vld [vmem:[%s3149_s18 + $0x10] sm:$0xff]  ;;  %v3156_v6 = vpack.c.bf16 %v507_v4, %v506_v3  ;;  %v503_v7 = vld [vmem:[%s3149_s18 + $0x18] sm:$0xff]  ;;  %v505_v11 = vld [vmem:[%s3149_s18 + $0x28] sm:$0xff] }
  0x25   : > { %vm526_vm0 = vcmp.ne.s32.totalorder %v518_v2, 0  ;;  %v509_v13 = vpack.c.bf16 %v503_v7, %v502_v5  ;;  %v510_v14 = vpack.c.bf16 %v505_v11, %v504_v10  ;;  %v583_v26 = vld [vmem:[%s3977_s3 + $0x18] sm:$0xff]  ;;  %v582_v27 = vld [vmem:[%s3977_s3 + $0x10] sm:$0xff]  ;;  %v580_v28 = vld [vmem:[%s3977_s3] sm:$0xff]  ;;  %vm530_vm3 = vcmp.ne.s32.totalorder %v518_v2, 7 }
  0x26   : > { %v2422_v9 = vsel %vm526_vm0, 1.0, %v2998_v8  ;;  %539 = vrot.lane.b32.xlu0 %v3156_v6, %s3937_s20  ;;  %v581_v29 = vld [vmem:[%s3977_s3 + $0x8] sm:$0xff]  ;;  %v500_v31 = vld [vmem:[%s3149_s18] sm:$0xff]  ;;  %v2825_v39 = vld [vmem:[%s3976_s2 + $0x14] ss:$8 sps:$4 sm:$0xff]   ;;  %v2423_v54 = vsel %vm530_vm3, 1.0, %v2998_v8 }
  0x27   : > { %v3164_v15 = vpack.c.bf16 %v2422_v9, %v2422_v9  ;;  %553 = vrot.lane.b32.xlu1 %v509_v13, %s3937_s20  ;;  %630 = vmatpush1.bf16.msra.mxu0 %v510_v14  ;;  %v501_v32 = vld [vmem:[%s3149_s18 + $0x8] sm:$0xff]  ;;  %v2827_v40 = vld [vmem:[%s3976_s2 + $0x10] ss:$8 sps:$4 sm:$0xff]   ;;  %v533_v58 = vpack.c.bf16 %v2423_v54, %v2423_v54  ;;  %s3005_s18 = smov 16   ;;  %s3988_s3 = smov 110  }
  0x28   : > { %631 = vmatprep.subr.bf16.mxu0 %v2999_v12  ;;  %v508_v33 = vpack.c.bf16 %v501_v32, %v500_v31 }
  0x2a   : > { %559 = vrot.lane.b32.xlu0 %v3164_v15, %s3936_s21  ;;  %s3951_s21 = smov 111  }
  0x2b   : > { %548 = vrot.lane.b32.xlu1 %v510_v14, %s3937_s20  ;;  %s3006_s20 = smov 18  }
  0x98   : > { %v540_v16 = vpop.permute.xlu0 %539 }
  0x99   : > { %v554_v17 = vpop.permute.xlu1 %553  ;;  %v544_v19 = vsel %vm541_vm1, 0, %v540_v16 }
  0x9a   : > { %v556_v18 = vsel %vm541_vm1, 0, %v554_v17  ;;  %v546_v37 = vmul.bf16 %v544_v19, %v3164_v15 }
  0x9c   : > { %v3172_v20 = vpop.permute.xlu0 %559 }
  0x9d   : > { %v563_v21 = vmul.bf16 %v3172_v20, %v544_v19  ;;  %v562_v22 = vmul.bf16 %v3172_v20, %v556_v18  ;;  %v549_v23 = vpop.permute.xlu1 %548 }
  0x9e   : > { %v551_v24 = vsel %vm541_vm1, 0, %v549_v23 }
  0x9f   : > { %577 = vrot.lane.b32.xlu0 %v563_v21, %s3939_s26  ;;  %573 = vrot.lane.b32.xlu1 %v562_v22, %s3939_s26  ;;  %s3007_s26 = smov 10  }
  0xa3   : > { %569 = vrot.lane.b32.xlu0 %v544_v19, %s3942_s27  ;;  %565 = vrot.lane.b32.xlu1 %v551_v24, %s3942_s27  ;;  %s3944_s27 = sshll.u32 %s3140_s25, 5 }
  0xa4   : > { %s3222_s0 = scalar_lea.vmem %s3978_s1, %s3944_s27  ;;  %s3983_s27 = smov 112  }
  0xa5   : > { %v3227_v60 = vld [vmem:[%s3222_s0 + $0x10] sm:$0xff]  ;;  %v3230_v61 = vld [vmem:[%s3222_s0 + $0x18] sm:$0xff]  ;;  %v3244_v4 = vld [vmem:[%s3222_s0] sm:$0xff] }
  0xa6   : > { %v3234_v2 = vpack.c.bf16 %v3230_v61, %v3227_v60  ;;  %v3247_v5 = vld [vmem:[%s3222_s0 + $0x8] sm:$0xff] }
  0xa7   : > { %601 = vperm.xlu1 %2821, %v583_v26   ;;  %596 = vperm.xlu0 %2820, %v582_v27  }
  0xab   : > { %586 = vperm.xlu1 %2821, %v580_v28   ;;  %591 = vperm.xlu0 %2820, %v581_v29   ;;  %v2830_v28 = vld [vmem:[%s3982_s4 + $0x4] ss:$12 sps:$4 sm:$0xff]  }
  0xac   : > { %947 = vmatprep.mubr.bf16.mxu1 %v2830_v28 }
 0x111   : > { %v578_v30 = vpop.permute.xlu0 %577  ;;  %v574_v34 = vpop.permute.xlu1 %573 }
 0x112   : > { %632 = vmatpush1.bf16.msra.mxu0 %v578_v30 }
 0x113   : > { %633 = vmatprep.subr.bf16.mxu0 %v2999_v12 }
 0x115   : > { %v570_v35 = vpop.permute.xlu0 %569  ;;  %v566_v36 = vpop.permute.xlu1 %565 }
 0x116   : > { %634 = vmatpush1.bf16.msra.mxu0 %v509_v13 }
 0x117   : > { %635 = vmatprep.subr.bf16.mxu0 %v2999_v12 }
 0x11a   : > { %636 = vmatpush1.bf16.msra.mxu0 %v508_v33 }
 0x11b   : > { %637 = vmatprep.subr.bf16.mxu0 %v2999_v12 }
 0x11e   : > { %638 = vmatpush1.bf16.msra.mxu0 %v574_v34 }
 0x11f   : > { %639 = vmatprep.subr.bf16.mxu0 %v2999_v12 }
 0x122   : > { %640 = vmatpush1.bf16.msra.mxu0 %v570_v35  ;;  %v602_v41 = vpop.permute.xlu1 %601  ;;  %v597_v42 = vpop.permute.xlu0 %596 }
 0x123   : > { %641 = vmatprep.subr.bf16.mxu0 %v2999_v12 }
 0x126   : > { %642 = vmatpush1.bf16.msra.mxu0 %v566_v36  ;;  %v587_v43 = vpop.permute.xlu1 %586  ;;  %v592_v46 = vpop.permute.xlu0 %591 }
 0x127   : > { %643 = vmatprep.subr.bf16.mxu0 %v2999_v12 }
 0x12a   : > { %644 = vmatpush1.bf16.msra.mxu0 %v546_v37  ;;  %v2834_v37 = vld [vmem:[%s3982_s4 + $0x8] ss:$12 sps:$4 sm:$0xff]  }
 0x12b   : > { %659 = vmatprep.subr.bf16.mxu0 %v2999_v12 }
 0x12e   : > { %660 = vmatpush2.bf16.msra.mxu0 %v3156_v6  ;;  %v3251_v6 = vpack.c.bf16 %v3247_v5, %v3244_v4 }
 0x131   : > { %662 = vmatmul.mubr.bf16.vlgmr.msra.gmra.mxu0 %v2822_v38 }
 0x132   : > { %2429 = vmatprep.mubr.msk.bf16.mxu0 %vm622_vm2, %v2825_v39 }
 0x139   : > { %670 = vmatmul.mubr.bf16.gmra.mxu0 %v2827_v40 }
 0x13a   : > { %2717 = vmatprep.mubr.msk.bf16.mxu0 %vm896_vm5, %v2834_v37  ;;  %v2842_v37 = vld [vmem:[%s3982_s4 + $0x50] ss:$12 sps:$4 sm:$0xff]  }
 0x1f1   : > { %v663_v44 = vpop.f32.mrf.mxu0 }
 0x1f2   : > { %v664_v47 = vadd.f32 %v663_v44, %v587_v43 }
 0x1f3   : > { %v665_v45 = vpop.f32.mrf.mxu0 }
 0x1f4   : > { %v678_v51 = vmax.f32 %v664_v47, 0.0  ;;  %v1387_v47 = vld [vmem:[%s3927_s6 + $0x10] sm:$0xff] }
 0x1f5   : > { %v666_v48 = vpop.f32.mrf.mxu0 }
 0x1f6   : > { %v667_v49 = vadd.f32 %v666_v48, %v592_v46  ;;  %v1388_v48 = vld [vmem:[%s3927_s6 + $0x18] sm:$0xff] }
 0x1f7   : > { %v668_v50 = vpop.f32.mrf.mxu0 }
 0x1f8   : > { %v679_v52 = vmax.f32 %v667_v49, 0.0  ;;  %v1385_v49 = vld [vmem:[%s3927_s6] sm:$0xff]  ;;  %v1386_v50 = vld [vmem:[%s3927_s6 + $0x8] sm:$0xff] }
 0x1f9   : > { %v671_v53 = vpop.f32.mrf.mxu0 }
 0x1fa   : > { %v3215_v55 = vpack.c.bf16 %v679_v52, %v678_v51  ;;  %v672_v57 = vadd.f32 %v671_v53, %v597_v42 }
 0x1fb   : > { %v673_v56 = vpop.f32.mrf.mxu0 }
 0x1fc   : > { %714 = vrot.lane.b32.xlu0 %v3215_v55, %s3979_s15  ;;  %v680_v0 = vmax.f32 %v672_v57, 0.0 }
 0x1fd   : > { %v674_v59 = vpop.f32.mrf.mxu0 }
 0x1fe   : > { %v675_v62 = vadd.f32 %v674_v59, %v602_v41 }
 0x1ff   : > { %v676_v63 = vpop.f32.mrf.mxu0 }
 0x200   : > { %v681_v1 = vmax.f32 %v675_v62, 0.0  ;;  %730 = vrot.lane.b32.xlu0 %v533_v58, %s3004_s22  ;;  %s3945_s22 = smov 112  }
 0x202   : > { %v3236_v3 = vpack.c.bf16 %v681_v1, %v680_v0 }
 0x204   : > { %716 = vrot.lane.b32.xlu1 %v3236_v3, %s3979_s15  ;;  %1099 = vrot.lane.b32.xlu0 %v3234_v2, %s3979_s15 }
 0x208   : > { %742 = vrot.lane.b32.xlu1 %v3164_v15, %s3005_s18  ;;  %747 = vrot.lane.b32.xlu0 %v533_v58, %s3006_s20  ;;  %s3949_s18 = smov 126   ;;  %s3947_s20 = smov 118  }
 0x20c   : > { %737 = vrot.lane.b32.xlu1 %v533_v58, %s3007_s26  ;;  %s3981_s26 = smov 127  }
 0x210   : > { %1097 = vrot.lane.b32.xlu1 %v3251_v6, %s3979_s15 }
 0x26e   : > { %v715_v7 = vpop.permute.xlu0 %714 }
 0x26f   : > { %v719_v9 = vsel %vm541_vm1, 0, %v715_v7 }
 0x270   : > { %v3265_v13 = vsel %vm722_vm4, %v719_v9, 0 }
 0x271   : > { %v735_v16 = vmul.bf16 %v3265_v13, %v3172_v20 }
 0x272   : > { %v3277_v18 = vpop.permute.xlu0 %730 }
 0x273   : > { %v733_v23 = vmul.bf16 %v3277_v18, %v3265_v13 }
 0x276   : > { %v717_v8 = vpop.permute.xlu1 %716  ;;  %v1100_v25 = vpop.permute.xlu0 %1099 }
 0x277   : > { %v721_v10 = vsel %vm541_vm1, 0, %v717_v8  ;;  %v1104_v26 = vsel %vm541_vm1, 0, %v1100_v25 }
 0x278   : > { %v3258_v11 = vsel %vm722_vm4, %v721_v10, 0  ;;  %v3304_v30 = vsel %vm722_vm4, %v1104_v26, 0 }
 0x279   : > { %794 = vrot.lane.b32.xlu1 %v3258_v11, %s3951_s21  ;;  %v736_v12 = vmul.bf16 %v3258_v11, %v3172_v20  ;;  %v734_v19 = vmul.bf16 %v3277_v18, %v3258_v11  ;;  %v1114_v32 = vmul.bf16 %v3304_v30, %v3172_v20  ;;  %v1112_v36 = vmul.bf16 %v3304_v30, %v3277_v18 }
 0x27a   : > { %v3268_v14 = vpop.permute.xlu1 %742  ;;  %v3333_v39 = vpop.permute.xlu0 %747  ;;  %v728_v8 = vmul.bf16 %v3258_v11, %v3164_v15 }
 0x27b   : > { %772 = vrot.lane.b32.xlu0 %v736_v12, %s3980_s28  ;;  %v746_v17 = vmul.bf16 %v3268_v14, %v3258_v11  ;;  %v745_v21 = vmul.bf16 %v3268_v14, %v3265_v13  ;;  %v1118_v35 = vmul.bf16 %v3304_v30, %v3268_v14  ;;  %v751_v41 = vmul.bf16 %v3333_v39, %v3258_v11 }
 0x27c   : > { %v750_v42 = vmul.bf16 %v3333_v39, %v3265_v13  ;;  %v1120_v45 = vmul.bf16 %v3304_v30, %v3333_v39  ;;  %v727_v12 = vmul.bf16 %v3265_v13, %v3164_v15 }
 0x27d   : > { %792 = vrot.lane.b32.xlu1 %v3265_v13, %s3951_s21 }
 0x27e   : > { %v3285_v22 = vpop.permute.xlu1 %737 }
 0x27f   : > { %770 = vrot.lane.b32.xlu0 %v735_v16, %s3980_s28  ;;  %v741_v24 = vmul.bf16 %v3285_v22, %v3258_v11  ;;  %v740_v27 = vmul.bf16 %v3285_v22, %v3265_v13  ;;  %v1116_v43 = vmul.bf16 %v3304_v30, %v3285_v22 }
 0x281   : > { %788 = vrot.lane.b32.xlu1 %v746_v17, %s3945_s22  ;;  %v2828_v17 = vld [vmem:[%s3982_s4] ss:$12 sps:$4 sm:$0xff]  }
 0x282   : > { %v1098_v29 = vpop.permute.xlu1 %1097 }
 0x283   : > { %764 = vrot.lane.b32.xlu0 %v734_v19, %s3949_s18  ;;  %v1102_v31 = vsel %vm541_vm1, 0, %v1098_v29  ;;  %v2838_v29 = vld [vmem:[%s3982_s4 + $0x30] ss:$12 sps:$4 sm:$0xff]  }
 0x284   : > { %v3314_v33 = vsel %vm722_vm4, %v1102_v31, 0  ;;  %v2839_v31 = vld [vmem:[%s3982_s4 + $0x38] ss:$12 sps:$4 sm:$0xff]  }
 0x285   : > { %786 = vrot.lane.b32.xlu1 %v745_v21, %s3945_s22  ;;  %v1113_v34 = vmul.bf16 %v3314_v33, %v3172_v20  ;;  %v1111_v38 = vmul.bf16 %v3314_v33, %v3277_v18  ;;  %v1117_v40 = vmul.bf16 %v3314_v33, %v3268_v14  ;;  %s3984_s22 = smov 118   ;;  %v1115_v44 = vmul.bf16 %v3314_v33, %v3285_v22 }
 0x286   : > { %v1119_v46 = vmul.bf16 %v3314_v33, %v3333_v39 }
 0x287   : > { %762 = vrot.lane.b32.xlu0 %v733_v23, %s3949_s18 }
 0x289   : > { %780 = vrot.lane.b32.xlu1 %v741_v24, %s3947_s20  ;;  %v2835_v24 = vld [vmem:[%s3982_s4 + $0x34] ss:$12 sps:$4 sm:$0xff]  }
 0x28b   : > { %756 = vrot.lane.b32.xlu0 %v3258_v11, %s3981_s26 }
 0x28d   : > { %778 = vrot.lane.b32.xlu1 %v740_v27, %s3947_s20  ;;  %s3957_s20 = smov 110   ;;  %v2837_v27 = vld [vmem:[%s3982_s4 + $0x20] ss:$12 sps:$4 sm:$0xff]  }
 0x28f   : > { %754 = vrot.lane.b32.xlu0 %v3265_v13, %s3981_s26  ;;  %v2833_v13 = vld [vmem:[%s3982_s4 + $0x18] ss:$12 sps:$4 sm:$0xff]  }
 0x291   : > { %1163 = vrot.lane.b32.xlu1 %v3304_v30, %s3951_s21 }
 0x293   : > { %1141 = vrot.lane.b32.xlu0 %v1114_v32, %s3980_s28  ;;  %v2840_v32 = vld [vmem:[%s3982_s4 + $0x4c] ss:$12 sps:$4 sm:$0xff]  }
 0x295   : > { %1161 = vrot.lane.b32.xlu1 %v3314_v33, %s3951_s21 }
 0x297   : > { %1139 = vrot.lane.b32.xlu0 %v1113_v34, %s3980_s28 }
 0x299   : > { %1157 = vrot.lane.b32.xlu1 %v1118_v35, %s3983_s27 }
 0x29b   : > { %1133 = vrot.lane.b32.xlu0 %v1112_v36, %s3949_s18 }
 0x29d   : > { %1131 = vrot.lane.b32.xlu1 %v1111_v38, %s3949_s18  ;;  %s474_s18 = sand.u32 1, %s2988_s30  }
 0x29e   : > { %s2415_s1 = sshll.u32 %s474_s18, 5 }
 0x29f   : > { %1155 = vrot.lane.b32.xlu0 %v1117_v40, %s3983_s27  ;;  %v2843_v40 = vld [vmem:[%s3982_s4 + $0x48] ss:$12 sps:$4 sm:$0xff]  }
 0x2a1   : > { %802 = vrot.lane.b32.xlu1 %v751_v41, %s3957_s20  ;;  %v2844_v41 = vld [vmem:[%s3982_s4 + $0x64] ss:$12 sps:$4 sm:$0xff]  }
 0x2a3   : > { %800 = vrot.lane.b32.xlu0 %v750_v42, %s3957_s20  ;;  %v2847_v42 = vld [vmem:[%s3982_s4 + $0x68] ss:$12 sps:$4 sm:$0xff]  }
 0x2a5   : > { %1149 = vrot.lane.b32.xlu1 %v1116_v43, %s3984_s22  ;;  %v1110_v43 = vmul.bf16 %v3304_v30, %v3164_v15 }
 0x2a7   : > { %1125 = vrot.lane.b32.xlu0 %v3304_v30, %s3981_s26  ;;  %v2855_v30 = vld [vmem:[%s3985_s5 + $0x8] ss:$12 sps:$4 sm:$0xff]  }
 0x2a9   : > { %1147 = vrot.lane.b32.xlu1 %v1115_v44, %s3984_s22  ;;  %v2848_v44 = vld [vmem:[%s3982_s4 + $0x80] ss:$12 sps:$4 sm:$0xff]  }
 0x2ab   : > { %1123 = vrot.lane.b32.xlu0 %v3314_v33, %s3981_s26 }
 0x2ad   : > { %1171 = vrot.lane.b32.xlu1 %v1120_v45, %s3957_s20  ;;  %v2846_v45 = vld [vmem:[%s3982_s4 + $0x60] ss:$12 sps:$4 sm:$0xff]  }
 0x2af   : > { %1169 = vrot.lane.b32.xlu0 %v1119_v46, %s3957_s20  ;;  %v2851_v46 = vld [vmem:[%s3982_s4 + $0x78] ss:$12 sps:$4 sm:$0xff]   ;;  %s3987_s20 = smov 126  }
 0x2b1   : > { %1405 = vperm.xlu1 %2821, %v1387_v47   ;;  %v2863_v47 = vld [vmem:[%s3985_s5 + $0x38] ss:$12 sps:$4 sm:$0xff]  }
 0x2b3   : > { %1410 = vperm.xlu0 %2820, %v1388_v48   ;;  %v2854_v48 = vld [vmem:[%s3985_s5 + $0x4] ss:$12 sps:$4 sm:$0xff]  }
 0x2b5   : > { %1395 = vperm.xlu1 %2821, %v1385_v49   ;;  %v2864_v49 = vld [vmem:[%s3985_s5 + $0x50] ss:$12 sps:$4 sm:$0xff]  }
 0x2b7   : > { %1400 = vperm.xlu0 %2820, %v1386_v50   ;;  %v2852_v50 = vld [vmem:[%s3985_s5] ss:$12 sps:$4 sm:$0xff]  }
 0x2eb   : > { %v795_v51 = vpop.permute.xlu1 %794 }
 0x2ec   : > { %2511 = vmatprep.subr.bf16.mxu1 %v795_v51  ;;  %v2857_v51 = vld [vmem:[%s3985_s5 + $0x1c] ss:$12 sps:$4 sm:$0xff]  }
 0x2ed   : > { %v773_v52 = vpop.permute.xlu0 %772 }
 0x2ee   : > { %2512 = vmatpush3.bf16.msra.mxu1 %v773_v52  ;;  %v2859_v52 = vld [vmem:[%s3985_s5 + $0x18] ss:$12 sps:$4 sm:$0xff]  }
 0x2ef   : > { %v793_v53 = vpop.permute.xlu1 %792 }
 0x2f0   : > { %2513 = vmatprep.subr.bf16.mxu1 %v793_v53  ;;  %v2860_v53 = vld [vmem:[%s3985_s5 + $0x34] ss:$12 sps:$4 sm:$0xff]  }
 0x2f1   : > { %v771_v54 = vpop.permute.xlu0 %770 }
 0x2f2   : > { %2514 = vmatpush3.bf16.msra.mxu1 %v771_v54  ;;  %v2862_v54 = vld [vmem:[%s3985_s5 + $0x30] ss:$12 sps:$4 sm:$0xff]  }
 0x2f3   : > { %v789_v56 = vpop.permute.xlu1 %788 }
 0x2f4   : > { %2515 = vmatprep.subr.bf16.mxu1 %v789_v56  ;;  %v2865_v56 = vld [vmem:[%s3985_s5 + $0x4c] ss:$12 sps:$4 sm:$0xff]  }
 0x2f5   : > { %v765_v57 = vpop.permute.xlu0 %764 }
 0x2f6   : > { %2516 = vmatpush3.bf16.msra.mxu1 %v765_v57  ;;  %v2867_v57 = vld [vmem:[%s3985_s5 + $0x48] ss:$12 sps:$4 sm:$0xff]  }
 0x2f7   : > { %v787_v58 = vpop.permute.xlu1 %786 }
 0x2f8   : > { %2517 = vmatprep.subr.bf16.mxu1 %v787_v58 }
 0x2f9   : > { %v763_v59 = vpop.permute.xlu0 %762 }
 0x2fa   : > { %2518 = vmatpush3.bf16.msra.mxu1 %v763_v59 }
 0x2fb   : > { %v781_v62 = vpop.permute.xlu1 %780 }
 0x2fc   : > { %2519 = vmatprep.subr.bf16.mxu1 %v781_v62 }
 0x2fd   : > { %v757_v63 = vpop.permute.xlu0 %756 }
 0x2fe   : > { %2520 = vmatpush3.bf16.msra.mxu1 %v757_v63 }
 0x2ff   : > { %v779_v0 = vpop.permute.xlu1 %778 }
 0x300   : > { %2521 = vmatprep.subr.bf16.mxu1 %v779_v0 }
 0x301   : > { %v755_v1 = vpop.permute.xlu0 %754 }
 0x302   : > { %2522 = vmatpush3.bf16.msra.mxu1 %v755_v1 }
 0x303   : > { %v1164_v7 = vpop.permute.xlu1 %1163  ;;  %2523 = vmatprep.subr.bf16.mxu1 %v3236_v3  ;;  %v2831_v3 = vld [vmem:[%s3982_s4 + $0x1c] ss:$12 sps:$4 sm:$0xff]  }
 0x305   : > { %v1142_v9 = vpop.permute.xlu0 %1141 }
 0x306   : > { %2524 = vmatpush3.bf16.msra.mxu1 %v728_v8 }
 0x307   : > { %v1162_v10 = vpop.permute.xlu1 %1161  ;;  %2525 = vmatprep.subr.bf16.mxu1 %v3215_v55 }
 0x309   : > { %v1140_v16 = vpop.permute.xlu0 %1139 }
 0x30a   : > { %2526 = vmatpush3.bf16.msra.mxu1 %v727_v12 }
 0x30b   : > { %v1158_v19 = vpop.permute.xlu1 %1157  ;;  %2571 = vmatprep.subr.bf16.mxu1 %v1164_v7 }
 0x30d   : > { %948 = vmatmul.mubr.bf16.vlgmr.msra.gmra.mxu1 %v2828_v17  ;;  %v1134_v11 = vpop.permute.xlu0 %1133 }
 0x30e   : > { %2572 = vmatpush3.bf16.msra.mxu1 %v1142_v9  ;;  %955 = vmatprep.mubr.bf16.mxu1 %v2831_v3 }
 0x30f   : > { %v1132_v55 = vpop.permute.xlu1 %1131  ;;  %2573 = vmatprep.subr.bf16.mxu1 %v1162_v10 }
 0x311   : > { %v1156_v21 = vpop.permute.xlu0 %1155 }
 0x312   : > { %2574 = vmatpush3.bf16.msra.mxu1 %v1140_v16 }
 0x313   : > { %v803_v23 = vpop.permute.xlu1 %802  ;;  %2575 = vmatprep.subr.bf16.mxu1 %v1158_v19 }
 0x314   : > { %2713 = vmatprep.subr.bf16.mxu0 %v803_v23 }
 0x315   : > { %956 = vmatmul.mubr.bf16.gmra.mxu1 %v2833_v13  ;;  %2714 = vmatpush3.bf16.msra.mxu0 %v803_v23  ;;  %v801_v25 = vpop.permute.xlu0 %800 }
 0x316   : > { %2715 = vmatprep.subr.bf16.mxu0 %v801_v25  ;;  %2576 = vmatpush3.bf16.msra.mxu1 %v1134_v11 }
 0x317   : > { %v1150_v26 = vpop.permute.xlu1 %1149  ;;  %2577 = vmatprep.subr.bf16.mxu1 %v1156_v21  ;;  %963 = vmatprep.mubr.bf16.mxu1 %v2835_v24 }
 0x319   : > { %2716 = vmatpush3.bf16.msra.mxu0 %v801_v25  ;;  %v1126_v28 = vpop.permute.xlu0 %1125 }
 0x31a   : > { %2578 = vmatpush3.bf16.msra.mxu1 %v1132_v55 }
 0x31b   : > { %v1148_v34 = vpop.permute.xlu1 %1147  ;;  %2579 = vmatprep.subr.bf16.mxu1 %v1150_v26 }
 0x31c   : > { %2718 = vmatmul.mubr.msk.bf16.vlgmr.msra.gmra.mxu0 %vm896_vm5, %v2837_v27 }
 0x31d   : > { %964 = vmatmul.mubr.bf16.gmra.mxu1 %v2838_v29  ;;  %v1124_v35 = vpop.permute.xlu0 %1123  ;;  %2721 = vmatprep.mubr.msk.bf16.mxu0 %vm896_vm5, %v2839_v31 }
 0x31e   : > { %2580 = vmatpush3.bf16.msra.mxu1 %v1126_v28  ;;  %971 = vmatprep.mubr.bf16.mxu1 %v2840_v32 }
 0x31f   : > { %v1172_v36 = vpop.permute.xlu1 %1171  ;;  %2581 = vmatprep.subr.bf16.mxu1 %v1148_v34 }
 0x320   : > { %2729 = vmatprep.subr.bf16.mxu0 %v1172_v36 }
 0x321   : > { %2730 = vmatpush3.bf16.msra.mxu0 %v1172_v36  ;;  %v1170_v38 = vpop.permute.xlu0 %1169 }
 0x322   : > { %2582 = vmatpush3.bf16.msra.mxu1 %v1124_v35  ;;  %2731 = vmatprep.subr.bf16.mxu0 %v1170_v38 }
 0x323   : > { %2583 = vmatprep.subr.bf16.mxu1 %v3234_v2  ;;  %v1109_v2 = vmul.bf16 %v3314_v33, %v3164_v15  ;;  %v2856_v33 = vld [vmem:[%s3985_s5 + $0x20] ss:$12 sps:$4 sm:$0xff]   ;;  %s3642_s5 = scalar_lea.vmem [#allocation2], %s2415_s1 }
 0x324   : > { %2722 = vmatmul.mubr.msk.bf16.gmra.mxu0 %vm896_vm5, %v2842_v37 }
 0x325   : > { %972 = vmatmul.mubr.bf16.gmra.mxu1 %v2843_v40  ;;  %2732 = vmatpush3.bf16.msra.mxu0 %v1170_v38 }
 0x326   : > { %2584 = vmatpush3.bf16.msra.mxu1 %v1110_v43  ;;  %979 = vmatprep.mubr.bf16.mxu1 %v2844_v41 }
 0x327   : > { %2585 = vmatprep.subr.bf16.mxu1 %v3251_v6  ;;  %2725 = vmatprep.mubr.msk.bf16.mxu0 %vm896_vm5, %v2847_v42  ;;  %v2849_v6 = vld [vmem:[%s3982_s4 + $0x7c] ss:$12 sps:$4 sm:$0xff]   ;;  %s3986_s4 = smov 111  }
 0x32a   : > { %2586 = vmatpush3.bf16.msra.mxu1 %v1109_v2 }
 0x32c   : > { %2726 = vmatmul.mubr.msk.bf16.gmra.mxu0 %vm896_vm5, %v2848_v44 }
 0x32d   : > { %980 = vmatmul.mubr.bf16.gmra.mxu1 %v2846_v45  ;;  %2733 = vmatprep.mubr.msk.bf16.mxu0 %vm896_vm5, %v2855_v30 }
 0x32e   : > { %987 = vmatprep.mubr.bf16.mxu1 %v2849_v6 }
 0x334   : > { %2734 = vmatmul.mubr.msk.bf16.vlgmr.msra.gmra.mxu0 %vm896_vm5, %v2856_v33 }
 0x335   : > { %988 = vmatmul.mubr.bf16.gmra.mxu1 %v2851_v46  ;;  %2737 = vmatprep.mubr.msk.bf16.mxu0 %vm896_vm5, %v2863_v47 }
 0x336   : > { %1279 = vmatprep.mubr.bf16.mxu1 %v2854_v48 }
 0x33c   : > { %2738 = vmatmul.mubr.msk.bf16.gmra.mxu0 %vm896_vm5, %v2864_v49 }
 0x33d   : > { %1280 = vmatmul.mubr.bf16.vlgmr.msra.gmra.mxu1 %v2852_v50 }
 0x33e   : > { %1287 = vmatprep.mubr.bf16.mxu1 %v2857_v51 }
 0x345   : > { %1288 = vmatmul.mubr.bf16.gmra.mxu1 %v2859_v52 }
 0x346   : > { %1295 = vmatprep.mubr.bf16.mxu1 %v2860_v53 }
 0x34d   : > { %1296 = vmatmul.mubr.bf16.gmra.mxu1 %v2862_v54 }
 0x34e   : > { %1303 = vmatprep.mubr.bf16.mxu1 %v2865_v56 }
 0x355   : > { %1304 = vmatmul.mubr.bf16.gmra.mxu1 %v2867_v57 }
 0x3cd   : > { %v2527_v58 = vpop.f32.mrf.mxu1 }
 0x3cf   : > { %v2528_v59 = vpop.f32.mrf.mxu1 }
 0x3d1   : > { %v3479_v62 = vpop.f32.mrf.mxu1 }
 0x3d3   : > { %v3481_v63 = vpop.f32.mrf.mxu1 }
 0x3d5   : > { %v3483_v0 = vpop.f32.mrf.mxu1 }
 0x3d7   : > { %v3485_v1 = vpop.f32.mrf.mxu1 }
 0x3d9   : > { %v3487_v7 = vpop.f32.mrf.mxu1 }
 0x3db   : > { %v3489_v8 = vpop.f32.mrf.mxu1 }
 0x3dc   : > { %v3491_v9 = vpop.f32.mrf.mxu0 }
 0x3dd   : > { %v2539_v10 = vpop.f32.mrf.mxu1 }
 0x3de   : > { %v1030_v12 = vpop.f32.mrf.mxu0 }
 0x3df   : > { %v2540_v16 = vpop.f32.mrf.mxu1 }
 0x3e0   : > { %v2541_v17 = vadd.f32 %v2540_v16, %v2539_v10  ;;  %v3493_v3 = vpop.f32.mrf.mxu0  ;;  %v1406_v10 = vpop.permute.xlu1 %1405 }
 0x3e1   : > { %v2542_v19 = vpop.f32.mrf.mxu1 }
 0x3e2   : > { %v1033_v11 = vpop.f32.mrf.mxu0 }
 0x3e3   : > { %v2543_v55 = vpop.f32.mrf.mxu1 }
 0x3e4   : > { %v2544_v21 = vadd.f32 %v2543_v55, %v2542_v19  ;;  %v2723_v13 = vpop.f32.mrf.mxu0  ;;  %v2529_v55 = vadd.f32 %v2528_v59, %v2527_v58  ;;  %v2535_v58 = vadd.f32 %v3485_v1, %v3483_v0 }
 0x3e5   : > { %v2545_v23 = vpop.f32.mrf.mxu1 }
 0x3e6   : > { %v1046_v24 = vpop.f32.mrf.mxu0 }
 0x3e7   : > { %v3495_v25 = vadd.f32 %v2541_v17, %v1046_v24  ;;  %v2546_v26 = vpop.f32.mrf.mxu1  ;;  %v1031_v24 = vadd.f32 %v2529_v55, %v1030_v12 }
 0x3e8   : > { %v2547_v27 = vadd.f32 %v2546_v26, %v2545_v23  ;;  %v2724_v28 = vpop.f32.mrf.mxu0  ;;  %v1411_v23 = vpop.permute.xlu0 %1410 }
 0x3e9   : > { %v2548_v29 = vpop.f32.mrf.mxu1 }
 0x3ea   : > { %v3497_v31 = vadd.f32 %v2723_v13, %v2547_v27  ;;  %v1049_v32 = vpop.f32.mrf.mxu0 }
 0x3eb   : > { %v3499_v34 = vadd.f32 %v2544_v21, %v1049_v32  ;;  %v2549_v35 = vpop.f32.mrf.mxu1 }
 0x3ec   : > { %v2550_v36 = vadd.f32 %v2549_v35, %v2548_v29  ;;  %v2727_v37 = vpop.f32.mrf.mxu0  ;;  %v2532_v29 = vadd.f32 %v3481_v63, %v3479_v62 }
 0x3ed   : > { %v2551_v38 = vpop.f32.mrf.mxu1 }
 0x3ee   : > { %v3501_v40 = vadd.f32 %v2724_v28, %v2550_v36  ;;  %v1062_v41 = vpop.f32.mrf.mxu0  ;;  %v1396_v36 = vpop.permute.xlu1 %1395 }
 0x3ef   : > { %v2552_v42 = vpop.f32.mrf.mxu1 }
 0x3f0   : > { %v2553_v43 = vadd.f32 %v2552_v42, %v2551_v38  ;;  %v2728_v2 = vpop.f32.mrf.mxu0  ;;  %v1034_v38 = vadd.f32 %v2532_v29, %v1033_v11  ;;  %v2538_v11 = vadd.f32 %v3489_v8, %v3487_v7 }
 0x3f1   : > { %v2554_v44 = vpop.f32.mrf.mxu1 }
 0x3f2   : > { %v3503_v45 = vadd.f32 %v2553_v43, %v1062_v41  ;;  %v1065_v6 = vpop.f32.mrf.mxu0 }
 0x3f3   : > { %v2555_v30 = vpop.f32.mrf.mxu1 }
 0x3f4   : > { %v2556_v33 = vadd.f32 %v2555_v30, %v2554_v44  ;;  %v2735_v49 = vpop.f32.mrf.mxu0  ;;  %v1401_v44 = vpop.permute.xlu0 %1400 }
 0x3f5   : > { %v2557_v46 = vpop.f32.mrf.mxu1 }
 0x3f6   : > { %v3505_v47 = vadd.f32 %v2556_v33, %v1065_v6  ;;  %v1346_v54 = vpop.f32.mrf.mxu0  ;;  %v1039_v6 = vadd.f32 %v3491_v9, %v2535_v58 }
 0x3f7   : > { %v2558_v48 = vpop.f32.mrf.mxu1 }
 0x3f8   : > { %v2559_v50 = vadd.f32 %v2558_v48, %v2557_v46  ;;  %v2736_v19 = vpop.f32.mrf.mxu0 }
 0x3f9   : > { %v2560_v51 = vpop.f32.mrf.mxu1 }
 0x3fa   : > { %v3507_v52 = vadd.f32 %v2727_v37, %v2559_v50  ;;  %v1349_v28 = vpop.f32.mrf.mxu0 }
 0x3fb   : > { %v2561_v53 = vpop.f32.mrf.mxu1 }
 0x3fc   : > { %v2562_v56 = vadd.f32 %v2561_v53, %v2560_v51  ;;  %v1042_v51 = vadd.f32 %v3493_v3, %v2538_v11  ;;  %v1390_v11 = vld [vmem:[%s3927_s6 + $0x28] sm:$0xff] }
 0x3fd   : > { %v2587_v57 = vpop.f32.mrf.mxu1 }
 0x3fe   : > { %v3509_v16 = vadd.f32 %v2728_v2, %v2562_v56 }
 0x3ff   : > { %v2588_v17 = vpop.f32.mrf.mxu1 }
 0x400   : > { %v2589_v21 = vadd.f32 %v2588_v17, %v2587_v57 }
 0x401   : > { %v2590_v13 = vpop.f32.mrf.mxu1 }
 0x402   : > { %v1347_v26 = vadd.f32 %v2589_v21, %v1346_v54 }
 0x403   : > { %v2591_v27 = vpop.f32.mrf.mxu1 }
 0x404   : > { %v1377_v32 = vadd.f32 %v1347_v26, %v1031_v24  ;;  %v2592_v35 = vadd.f32 %v2591_v27, %v2590_v13 }
 0x405   : > { %v2593_v37 = vpop.f32.mrf.mxu1 }
 0x406   : > { %v1433_v41 = vadd.f32 %v1396_v36, %v1377_v32  ;;  %v1350_v42 = vadd.f32 %v2592_v35, %v1349_v28 }
 0x407   : > { %v2594_v43 = vpop.f32.mrf.mxu1 }
 0x408   : > { %v2470_v59 = vmul.f32 -1.442695, %v1433_v41  ;;  %v1378_v2 = vadd.f32 %v1350_v42, %v1034_v38  ;;  %v2595_v12 = vadd.f32 %v2594_v43, %v2593_v37 }
 0x409   : > { %v2596_v30 = vpop.f32.mrf.mxu1 }
 0x40a   : > { %2892 = vpow2.f32 %v2470_v59  ;;  %v1434_v62 = vadd.f32 %v1401_v44, %v1378_v2  ;;  %v1355_v63 = vadd.f32 %v2735_v49, %v2595_v12  ;;  %v2870_v2 = vld [vmem:[%s3928_s7 + $0x4] ss:$12 sps:$4 sm:$0xff]   ;;  %v2871_v44 = vld [vmem:[%s3928_s7 + $0x8] ss:$12 sps:$4 sm:$0xff]  }
 0x40b   : > { %v2597_v33 = vpop.f32.mrf.mxu1  ;;  %1651 = vmatprep.mubr.bf16.mxu0 %v2870_v2  ;;  %2745 = vmatprep.mubr.msk.bf16.mxu1 %vm896_vm5, %v2871_v44 }
 0x40c   : > { %v2471_v46 = vmul.f32 -1.442695, %v1434_v62  ;;  %v1379_v48 = vadd.f32 %v1355_v63, %v1039_v6  ;;  %v2598_v50 = vadd.f32 %v2597_v33, %v2596_v30  ;;  %v1391_v62 = vld [vmem:[%s3927_s6 + $0x30] sm:$0xff]  ;;  %v1392_v63 = vld [vmem:[%s3927_s6 + $0x38] sm:$0xff]  ;;  %v1389_v33 = vld [vmem:[%s3927_s6 + $0x20] sm:$0xff] }
 0x40e   : > { %2894 = vpow2.f32 %v2471_v46  ;;  %v1435_v0 = vadd.f32 %v1406_v10, %v1379_v48  ;;  %v1358_v1 = vadd.f32 %v2736_v19, %v2598_v50  ;;  %v1723_v46 = vld [vmem:[%s3929_s8 + $0x10] sm:$0xff]  ;;  %v1724_v48 = vld [vmem:[%s3929_s8 + $0x18] sm:$0xff]  ;;  %v1721_v50 = vld [vmem:[%s3929_s8] sm:$0xff] }
 0x410   : > { %v2472_v53 = vmul.f32 -1.442695, %v1435_v0  ;;  %v1380_v54 = vadd.f32 %v1358_v1, %v1042_v51  ;;  %v1722_v51 = vld [vmem:[%s3929_s8 + $0x8] sm:$0xff] }
 0x412   : > { %2896 = vpow2.f32 %v2472_v53  ;;  %v1436_v56 = vadd.f32 %v1411_v23, %v1380_v54 }
 0x414   : > { %v2473_v9 = vmul.f32 -1.442695, %v1436_v56 }
 0x416   : > { %2898 = vpow2.f32 %v2473_v9 }
 0x417   : > { %v2893_v57 = vpop.eup %2892 }
 0x418   : > { %v1465_v49 = vadd.f32 1.0, %v2893_v57 }
 0x41a   : > { %2900 = vrcp.f32 %v1465_v49 }
 0x41b   : > { %v2895_v17 = vpop.eup %2894 }
 0x41c   : > { %v1466_v55 = vadd.f32 1.0, %v2895_v17 }
 0x41e   : > { %2902 = vrcp.f32 %v1466_v55 }
 0x41f   : > { %v2897_v7 = vpop.eup %2896 }
 0x420   : > { %v1467_v8 = vadd.f32 1.0, %v2897_v7 }
 0x422   : > { %2904 = vrcp.f32 %v1467_v8 }
 0x423   : > { %v2899_v21 = vpop.eup %2898 }
 0x424   : > { %v1468_v3 = vadd.f32 1.0, %v2899_v21 }
 0x426   : > { %2906 = vrcp.f32 %v1468_v3 }
 0x427   : > { %v2901_v10 = vpop.eup %2900 }
 0x428   : > { %v1497_v13 = vmul.f32 %v2901_v10, %v3244_v4 }
 0x42b   : > { %v2903_v19 = vpop.eup %2902 }
 0x42c   : > { %v1498_v23 = vmul.f32 %v2903_v19, %v3247_v5 }
 0x42e   : > { %v3521_v24 = vpack.c.bf16 %v1498_v23, %v1497_v13  ;;  %v2872_v13 = vld [vmem:[%s3928_s7 + $0x20] ss:$12 sps:$4 sm:$0xff]  }
 0x42f   : > { %v2905_v26 = vpop.eup %2904  ;;  %v2868_v23 = vld [vmem:[%s3928_s7] ss:$12 sps:$4 sm:$0xff]  }
 0x430   : > { %1505 = vrot.lane.b32.xlu0 %v3521_v24, %s3979_s15  ;;  %v1499_v28 = vmul.f32 %v2905_v26, %v3227_v60  ;;  %v2873_v26 = vld [vmem:[%s3928_s7 + $0x1c] ss:$12 sps:$4 sm:$0xff]  }
 0x433   : > { %v2907_v27 = vpop.eup %2906 }
 0x434   : > { %v1500_v29 = vmul.f32 %v2907_v27, %v3230_v61  ;;  %v2599_v27 = vpop.f32.mrf.mxu1 }
 0x436   : > { %v3527_v32 = vpack.c.bf16 %v1500_v29, %v1499_v28  ;;  %v2600_v28 = vpop.f32.mrf.mxu1 }
 0x438   : > { %1507 = vrot.lane.b32.xlu1 %v3527_v32, %s3979_s15  ;;  %v2602_v29 = vpop.f32.mrf.mxu1 }
 0x4a2   : > { %v1506_v35 = vpop.permute.xlu0 %1505 }
 0x4a3   : > { %v1510_v5 = vsel %vm541_vm1, 0, %v1506_v35  ;;  %v2603_v35 = vpop.f32.mrf.mxu1 }
 0x4a4   : > { %v3541_v61 = vsel %vm722_vm4, %v1510_v5, 0 }
 0x4a5   : > { %v1521_v38 = vmul.bf16 %v3541_v61, %v3172_v20  ;;  %v1525_v43 = vmul.bf16 %v3541_v61, %v3268_v14  ;;  %v1519_v58 = vmul.bf16 %v3541_v61, %v3277_v18  ;;  %v1523_v12 = vmul.bf16 %v3541_v61, %v3285_v22  ;;  %v2605_v5 = vpop.f32.mrf.mxu1 }
 0x4a6   : > { %v1527_v6 = vmul.bf16 %v3541_v61, %v3333_v39  ;;  %v1517_v19 = vmul.bf16 %v3541_v61, %v3164_v15 }
 0x4aa   : > { %v1508_v4 = vpop.permute.xlu1 %1507 }
 0x4ab   : > { %v1512_v36 = vsel %vm541_vm1, 0, %v1508_v4 }
 0x4ac   : > { %v3534_v37 = vsel %vm722_vm4, %v1512_v36, 0  ;;  %v2601_v36 = vadd.f32 %v2600_v28, %v2599_v27 }
 0x4ad   : > { %1571 = vrot.lane.b32.xlu1 %v3534_v37, %s3986_s4  ;;  %v1522_v60 = vmul.bf16 %v3534_v37, %v3172_v20  ;;  %v1526_v41 = vmul.bf16 %v3534_v37, %v3268_v14  ;;  %v1520_v42 = vmul.bf16 %v3534_v37, %v3277_v18  ;;  %v1524_v59 = vmul.bf16 %v3534_v37, %v3285_v22 }
 0x4ae   : > { %v1528_v30 = vmul.bf16 %v3534_v37, %v3333_v39  ;;  %v1518_v3 = vmul.bf16 %v3534_v37, %v3164_v15 }
 0x4af   : > { %1549 = vrot.lane.b32.xlu0 %v1522_v60, %s3980_s28  ;;  %v2606_v60 = vpop.f32.mrf.mxu1 }
 0x4b1   : > { %1569 = vrot.lane.b32.xlu1 %v3541_v61, %s3986_s4 }
 0x4b3   : > { %1547 = vrot.lane.b32.xlu0 %v1521_v38, %s3980_s28 }
 0x4b5   : > { %1565 = vrot.lane.b32.xlu1 %v1526_v41, %s3983_s27  ;;  %v2604_v41 = vadd.f32 %v2603_v35, %v2602_v29 }
 0x4b7   : > { %1541 = vrot.lane.b32.xlu0 %v1520_v42, %s3987_s20 }
 0x4b9   : > { %1563 = vrot.lane.b32.xlu1 %v1525_v43, %s3983_s27  ;;  %v2608_v43 = vpop.f32.mrf.mxu1 }
 0x4bb   : > { %1539 = vrot.lane.b32.xlu0 %v1519_v58, %s3987_s20 }
 0x4bd   : > { %1557 = vrot.lane.b32.xlu1 %v1524_v59, %s3984_s22 }
 0x4bf   : > { %1533 = vrot.lane.b32.xlu0 %v3534_v37, %s3981_s26 }
 0x4c1   : > { %1555 = vrot.lane.b32.xlu1 %v1523_v12, %s3984_s22  ;;  %v2607_v12 = vadd.f32 %v2606_v60, %v2605_v5 }
 0x4c3   : > { %1531 = vrot.lane.b32.xlu0 %v3541_v61, %s3981_s26 }
 0x4c5   : > { %1579 = vrot.lane.b32.xlu1 %v1528_v30, %s3988_s3  ;;  %v2609_v30 = vpop.f32.mrf.mxu1 }
 0x4c7   : > { %1577 = vrot.lane.b32.xlu0 %v1527_v6, %s3988_s3 }
 0x4c9   : > { %1425 = vperm.xlu1 %2821, %v1391_v62  }
 0x4cb   : > { %1430 = vperm.xlu0 %2820, %v1392_v63  }
 0x4cd   : > { %1415 = vperm.xlu1 %2821, %v1389_v33   ;;  %v2610_v33 = vadd.f32 %v2609_v30, %v2608_v43 }
 0x4cf   : > { %1420 = vperm.xlu0 %2820, %v1390_v11  }
 0x4d1   : > { %1737 = vperm.xlu1 %2821, %v1723_v46  }
 0x4d3   : > { %1742 = vperm.xlu0 %2820, %v1724_v48  }
 0x4d5   : > { %1727 = vperm.xlu1 %2821, %v1721_v50  }
 0x4d7   : > { %1732 = vperm.xlu0 %2820, %v1722_v51  }
 0x51f   : > { %v1572_v0 = vpop.permute.xlu1 %1571 }
 0x520   : > { %2617 = vmatprep.subr.bf16.mxu0 %v1572_v0 }
 0x521   : > { %v1550_v1 = vpop.permute.xlu0 %1549 }
 0x522   : > { %2618 = vmatpush3.bf16.msra.mxu0 %v1550_v1 }
 0x523   : > { %v1570_v53 = vpop.permute.xlu1 %1569 }
 0x524   : > { %2619 = vmatprep.subr.bf16.mxu0 %v1570_v53 }
 0x525   : > { %v1548_v54 = vpop.permute.xlu0 %1547 }
 0x526   : > { %2620 = vmatpush3.bf16.msra.mxu0 %v1548_v54 }
 0x527   : > { %v1566_v56 = vpop.permute.xlu1 %1565 }
 0x528   : > { %2621 = vmatprep.subr.bf16.mxu0 %v1566_v56 }
 0x529   : > { %v1542_v9 = vpop.permute.xlu0 %1541 }
 0x52a   : > { %2622 = vmatpush3.bf16.msra.mxu0 %v1542_v9 }
 0x52b   : > { %v1564_v57 = vpop.permute.xlu1 %1563 }
 0x52c   : > { %2623 = vmatprep.subr.bf16.mxu0 %v1564_v57 }
 0x52d   : > { %v1540_v49 = vpop.permute.xlu0 %1539 }
 0x52e   : > { %2624 = vmatpush3.bf16.msra.mxu0 %v1540_v49 }
 0x52f   : > { %v1558_v17 = vpop.permute.xlu1 %1557 }
 0x530   : > { %2625 = vmatprep.subr.bf16.mxu0 %v1558_v17 }
 0x531   : > { %v1534_v55 = vpop.permute.xlu0 %1533 }
 0x532   : > { %2626 = vmatpush3.bf16.msra.mxu0 %v1534_v55 }
 0x533   : > { %v1556_v7 = vpop.permute.xlu1 %1555 }
 0x534   : > { %2627 = vmatprep.subr.bf16.mxu0 %v1556_v7 }
 0x535   : > { %v1532_v8 = vpop.permute.xlu0 %1531 }
 0x536   : > { %2628 = vmatpush3.bf16.msra.mxu0 %v1532_v8 }
 0x537   : > { %v1580_v21 = vpop.permute.xlu1 %1579  ;;  %2629 = vmatprep.subr.bf16.mxu0 %v3527_v32  ;;  %v2739_v32 = vpop.f32.mrf.mxu0 }
 0x538   : > { %2741 = vmatprep.subr.bf16.mxu1 %v1580_v21  ;;  %v1371_v63 = vadd.f32 %v2739_v32, %v2607_v12 }
 0x539   : > { %2742 = vmatpush3.bf16.msra.mxu1 %v1580_v21  ;;  %v1578_v10 = vpop.permute.xlu0 %1577  ;;  %v1362_v4 = vpop.f32.mrf.mxu0 }
 0x53a   : > { %2630 = vmatpush3.bf16.msra.mxu0 %v1518_v3  ;;  %2743 = vmatprep.subr.bf16.mxu1 %v1578_v10  ;;  %v1363_v38 = vadd.f32 %v2601_v36, %v1362_v4  ;;  %v1383_v51 = vadd.f32 %v1371_v63, %v3497_v31 }
 0x53b   : > { %2631 = vmatprep.subr.bf16.mxu0 %v3521_v24  ;;  %v2875_v24 = vld [vmem:[%s3928_s7 + $0x18] ss:$12 sps:$4 sm:$0xff]   ;;  %v2740_v37 = vpop.f32.mrf.mxu0 }
 0x53c   : > { %v1381_v44 = vadd.f32 %v1363_v38, %v3495_v25  ;;  %v1374_v50 = vadd.f32 %v2740_v37, %v2610_v33 }
 0x53d   : > { %2744 = vmatpush3.bf16.msra.mxu1 %v1578_v10  ;;  %v1365_v42 = vpop.f32.mrf.mxu0 }
 0x53e   : > { %2632 = vmatpush3.bf16.msra.mxu0 %v1517_v19  ;;  %v1366_v2 = vadd.f32 %v2604_v41, %v1365_v42  ;;  %v1384_v53 = vadd.f32 %v1374_v50, %v3501_v40 }
 0x540   : > { %2746 = vmatmul.mubr.msk.bf16.vlgmr.msra.gmra.mxu1 %vm896_vm5, %v2872_v13  ;;  %v1382_v11 = vadd.f32 %v1366_v2, %v3499_v34 }
 0x541   : > { %1652 = vmatmul.mubr.bf16.vlgmr.msra.gmra.mxu0 %v2868_v23 }
 0x542   : > { %1659 = vmatprep.mubr.bf16.mxu0 %v2873_v26 }
 0x544   : > { %v1426_v61 = vpop.permute.xlu1 %1425 }
 0x545   : > { %v1439_v0 = vadd.f32 %v1426_v61, %v1383_v51 }
 0x546   : > { %v1431_v58 = vpop.permute.xlu0 %1430 }
 0x547   : > { %v2476_v54 = vmul.f32 -1.442695, %v1439_v0  ;;  %v1440_v56 = vadd.f32 %v1431_v58, %v1384_v53 }
 0x548   : > { %v1416_v59 = vpop.permute.xlu1 %1415 }
 0x549   : > { %1660 = vmatmul.mubr.bf16.gmra.mxu0 %v2875_v24  ;;  %v1437_v6 = vadd.f32 %v1416_v59, %v1381_v44  ;;  %v2477_v25 = vmul.f32 -1.442695, %v1440_v56 }
 0x54a   : > { %v1421_v62 = vpop.permute.xlu0 %1420 }
 0x54b   : > { %v2474_v46 = vmul.f32 -1.442695, %v1437_v6  ;;  %v1438_v48 = vadd.f32 %v1421_v62, %v1382_v11 }
 0x54c   : > { %v1738_v7 = vpop.permute.xlu1 %1737 }
 0x54d   : > { %2908 = vpow2.f32 %v2474_v46  ;;  %v2475_v1 = vmul.f32 -1.442695, %v1438_v48 }
 0x54e   : > { %v1743_v40 = vpop.permute.xlu0 %1742 }
 0x54f   : > { %2910 = vpow2.f32 %v2475_v1 }
 0x550   : > { %2912 = vpow2.f32 %v2476_v54  ;;  %v1728_v28 = vpop.permute.xlu1 %1727 }
 0x551   : > { %2914 = vpow2.f32 %v2477_v25 }
 0x552   : > { %v1733_v61 = vpop.permute.xlu0 %1732 }
 0x55a   : > { %v2909_v9 = vpop.eup %2908 }
 0x55b   : > { %v1469_v34 = vadd.f32 1.0, %v2909_v9 }
 0x55c   : > { %v2911_v55 = vpop.eup %2910 }
 0x55d   : > { %2916 = vrcp.f32 %v1469_v34  ;;  %v1470_v10 = vadd.f32 1.0, %v2911_v55  ;;  %v2913_v13 = vpop.eup %2912 }
 0x55e   : > { %v1471_v32 = vadd.f32 1.0, %v2913_v13  ;;  %v2915_v5 = vpop.eup %2914 }
 0x55f   : > { %2918 = vrcp.f32 %v1470_v10  ;;  %v1472_v41 = vadd.f32 1.0, %v2915_v5 }
 0x56a   : > { %v2917_v44 = vpop.eup %2916 }
 0x56b   : > { %v1753_v6 = vsub.f32 1.0, %v2917_v44 }
 0x56c   : > { %v2919_v62 = vpop.eup %2918 }
 0x56d   : > { %v1754_v33 = vsub.f32 1.0, %v2919_v62 }
 0x600   : > { %v2747_v57 = vpop.f32.mrf.mxu1 }
 0x601   : > { %v2633_v49 = vpop.f32.mrf.mxu0 }
 0x602   : > { %v1702_v17 = vpop.f32.mrf.mxu1 }
 0x603   : > { %v2634_v8 = vpop.f32.mrf.mxu0 }
 0x604   : > { %v2635_v31 = vadd.f32 %v2634_v8, %v2633_v49  ;;  %v2748_v21 = vpop.f32.mrf.mxu1  ;;  %v2934_v49 = vld [vmem:[%s3222_s0 + $0x10] sm:$0xff]  ;;  %v2935_v8 = vld [vmem:[%s3222_s0 + $0x18] sm:$0xff] }
 0x605   : > { %v2636_v3 = vpop.f32.mrf.mxu0 }
 0x606   : > { %v1703_v19 = vadd.f32 %v2635_v31, %v1702_v17  ;;  %v1705_v26 = vpop.f32.mrf.mxu1 }
 0x607   : > { %v2637_v23 = vpop.f32.mrf.mxu0 }
 0x608   : > { %v1717_v24 = vadd.f32 %v1703_v19, %v3503_v45  ;;  %v2638_v27 = vadd.f32 %v2637_v23, %v2636_v3 }
 0x609   : > { %v2639_v29 = vpop.f32.mrf.mxu0 }
 0x60a   : > { %v1745_v35 = vadd.f32 %v1728_v28, %v1717_v24  ;;  %v1706_v4 = vadd.f32 %v2638_v27, %v1705_v26 }
 0x60b   : > { %v2640_v36 = vpop.f32.mrf.mxu0 }
 0x60c   : > { %2920 = vtanh.f32 %v1745_v35  ;;  %v1718_v37 = vadd.f32 %v1706_v4, %v3505_v47  ;;  %v2641_v60 = vadd.f32 %v2640_v36, %v2639_v29  ;;  %v2878_v36 = vld [vmem:[%s3930_s9 + $0x4] ss:$12 sps:$4 sm:$0xff]  }
 0x60d   : > { %v2642_v38 = vpop.f32.mrf.mxu0  ;;  %2922 = vrcp.f32 %v1471_v32  ;;  %1956 = vmatprep.mubr.bf16.mxu0 %v2878_v36 }
 0x60e   : > { %v1746_v42 = vadd.f32 %v1733_v61, %v1718_v37  ;;  %v1711_v45 = vadd.f32 %v2747_v57, %v2641_v60  ;;  %v2879_v60 = vld [vmem:[%s3930_s9 + $0x8] ss:$12 sps:$4 sm:$0xff]  }
 0x60f   : > { %v2643_v43 = vpop.f32.mrf.mxu0  ;;  %2753 = vmatprep.mubr.msk.bf16.mxu1 %vm896_vm5, %v2879_v60 }
 0x610   : > { %2924 = vtanh.f32 %v1746_v42  ;;  %v1719_v58 = vadd.f32 %v1711_v45, %v3507_v52  ;;  %v2644_v59 = vadd.f32 %v2643_v43, %v2642_v38  ;;  %v2932_v52 = vld [vmem:[%s3222_s0] sm:$0xff]  ;;  %v1785_v42 = vld [vmem:[%s3931_s10 + $0x18] sm:$0xff]  ;;  %v1783_v43 = vld [vmem:[%s3931_s10 + $0x8] sm:$0xff] }
 0x611   : > { %2926 = vrcp.f32 %v1472_v41  ;;  %v1757_v11 = vmul.f32 %v2932_v52, %v1753_v6  ;;  %v1784_v41 = vld [vmem:[%s3931_s10 + $0x10] sm:$0xff]  ;;  %v1782_v45 = vld [vmem:[%s3931_s10] sm:$0xff] }
 0x612   : > { %v1747_v2 = vadd.f32 %v1738_v7, %v1719_v58  ;;  %v1714_v12 = vadd.f32 %v2748_v21, %v2644_v59 }
 0x614   : > { %2928 = vtanh.f32 %v1747_v2  ;;  %v1720_v47 = vadd.f32 %v1714_v12, %v3509_v16  ;;  %v2933_v16 = vld [vmem:[%s3222_s0 + $0x8] sm:$0xff] }
 0x615   : > { %v1758_v0 = vmul.f32 %v2933_v16, %v1754_v33  ;;  %v2880_v16 = vld [vmem:[%s3930_s9 + $0x20] ss:$12 sps:$4 sm:$0xff]  }
 0x616   : > { %v1748_v30 = vadd.f32 %v1743_v40, %v1720_v47 }
 0x618   : > { %2930 = vtanh.f32 %v1748_v30 }
 0x619   : > { %v2921_v63 = vpop.eup %2920 }
 0x61a   : > { %v1761_v46 = vmul.f32 %v2921_v63, %v2917_v44  ;;  %v2923_v48 = vpop.eup %2922 }
 0x61b   : > { %v1755_v53 = vsub.f32 1.0, %v2923_v48 }
 0x61c   : > { %v3639_v50 = vadd.f32 %v1761_v46, %v1757_v11 }
 0x61d   : > { %v2925_v51 = vpop.eup %2924  ;;  %v1759_v34 = vmul.f32 %v2934_v49, %v1755_v53  ;;  %v2883_v53 = vld [vmem:[%s3930_s9 + $0x18] ss:$12 sps:$4 sm:$0xff]  }
 0x61e   : > { %v1762_v1 = vmul.f32 %v2925_v51, %v2919_v62  ;;  %1770 = vst.msk [vmem:[%s3642_s5] sm:$0xff] %vm1769_vm6, %v3639_v50  ;;  %v2927_v54 = vpop.eup %2926 }
 0x61f   : > { %v1756_v57 = vsub.f32 1.0, %v2927_v54 }
 0x620   : > { %v3647_v56 = vadd.f32 %v1762_v1, %v1758_v0  ;;  %v2876_v0 = vld [vmem:[%s3930_s9] ss:$12 sps:$4 sm:$0xff]   ;;  %v2881_v1 = vld [vmem:[%s3930_s9 + $0x1c] ss:$12 sps:$4 sm:$0xff]  }
 0x621   : > { %v2929_v25 = vpop.eup %2928  ;;  %v1760_v31 = vmul.f32 %v2935_v8, %v1756_v57 }
 0x622   : > { %v3651_v9 = vpack.c.bf16 %v3647_v56, %v3639_v50  ;;  %v1763_v17 = vmul.f32 %v2929_v25, %v2923_v48  ;;  %1771 = vst.msk [vmem:[%s3642_s5 + $0x8] sm:$0xff] %vm1769_vm6, %v3647_v56 }
 0x624   : > { %1790 = vrot.lane.b32.xlu0 %v3651_v9, %s3979_s15  ;;  %v3659_v55 = vadd.f32 %v1763_v17, %v1759_v34 }
 0x625   : > { %v2931_v7 = vpop.eup %2930 }
 0x626   : > { %v1764_v21 = vmul.f32 %v2931_v7, %v2927_v54  ;;  %1772 = vst.msk [vmem:[%s3642_s5 + $0x10] sm:$0xff] %vm1769_vm6, %v3659_v55 }
 0x628   : > { %v3665_v3 = vadd.f32 %v1764_v21, %v1760_v31 }
 0x62a   : > { %v3669_v10 = vpack.c.bf16 %v3665_v3, %v3659_v55  ;;  %1773 = vst.msk [vmem:[%s3642_s5 + $0x18] sm:$0xff] %vm1769_vm6, %v3665_v3 }
 0x62c   : > { %1792 = vrot.lane.b32.xlu1 %v3669_v10, %s3979_s15 }
 0x696   : > { %v1791_v40 = vpop.permute.xlu0 %1790 }
 0x697   : > { %v1795_v13 = vsel %vm541_vm1, 0, %v1791_v40 }
 0x698   : > { %v3686_v27 = vsel %vm722_vm4, %v1795_v13, 0 }
 0x699   : > { %v1806_v28 = vmul.bf16 %v3686_v27, %v3172_v20  ;;  %v1810_v35 = vmul.bf16 %v3686_v27, %v3268_v14  ;;  %v1804_v4 = vmul.bf16 %v3686_v27, %v3277_v18  ;;  %v1808_v37 = vmul.bf16 %v3686_v27, %v3285_v22 }
 0x69a   : > { %v1812_v38 = vmul.bf16 %v3686_v27, %v3333_v39  ;;  %v1802_v51 = vmul.bf16 %v3686_v27, %v3164_v15 }
 0x69e   : > { %v1793_v19 = vpop.permute.xlu1 %1792 }
 0x69f   : > { %v1797_v23 = vsel %vm541_vm1, 0, %v1793_v19 }
 0x6a0   : > { %v3679_v26 = vsel %vm722_vm4, %v1797_v23, 0 }
 0x6a1   : > { %1856 = vrot.lane.b32.xlu1 %v3679_v26, %s3986_s4  ;;  %v1807_v24 = vmul.bf16 %v3679_v26, %v3172_v20  ;;  %v1811_v29 = vmul.bf16 %v3679_v26, %v3268_v14  ;;  %v1805_v32 = vmul.bf16 %v3679_v26, %v3277_v18  ;;  %v1809_v5 = vmul.bf16 %v3679_v26, %v3285_v22 }
 0x6a2   : > { %v1813_v61 = vmul.bf16 %v3679_v26, %v3333_v39  ;;  %v1803_v46 = vmul.bf16 %v3679_v26, %v3164_v15 }
 0x6a3   : > { %1834 = vrot.lane.b32.xlu0 %v1807_v24, %s3980_s28 }
 0x6a5   : > { %1854 = vrot.lane.b32.xlu1 %v3686_v27, %s3986_s4 }
 0x6a7   : > { %1832 = vrot.lane.b32.xlu0 %v1806_v28, %s3980_s28 }
 0x6a9   : > { %1850 = vrot.lane.b32.xlu1 %v1811_v29, %s3983_s27 }
 0x6ab   : > { %1826 = vrot.lane.b32.xlu0 %v1805_v32, %s3987_s20 }
 0x6ad   : > { %1848 = vrot.lane.b32.xlu1 %v1810_v35, %s3983_s27 }
 0x6af   : > { %1824 = vrot.lane.b32.xlu0 %v1804_v4, %s3987_s20 }
 0x6b1   : > { %1842 = vrot.lane.b32.xlu1 %v1809_v5, %s3984_s22 }
 0x6b3   : > { %1818 = vrot.lane.b32.xlu0 %v3679_v26, %s3981_s26 }
 0x6b5   : > { %1840 = vrot.lane.b32.xlu1 %v1808_v37, %s3984_s22 }
 0x6b7   : > { %1816 = vrot.lane.b32.xlu0 %v3686_v27, %s3981_s26 }
 0x6b9   : > { %1864 = vrot.lane.b32.xlu1 %v1813_v61, %s3988_s3 }
 0x6bb   : > { %1862 = vrot.lane.b32.xlu0 %v1812_v38, %s3988_s3 }
 0x6bd   : > { %1880 = vperm.xlu1 %2821, %v1784_v41  }
 0x6bf   : > { %1885 = vperm.xlu0 %2820, %v1785_v42  }
 0x6c1   : > { %1870 = vperm.xlu1 %2821, %v1782_v45  }
 0x6c3   : > { %1875 = vperm.xlu0 %2820, %v1783_v43  }
 0x713   : > { %v1857_v58 = vpop.permute.xlu1 %1856 }
 0x714   : > { %2649 = vmatprep.subr.bf16.mxu0 %v1857_v58 }
 0x715   : > { %v1835_v59 = vpop.permute.xlu0 %1834 }
 0x716   : > { %2650 = vmatpush3.bf16.msra.mxu0 %v1835_v59 }
 0x717   : > { %v1855_v2 = vpop.permute.xlu1 %1854 }
 0x718   : > { %2651 = vmatprep.subr.bf16.mxu0 %v1855_v2 }
 0x719   : > { %v1833_v12 = vpop.permute.xlu0 %1832 }
 0x71a   : > { %2652 = vmatpush3.bf16.msra.mxu0 %v1833_v12 }
 0x71b   : > { %v1851_v44 = vpop.permute.xlu1 %1850 }
 0x71c   : > { %2653 = vmatprep.subr.bf16.mxu0 %v1851_v44 }
 0x71d   : > { %v1827_v47 = vpop.permute.xlu0 %1826 }
 0x71e   : > { %2654 = vmatpush3.bf16.msra.mxu0 %v1827_v47 }
 0x71f   : > { %v1849_v30 = vpop.permute.xlu1 %1848 }
 0x720   : > { %2655 = vmatprep.subr.bf16.mxu0 %v1849_v30 }
 0x721   : > { %v1825_v6 = vpop.permute.xlu0 %1824 }
 0x722   : > { %2656 = vmatpush3.bf16.msra.mxu0 %v1825_v6 }
 0x723   : > { %v1843_v62 = vpop.permute.xlu1 %1842 }
 0x724   : > { %2657 = vmatprep.subr.bf16.mxu0 %v1843_v62 }
 0x725   : > { %v1819_v63 = vpop.permute.xlu0 %1818 }
 0x726   : > { %2658 = vmatpush3.bf16.msra.mxu0 %v1819_v63 }
 0x727   : > { %v1841_v33 = vpop.permute.xlu1 %1840 }
 0x728   : > { %2659 = vmatprep.subr.bf16.mxu0 %v1841_v33 }
 0x729   : > { %v1817_v52 = vpop.permute.xlu0 %1816 }
 0x72a   : > { %2660 = vmatpush3.bf16.msra.mxu0 %v1817_v52 }
 0x72b   : > { %v1865_v11 = vpop.permute.xlu1 %1864  ;;  %2661 = vmatprep.subr.bf16.mxu0 %v3669_v10 }
 0x72c   : > { %2749 = vmatprep.subr.bf16.mxu1 %v1865_v11 }
 0x72d   : > { %2750 = vmatpush3.bf16.msra.mxu1 %v1865_v11  ;;  %v1863_v48 = vpop.permute.xlu0 %1862  ;;  %v2886_v11 = vld [vmem:[%s3932_s11 + $0x4] ss:$12 sps:$4 sm:$0xff]  }
 0x72e   : > { %2662 = vmatpush3.bf16.msra.mxu0 %v1803_v46  ;;  %2751 = vmatprep.subr.bf16.mxu1 %v1863_v48 }
 0x72f   : > { %2663 = vmatprep.subr.bf16.mxu0 %v3651_v9 }
 0x731   : > { %2752 = vmatpush3.bf16.msra.mxu1 %v1863_v48  ;;  %v2034_v48 = vld [vmem:[%s3933_s12] sm:$0xff] }
 0x732   : > { %2664 = vmatpush3.bf16.msra.mxu0 %v1802_v51  ;;  %v2035_v51 = vld [vmem:[%s3933_s12 + $0x8] sm:$0xff] }
 0x734   : > { %2754 = vmatmul.mubr.msk.bf16.vlgmr.msra.gmra.mxu1 %vm896_vm5, %v2880_v16  ;;  %v2036_v16 = vld [vmem:[%s3933_s12 + $0x10] sm:$0xff] }
 0x735   : > { %1957 = vmatmul.mubr.bf16.vlgmr.msra.gmra.mxu0 %v2876_v0  ;;  %2208 = vmatprep.mubr.bf16.mxu1 %v2886_v11 }
 0x736   : > { %1964 = vmatprep.mubr.bf16.mxu0 %v2881_v1 }
 0x738   : > { %v1881_v54 = vpop.permute.xlu1 %1880 }
 0x73a   : > { %v1886_v57 = vpop.permute.xlu0 %1885 }
 0x73c   : > { %v1871_v17 = vpop.permute.xlu1 %1870 }
 0x73d   : > { %1965 = vmatmul.mubr.bf16.gmra.mxu0 %v2883_v53 }
 0x73e   : > { %v1876_v40 = vpop.permute.xlu0 %1875 }
 0x7f4   : > { %v2755_v25 = vpop.f32.mrf.mxu1 }
 0x7f5   : > { %v2665_v9 = vpop.f32.mrf.mxu0 }
 0x7f6   : > { %v2007_v49 = vpop.f32.mrf.mxu1 }
 0x7f7   : > { %v2666_v34 = vpop.f32.mrf.mxu0 }
 0x7f8   : > { %v2667_v7 = vadd.f32 %v2666_v34, %v2665_v9  ;;  %v2756_v31 = vpop.f32.mrf.mxu1 }
 0x7f9   : > { %v2668_v8 = vpop.f32.mrf.mxu0 }
 0x7fa   : > { %v1959_v21 = vadd.f32 %v2667_v7, %v1871_v17  ;;  %v2010_v23 = vpop.f32.mrf.mxu1 }
 0x7fb   : > { %v2669_v10 = vpop.f32.mrf.mxu0 }
 0x7fc   : > { %v2670_v19 = vadd.f32 %v2669_v10, %v2668_v8  ;;  %v2008_v26 = vadd.f32 %v2007_v49, %v1959_v21 }
 0x7fd   : > { %v2671_v13 = vpop.f32.mrf.mxu0 }
 0x7fe   : > { %v1962_v24 = vadd.f32 %v2670_v19, %v1876_v40  ;;  %v2022_v35 = vmax.f32 %v2008_v26, 0.0  ;;  %v2888_v19 = vld [vmem:[%s3932_s11 + $0x20] ss:$12 sps:$4 sm:$0xff]  }
 0x7ff   : > { %v2672_v27 = vpop.f32.mrf.mxu0 }
 0x800   : > { %v2673_v28 = vadd.f32 %v2672_v27, %v2671_v13  ;;  %v2011_v29 = vadd.f32 %v2010_v23, %v1962_v24  ;;  %v2884_v13 = vld [vmem:[%s3932_s11] ss:$12 sps:$4 sm:$0xff]   ;;  %v2889_v23 = vld [vmem:[%s3932_s11 + $0x1c] ss:$12 sps:$4 sm:$0xff]  }
 0x801   : > { %v2674_v32 = vpop.f32.mrf.mxu0 }
 0x802   : > { %v1967_v4 = vadd.f32 %v2673_v28, %v1881_v54  ;;  %v2023_v5 = vmax.f32 %v2011_v29, 0.0 }
 0x803   : > { %v2675_v36 = vpop.f32.mrf.mxu0 }
 0x804   : > { %v3760_v37 = vpack.c.bf16 %v2023_v5, %v2022_v35  ;;  %v2676_v60 = vadd.f32 %v2675_v36, %v2674_v32  ;;  %v2016_v61 = vadd.f32 %v2755_v25, %v1967_v4 }
 0x806   : > { %v1970_v38 = vadd.f32 %v2676_v60, %v1886_v57  ;;  %2042 = vrot.lane.b32.xlu0 %v3760_v37, %s3979_s15  ;;  %v2024_v42 = vmax.f32 %v2016_v61, 0.0 }
 0x808   : > { %v2019_v41 = vadd.f32 %v2756_v31, %v1970_v38 }
 0x80a   : > { %v2025_v45 = vmax.f32 %v2019_v41, 0.0 }
 0x80c   : > { %v3764_v43 = vpack.c.bf16 %v2025_v45, %v2024_v42 }
 0x80e   : > { %2044 = vrot.lane.b32.xlu1 %v3764_v43, %s3979_s15 }
 0x878   : > { %v2043_v58 = vpop.permute.xlu0 %2042 }
 0x879   : > { %v2047_v2 = vsel %vm541_vm1, 0, %v2043_v58 }
 0x87a   : > { %v3778_v30 = vsel %vm722_vm4, %v2047_v2, 0 }
 0x87b   : > { %v2058_v6 = vmul.bf16 %v3778_v30, %v3172_v20  ;;  %v2062_v33 = vmul.bf16 %v3778_v30, %v3268_v14  ;;  %v2054_v40 = vmul.bf16 %v3778_v30, %v3164_v15 }
 0x880   : > { %v2045_v59 = vpop.permute.xlu1 %2044 }
 0x881   : > { %v2049_v12 = vsel %vm541_vm1, 0, %v2045_v59 }
 0x882   : > { %v3771_v44 = vsel %vm722_vm4, %v2049_v12, 0 }
 0x883   : > { %2108 = vrot.lane.b32.xlu1 %v3771_v44, %s3986_s4  ;;  %v2059_v47 = vmul.bf16 %v3771_v44, %v3172_v20  ;;  %v2063_v62 = vmul.bf16 %v3771_v44, %v3268_v14  ;;  %v2057_v63 = vmul.bf16 %v3771_v44, %v3277_v18  ;;  %v2056_v20 = vmul.bf16 %v3778_v30, %v3277_v18  ;;  %v2887_v18 = vld [vmem:[%s3932_s11 + $0x8] ss:$12 sps:$4 sm:$0xff]  }
 0x884   : > { %v2061_v52 = vmul.bf16 %v3771_v44, %v3285_v22  ;;  %v2060_v14 = vmul.bf16 %v3778_v30, %v3285_v22  ;;  %v2065_v46 = vmul.bf16 %v3771_v44, %v3333_v39  ;;  %2761 = vmatprep.mubr.msk.bf16.mxu0 %vm896_vm5, %v2887_v18  ;;  %v2064_v22 = vmul.bf16 %v3778_v30, %v3333_v39  ;;  %v2037_v39 = vld [vmem:[%s3933_s12 + $0x18] sm:$0xff] }
 0x885   : > { %2086 = vrot.lane.b32.xlu0 %v2059_v47, %s3980_s28  ;;  %v2055_v21 = vmul.bf16 %v3771_v44, %v3164_v15  ;;  %v2891_v15 = vld [vmem:[%s3932_s11 + $0x18] ss:$12 sps:$4 sm:$0xff]  }
 0x887   : > { %2106 = vrot.lane.b32.xlu1 %v3778_v30, %s3986_s4  ;;  %s2510_s4 = sshll.u32 %s3111_s17, 9  ;;  %s3013_s17 = smov [#allocation2]  }
 0x888   : > { %s3857_s2 = scalar_lea.hbm %s3934_s13, %s2510_s4 }
 0x889   : > { %2084 = vrot.lane.b32.xlu0 %v2058_v6, %s3980_s28 }
 0x88b   : > { %2102 = vrot.lane.b32.xlu1 %v2063_v62, %s3983_s27 }
 0x88d   : > { %2078 = vrot.lane.b32.xlu0 %v2057_v63, %s3987_s20 }
 0x88f   : > { %2100 = vrot.lane.b32.xlu1 %v2062_v33, %s3983_s27 }
 0x891   : > { %2076 = vrot.lane.b32.xlu0 %v2056_v20, %s3987_s20  ;;  %s2309_s20 = sshll.u32 %s3642_s5, 4  ;;  %s2940_s5 = sshll.u32 %s3013_s17, 4  ;;  %s3859_s20 = int_to_ptr.vmem [resolvable:$true] %s2309_s20  ;;  %s2941_s5 = int_to_ptr.vmem [resolvable:$false] %s2940_s5 }
 0x892   : > { %s2936_s29 = scalar_lea.vmem %s3859_s20, 512  ;;  %s2942_s19 = scalar_lea.vmem %s2941_s5, 1024 }
 0x893   : > { %2094 = vrot.lane.b32.xlu1 %v2061_v52, %s3984_s22  ;;  %p2937_p11 = scmp.ne.s32.totalorder %s3859_s20, %s2936_s29  ;;  %p2943_p0 = scmp.lt.s32.totalorder %s3859_s20, %s2941_s5 }
 0x894   : > { %p2944_p1 = scmp.lt.s32.totalorder %s2942_s19, %s2936_s29 }
 0x895   : > { %2070 = vrot.lane.b32.xlu0 %v3771_v44, %s3981_s26  ;;  %p2938_p12 = pnand %p2937_p11, %p3128_p5 }
 0x896   : > { %p2945_p2 = por %p2944_p1, %p2943_p0 }
 0x897   : > { %2092 = vrot.lane.b32.xlu1 %v2060_v14, %s3984_s22  ;;  %p2939_p13 = pneg %p2938_p12 }
 0x899   : > { %2068 = vrot.lane.b32.xlu0 %v3778_v30, %s3981_s26  ;;  %s3863_s26 = scalar_lea.sflag [#allocation3], %s474_s18  ;;  %p2946_p3 = pnand %p2945_p2, %p2939_p13 }
 0x89b   : > { %2116 = vrot.lane.b32.xlu1 %v2065_v46, %s3988_s3 }
 0x89d   : > { %2114 = vrot.lane.b32.xlu0 %v2064_v22, %s3988_s3 }
 0x89f   : > { %2122 = vperm.xlu1 %2821, %v2034_v48  }
 0x8a1   : > { %2127 = vperm.xlu0 %2820, %v2035_v51  }
 0x8a3   : > { %2132 = vperm.xlu1 %2821, %v2036_v16  }
 0x8a5   : > { %2137 = vperm.xlu0 %2820, %v2037_v39  }
 0x8f5   : > { %v2109_v0 = vpop.permute.xlu1 %2108 }
 0x8f6   : > { %2681 = vmatprep.subr.bf16.mxu1 %v2109_v0 }
 0x8f7   : > { %v2087_v1 = vpop.permute.xlu0 %2086 }
 0x8f8   : > { %2682 = vmatpush3.bf16.msra.mxu1 %v2087_v1 }
 0x8f9   : > { %v2107_v53 = vpop.permute.xlu1 %2106 }
 0x8fa   : > { %2683 = vmatprep.subr.bf16.mxu1 %v2107_v53 }
 0x8fb   : > { %v2085_v54 = vpop.permute.xlu0 %2084 }
 0x8fc   : > { %2684 = vmatpush3.bf16.msra.mxu1 %v2085_v54 }
 0x8fd   : > { %v2103_v25 = vpop.permute.xlu1 %2102 }
 0x8fe   : > { %2685 = vmatprep.subr.bf16.mxu1 %v2103_v25 }
 0x8ff   : > { %v2079_v9 = vpop.permute.xlu0 %2078 }
 0x900   : > { %2686 = vmatpush3.bf16.msra.mxu1 %v2079_v9 }
 0x901   : > { %v2101_v57 = vpop.permute.xlu1 %2100 }
 0x902   : > { %2687 = vmatprep.subr.bf16.mxu1 %v2101_v57 }
 0x903   : > { %v2077_v49 = vpop.permute.xlu0 %2076 }
 0x904   : > { %2688 = vmatpush3.bf16.msra.mxu1 %v2077_v49 }
 0x905   : > { %v2095_v34 = vpop.permute.xlu1 %2094 }
 0x906   : > { %2689 = vmatprep.subr.bf16.mxu1 %v2095_v34 }
 0x907   : > { %v2071_v17 = vpop.permute.xlu0 %2070 }
 0x908   : > { %2690 = vmatpush3.bf16.msra.mxu1 %v2071_v17 }
 0x909   : > { %v2093_v7 = vpop.permute.xlu1 %2092 }
 0x90a   : > { %2691 = vmatprep.subr.bf16.mxu1 %v2093_v7 }
 0x90b   : > { %v2069_v8 = vpop.permute.xlu0 %2068 }
 0x90c   : > { %2692 = vmatpush3.bf16.msra.mxu1 %v2069_v8 }
 0x90d   : > { %v2117_v31 = vpop.permute.xlu1 %2116  ;;  %2693 = vmatprep.subr.bf16.mxu1 %v3764_v43 }
 0x90e   : > { %2757 = vmatprep.subr.bf16.mxu0 %v2117_v31 }
 0x90f   : > { %2758 = vmatpush3.bf16.msra.mxu0 %v2117_v31  ;;  %v2115_v10 = vpop.permute.xlu0 %2114 }
 0x910   : > { %2694 = vmatpush3.bf16.msra.mxu1 %v2055_v21  ;;  %2759 = vmatprep.subr.bf16.mxu0 %v2115_v10 }
 0x911   : > { %2695 = vmatprep.subr.bf16.mxu1 %v3760_v37 }
 0x913   : > { %2760 = vmatpush3.bf16.msra.mxu0 %v2115_v10 }
 0x914   : > { %2696 = vmatpush3.bf16.msra.mxu1 %v2054_v40 }
 0x916   : > { %2762 = vmatmul.mubr.msk.bf16.vlgmr.msra.gmra.mxu0 %vm896_vm5, %v2888_v19 }
 0x917   : > { %2209 = vmatmul.mubr.bf16.vlgmr.msra.gmra.mxu1 %v2884_v13 }
 0x918   : > { %2216 = vmatprep.mubr.bf16.mxu1 %v2889_v23 }
 0x91f   : > { %2217 = vmatmul.mubr.bf16.gmra.mxu1 %v2891_v15 }
 0x920   : > { %2949 = shalt.err (!%p2946_p3)
}
 0x921   : > { %s2950_s18 = scalar_lea.hbm %s3857_s2, 512  ;;  %s2954_s21 = scalar_lea.hbm %s3934_s13, 1024 }
 0x922   : > { %p2951_p4 = scmp.ne.s32.totalorder %s3857_s2, %s2950_s18  ;;  %p2955_p9 = scmp.lt.s32.totalorder %s3857_s2, %s3934_s13 }
 0x923   : > { %p2956_p10 = scmp.lt.s32.totalorder %s2954_s21, %s2950_s18 }
 0x924   : > { %p2952_p7 = pnand %p2951_p4, %p3128_p5 }
 0x925   : > { %p2957_p11 = por %p2956_p10, %p2955_p9 }
 0x926   : > { %p2953_p8 = pneg %p2952_p7 }
 0x928   : > { %p2958_p12 = pnand %p2957_p11, %p2953_p8 }
 0x92a   : > { %2961 = shalt.err (!%p2958_p12)
}
 0x92b   : > { %s3014_s14 = smov 128   ;;  %s3989_s15 = smov 8   ;;  %v2123_v29 = vpop.permute.xlu1 %2122  ;;  %v2128_v37 = vpop.permute.xlu0 %2127 }
 0x92c   : > { %2765 = dma.vmem_to_hbm [thread:$0]  (%p3128_p5), %s3859_s20, 512, %s3857_s2, %s3863_s26, %s3014_s14, %s3014_s14, %s3989_s15  }
 0x92d   : > { %s3990_s23 = sshll.u32 %s3140_s25, 5  ;;  %s3991_s4 = sld [smem:[#allocation17_spill]] }
 0x92f   : > { %v2133_v12 = vpop.permute.xlu1 %2132  ;;  %v2138_v52 = vpop.permute.xlu0 %2137 }
 0x933   : > { %s498_s20 = scalar_lea.vmem %s3991_s4, %s3990_s23 }
 0x9d6   : > { %v2763_v26 = vpop.f32.mrf.mxu0 }
 0x9d7   : > { %v2697_v24 = vpop.f32.mrf.mxu1 }
 0x9d8   : > { %v2259_v27 = vpop.f32.mrf.mxu0 }
 0x9d9   : > { %v2698_v28 = vpop.f32.mrf.mxu1 }
 0x9da   : > { %v2699_v32 = vadd.f32 %v2698_v28, %v2697_v24  ;;  %v2764_v4 = vpop.f32.mrf.mxu0 }
 0x9db   : > { %v2700_v35 = vpop.f32.mrf.mxu1 }
 0x9dc   : > { %v2211_v5 = vadd.f32 %v2699_v32, %v2123_v29  ;;  %v2262_v41 = vpop.f32.mrf.mxu0 }
 0x9dd   : > { %v2701_v36 = vpop.f32.mrf.mxu1 }
 0x9de   : > { %v2702_v60 = vadd.f32 %v2701_v36, %v2700_v35  ;;  %v2260_v61 = vadd.f32 %v2259_v27, %v2211_v5 }
 0x9df   : > { %v2703_v38 = vpop.f32.mrf.mxu1 }
 0x9e0   : > { %v2274_v42 = vadd.f32 %v2260_v61, %v3639_v50  ;;  %v2214_v45 = vadd.f32 %v2702_v60, %v2128_v37 }
 0x9e1   : > { %v2704_v43 = vpop.f32.mrf.mxu1 }
 0x9e2   : > { %v2278_v58 = vmax.f32 %v2274_v42, 0.0  ;;  %v2705_v59 = vadd.f32 %v2704_v43, %v2703_v38  ;;  %v2263_v2 = vadd.f32 %v2262_v41, %v2214_v45 }
 0x9e3   : > { %v2706_v44 = vpop.f32.mrf.mxu1 }
 0x9e4   : > { %v2282_v47 = vadd.f32 %v2278_v58, %v3639_v50  ;;  %v2219_v30 = vadd.f32 %v2705_v59, %v2133_v12  ;;  %v2275_v6 = vadd.f32 %v2263_v2, %v3647_v56 }
 0x9e5   : > { %v2707_v62 = vpop.f32.mrf.mxu1 }
 0x9e6   : > { %2286 = vst.msk [vmem:[%s498_s20] sm:$0xff] %vm1769_vm6, %v2282_v47  ;;  %v2268_v63 = vadd.f32 %v2763_v26, %v2219_v30  ;;  %v2279_v33 = vmax.f32 %v2275_v6, 0.0  ;;  %v2708_v20 = vadd.f32 %v2707_v62, %v2706_v44 }
 0x9e8   : > { %v2276_v11 = vadd.f32 %v2268_v63, %v3659_v55  ;;  %v2283_v14 = vadd.f32 %v2279_v33, %v3647_v56  ;;  %v2222_v18 = vadd.f32 %v2708_v20, %v2138_v52 }
 0x9ea   : > { %v2280_v46 = vmax.f32 %v2276_v11, 0.0  ;;  %2287 = vst.msk [vmem:[%s498_s20 + $0x8] sm:$0xff] %vm1769_vm6, %v2283_v14  ;;  %v2271_v22 = vadd.f32 %v2764_v4, %v2222_v18 }
 0x9ec   : > { %v2284_v50 = vadd.f32 %v2280_v46, %v3659_v55  ;;  %v2277_v48 = vadd.f32 %v2271_v22, %v3665_v3 }
 0x9ee   : > { %2288 = vst.msk [vmem:[%s498_s20 + $0x10] sm:$0xff] %vm1769_vm6, %v2284_v50  ;;  %v2281_v51 = vmax.f32 %v2277_v48, 0.0 }
 0x9f0   : > { %v2285_v16 = vadd.f32 %v2281_v51, %v3665_v3 }
 0x9f2   : > { %2289 = vst.msk [vmem:[%s498_s20 + $0x18] sm:$0xff] %vm1769_vm6, %v2285_v16 }
 0x9f3 PF: > { %s3992_s25 = sld [smem:[#allocation7_spill]] }
 0x9f4   : > { %s3993_s16 = sld [smem:[#allocation5_spill]] }
 0x9f9   : > { %p2771_p5 = scmp.ge.s32.totalorder %s3992_s25, 2 }
 0x9fa   : > { %s2327_s2 = sand.u32 1, %s3993_s16  }
 0x9fb   : > { %p2768_p13 = pnand %p2771_p5, %p3132_p6  ;;  %s2328_s26 = scalar_lea.sflag [#allocation3], %s2327_s2 }
 0x9fd   : > { %p2769_p0 = pneg %p2768_p13 }
 0x9ff   : > { %2979 = dma.done.wait (%p2769_p0), %s2328_s26, 512  }
 0xa00   : > { %2981 = vsyncadd (%p2769_p0), %s2328_s26, 4294966784  ;;  %s3995_s16 = sld [smem:[#allocation8_spill]]  ;;  %s3998_s29 = smov %s2988_s30 }
 0xa01   : > { %s3996_s17 = sld [smem:[#allocation6_spill]] }
 0xa02   : > { %s3997_s15 = sld [smem:[#allocation9_spill]] }
 0xa06   : > { %p25_p1 = scmp.ge.s32.totalorder %s3995_s16, 4  }
 0xa07   : > { %s3999_s30 = smov %s3996_s17 }
 0xa08   :  { %27 = sbr.rel (!%p25_p1) target bundleno = 11 (0xb), region = 122 }
 0xa0d   :  { %2341 = vsyncpa [#allocation3], 1 }
 0xa0e   :  { %2343 = vsyncpa [#allocation3 + $0x1], 1 }

// kernel: e2vid_forward.8
= control target key start
LH: loop header
LB: loop body
LE: loop exit
PB: predicated region body
PF: predicated region fallthrough
CT: control target
= control target key end

     0   :  { %s874_s15 = smov 0   ;;  %s1019_s0 = inlined_call_operand.vmem [shape: f32[2,32,256], index: 0, kind: input, shape index: {}]   ;;  %s1020_s1 = inlined_call_operand.vmem [shape: f32[2,16,256], index: 1, kind: input, shape index: {}]   ;;  %s1021_s2 = inlined_call_operand.vmem [shape: bf16[16,288], index: 2, kind: input, shape index: {}]   ;;  %s1022_s3 = inlined_call_operand.vmem [shape: f32[16,1], index: 3, kind: input, shape index: {}]   ;;  %s1023_s4 = inlined_call_operand.vmem [shape: f32[2,16,256], index: 4, kind: output, shape index: {}]  }
   0x1 LB: > { %s773_s16 = sadd.s32 4294967295, %s832_s15   ;;  %p777_p0 = scmp.ge.s32.totalorder %s832_s15, 1  ;;  %s832_s15 = sphi %s874_s15, %s14_s15  }
   0x2   : > { %p172_p1 = scmp.lt.s32.totalorder %s832_s15, 3 }
   0x4   : > { %p173_p2 = pnand %p777_p0, %p172_p1 }
   0x5   : > { %p203_p3 = scmp.lt.s32.totalorder (!%p173_p2), %s773_s16, 1  ;;  %s835_s21 = smov (!%p173_p2), 17  }
   0x6   : > { %176 = sbr.rel (%p173_p2) target bundleno = 548 (0x224), region = 36  ;;  %s836_s22 = smov (!%p173_p2), 16  }
   0x7   : > { %s837_s23 = smov (!%p173_p2), 2   ;;  %s838_s24 = smov (!%p173_p2), 32  }
   0x8   : > { %s839_s25 = smov (!%p173_p2), 18   ;;  %s840_s26 = smov (!%p173_p2), 34  }
   0x9   : > { %s841_s27 = smov (!%p173_p2), 112   ;;  %s842_s28 = smov (!%p173_p2), 126  }
   0xa   : > { %s843_s29 = smov (!%p173_p2), 127   ;;  %s844_s30 = smov (!%p173_p2), 95  }
   0xb   : > { %v219_v0 = vlaneseq  ;;  %s1025_s16 = smov (!%p203_p3, %s773_s16), 1  ;;  %v834_v9 = vmov 0.0   ;;  %vm292_vm4 = vcmask 138240   ;;  %vm338_vm5 = vcmask 130048   ;;  %s845_s5 = smov 96  }
   0xc   : > { %s794_s17 = sshll.u32 %s1025_s16, 6  ;;  %vm321_vm6 = vcmask 15360   ;;  %vm368_vm7 = vcmask 261120   ;;  %vm353_vm8 = vcmask 146432   ;;  %s846_s6 = smov 110   ;;  %vm383_vm9 = vcmask 277504  }
   0xd   : > { %v220_v1 = vand.u32 127, %v219_v0  ;;  %s207_s20 = scalar_lea.vmem %s1019_s0, %s794_s17  ;;  %s848_s9 = smov 94   ;;  %vm464_vm10 = vcmask 916480   ;;  %vm437_vm11 = vcmask 1031168   ;;  %vm410_vm12 = vcmask 1039360  }
   0xe   : > { %v266_v4 = vld [vmem:[%s207_s20 + $0x20] sm:$0xff]  ;;  %v268_v5 = vld [vmem:[%s207_s20 + $0x30] sm:$0xff]  ;;  %v267_v6 = vld [vmem:[%s207_s20 + $0x28] sm:$0xff]  ;;  %vm539_vm13 = vcmask 777216   ;;  %vm518_vm14 = vcmask 785408   ;;  %vm491_vm15 = vcmask 900096  }
   0xf   : > { %v226_v2 = vand.u32 15, %v220_v1  ;;  %v221_v3 = vadd.s32 128, %v220_v1  ;;  %v888_v8 = vpack.c.bf16 %v268_v5, %v266_v4  ;;  %v269_v11 = vld [vmem:[%s207_s20 + $0x38] sm:$0xff]  ;;  %v262_v16 = vld [vmem:[%s207_s20] sm:$0xff]  ;;  %v264_v17 = vld [vmem:[%s207_s20 + $0x10] sm:$0xff] }
  0x10   : > { %v893_v13 = vpack.c.bf16 %v269_v11, %v267_v6  ;;  %v263_v18 = vld [vmem:[%s207_s20 + $0x8] sm:$0xff]  ;;  %v265_v19 = vld [vmem:[%s207_s20 + $0x18] sm:$0xff]  ;;  %v899_v20 = vpack.c.bf16 %v264_v17, %v262_v16  ;;  %v847_v16 = vmov 0   ;;  %s795_s20 = sshll.u32 %s1025_s16, 5 }
  0x11   : > { %vm246_vm0 = vcmp.ne.s32.totalorder %v226_v2, 0  ;;  %v233_v7 = vand.u32 15, %v221_v3  ;;  %288 = vrot.lane.b32.xlu0 %v888_v8, %s835_s21  ;;  %vm254_vm2 = vcmp.ne.s32.totalorder %v226_v2, 15  ;;  %v902_v21 = vpack.c.bf16 %v265_v19, %v263_v18  ;;  %679 = vmatprep.mubr.bf16.mxu1 %v847_v16 }
  0x12   : > { %v784_v10 = vsel %vm246_vm0, 1.0, %v834_v9  ;;  %v786_v22 = vsel %vm254_vm2, 1.0, %v834_v9  ;;  %820 = vset.pattern.permute.xlu0 %v847_v16  ;;  %821 = vset.pattern.permute.xlu1 %v847_v16  ;;  %vm566_vm0 = vcmask 769024  }
  0x13   : > { %v890_v12 = vpack.c.bf16 %v784_v10, %v784_v10  ;;  %vm247_vm1 = vcmp.ne.s32.totalorder %v233_v7, 0  ;;  %vm255_vm3 = vcmp.ne.s32.totalorder %v233_v7, 15  ;;  %v260_v24 = vpack.c.bf16 %v786_v22, %v786_v22  ;;  %v824_v7 = vld [vmem:[%s1021_s2 + $0x4] ss:$12 sps:$4 sm:$0xff]  }
  0x14   : > { %v785_v14 = vsel %vm247_vm1, 1.0, %v834_v9  ;;  %v787_v23 = vsel %vm255_vm3, 1.0, %v834_v9  ;;  %636 = vmatprep.mubr.bf16.mxu0 %v824_v7 }
  0x15   : > { %334 = vrot.lane.b32.xlu1 %v890_v12, %s836_s22  ;;  %v896_v15 = vpack.c.bf16 %v785_v14, %v785_v14  ;;  %290 = vrot.lane.b32.xlu0 %v893_v13, %s835_s21  ;;  %v261_v25 = vpack.c.bf16 %v787_v23, %v787_v23 }
  0x19   : > { %336 = vrot.lane.b32.xlu1 %v896_v15, %s836_s22  ;;  %284 = vrot.lane.b32.xlu0 %v899_v20, %s835_s21 }
  0x1d   : > { %286 = vrot.lane.b32.xlu1 %v902_v21, %s835_s21  ;;  %317 = vrot.lane.b32.xlu0 %v260_v24, %s837_s23 }
  0x21   : > { %319 = vrot.lane.b32.xlu1 %v261_v25, %s837_s23  ;;  %364 = vrot.lane.b32.xlu0 %v890_v12, %s838_s24  ;;  %s212_s23 = scalar_lea.vmem %s1020_s1, %s795_s20 }
  0x25   : > { %366 = vrot.lane.b32.xlu1 %v896_v15, %s838_s24  ;;  %349 = vrot.lane.b32.xlu0 %v260_v24, %s839_s25 }
  0x29   : > { %351 = vrot.lane.b32.xlu1 %v261_v25, %s839_s25  ;;  %379 = vrot.lane.b32.xlu0 %v260_v24, %s840_s26  ;;  %s217_s25 = scalar_lea.vmem %s1023_s4, %s795_s20 }
  0x2d   : > { %381 = vrot.lane.b32.xlu1 %v261_v25, %s840_s26  ;;  %v274_v25 = vld [vmem:[%s1022_s3] sm:$0xff] }
  0x83   : > { %v289_v26 = vpop.permute.xlu0 %288 }
  0x84   : > { %v909_v27 = vsel %vm292_vm4, 0, %v289_v26 }
  0x87   : > { %v335_v28 = vpop.permute.xlu1 %334  ;;  %v291_v30 = vpop.permute.xlu0 %290 }
  0x88   : > { %v346_v29 = vmul.bf16 %v335_v28, %v909_v27  ;;  %v924_v40 = vsel %vm292_vm4, %v291_v30, 0  ;;  %v934_v45 = vsel %vm292_vm4, %v289_v26, %v291_v30  ;;  %v275_v26 = vld [vmem:[%s1022_s3 + $0x8] sm:$0xff] }
  0x8a   : > { %458 = vrot.lane.b32.xlu0 %v346_v29, %s841_s27 }
  0x8b   : > { %v337_v31 = vpop.permute.xlu1 %336  ;;  %v285_v32 = vpop.permute.xlu0 %284 }
  0x8c   : > { %v914_v33 = vsel %vm292_vm4, 0, %v285_v32  ;;  %v348_v42 = vmul.bf16 %v337_v31, %v924_v40  ;;  %v339_v46 = vsel %vm338_vm5, %v335_v28, %v337_v31 }
  0x8d   : > { %v343_v34 = vmul.bf16 %v335_v28, %v914_v33  ;;  %v347_v48 = vmul.bf16 %v339_v46, %v934_v45 }
  0x8f   : > { %v287_v35 = vpop.permute.xlu1 %286  ;;  %452 = vrot.lane.b32.xlu1 %v343_v34, %s841_s27  ;;  %v318_v36 = vpop.permute.xlu0 %317 }
  0x90   : > { %v326_v37 = vmul.bf16 %v318_v36, %v914_v33  ;;  %v329_v38 = vmul.bf16 %v318_v36, %v909_v27  ;;  %v921_v39 = vsel %vm292_vm4, %v287_v35, 0  ;;  %v941_v49 = vsel %vm292_vm4, %v285_v32, %v287_v35 }
  0x91   : > { %v345_v41 = vmul.bf16 %v337_v31, %v921_v39  ;;  %v344_v51 = vmul.bf16 %v339_v46, %v941_v49 }
  0x92   : > { %431 = vrot.lane.b32.xlu0 %v329_v38, %s842_s28 }
  0x93   : > { %425 = vrot.lane.b32.xlu1 %v326_v37, %s842_s28  ;;  %v320_v43 = vpop.permute.xlu1 %319  ;;  %v365_v54 = vpop.permute.xlu0 %364 }
  0x94   : > { %v328_v44 = vmul.bf16 %v320_v43, %v921_v39  ;;  %v331_v47 = vmul.bf16 %v320_v43, %v924_v40  ;;  %v322_v50 = vsel %vm321_vm6, %v318_v36, %v320_v43  ;;  %v376_v56 = vmul.bf16 %v365_v54, %v909_v27 }
  0x95   : > { %v330_v52 = vmul.bf16 %v322_v50, %v934_v45  ;;  %v327_v53 = vmul.bf16 %v322_v50, %v941_v49  ;;  %v373_v59 = vmul.bf16 %v365_v54, %v914_v33 }
  0x96   : > { %456 = vrot.lane.b32.xlu0 %v345_v41, %s841_s27 }
  0x97   : > { %462 = vrot.lane.b32.xlu1 %v348_v42, %s841_s27  ;;  %v367_v55 = vpop.permute.xlu1 %366  ;;  %v350_v63 = vpop.permute.xlu0 %349 }
  0x98   : > { %v378_v57 = vmul.bf16 %v367_v55, %v924_v40  ;;  %v375_v58 = vmul.bf16 %v367_v55, %v921_v39  ;;  %v369_v60 = vsel %vm368_vm7, %v365_v54, %v367_v55  ;;  %v361_v1 = vmul.bf16 %v350_v63, %v909_v27 }
  0x99   : > { %v377_v62 = vmul.bf16 %v369_v60, %v934_v45  ;;  %v374_v3 = vmul.bf16 %v369_v60, %v941_v49  ;;  %v358_v5 = vmul.bf16 %v350_v63, %v914_v33 }
  0x9a   : > { %429 = vrot.lane.b32.xlu0 %v328_v44, %s842_s28 }
  0x9b   : > { %435 = vrot.lane.b32.xlu1 %v331_v47, %s842_s28  ;;  %v352_v61 = vpop.permute.xlu1 %351  ;;  %v380_v9 = vpop.permute.xlu0 %379 }
  0x9c   : > { %v363_v0 = vmul.bf16 %v352_v61, %v924_v40  ;;  %v354_v2 = vsel %vm353_vm8, %v350_v63, %v352_v61  ;;  %v360_v6 = vmul.bf16 %v352_v61, %v921_v39  ;;  %v391_v14 = vmul.bf16 %v380_v9, %v909_v27 }
  0x9d   : > { %v362_v4 = vmul.bf16 %v354_v2, %v934_v45  ;;  %v359_v10 = vmul.bf16 %v354_v2, %v941_v49  ;;  %v388_v24 = vmul.bf16 %v380_v9, %v914_v33  ;;  %v314_v63 = vmul.bf16 %v934_v45, %v896_v15 }
  0x9e   : > { %460 = vrot.lane.b32.xlu0 %v347_v48, %s841_s27  ;;  %v313_v2 = vmul.bf16 %v909_v27, %v890_v12 }
  0x9f   : > { %408 = vrot.lane.b32.xlu1 %v924_v40, %s843_s29  ;;  %v382_v11 = vpop.permute.xlu1 %381 }
  0xa0   : > { %v384_v17 = vsel %vm383_vm9, %v380_v9, %v382_v11  ;;  %v393_v18 = vmul.bf16 %v382_v11, %v924_v40  ;;  %v390_v23 = vmul.bf16 %v382_v11, %v921_v39 }
  0xa1   : > { %v392_v19 = vmul.bf16 %v384_v17, %v934_v45  ;;  %v389_v22 = vmul.bf16 %v384_v17, %v941_v49 }
  0xa2   : > { %406 = vrot.lane.b32.xlu0 %v934_v45, %s843_s29 }
  0xa3   : > { %454 = vrot.lane.b32.xlu1 %v344_v51, %s841_s27 }
  0xa6   : > { %433 = vrot.lane.b32.xlu0 %v330_v52, %s842_s28 }
  0xa7   : > { %400 = vrot.lane.b32.xlu1 %v941_v49, %s843_s29 }
  0xaa   : > { %404 = vrot.lane.b32.xlu0 %v909_v27, %s843_s29 }
  0xab   : > { %427 = vrot.lane.b32.xlu1 %v327_v53, %s842_s28 }
  0xae   : > { %402 = vrot.lane.b32.xlu0 %v921_v39, %s843_s29 }
  0xaf   : > { %398 = vrot.lane.b32.xlu1 %v914_v33, %s843_s29 }
  0xb2   : > { %535 = vrot.lane.b32.xlu0 %v934_v45, %s844_s30 }
  0xb3   : > { %537 = vrot.lane.b32.xlu1 %v924_v40, %s844_s30 }
  0xb6   : > { %533 = vrot.lane.b32.xlu0 %v909_v27, %s844_s30 }
  0xb7   : > { %529 = vrot.lane.b32.xlu1 %v941_v49, %s844_s30 }
  0xba   : > { %531 = vrot.lane.b32.xlu0 %v921_v39, %s844_s30 }
  0xbb   : > { %527 = vrot.lane.b32.xlu1 %v914_v33, %s844_s30 }
  0xbe   : > { %512 = vrot.lane.b32.xlu0 %v376_v56, %s845_s5 }
  0xbf   : > { %516 = vrot.lane.b32.xlu1 %v378_v57, %s845_s5 }
  0xc2   : > { %510 = vrot.lane.b32.xlu0 %v375_v58, %s845_s5 }
  0xc3   : > { %506 = vrot.lane.b32.xlu1 %v373_v59, %s845_s5 }
  0xc6   : > { %514 = vrot.lane.b32.xlu0 %v377_v62, %s845_s5 }
  0xc7   : > { %489 = vrot.lane.b32.xlu1 %v363_v0, %s846_s6 }
  0xca   : > { %485 = vrot.lane.b32.xlu0 %v361_v1, %s846_s6 }
  0xcb   : > { %508 = vrot.lane.b32.xlu1 %v374_v3, %s845_s5  ;;  %v312_v3 = vmul.bf16 %v941_v49, %v896_v15 }
  0xce   : > { %487 = vrot.lane.b32.xlu0 %v362_v4, %s846_s6 }
  0xcf   : > { %479 = vrot.lane.b32.xlu1 %v358_v5, %s846_s6 }
  0xd2   : > { %483 = vrot.lane.b32.xlu0 %v360_v6, %s846_s6  ;;  %v311_v6 = vmul.bf16 %v914_v33, %v890_v12 }
  0xd3   : > { %481 = vrot.lane.b32.xlu1 %v359_v10, %s846_s6 }
  0xd6   : > { %560 = vrot.lane.b32.xlu0 %v391_v14, %s848_s9 }
  0xd7   : > { %564 = vrot.lane.b32.xlu1 %v393_v18, %s848_s9 }
  0xda   : > { %562 = vrot.lane.b32.xlu0 %v392_v19, %s848_s9 }
  0xdb   : > { %556 = vrot.lane.b32.xlu1 %v389_v22, %s848_s9 }
  0xde   : > { %558 = vrot.lane.b32.xlu0 %v390_v23, %s848_s9 }
  0xdf   : > { %554 = vrot.lane.b32.xlu1 %v388_v24, %s848_s9 }
  0xe2   : > { %577 = vperm.xlu0 %820, %v274_v25  }
  0xe3   : > { %582 = vperm.xlu1 %821, %v275_v26  }
  0xfc   : > { %v459_v28 = vpop.permute.xlu0 %458 }
 0x101   : > { %v453_v29 = vpop.permute.xlu1 %452 }
 0x104   : > { %v432_v30 = vpop.permute.xlu0 %431 }
 0x105   : > { %v426_v31 = vpop.permute.xlu1 %425 }
 0x108   : > { %v457_v32 = vpop.permute.xlu0 %456 }
 0x109   : > { %v463_v34 = vpop.permute.xlu1 %462 }
 0x10c   : > { %v430_v35 = vpop.permute.xlu0 %429 }
 0x10d   : > { %v436_v36 = vpop.permute.xlu1 %435 }
 0x110   : > { %v461_v37 = vpop.permute.xlu0 %460 }
 0x111   : > { %v409_v38 = vpop.permute.xlu1 %408  ;;  %v468_v39 = vsel %vm464_vm10, %v461_v37, %v463_v34  ;;  %v467_v40 = vsel %vm464_vm10, %v459_v28, %v461_v37 }
 0x112   : > { %604 = vmatprep.subr.bf16.mxu0 %v468_v39  ;;  %v822_v39 = vld [vmem:[%s1021_s2] ss:$12 sps:$4 sm:$0xff]  }
 0x113   : > { %605 = vmatpush1.bf16.msra.mxu0 %v467_v40 }
 0x114   : > { %v407_v41 = vpop.permute.xlu0 %406 }
 0x115   : > { %v455_v42 = vpop.permute.xlu1 %454  ;;  %v414_v56 = vsel %vm410_vm12, %v407_v41, %v409_v38 }
 0x116   : > { %v466_v43 = vsel %vm464_vm10, %v455_v42, %v457_v32  ;;  %v465_v44 = vsel %vm464_vm10, %v453_v29, %v455_v42  ;;  %v825_v42 = vld [vmem:[%s1021_s2 + $0x8] ss:$12 sps:$4 sm:$0xff]  }
 0x117   : > { %606 = vmatprep.subr.bf16.mxu0 %v466_v43 }
 0x118   : > { %607 = vmatpush1.bf16.msra.mxu0 %v465_v44  ;;  %v434_v46 = vpop.permute.xlu0 %433 }
 0x119   : > { %v401_v47 = vpop.permute.xlu1 %400  ;;  %v441_v48 = vsel %vm437_vm11, %v434_v46, %v436_v36  ;;  %v440_v50 = vsel %vm437_vm11, %v432_v30, %v434_v46 }
 0x11a   : > { %608 = vmatprep.subr.bf16.mxu0 %v441_v48 }
 0x11c   : > { %609 = vmatpush1.bf16.msra.mxu0 %v440_v50  ;;  %v405_v51 = vpop.permute.xlu0 %404 }
 0x11d   : > { %v428_v52 = vpop.permute.xlu1 %427  ;;  %v413_v58 = vsel %vm410_vm12, %v405_v51, %v407_v41 }
 0x11e   : > { %v439_v53 = vsel %vm437_vm11, %v428_v52, %v430_v35  ;;  %v438_v54 = vsel %vm437_vm11, %v426_v31, %v428_v52  ;;  %v694_v52 = vld [vmem:[%s212_s23] sm:$0xff] }
 0x11f   : > { %610 = vmatprep.subr.bf16.mxu0 %v439_v53 }
 0x120   : > { %611 = vmatpush1.bf16.msra.mxu0 %v438_v54  ;;  %v403_v55 = vpop.permute.xlu0 %402 }
 0x121   : > { %v399_v57 = vpop.permute.xlu1 %398  ;;  %612 = vmatprep.subr.bf16.mxu0 %v414_v56  ;;  %v412_v60 = vsel %vm410_vm12, %v401_v47, %v403_v55 }
 0x122   : > { %v411_v62 = vsel %vm410_vm12, %v399_v57, %v401_v47 }
 0x124   : > { %613 = vmatpush1.bf16.msra.mxu0 %v413_v58  ;;  %v536_v59 = vpop.permute.xlu0 %535  ;;  %v695_v58 = vld [vmem:[%s212_s23 + $0x8] sm:$0xff] }
 0x125   : > { %v538_v61 = vpop.permute.xlu1 %537  ;;  %614 = vmatprep.subr.bf16.mxu0 %v412_v60 }
 0x126   : > { %v543_v7 = vsel %vm539_vm13, %v536_v59, %v538_v61 }
 0x128   : > { %615 = vmatpush1.bf16.msra.mxu0 %v411_v62  ;;  %v534_v0 = vpop.permute.xlu0 %533 }
 0x129   : > { %v530_v1 = vpop.permute.xlu1 %529  ;;  %616 = vmatprep.subr.bf16.mxu0 %v314_v63  ;;  %v542_v10 = vsel %vm539_vm13, %v534_v0, %v536_v59  ;;  %v696_v0 = vld [vmem:[%s212_s23 + $0x10] sm:$0xff] }
 0x12c   : > { %617 = vmatpush1.bf16.msra.mxu0 %v313_v2  ;;  %v532_v4 = vpop.permute.xlu0 %531 }
 0x12d   : > { %v528_v5 = vpop.permute.xlu1 %527  ;;  %618 = vmatprep.subr.bf16.mxu0 %v312_v3  ;;  %v541_v27 = vsel %vm539_vm13, %v530_v1, %v532_v4 }
 0x12e   : > { %v540_v15 = vsel %vm539_vm13, %v528_v5, %v530_v1  ;;  %v697_v5 = vld [vmem:[%s212_s23 + $0x18] sm:$0xff] }
 0x130   : > { %619 = vmatpush1.bf16.msra.mxu0 %v311_v6  ;;  %v513_v45 = vpop.permute.xlu0 %512 }
 0x131   : > { %v517_v9 = vpop.permute.xlu1 %516  ;;  %620 = vmatprep.subr.bf16.mxu0 %v543_v7 }
 0x134   : > { %621 = vmatpush2.bf16.msra.mxu0 %v542_v10  ;;  %v511_v11 = vpop.permute.xlu0 %510 }
 0x135   : > { %v507_v14 = vpop.permute.xlu1 %506  ;;  %622 = vmatprep.subr.bf16.mxu0 %v541_v27 }
 0x138   : > { %623 = vmatpush2.bf16.msra.mxu0 %v540_v15  ;;  %v515_v49 = vpop.permute.xlu0 %514 }
 0x139   : > { %v490_v16 = vpop.permute.xlu1 %489  ;;  %v522_v17 = vsel %vm518_vm14, %v515_v49, %v517_v9  ;;  %v521_v18 = vsel %vm518_vm14, %v513_v45, %v515_v49 }
 0x13a   : > { %624 = vmatprep.subr.bf16.mxu0 %v522_v17 }
 0x13c   : > { %625 = vmatpush2.bf16.msra.mxu0 %v521_v18  ;;  %v486_v12 = vpop.permute.xlu0 %485 }
 0x13d   : > { %v509_v33 = vpop.permute.xlu1 %508 }
 0x13e   : > { %v520_v19 = vsel %vm518_vm14, %v509_v33, %v511_v11  ;;  %v519_v22 = vsel %vm518_vm14, %v507_v14, %v509_v33 }
 0x13f   : > { %626 = vmatprep.subr.bf16.mxu0 %v520_v19 }
 0x140   : > { %627 = vmatpush2.bf16.msra.mxu0 %v519_v22  ;;  %v488_v23 = vpop.permute.xlu0 %487 }
 0x141   : > { %v480_v24 = vpop.permute.xlu1 %479  ;;  %v495_v25 = vsel %vm491_vm15, %v488_v23, %v490_v16  ;;  %v494_v26 = vsel %vm491_vm15, %v486_v12, %v488_v23 }
 0x142   : > { %628 = vmatprep.subr.bf16.mxu0 %v495_v25 }
 0x144   : > { %629 = vmatpush2.bf16.msra.mxu0 %v494_v26  ;;  %v484_v28 = vpop.permute.xlu0 %483 }
 0x145   : > { %v482_v29 = vpop.permute.xlu1 %481 }
 0x146   : > { %v493_v30 = vsel %vm491_vm15, %v482_v29, %v484_v28  ;;  %v492_v31 = vsel %vm491_vm15, %v480_v24, %v482_v29 }
 0x147   : > { %630 = vmatprep.subr.bf16.mxu0 %v493_v30 }
 0x148   : > { %631 = vmatpush2.bf16.msra.mxu0 %v492_v31  ;;  %v561_v32 = vpop.permute.xlu0 %560 }
 0x149   : > { %v565_v34 = vpop.permute.xlu1 %564  ;;  %632 = vmatprep.subr.bf16.mxu0 %v893_v13 }
 0x14c   : > { %633 = vmatpush2.bf16.msra.mxu0 %v888_v8  ;;  %v563_v35 = vpop.permute.xlu0 %562 }
 0x14d   : > { %v557_v36 = vpop.permute.xlu1 %556  ;;  %v570_v37 = vsel %vm566_vm0, %v563_v35, %v565_v34  ;;  %634 = vmatprep.subr.bf16.mxu0 %v902_v21  ;;  %v569_v38 = vsel %vm566_vm0, %v561_v32, %v563_v35 }
 0x14e   : > { %659 = vmatprep.subr.bf16.mxu1 %v570_v37 }
 0x14f   : > { %660 = vmatpush1.bf16.msra.mxu1 %v569_v38 }
 0x150   : > { %635 = vmatpush2.bf16.msra.mxu0 %v899_v20  ;;  %v559_v40 = vpop.permute.xlu0 %558 }
 0x151   : > { %v555_v13 = vpop.permute.xlu1 %554  ;;  %v568_v41 = vsel %vm566_vm0, %v557_v36, %v559_v40 }
 0x152   : > { %661 = vmatprep.subr.bf16.mxu1 %v568_v41  ;;  %v567_v8 = vsel %vm566_vm0, %v555_v13, %v557_v36 }
 0x153   : > { %637 = vmatmul.mubr.bf16.vlgmr.msra.gmra.mxu0 %v822_v39  ;;  %662 = vmatpush1.bf16.msra.mxu1 %v567_v8 }
 0x156   : > { %791 = vmatmul.mubr.msk.bf16.vlgmr.msra.gmra.mxu1 %vm368_vm7, %v825_v42 }
 0x15d   : > { %v578_v21 = vpop.permute.xlu0 %577 }
 0x15e   : > { %v583_v20 = vpop.permute.xlu1 %582 }
 0x213   : > { %v638_v43 = vpop.f32.mrf.mxu0 }
 0x214   : > { %v639_v44 = vadd.f32 %v638_v43, %v578_v21 }
 0x215   : > { %v640_v46 = vpop.f32.mrf.mxu0 }
 0x216   : > { %v641_v47 = vadd.f32 %v640_v46, %v578_v21  ;;  %v681_v48 = vpop.f32.mrf.mxu1 }
 0x217   : > { %v682_v50 = vadd.f32 %v681_v48, %v639_v44  ;;  %v642_v51 = vpop.f32.mrf.mxu0 }
 0x218   : > { %v643_v53 = vadd.f32 %v642_v51, %v583_v20  ;;  %v683_v54 = vpop.f32.mrf.mxu1 }
 0x219   : > { %v690_v55 = vmax.f32 %v682_v50, 0.0  ;;  %v684_v56 = vadd.f32 %v683_v54, %v641_v47  ;;  %v644_v57 = vpop.f32.mrf.mxu0 }
 0x21a   : > { %v645_v59 = vadd.f32 %v644_v57, %v583_v20  ;;  %v685_v60 = vpop.f32.mrf.mxu1 }
 0x21b   : > { %v698_v61 = vadd.f32 %v694_v52, %v690_v55  ;;  %v691_v62 = vmax.f32 %v684_v56, 0.0  ;;  %v686_v63 = vadd.f32 %v685_v60, %v643_v53 }
 0x21c   : > { %v687_v1 = vpop.f32.mrf.mxu1 }
 0x21d   : > { %702 = vst [vmem:[%s217_s25] sm:$0xff] %v698_v61  ;;  %v699_v2 = vadd.f32 %v695_v58, %v691_v62  ;;  %v692_v3 = vmax.f32 %v686_v63, 0.0  ;;  %v688_v4 = vadd.f32 %v687_v1, %v645_v59 }
 0x21f   : > { %703 = vst [vmem:[%s217_s25 + $0x8] sm:$0xff] %v699_v2  ;;  %v700_v6 = vadd.f32 %v696_v0, %v692_v3  ;;  %v693_v45 = vmax.f32 %v688_v4, 0.0 }
 0x221   : > { %704 = vst [vmem:[%s217_s25 + $0x10] sm:$0xff] %v700_v6  ;;  %v701_v7 = vadd.f32 %v697_v5, %v693_v45 }
 0x223   : > { %705 = vst [vmem:[%s217_s25 + $0x18] sm:$0xff] %v701_v7 }
 0x224 PF: > { %s14_s15 = sadd.s32 1, %s832_s15  }
 0x225   : > { %p11_p4 = scmp.ge.s32.totalorder %s14_s15, 4  }
 0x227   :  { %13 = sbr.rel (!%p11_p4) target bundleno = 1 (0x1), region = 69 }

// kernel: e2vid_forward.9
= control target key start
LH: loop header
LB: loop body
LE: loop exit
PB: predicated region body
PF: predicated region fallthrough
CT: control target
= control target key end

     0   :  { %s1711_s23 = smov 0   ;;  %s2269_s0 = inlined_call_operand.vmem [shape: f32[2,16,1024], index: 0, kind: input, shape index: {}]   ;;  %s2270_s1 = inlined_call_operand.vmem [shape: f32[2,8,1024], index: 1, kind: input, shape index: {}]   ;;  %s2271_s2 = inlined_call_operand.vmem [shape: bf16[8,144], index: 2, kind: input, shape index: {}]   ;;  %s2272_s3 = inlined_call_operand.vmem [shape: f32[8,1], index: 3, kind: input, shape index: {}]   ;;  %s2273_s4 = inlined_call_operand.vmem [shape: bf16[1,8], index: 4, kind: input, shape index: {}]   ;;  %s2274_s5 = inlined_call_operand.<no memory space> [shape: f32[1,1], index: 5, kind: input, shape index: {}]   ;;  %s2275_s6 = inlined_call_operand.vmem [shape: f32[2,1,1024], index: 6, kind: output, shape index: {}]  }
   0x1   :  { %v11_v0 = vstv %s2274_s5 }
   0x2   :  { %12 = vst [vmem:[#allocation2] sm:$0x1] %v11_v0 }
   0x3 LB: > { %s1579_s24 = sadd.s32 4294967295, %s1656_s23   ;;  %p1583_p0 = scmp.ge.s32.totalorder %s1656_s23, 1  ;;  %s1656_s23 = sphi %s1711_s23, %s18_s23  }
   0x4   : > { %p224_p1 = scmp.lt.s32.totalorder %s1656_s23, 3 }
   0x6   : > { %p225_p2 = pnand %p1583_p0, %p224_p1 }
   0x7   : > { %p258_p3 = scmp.lt.s32.totalorder (!%p225_p2), %s1579_s24, 1  ;;  %s1658_s28 = smov (!%p225_p2), 33  }
   0x8   : > { %228 = sbr.rel (%p225_p2) target bundleno = 804 (0x324), region = 44  ;;  %s1660_s29 = smov (!%p225_p2), 64  }
   0x9   : > { %s1661_s30 = smov (!%p225_p2), 34   ;;  %s1662_s7 = smov (!%p225_p2), 32  }
   0xa   : > { %s1663_s8 = smov (!%p225_p2), 2   ;;  %s1664_s9 = smov (!%p225_p2), 66  }
   0xb   : > { %s1665_s10 = smov (!%p225_p2), 63   ;;  %s1666_s11 = smov (!%p225_p2), 94  }
   0xc   : > { %s1667_s12 = smov (!%p225_p2), 96   ;;  %s1668_s13 = smov (!%p225_p2), 126  }
   0xd   : > { %v273_v1 = vlaneseq  ;;  %s2277_s24 = smov (!%p258_p3, %s1579_s24), 1  ;;  %v1659_v22 = vmov 0.0   ;;  %s1669_s14 = smov 127  }
   0xe   : > { %s1621_s5 = sshll.u32 %s2277_s24, 7  ;;  %s1670_s15 = smov 62  }
   0xf   : > { %v1722_v2 = vand.u32 127, %v273_v1  ;;  %s1731_s27 = scalar_lea.vmem %s2269_s0, %s1621_s5  ;;  %s1622_s20 = sshll.u32 %s2277_s24, 6 }
  0x10   : > { %v444_v6 = vld [vmem:[%s1731_s27 + $0x10] sm:$0xff]  ;;  %v442_v8 = vld [vmem:[%s1731_s27] sm:$0xff]  ;;  %v445_v11 = vld [vmem:[%s1731_s27 + $0x18] sm:$0xff]  ;;  %s2234_s5 = scalar_lea.vmem %s2270_s1, %s1622_s20 }
  0x11   : > { %v286_v3 = vand.u32 31, %v1722_v2  ;;  %v276_v4 = vadd.s32 256, %v1722_v2  ;;  %v275_v5 = vadd.s32 128, %v1722_v2  ;;  %v452_v7 = vld [vmem:[%s1731_s27 + $0x50] sm:$0xff]  ;;  %v450_v10 = vld [vmem:[%s1731_s27 + $0x40] sm:$0xff]  ;;  %v453_v12 = vld [vmem:[%s1731_s27 + $0x58] sm:$0xff] }
  0x12   : > { %v1736_v9 = vpack.c.bf16 %v452_v7, %v444_v6  ;;  %v278_v14 = vadd.s32 512, %v1722_v2  ;;  %v1742_v15 = vpack.c.bf16 %v450_v10, %v442_v8  ;;  %v443_v16 = vld [vmem:[%s1731_s27 + $0x8] sm:$0xff]  ;;  %v277_v19 = vadd.s32 384, %v1722_v2  ;;  %v446_v24 = vld [vmem:[%s1731_s27 + $0x20] sm:$0xff]  ;;  %v448_v52 = vld [vmem:[%s1731_s27 + $0x30] sm:$0xff] }
  0x13   : > { %vm378_vm0 = vcmp.ne.s32.totalorder %v286_v3, 0  ;;  %v300_v13 = vand.u32 31, %v276_v4  ;;  %v451_v17 = vld [vmem:[%s1731_s27 + $0x48] sm:$0xff]  ;;  %v293_v18 = vand.u32 31, %v275_v5  ;;  %v1749_v20 = vpack.c.bf16 %v453_v12, %v445_v11  ;;  %v454_v25 = vld [vmem:[%s1731_s27 + $0x60] sm:$0xff]  ;;  %v456_v53 = vld [vmem:[%s1731_s27 + $0x70] sm:$0xff] }
  0x14   : > { %480 = vrot.lane.b32.xlu1 %v1736_v9, %s1658_s28  ;;  %476 = vrot.lane.b32.xlu0 %v1742_v15, %s1658_s28  ;;  %v1753_v21 = vpack.c.bf16 %v451_v17, %v443_v16  ;;  %v1589_v23 = vsel %vm378_vm0, 1.0, %v1659_v22  ;;  %v314_v26 = vand.u32 31, %v278_v14  ;;  %v307_v27 = vand.u32 31, %v277_v19  ;;  %v447_v54 = vld [vmem:[%s1731_s27 + $0x28] sm:$0xff]  ;;  %v449_v61 = vld [vmem:[%s1731_s27 + $0x38] sm:$0xff] }
  0x15   : > { %vm380_vm1 = vcmp.ne.s32.totalorder %v300_v13, 0  ;;  %vm379_vm2 = vcmp.ne.s32.totalorder %v293_v18, 0  ;;  %v1760_v28 = vpack.c.bf16 %v1589_v23, %v1589_v23  ;;  %v1764_v29 = vpack.c.bf16 %v454_v25, %v446_v24  ;;  %v455_v55 = vld [vmem:[%s1731_s27 + $0x68] sm:$0xff]  ;;  %v457_v62 = vld [vmem:[%s1731_s27 + $0x78] sm:$0xff]  ;;  %s1588_s27 = sshll.u32 %s2277_s24, 3 }
  0x16   : > { %v1591_v30 = vsel %vm380_vm1, 1.0, %v1659_v22  ;;  %v1590_v31 = vsel %vm379_vm2, 1.0, %v1659_v22  ;;  %vm382_vm3 = vcmp.ne.s32.totalorder %v314_v26, 0  ;;  %vm381_vm4 = vcmp.ne.s32.totalorder %v307_v27, 0 }
  0x17   : > { %v1770_v32 = vpack.c.bf16 %v1591_v30, %v1591_v30  ;;  %v1774_v33 = vpack.c.bf16 %v1590_v31, %v1590_v31  ;;  %v1593_v34 = vsel %vm382_vm3, 1.0, %v1659_v22  ;;  %v1592_v35 = vsel %vm381_vm4, 1.0, %v1659_v22 }
  0x18   : > { %482 = vrot.lane.b32.xlu1 %v1749_v20, %s1658_s28  ;;  %478 = vrot.lane.b32.xlu0 %v1753_v21, %s1658_s28  ;;  %vm411_vm5 = vcmp.ne.s32.totalorder %v293_v18, 31  ;;  %vm410_vm6 = vcmp.ne.s32.totalorder %v286_v3, 31  ;;  %v1780_v36 = vpack.c.bf16 %v1593_v34, %v1593_v34  ;;  %v1784_v37 = vpack.c.bf16 %v1592_v35, %v1592_v35 }
  0x19   : > { %v1598_v38 = vsel %vm411_vm5, 1.0, %v1659_v22  ;;  %v1597_v39 = vsel %vm410_vm6, 1.0, %v1659_v22  ;;  %vm413_vm7 = vcmp.ne.s32.totalorder %v307_v27, 31  ;;  %vm412_vm8 = vcmp.ne.s32.totalorder %v300_v13, 31 }
  0x1a   : > { %v435_v40 = vpack.c.bf16 %v1598_v38, %v1598_v38  ;;  %v434_v41 = vpack.c.bf16 %v1597_v39, %v1597_v39  ;;  %v1600_v42 = vsel %vm413_vm7, 1.0, %v1659_v22  ;;  %v1599_v43 = vsel %vm412_vm8, 1.0, %v1659_v22 }
  0x1b   : > { %vm414_vm9 = vcmp.ne.s32.totalorder %v314_v26, 31  ;;  %v437_v44 = vpack.c.bf16 %v1600_v42, %v1600_v42  ;;  %v436_v45 = vpack.c.bf16 %v1599_v43, %v1599_v43  ;;  %v279_v48 = vadd.s32 640, %v1722_v2 }
  0x1c   : > { %665 = vrot.lane.b32.xlu1 %v1760_v28, %s1660_s29  ;;  %484 = vrot.lane.b32.xlu0 %v1764_v29, %s1658_s28  ;;  %v1601_v46 = vsel %vm414_vm9, 1.0, %v1659_v22  ;;  %v281_v50 = vadd.s32 896, %v1722_v2  ;;  %v280_v51 = vadd.s32 768, %v1722_v2  ;;  %v1826_v58 = vpack.c.bf16 %v456_v53, %v448_v52 }
  0x1d   : > { %v438_v47 = vpack.c.bf16 %v1601_v46, %v1601_v46  ;;  %v321_v49 = vand.u32 31, %v279_v48  ;;  %v1829_v59 = vpack.c.bf16 %v455_v55, %v447_v54  ;;  %v1840_v0 = vpack.c.bf16 %v457_v62, %v449_v61 }
  0x1e   : > { %v335_v56 = vand.u32 31, %v281_v50  ;;  %v328_v57 = vand.u32 31, %v280_v51  ;;  %vm492_vm0 = vcmask 269312   ;;  %vm681_vm1 = vcmask 523264  }
  0x1f   : > { %vm383_vm10 = vcmp.ne.s32.totalorder %v321_v49, 0  ;;  %vm415_vm14 = vcmp.ne.s32.totalorder %v321_v49, 31  ;;  %vm639_vm2 = vcmask 277504   ;;  %vm597_vm3 = vcmask 261120  }
  0x20   : > { %669 = vrot.lane.b32.xlu1 %v1770_v32, %s1660_s29  ;;  %667 = vrot.lane.b32.xlu0 %v1774_v33, %s1660_s29  ;;  %v1594_v60 = vsel %vm383_vm10, 1.0, %v1659_v22  ;;  %vm385_vm11 = vcmp.ne.s32.totalorder %v335_v56, 0  ;;  %vm384_vm12 = vcmp.ne.s32.totalorder %v328_v57, 0  ;;  %vm416_vm13 = vcmp.ne.s32.totalorder %v328_v57, 31 }
  0x21   : > { %v1836_v63 = vpack.c.bf16 %v1594_v60, %v1594_v60  ;;  %v1596_v2 = vsel %vm385_vm11, 1.0, %v1659_v22  ;;  %v1595_v3 = vsel %vm384_vm12, 1.0, %v1659_v22  ;;  %v1603_v6 = vsel %vm416_vm13, 1.0, %v1659_v22 }
  0x22   : > { %v1846_v4 = vpack.c.bf16 %v1596_v2, %v1596_v2  ;;  %v1850_v5 = vpack.c.bf16 %v1595_v3, %v1595_v3  ;;  %v1602_v7 = vsel %vm415_vm14, 1.0, %v1659_v22  ;;  %vm417_vm15 = vcmp.ne.s32.totalorder %v335_v56, 31 }
  0x23   : > { %v440_v8 = vpack.c.bf16 %v1603_v6, %v1603_v6  ;;  %v439_v10 = vpack.c.bf16 %v1602_v7, %v1602_v7  ;;  %v1604_v11 = vsel %vm417_vm15, 1.0, %v1659_v22  ;;  %vm547_vm4 = vcmask 15360  }
  0x24   : > { %673 = vrot.lane.b32.xlu1 %v1780_v36, %s1660_s29  ;;  %671 = vrot.lane.b32.xlu0 %v1784_v37, %s1660_s29  ;;  %v441_v12 = vpack.c.bf16 %v1604_v11, %v1604_v11  ;;  %vm723_vm5 = vcmask 539648   ;;  %vm1051_vm6 = vcmask 130048   ;;  %vm979_vm7 = vcmask 515072  }
  0x25   : > { %vm901_vm8 = vcmask 769024   ;;  %vm857_vm9 = vcmask 785408   ;;  %vm813_vm10 = vcmask 1031168   ;;  %vm769_vm11 = vcmask 1039360  }
  0x26   : > { %vm1023_vm12 = vcmask 506880   ;;  %vm1266_vm13 = vcmask 1043456   ;;  %vm1262_vm14 = vcmask 64512  }
  0x28   : > { %625 = vrot.lane.b32.xlu1 %v435_v40, %s1661_s30  ;;  %623 = vrot.lane.b32.xlu0 %v434_v41, %s1661_s30 }
  0x2c   : > { %629 = vrot.lane.b32.xlu1 %v437_v44, %s1661_s30  ;;  %627 = vrot.lane.b32.xlu0 %v436_v45, %s1661_s30 }
  0x30   : > { %581 = vrot.lane.b32.xlu1 %v1760_v28, %s1662_s7  ;;  %631 = vrot.lane.b32.xlu0 %v438_v47, %s1661_s30 }
  0x34   : > { %585 = vrot.lane.b32.xlu1 %v1770_v32, %s1662_s7  ;;  %583 = vrot.lane.b32.xlu0 %v1774_v33, %s1662_s7 }
  0x38   : > { %589 = vrot.lane.b32.xlu1 %v1780_v36, %s1662_s7  ;;  %587 = vrot.lane.b32.xlu0 %v1784_v37, %s1662_s7 }
  0x3c   : > { %533 = vrot.lane.b32.xlu1 %v435_v40, %s1663_s8  ;;  %531 = vrot.lane.b32.xlu0 %v434_v41, %s1663_s8 }
  0x40   : > { %537 = vrot.lane.b32.xlu1 %v437_v44, %s1663_s8  ;;  %535 = vrot.lane.b32.xlu0 %v436_v45, %s1663_s8 }
  0x44   : > { %707 = vrot.lane.b32.xlu1 %v434_v41, %s1664_s9  ;;  %539 = vrot.lane.b32.xlu0 %v438_v47, %s1663_s8 }
  0x48   : > { %711 = vrot.lane.b32.xlu1 %v436_v45, %s1664_s9  ;;  %709 = vrot.lane.b32.xlu0 %v435_v40, %s1664_s9 }
  0x4c   : > { %715 = vrot.lane.b32.xlu1 %v438_v47, %s1664_s9  ;;  %713 = vrot.lane.b32.xlu0 %v437_v44, %s1664_s9 }
  0x50   : > { %488 = vrot.lane.b32.xlu1 %v1826_v58, %s1658_s28  ;;  %486 = vrot.lane.b32.xlu0 %v1829_v59, %s1658_s28 }
  0x54   : > { %675 = vrot.lane.b32.xlu1 %v1836_v63, %s1660_s29  ;;  %490 = vrot.lane.b32.xlu0 %v1840_v0, %s1658_s28 }
  0x58   : > { %679 = vrot.lane.b32.xlu1 %v1846_v4, %s1660_s29  ;;  %677 = vrot.lane.b32.xlu0 %v1850_v5, %s1660_s29 }
  0x5c   : > { %635 = vrot.lane.b32.xlu1 %v440_v8, %s1661_s30  ;;  %633 = vrot.lane.b32.xlu0 %v439_v10, %s1661_s30 }
  0x60   : > { %591 = vrot.lane.b32.xlu1 %v1836_v63, %s1662_s7  ;;  %637 = vrot.lane.b32.xlu0 %v441_v12, %s1661_s30  ;;  %s271_s30 = scalar_lea.vmem %s2275_s6, %s1588_s27 }
  0x64   : > { %595 = vrot.lane.b32.xlu1 %v1846_v4, %s1662_s7  ;;  %593 = vrot.lane.b32.xlu0 %v1850_v5, %s1662_s7 }
  0x68   : > { %543 = vrot.lane.b32.xlu1 %v440_v8, %s1663_s8  ;;  %541 = vrot.lane.b32.xlu0 %v439_v10, %s1663_s8 }
  0x6c   : > { %717 = vrot.lane.b32.xlu1 %v439_v10, %s1664_s9  ;;  %545 = vrot.lane.b32.xlu0 %v441_v12, %s1663_s8 }
  0x70   : > { %721 = vrot.lane.b32.xlu1 %v441_v12, %s1664_s9  ;;  %719 = vrot.lane.b32.xlu0 %v440_v8, %s1664_s9 }
  0x86   : > { %v481_v13 = vpop.permute.xlu1 %480  ;;  %v477_v14 = vpop.permute.xlu0 %476 }
  0x87   : > { %v1898_v26 = vsel %vm492_vm0, 0, %v477_v14 }
  0x8a   : > { %v483_v16 = vpop.permute.xlu1 %482  ;;  %v479_v17 = vpop.permute.xlu0 %478 }
  0x8b   : > { %v1875_v18 = vsel %vm492_vm0, %v477_v14, %v479_v17  ;;  %v1878_v19 = vsel %vm492_vm0, %v479_v17, %v481_v13  ;;  %v1885_v22 = vsel %vm492_vm0, %v481_v13, %v483_v16 }
  0x8c   : > { %965 = vrot.lane.b32.xlu0 %v1878_v19, %s1665_s10  ;;  %963 = vrot.lane.b32.xlu1 %v1875_v18, %s1665_s10 }
  0x8e   : > { %v666_v23 = vpop.permute.xlu1 %665  ;;  %v1887_v24 = vpop.permute.xlu0 %484 }
  0x8f   : > { %v1891_v25 = vsel %vm492_vm0, %v483_v16, %v1887_v24  ;;  %v698_v30 = vmul.bf16 %v666_v23, %v1898_v26 }
  0x90   : > { %967 = vrot.lane.b32.xlu1 %v1885_v22, %s1665_s10  ;;  %969 = vrot.lane.b32.xlu0 %v1891_v25, %s1665_s10 }
  0x92   : > { %v670_v27 = vpop.permute.xlu1 %669  ;;  %v668_v31 = vpop.permute.xlu0 %667 }
  0x93   : > { %v683_v34 = vsel %vm681_vm1, %v668_v31, %v670_v27  ;;  %v682_v45 = vsel %vm681_vm1, %v666_v23, %v668_v31 }
  0x94   : > { %961 = vrot.lane.b32.xlu1 %v1898_v26, %s1665_s10  ;;  %927 = vrot.lane.b32.xlu0 %v698_v30, %s1660_s29  ;;  %v700_v39 = vmul.bf16 %v683_v34, %v1878_v19  ;;  %v699_v49 = vmul.bf16 %v682_v45, %v1875_v18 }
  0x96   : > { %v1905_v35 = vpop.permute.xlu1 %673  ;;  %v672_v38 = vpop.permute.xlu0 %671 }
  0x97   : > { %v685_v40 = vsel %vm681_vm1, %v672_v38, %v1905_v35  ;;  %v684_v50 = vsel %vm681_vm1, %v670_v27, %v672_v38 }
  0x98   : > { %931 = vrot.lane.b32.xlu1 %v700_v39, %s1660_s29  ;;  %v702_v43 = vmul.bf16 %v685_v40, %v1891_v25  ;;  %v701_v55 = vmul.bf16 %v684_v50, %v1885_v22 }
  0x9a   : > { %v626_v41 = vpop.permute.xlu1 %625  ;;  %v624_v42 = vpop.permute.xlu0 %623 }
  0x9b   : > { %v656_v44 = vmul.bf16 %v624_v42, %v1898_v26  ;;  %v640_v56 = vsel %vm639_vm2, %v624_v42, %v626_v41 }
  0x9c   : > { %935 = vrot.lane.b32.xlu1 %v702_v43, %s1660_s29  ;;  %v657_v2 = vmul.bf16 %v640_v56, %v1875_v18 }
  0x9d   : > { %883 = vrot.lane.b32.xlu0 %v656_v44, %s1666_s11 }
  0x9e   : > { %v630_v46 = vpop.permute.xlu1 %629  ;;  %v628_v47 = vpop.permute.xlu0 %627 }
  0x9f   : > { %v641_v48 = vsel %vm639_vm2, %v626_v41, %v628_v47  ;;  %v642_v3 = vsel %vm639_vm2, %v628_v47, %v630_v46 }
  0xa0   : > { %v658_v51 = vmul.bf16 %v641_v48, %v1878_v19  ;;  %v659_v11 = vmul.bf16 %v642_v3, %v1885_v22 }
  0xa1   : > { %929 = vrot.lane.b32.xlu0 %v699_v49, %s1660_s29 }
  0xa2   : > { %v582_v52 = vpop.permute.xlu1 %581  ;;  %887 = vrot.lane.b32.xlu1 %v658_v51, %s1666_s11  ;;  %v1922_v53 = vpop.permute.xlu0 %631 }
  0xa3   : > { %v643_v54 = vsel %vm639_vm2, %v630_v46, %v1922_v53  ;;  %v614_v23 = vmul.bf16 %v582_v52, %v1898_v26 }
  0xa4   : > { %v660_v57 = vmul.bf16 %v643_v54, %v1891_v25 }
  0xa5   : > { %933 = vrot.lane.b32.xlu0 %v701_v55, %s1660_s29 }
  0xa6   : > { %v586_v60 = vpop.permute.xlu1 %585  ;;  %891 = vrot.lane.b32.xlu1 %v660_v57, %s1666_s11  ;;  %v584_v61 = vpop.permute.xlu0 %583 }
  0xa7   : > { %v598_v62 = vsel %vm597_vm3, %v582_v52, %v584_v61  ;;  %v599_v12 = vsel %vm597_vm3, %v584_v61, %v586_v60 }
  0xa8   : > { %v615_v6 = vmul.bf16 %v598_v62, %v1875_v18  ;;  %v616_v17 = vmul.bf16 %v599_v12, %v1878_v19 }
  0xa9   : > { %885 = vrot.lane.b32.xlu0 %v657_v2, %s1666_s11 }
  0xaa   : > { %v1936_v7 = vpop.permute.xlu1 %589  ;;  %841 = vrot.lane.b32.xlu1 %v615_v6, %s1667_s12  ;;  %v588_v8 = vpop.permute.xlu0 %587 }
  0xab   : > { %v600_v10 = vsel %vm597_vm3, %v586_v60, %v588_v8  ;;  %v601_v27 = vsel %vm597_vm3, %v588_v8, %v1936_v7  ;;  %v1994_v8 = vld [vmem:[%s2271_s2] sm:$0xff] }
  0xac   : > { %v617_v13 = vmul.bf16 %v600_v10, %v1885_v22  ;;  %v618_v34 = vmul.bf16 %v601_v27, %v1891_v25 }
  0xad   : > { %889 = vrot.lane.b32.xlu0 %v659_v11, %s1666_s11  ;;  %v1999_v11 = vcombine.high %v1994_v8, %v1994_v8 }
  0xae   : > { %v534_v14 = vpop.permute.xlu1 %533  ;;  %845 = vrot.lane.b32.xlu1 %v617_v13, %s1667_s12  ;;  %v532_v16 = vpop.permute.xlu0 %531 }
  0xaf   : > { %v548_v39 = vsel %vm547_vm4, %v532_v16, %v534_v14  ;;  %v564_v52 = vmul.bf16 %v532_v16, %v1898_v26  ;;  %1607 = vmatprep.mubr.msk.bf16.mxu0 %vm1051_vm6, %v1999_v11  ;;  %1608 = vmatprep.mubr.msk.bf16.mxu1 %vm1051_vm6, %v1999_v11 }
  0xb0   : > { %v565_v43 = vmul.bf16 %v548_v39, %v1875_v18 }
  0xb1   : > { %843 = vrot.lane.b32.xlu0 %v616_v17, %s1667_s12 }
  0xb2   : > { %v538_v30 = vpop.permute.xlu1 %537  ;;  %839 = vrot.lane.b32.xlu1 %v614_v23, %s1667_s12  ;;  %v536_v31 = vpop.permute.xlu0 %535 }
  0xb3   : > { %v549_v38 = vsel %vm547_vm4, %v534_v14, %v536_v31  ;;  %v550_v45 = vsel %vm547_vm4, %v536_v31, %v538_v30 }
  0xb4   : > { %v566_v40 = vmul.bf16 %v549_v38, %v1878_v19  ;;  %v567_v49 = vmul.bf16 %v550_v45, %v1885_v22 }
  0xb5   : > { %847 = vrot.lane.b32.xlu0 %v618_v34, %s1667_s12 }
  0xb6   : > { %v1956_v41 = vpop.permute.xlu1 %707  ;;  %799 = vrot.lane.b32.xlu1 %v566_v40, %s1668_s13  ;;  %v1959_v42 = vpop.permute.xlu0 %539 }
  0xb7   : > { %v551_v44 = vsel %vm547_vm4, %v538_v30, %v1959_v42 }
  0xb8   : > { %v568_v46 = vmul.bf16 %v551_v44, %v1891_v25 }
  0xb9   : > { %797 = vrot.lane.b32.xlu0 %v565_v43, %s1668_s13  ;;  %v740_v43 = vmul.bf16 %v1956_v41, %v1898_v26 }
  0xba   : > { %v712_v47 = vpop.permute.xlu1 %711  ;;  %803 = vrot.lane.b32.xlu1 %v568_v46, %s1668_s13  ;;  %v710_v48 = vpop.permute.xlu0 %709 }
  0xbb   : > { %v725_v56 = vsel %vm723_vm5, %v710_v48, %v712_v47  ;;  %v724_v61 = vsel %vm723_vm5, %v1956_v41, %v710_v48 }
  0xbc   : > { %v742_v62 = vmul.bf16 %v725_v56, %v1878_v19  ;;  %v741_v10 = vmul.bf16 %v724_v61, %v1875_v18 }
  0xbd   : > { %801 = vrot.lane.b32.xlu0 %v567_v49, %s1668_s13 }
  0xbe   : > { %v1970_v50 = vpop.permute.xlu1 %715  ;;  %753 = vrot.lane.b32.xlu1 %v1875_v18, %s1669_s14  ;;  %v714_v51 = vpop.permute.xlu0 %713 }
  0xbf   : > { %v727_v2 = vsel %vm723_vm5, %v714_v51, %v1970_v50  ;;  %v726_v12 = vsel %vm723_vm5, %v712_v47, %v714_v51 }
  0xc0   : > { %v744_v13 = vmul.bf16 %v727_v2, %v1891_v25  ;;  %v743_v23 = vmul.bf16 %v726_v12, %v1885_v22 }
  0xc1   : > { %795 = vrot.lane.b32.xlu0 %v564_v52, %s1668_s13 }
  0xc2   : > { %v489_v54 = vpop.permute.xlu1 %488  ;;  %757 = vrot.lane.b32.xlu1 %v1885_v22, %s1669_s14  ;;  %v487_v55 = vpop.permute.xlu0 %486 }
  0xc3   : > { %v2004_v14 = vsel %vm492_vm0, %v487_v55, %v489_v54  ;;  %v2015_v27 = vsel %vm492_vm0, %v1887_v24, %v487_v55 }
  0xc5   : > { %755 = vrot.lane.b32.xlu0 %v1878_v19, %s1669_s14 }
  0xc6   : > { %v676_v57 = vpop.permute.xlu1 %675  ;;  %751 = vrot.lane.b32.xlu1 %v1898_v26, %s1669_s14  ;;  %v491_v60 = vpop.permute.xlu0 %490 }
  0xc7   : > { %v686_v47 = vsel %vm681_vm1, %v1905_v35, %v676_v57 }
  0xc8   : > { %v703_v51 = vmul.bf16 %v686_v47, %v2015_v27 }
  0xc9   : > { %759 = vrot.lane.b32.xlu0 %v1891_v25, %s1669_s14 }
  0xca   : > { %v680_v3 = vpop.permute.xlu1 %679  ;;  %1009 = vrot.lane.b32.xlu1 %v742_v62, %s1670_s15  ;;  %v678_v6 = vpop.permute.xlu0 %677  ;;  %v2051_v62 = vsel %vm492_vm0, %v491_v60, 0 }
  0xcb   : > { %v688_v55 = vsel %vm681_vm1, %v678_v6, %v680_v3  ;;  %v687_v2 = vsel %vm681_vm1, %v676_v57, %v678_v6  ;;  %v706_v57 = vmul.bf16 %v680_v3, %v2051_v62 }
  0xcd   : > { %1007 = vrot.lane.b32.xlu0 %v741_v10, %s1670_s15 }
  0xce   : > { %v636_v16 = vpop.permute.xlu1 %635  ;;  %1013 = vrot.lane.b32.xlu1 %v744_v13, %s1670_s15  ;;  %v634_v17 = vpop.permute.xlu0 %633 }
  0xcf   : > { %v644_v30 = vsel %vm639_vm2, %v1922_v53, %v634_v17  ;;  %v645_v31 = vsel %vm639_vm2, %v634_v17, %v636_v16  ;;  %v2030_v53 = vsel %vm492_vm0, %v489_v54, %v491_v60 }
  0xd0   : > { %v661_v34 = vmul.bf16 %v644_v30, %v2015_v27  ;;  %v662_v38 = vmul.bf16 %v645_v31, %v2004_v14  ;;  %v705_v10 = vmul.bf16 %v688_v55, %v2030_v53  ;;  %v459_v55 = vld [vmem:[%s2272_s3] sm:$0xff] }
  0xd1   : > { %1011 = vrot.lane.b32.xlu0 %v743_v23, %s1670_s15 }
  0xd2   : > { %v592_v39 = vpop.permute.xlu1 %591  ;;  %971 = vrot.lane.b32.xlu1 %v2015_v27, %s1665_s10  ;;  %v638_v24 = vpop.permute.xlu0 %637 }
  0xd3   : > { %v602_v40 = vsel %vm597_vm3, %v1936_v7, %v592_v39  ;;  %v646_v45 = vsel %vm639_vm2, %v636_v16, %v638_v24  ;;  %v704_v16 = vmul.bf16 %v687_v2, %v2004_v14  ;;  %v664_v60 = vmul.bf16 %v638_v24, %v2051_v62 }
  0xd4   : > { %v619_v44 = vmul.bf16 %v602_v40, %v2015_v27  ;;  %v663_v46 = vmul.bf16 %v646_v45, %v2030_v53 }
  0xd5   : > { %1005 = vrot.lane.b32.xlu0 %v740_v43, %s1670_s15 }
  0xd6   : > { %v596_v7 = vpop.permute.xlu1 %595  ;;  %975 = vrot.lane.b32.xlu1 %v2030_v53, %s1665_s10  ;;  %v594_v48 = vpop.permute.xlu0 %593 }
  0xd7   : > { %v603_v41 = vsel %vm597_vm3, %v592_v39, %v594_v48  ;;  %v604_v49 = vsel %vm597_vm3, %v594_v48, %v596_v7  ;;  %v622_v3 = vmul.bf16 %v596_v7, %v2051_v62 }
  0xd8   : > { %v620_v52 = vmul.bf16 %v603_v41, %v2004_v14  ;;  %v621_v54 = vmul.bf16 %v604_v49, %v2030_v53 }
  0xd9   : > { %973 = vrot.lane.b32.xlu0 %v2004_v14, %s1665_s10 }
  0xda   : > { %v544_v35 = vpop.permute.xlu1 %543  ;;  %937 = vrot.lane.b32.xlu1 %v703_v51, %s1660_s29  ;;  %v542_v56 = vpop.permute.xlu0 %541  ;;  %v1671_v51 = vmov 0  }
  0xdb   : > { %v553_v61 = vsel %vm547_vm4, %v542_v56, %v544_v35  ;;  %v552_v6 = vsel %vm547_vm4, %v1959_v42, %v542_v56  ;;  %1647 = vset.pattern.permute.xlu0 %v1671_v51  ;;  %1646 = vset.pattern.permute.xlu1 %v1671_v51 }
  0xdc   : > { %v570_v12 = vmul.bf16 %v553_v61, %v2004_v14  ;;  %v569_v30 = vmul.bf16 %v552_v6, %v2015_v27 }
  0xdd   : > { %977 = vrot.lane.b32.xlu0 %v2051_v62, %s1665_s10 }
  0xde   : > { %941 = vrot.lane.b32.xlu1 %v705_v10, %s1660_s29  ;;  %v546_v13 = vpop.permute.xlu0 %545  ;;  %v718_v31 = vpop.permute.xlu1 %717 }
  0xdf   : > { %v554_v17 = vsel %vm547_vm4, %v544_v35, %v546_v13  ;;  %v728_v39 = vsel %vm723_vm5, %v1970_v50, %v718_v31 }
  0xe0   : > { %v571_v23 = vmul.bf16 %v554_v17, %v2030_v53 }
  0xe1   : > { %939 = vrot.lane.b32.xlu0 %v704_v16, %s1660_s29 }
  0xe2   : > { %893 = vrot.lane.b32.xlu1 %v661_v34, %s1666_s11  ;;  %v722_v42 = vpop.permute.xlu1 %721  ;;  %v720_v34 = vpop.permute.xlu0 %719 }
  0xe3   : > { %v730_v45 = vsel %vm723_vm5, %v720_v34, %v722_v42  ;;  %v729_v48 = vsel %vm723_vm5, %v718_v31, %v720_v34  ;;  %v748_v56 = vmul.bf16 %v722_v42, %v2051_v62 }
  0xe4   : > { %v747_v41 = vmul.bf16 %v730_v45, %v2030_v53 }
  0xe5   : > { %943 = vrot.lane.b32.xlu0 %v706_v57, %s1660_s29 }
  0xe6   : > { %897 = vrot.lane.b32.xlu1 %v663_v46, %s1666_s11 }
  0xe9   : > { %895 = vrot.lane.b32.xlu0 %v662_v38, %s1666_s11  ;;  %v572_v38 = vmul.bf16 %v546_v13, %v2051_v62 }
  0xea   : > { %849 = vrot.lane.b32.xlu1 %v619_v44, %s1667_s12  ;;  %v745_v44 = vmul.bf16 %v728_v39, %v2015_v27 }
  0xed   : > { %899 = vrot.lane.b32.xlu0 %v664_v60, %s1666_s11 }
  0xee   : > { %853 = vrot.lane.b32.xlu1 %v621_v54, %s1667_s12 }
  0xf1   : > { %851 = vrot.lane.b32.xlu0 %v620_v52, %s1667_s12  ;;  %v746_v52 = vmul.bf16 %v729_v48, %v2004_v14 }
  0xf2   : > { %805 = vrot.lane.b32.xlu1 %v569_v30, %s1668_s13 }
  0xf5   : > { %855 = vrot.lane.b32.xlu0 %v622_v3, %s1667_s12 }
  0xf6   : > { %809 = vrot.lane.b32.xlu1 %v571_v23, %s1668_s13 }
  0xf9   : > { %807 = vrot.lane.b32.xlu0 %v570_v12, %s1668_s13 }
  0xfa   : > { %761 = vrot.lane.b32.xlu1 %v2015_v27, %s1669_s14 }
  0xfd   : > { %811 = vrot.lane.b32.xlu0 %v572_v38, %s1668_s13 }
  0xfe   : > { %v964_v40 = vpop.permute.xlu1 %963  ;;  %765 = vrot.lane.b32.xlu1 %v2030_v53, %s1669_s14  ;;  %v966_v24 = vpop.permute.xlu0 %965 }
  0xff   : > { %v981_v43 = vsel %vm979_vm7, %v964_v40, %v966_v24 }
 0x100   : > { %1055 = vmatprep.subr.bf16.mxu0 %v981_v43 }
 0x101   : > { %763 = vrot.lane.b32.xlu0 %v2004_v14, %s1669_s14 }
 0x102   : > { %v968_v46 = vpop.permute.xlu1 %967  ;;  %1015 = vrot.lane.b32.xlu1 %v745_v44, %s1670_s15  ;;  %v2095_v50 = vpop.permute.xlu0 %969 }
 0x103   : > { %v983_v47 = vsel %vm979_vm7, %v968_v46, %v2095_v50  ;;  %v982_v7 = vsel %vm979_vm7, %v966_v24, %v968_v46 }
 0x104   : > { %1096 = vmatprep.subr.bf16.mxu1 %v983_v47 }
 0x105   : > { %767 = vrot.lane.b32.xlu0 %v2051_v62, %s1669_s14  ;;  %1097 = vmatpush1.bf16.msra.mxu1 %v982_v7 }
 0x106   : > { %v962_v49 = vpop.permute.xlu1 %961  ;;  %1019 = vrot.lane.b32.xlu1 %v747_v41, %s1670_s15  ;;  %v928_v61 = vpop.permute.xlu0 %927 }
 0x107   : > { %v980_v54 = vsel %vm979_vm7, %v962_v49, %v964_v40 }
 0x108   : > { %1056 = vmatpush1.bf16.msra.mxu0 %v980_v54 }
 0x109   : > { %1017 = vrot.lane.b32.xlu0 %v746_v52, %s1670_s15 }
 0x10a   : > { %v932_v35 = vpop.permute.xlu1 %931  ;;  %1042 = vperm.xlu1 %1646, %v459_v55  }
 0x10d   : > { %1021 = vrot.lane.b32.xlu0 %v748_v56, %s1670_s15 }
 0x10e   : > { %v2115_v10 = vpop.permute.xlu1 %935 }
 0x10f   : > { %v884_v2 = vpop.permute.xlu0 %883 }
 0x113   : > { %v930_v12 = vpop.permute.xlu0 %929 }
 0x114   : > { %v888_v13 = vpop.permute.xlu1 %887  ;;  %v946_v16 = vsel %vm681_vm1, %v930_v12, %v932_v35  ;;  %v945_v17 = vsel %vm681_vm1, %v928_v61, %v930_v12  ;;  %v516_v12 = vmul.bf16 %v1875_v18, %v1774_v33 }
 0x115   : > { %1057 = vmatprep.subr.bf16.mxu0 %v946_v16 }
 0x116   : > { %1058 = vmatpush1.bf16.msra.mxu0 %v945_v17 }
 0x117   : > { %v934_v23 = vpop.permute.xlu0 %933 }
 0x118   : > { %v2119_v57 = vpop.permute.xlu1 %891  ;;  %v948_v62 = vsel %vm681_vm1, %v934_v23, %v2115_v10  ;;  %v947_v60 = vsel %vm681_vm1, %v932_v35, %v934_v23  ;;  %v515_v23 = vmul.bf16 %v1898_v26, %v1760_v28 }
 0x119   : > { %1098 = vmatprep.subr.bf16.mxu1 %v948_v62 }
 0x11a   : > { %1099 = vmatpush1.bf16.msra.mxu1 %v947_v60  ;;  %v518_v60 = vmul.bf16 %v1885_v22, %v1784_v37 }
 0x11b   : > { %v886_v6 = vpop.permute.xlu0 %885 }
 0x11c   : > { %v842_v30 = vpop.permute.xlu1 %841  ;;  %v903_v3 = vsel %vm901_vm8, %v886_v6, %v888_v13  ;;  %v902_v31 = vsel %vm901_vm8, %v884_v2, %v886_v6 }
 0x11d   : > { %1059 = vmatprep.subr.bf16.mxu0 %v903_v3 }
 0x11e   : > { %1060 = vmatpush1.bf16.msra.mxu0 %v902_v31  ;;  %v2170_v31 = vcombine.low %v1994_v8, %v1994_v8 }
 0x11f   : > { %v890_v42 = vpop.permute.xlu0 %889  ;;  %1061 = vmatprep.subr.bf16.mxu0 %v1753_v21 }
 0x120   : > { %v846_v34 = vpop.permute.xlu1 %845  ;;  %v905_v38 = vsel %vm901_vm8, %v890_v42, %v2119_v57  ;;  %v904_v39 = vsel %vm901_vm8, %v888_v13, %v890_v42 }
 0x121   : > { %1100 = vmatprep.subr.bf16.mxu1 %v905_v38 }
 0x122   : > { %1062 = vmatpush1.bf16.msra.mxu0 %v1742_v15  ;;  %1101 = vmatpush1.bf16.msra.mxu1 %v904_v39 }
 0x123   : > { %v844_v40 = vpop.permute.xlu0 %843  ;;  %1102 = vmatprep.subr.bf16.mxu1 %v1749_v20 }
 0x124   : > { %v840_v24 = vpop.permute.xlu1 %839  ;;  %v859_v43 = vsel %vm857_vm9, %v842_v30, %v844_v40  ;;  %v860_v15 = vsel %vm857_vm9, %v844_v40, %v846_v34 }
 0x125   : > { %1063 = vmatprep.subr.bf16.mxu0 %v859_v43  ;;  %v858_v21 = vsel %vm857_vm9, %v840_v24, %v842_v30  ;;  %v517_v30 = vmul.bf16 %v1878_v19, %v1770_v32 }
 0x126   : > { %1064 = vmatpush1.bf16.msra.mxu0 %v858_v21  ;;  %1103 = vmatpush1.bf16.msra.mxu1 %v1736_v9 }
 0x127   : > { %v2135_v44 = vpop.permute.xlu0 %847 }
 0x128   : > { %v800_v45 = vpop.permute.xlu1 %799  ;;  %v861_v46 = vsel %vm857_vm9, %v846_v34, %v2135_v44 }
 0x129   : > { %1104 = vmatprep.subr.bf16.mxu1 %v861_v46 }
 0x12a   : > { %1105 = vmatpush1.bf16.msra.mxu1 %v860_v15 }
 0x12b   : > { %v798_v20 = vpop.permute.xlu0 %797 }
 0x12c   : > { %v2140_v47 = vpop.permute.xlu1 %803  ;;  %v815_v7 = vsel %vm813_vm10, %v798_v20, %v800_v45 }
 0x12d   : > { %1065 = vmatprep.subr.bf16.mxu0 %v815_v7 }
 0x12f   : > { %v802_v48 = vpop.permute.xlu0 %801 }
 0x130   : > { %v754_v41 = vpop.permute.xlu1 %753  ;;  %v817_v9 = vsel %vm813_vm10, %v802_v48, %v2140_v47  ;;  %v816_v49 = vsel %vm813_vm10, %v800_v45, %v802_v48 }
 0x131   : > { %1106 = vmatprep.subr.bf16.mxu1 %v817_v9 }
 0x132   : > { %1107 = vmatpush1.bf16.msra.mxu1 %v816_v49 }
 0x133   : > { %v796_v52 = vpop.permute.xlu0 %795 }
 0x134   : > { %v758_v54 = vpop.permute.xlu1 %757  ;;  %v814_v55 = vsel %vm813_vm10, %v796_v52, %v798_v20 }
 0x135   : > { %1066 = vmatpush1.bf16.msra.mxu0 %v814_v55 }
 0x137   : > { %v756_v35 = vpop.permute.xlu0 %755 }
 0x138   : > { %v752_v56 = vpop.permute.xlu1 %751  ;;  %v771_v61 = vsel %vm769_vm11, %v754_v41, %v756_v35  ;;  %v772_v62 = vsel %vm769_vm11, %v756_v35, %v758_v54 }
 0x139   : > { %1067 = vmatprep.subr.bf16.mxu0 %v771_v61  ;;  %v770_v2 = vsel %vm769_vm11, %v752_v56, %v754_v41 }
 0x13a   : > { %1068 = vmatpush1.bf16.msra.mxu0 %v770_v2 }
 0x13b   : > { %1069 = vmatprep.subr.bf16.mxu0 %v516_v12  ;;  %v2151_v13 = vpop.permute.xlu0 %759 }
 0x13c   : > { %v1010_v16 = vpop.permute.xlu1 %1009  ;;  %v773_v17 = vsel %vm769_vm11, %v758_v54, %v2151_v13 }
 0x13d   : > { %1108 = vmatprep.subr.bf16.mxu1 %v773_v17 }
 0x13e   : > { %1070 = vmatpush1.bf16.msra.mxu0 %v515_v23  ;;  %1109 = vmatpush1.bf16.msra.mxu1 %v772_v62 }
 0x13f   : > { %1110 = vmatprep.subr.bf16.mxu1 %v518_v60  ;;  %v1008_v33 = vpop.permute.xlu0 %1007 }
 0x140   : > { %v2160_v18 = vpop.permute.xlu1 %1013  ;;  %v1025_v6 = vsel %vm1023_vm12, %v1008_v33, %v1010_v16 }
 0x141   : > { %1085 = vmatprep.subr.bf16.mxu0 %v1025_v6 }
 0x142   : > { %1111 = vmatpush1.bf16.msra.mxu1 %v517_v30 }
 0x143   : > { %v1012_v28 = vpop.permute.xlu0 %1011 }
 0x144   : > { %v972_v26 = vpop.permute.xlu1 %971  ;;  %v1027_v3 = vsel %vm1023_vm12, %v1012_v28, %v2160_v18  ;;  %v1026_v37 = vsel %vm1023_vm12, %v1010_v16, %v1012_v28 }
 0x145   : > { %1126 = vmatprep.subr.bf16.mxu1 %v1027_v3  ;;  %v984_v39 = vsel %vm979_vm7, %v2095_v50, %v972_v26  ;;  %v519_v3 = vmul.bf16 %v1891_v25, %v1780_v36 }
 0x146   : > { %1127 = vmatpush2.bf16.msra.mxu1 %v1026_v37 }
 0x147   : > { %v1006_v22 = vpop.permute.xlu0 %1005 }
 0x148   : > { %v976_v42 = vpop.permute.xlu1 %975  ;;  %v1024_v34 = vsel %vm1023_vm12, %v1006_v22, %v1008_v33 }
 0x149   : > { %1086 = vmatpush2.bf16.msra.mxu0 %v1024_v34  ;;  %1129 = vmatmul.mubr.bf16.vlgmr.msra.gmra.mxu1 %v2170_v31 }
 0x14a   : > { %1610 = vmatprep.mubr.msk.bf16.mxu1 %vm1051_vm6, %v1999_v11 }
 0x14b   : > { %v974_v32 = vpop.permute.xlu0 %973 }
 0x14c   : > { %v938_v19 = vpop.permute.xlu1 %937  ;;  %v985_v38 = vsel %vm979_vm7, %v972_v26, %v974_v32  ;;  %1088 = vmatmul.mubr.bf16.vlgmr.msra.gmra.mxu0 %v2170_v31  ;;  %v986_v43 = vsel %vm979_vm7, %v974_v32, %v976_v42 }
 0x14d   : > { %1137 = vmatprep.subr.bf16.mxu0 %v985_v38  ;;  %1609 = vmatprep.mubr.msk.bf16.mxu0 %vm1051_vm6, %v1999_v11  ;;  %v949_v50 = vsel %vm681_vm1, %v2115_v10, %v938_v19  ;;  %v1229_v38 = vld [vmem:[%s2234_s5 + $0x10] sm:$0xff] }
 0x14e   : > { %1138 = vmatpush1.bf16.msra.mxu0 %v984_v39 }
 0x14f   : > { %v978_v8 = vpop.permute.xlu0 %977 }
 0x150   : > { %v942_v40 = vpop.permute.xlu1 %941  ;;  %v987_v24 = vsel %vm979_vm7, %v976_v42, %v978_v8  ;;  %v522_v42 = vmul.bf16 %v2030_v53, %v1846_v4 }
 0x151   : > { %1178 = vmatprep.subr.bf16.mxu1 %v987_v24  ;;  %v1230_v24 = vld [vmem:[%s2234_s5 + $0x18] sm:$0xff] }
 0x152   : > { %1179 = vmatpush1.bf16.msra.mxu1 %v986_v43 }
 0x153   : > { %v940_v21 = vpop.permute.xlu0 %939 }
 0x154   : > { %v894_v45 = vpop.permute.xlu1 %893  ;;  %v950_v46 = vsel %vm681_vm1, %v938_v19, %v940_v21  ;;  %v951_v7 = vsel %vm681_vm1, %v940_v21, %v942_v40 }
 0x155   : > { %1139 = vmatprep.subr.bf16.mxu0 %v950_v46  ;;  %v906_v49 = vsel %vm901_vm8, %v2119_v57, %v894_v45  ;;  %v1227_v46 = vld [vmem:[%s2234_s5] sm:$0xff] }
 0x156   : > { %1140 = vmatpush1.bf16.msra.mxu0 %v949_v50 }
 0x157   : > { %v944_v15 = vpop.permute.xlu0 %943 }
 0x158   : > { %v898_v11 = vpop.permute.xlu1 %897  ;;  %v952_v20 = vsel %vm681_vm1, %v942_v40, %v944_v15 }
 0x159   : > { %1180 = vmatprep.subr.bf16.mxu1 %v952_v20 }
 0x15a   : > { %1181 = vmatpush1.bf16.msra.mxu1 %v951_v7 }
 0x15b   : > { %v896_v48 = vpop.permute.xlu0 %895 }
 0x15c   : > { %v850_v41 = vpop.permute.xlu1 %849  ;;  %v907_v9 = vsel %vm901_vm8, %v894_v45, %v896_v48  ;;  %v908_v55 = vsel %vm901_vm8, %v896_v48, %v898_v11  ;;  %v1228_v48 = vld [vmem:[%s2234_s5 + $0x8] sm:$0xff] }
 0x15d   : > { %1141 = vmatprep.subr.bf16.mxu0 %v907_v9  ;;  %v862_v61 = vsel %vm857_vm9, %v2135_v44, %v850_v41 }
 0x15e   : > { %1142 = vmatpush1.bf16.msra.mxu0 %v906_v49 }
 0x15f   : > { %v900_v10 = vpop.permute.xlu0 %899  ;;  %1143 = vmatprep.subr.bf16.mxu0 %v1829_v59 }
 0x160   : > { %v854_v52 = vpop.permute.xlu1 %853  ;;  %v909_v54 = vsel %vm901_vm8, %v898_v11, %v900_v10 }
 0x161   : > { %1182 = vmatprep.subr.bf16.mxu1 %v909_v54 }
 0x162   : > { %1144 = vmatpush1.bf16.msra.mxu0 %v1764_v29  ;;  %1183 = vmatpush1.bf16.msra.mxu1 %v908_v55 }
 0x163   : > { %v852_v35 = vpop.permute.xlu0 %851  ;;  %1184 = vmatprep.subr.bf16.mxu1 %v1840_v0 }
 0x164   : > { %v806_v56 = vpop.permute.xlu1 %805  ;;  %v863_v57 = vsel %vm857_vm9, %v850_v41, %v852_v35  ;;  %v864_v29 = vsel %vm857_vm9, %v852_v35, %v854_v52 }
 0x165   : > { %1145 = vmatprep.subr.bf16.mxu0 %v863_v57  ;;  %v818_v17 = vsel %vm813_vm10, %v2140_v47, %v806_v56  ;;  %v520_v47 = vmul.bf16 %v2015_v27, %v1836_v63  ;;  %v521_v27 = vmul.bf16 %v2004_v14, %v1850_v5  ;;  %v1252_v5 = vld [vmem:[#allocation2] sm:$0x1] }
 0x166   : > { %1146 = vmatpush1.bf16.msra.mxu0 %v862_v61  ;;  %1185 = vmatpush1.bf16.msra.mxu1 %v1826_v58 }
 0x167   : > { %v856_v59 = vpop.permute.xlu0 %855  ;;  %1255 = vperm.xlu0 %1647, %v1252_v5  }
 0x168   : > { %v810_v2 = vpop.permute.xlu1 %809  ;;  %v865_v12 = vsel %vm857_vm9, %v854_v52, %v856_v59  ;;  %v1243_v59 = vld [vmem:[%s2273_s4] sm:$0x1] }
 0x169   : > { %1186 = vmatprep.subr.bf16.mxu1 %v865_v12 }
 0x16a   : > { %1187 = vmatpush1.bf16.msra.mxu1 %v864_v29  ;;  %v1231_v29 = vld [vmem:[%s2234_s5 + $0x20] sm:$0xff] }
 0x16b   : > { %v808_v16 = vpop.permute.xlu0 %807 }
 0x16c   : > { %v819_v0 = vsel %vm813_vm10, %v806_v56, %v808_v16  ;;  %v762_v23 = vpop.permute.xlu1 %761  ;;  %v820_v62 = vsel %vm813_vm10, %v808_v16, %v810_v2 }
 0x16d   : > { %1147 = vmatprep.subr.bf16.mxu0 %v819_v0  ;;  %v774_v30 = vsel %vm769_vm11, %v2151_v13, %v762_v23 }
 0x16e   : > { %1148 = vmatpush1.bf16.msra.mxu0 %v818_v17 }
 0x16f   : > { %v812_v44 = vpop.permute.xlu0 %811 }
 0x170   : > { %v821_v58 = vsel %vm813_vm10, %v810_v2, %v812_v44  ;;  %v766_v60 = vpop.permute.xlu1 %765 }
 0x171   : > { %1188 = vmatprep.subr.bf16.mxu1 %v821_v58 }
 0x172   : > { %1189 = vmatpush1.bf16.msra.mxu1 %v820_v62 }
 0x173   : > { %v764_v33 = vpop.permute.xlu0 %763 }
 0x174   : > { %v775_v6 = vsel %vm769_vm11, %v762_v23, %v764_v33  ;;  %v776_v37 = vsel %vm769_vm11, %v764_v33, %v766_v60  ;;  %v1016_v22 = vpop.permute.xlu1 %1015  ;;  %v1232_v23 = vld [vmem:[%s2234_s5 + $0x28] sm:$0xff] }
 0x175   : > { %1149 = vmatprep.subr.bf16.mxu0 %v775_v6  ;;  %v1028_v34 = vsel %vm1023_vm12, %v2160_v18, %v1016_v22  ;;  %v1233_v6 = vld [vmem:[%s2234_s5 + $0x30] sm:$0xff] }
 0x176   : > { %1150 = vmatpush1.bf16.msra.mxu0 %v774_v30 }
 0x177   : > { %1151 = vmatprep.subr.bf16.mxu0 %v520_v47  ;;  %v768_v28 = vpop.permute.xlu0 %767 }
 0x178   : > { %v777_v26 = vsel %vm769_vm11, %v766_v60, %v768_v28  ;;  %v1020_v36 = vpop.permute.xlu1 %1019 }
 0x179   : > { %1190 = vmatprep.subr.bf16.mxu1 %v777_v26 }
 0x17a   : > { %1152 = vmatpush1.bf16.msra.mxu0 %v519_v3  ;;  %1191 = vmatpush1.bf16.msra.mxu1 %v776_v37  ;;  %v1234_v37 = vld [vmem:[%s2234_s5 + $0x38] sm:$0xff] }
 0x17b   : > { %1192 = vmatprep.subr.bf16.mxu1 %v522_v42  ;;  %v1018_v13 = vpop.permute.xlu0 %1017 }
 0x17c   : > { %v1029_v63 = vsel %vm1023_vm12, %v1016_v22, %v1018_v13  ;;  %v1030_v53 = vsel %vm1023_vm12, %v1018_v13, %v1020_v36 }
 0x17d   : > { %1167 = vmatprep.subr.bf16.mxu0 %v1029_v63 }
 0x17e   : > { %1168 = vmatpush2.bf16.msra.mxu0 %v1028_v34  ;;  %1193 = vmatpush1.bf16.msra.mxu1 %v521_v27 }
 0x17f   : > { %v1022_v25 = vpop.permute.xlu0 %1021 }
 0x180   : > { %v1031_v4 = vsel %vm1023_vm12, %v1020_v36, %v1022_v25 }
 0x181   : > { %1170 = vmatmul.mubr.bf16.vlgmr.msra.gmra.mxu0 %v2170_v31  ;;  %1208 = vmatprep.subr.bf16.mxu1 %v1031_v4 }
 0x182   : > { %1209 = vmatpush2.bf16.msra.mxu1 %v1030_v53  ;;  %1323 = vmatprep.mubr.bf16.mxu0 %v1671_v51 }
 0x185   : > { %1211 = vmatmul.mubr.bf16.vlgmr.msra.gmra.mxu1 %v2170_v31  ;;  %v1043_v14 = vpop.permute.xlu1 %1042 }
 0x186   : > { %1364 = vmatprep.mubr.bf16.mxu1 %v1671_v51 }
 0x209   : > { %v1130_v18 = vpop.f32.mrf.mxu1 }
 0x20a   : > { %v1131_v32 = vadd.f32 %v1130_v18, %v1043_v14 }
 0x20b   : > { %v1132_v19 = vpop.f32.mrf.mxu1 }
 0x20c   : > { %v1089_v31 = vpop.f32.mrf.mxu0  ;;  %v1133_v39 = vadd.f32 %v1132_v19, %v1043_v14  ;;  %v1221_v8 = vmax.f32 %v1131_v32, 0.0 }
 0x20d   : > { %v1134_v40 = vpop.f32.mrf.mxu1  ;;  %v1090_v43 = vadd.f32 %v1089_v31, %v1043_v14 }
 0x20e   : > { %v1091_v21 = vpop.f32.mrf.mxu0  ;;  %v1222_v45 = vmax.f32 %v1133_v39, 0.0  ;;  %v1237_v50 = vadd.f32 %v1229_v38, %v1221_v8  ;;  %v1259_v8 = vshrl.u32 %v273_v1, 7 }
 0x20f   : > { %v1135_v15 = vpop.f32.mrf.mxu1  ;;  %v1092_v11 = vadd.f32 %v1091_v21, %v1043_v14  ;;  %v1219_v20 = vmax.f32 %v1090_v43, 0.0  ;;  %v1672_v43 = vmov 1966171168  }
 0x210   : > { %v1093_v7 = vpop.f32.mrf.mxu0  ;;  %v1238_v41 = vadd.f32 %v1230_v24, %v1222_v45  ;;  %v1246_v9 = vpack.c.bf16 %v1237_v50, %v1237_v50  ;;  %v1260_v40 = vsub.s32 0, %v1259_v8  ;;  %v1256_v24 = vpop.permute.xlu0 %1255  ;;  %v1468_v21 = vunpack.c.l.s4 %v1672_v43 }
 0x211   : > { %v1220_v49 = vmax.f32 %v1092_v11, 0.0  ;;  %v1235_v10 = vadd.f32 %v1227_v46, %v1219_v20 }
 0x212   : > { %v1094_v52 = vpop.f32.mrf.mxu0  ;;  %v1247_v54 = vpack.c.bf16 %v1238_v41, %v1238_v41  ;;  %v1274_v55 = vsel %vm1266_vm13, %v1246_v9, 0  ;;  %v1261_v45 = vrot.slane %v1256_v24, %v1260_v40  ;;  %v1469_v46 = vunpack.c.0.s8 %v1468_v21 }
 0x213   : > { %v1236_v35 = vadd.f32 %v1228_v48, %v1220_v49  ;;  %v1244_v56 = vpack.c.bf16 %v1235_v10, %v1235_v10 }
 0x214   : > { %1613 = vmatprep.subr.msk.bf16.mxu1 %vm1266_vm13, %v1247_v54  ;;  %v1472_v48 = vsub.s32 %v1469_v46, %v1259_v8 }
 0x215   : > { %v1245_v57 = vpack.c.bf16 %v1236_v35, %v1236_v35  ;;  %v1268_v61 = vsel %vm1266_vm13, %v1244_v56, 0  ;;  %1347 = vmatpush1.bf16.msra.mxu1 %v1274_v55 }
 0x217   : > { %1611 = vmatprep.subr.msk.bf16.mxu0 %vm1266_vm13, %v1245_v57 }
 0x218   : > { %1306 = vmatpush1.bf16.msra.mxu0 %v1268_v61  ;;  %1614 = vmatmul.mubr.msk.bf16.vlgmr.msra.gmra.mxu1 %vm1262_vm14, %v1243_v59 }
 0x219   : > { %1446 = vmatprep.mubr.bf16.mxu1 %v1671_v51 }
 0x21b   : > { %1612 = vmatmul.mubr.msk.bf16.vlgmr.msra.gmra.mxu0 %vm1262_vm14, %v1243_v59 }
 0x21c   : > { %1405 = vmatprep.mubr.bf16.mxu0 %v1671_v51 }
 0x241   : > { %v1171_v2 = vpop.f32.mrf.mxu0 }
 0x242   : > { %v1172_v12 = vadd.f32 %v1171_v2, %v1043_v14 }
 0x243   : > { %v1173_v16 = vpop.f32.mrf.mxu0 }
 0x244   : > { %v1223_v0 = vmax.f32 %v1172_v12, 0.0  ;;  %v1174_v17 = vadd.f32 %v1173_v16, %v1043_v14 }
 0x245   : > { %v1175_v44 = vpop.f32.mrf.mxu0  ;;  %v1212_v58 = vpop.f32.mrf.mxu1 }
 0x246   : > { %v1239_v62 = vadd.f32 %v1231_v29, %v1223_v0  ;;  %v1224_v60 = vmax.f32 %v1174_v17, 0.0  ;;  %v1213_v33 = vadd.f32 %v1212_v58, %v1043_v14 }
 0x247   : > { %v1176_v30 = vpop.f32.mrf.mxu0  ;;  %v1214_v47 = vpop.f32.mrf.mxu1 }
 0x248   : > { %v1248_v28 = vpack.c.bf16 %v1239_v62, %v1239_v62  ;;  %v1240_v26 = vadd.f32 %v1232_v23, %v1224_v60  ;;  %v1225_v3 = vmax.f32 %v1213_v33, 0.0  ;;  %v1215_v51 = vadd.f32 %v1214_v47, %v1043_v14 }
 0x249   : > { %v1216_v22 = vpop.f32.mrf.mxu1 }
 0x24a   : > { %v1249_v42 = vpack.c.bf16 %v1240_v26, %v1240_v26  ;;  %v1241_v13 = vadd.f32 %v1233_v6, %v1225_v3  ;;  %v1226_v63 = vmax.f32 %v1215_v51, 0.0  ;;  %v1280_v25 = vsel %vm1266_vm13, %v1248_v28, 0 }
 0x24b   : > { %v1217_v27 = vpop.f32.mrf.mxu1 }
 0x24c   : > { %v1250_v34 = vpack.c.bf16 %v1241_v13, %v1241_v13  ;;  %v1242_v36 = vadd.f32 %v1234_v37, %v1226_v63  ;;  %1615 = vmatprep.subr.msk.bf16.mxu0 %vm1266_vm13, %v1249_v42 }
 0x24d   : > { %1388 = vmatpush1.bf16.msra.mxu0 %v1280_v25 }
 0x24e   : > { %v1251_v4 = vpack.c.bf16 %v1242_v36, %v1242_v36  ;;  %v1286_v53 = vsel %vm1266_vm13, %v1250_v34, 0 }
 0x250   : > { %1617 = vmatprep.subr.msk.bf16.mxu1 %vm1266_vm13, %v1251_v4  ;;  %1616 = vmatmul.mubr.msk.bf16.vlgmr.msra.gmra.mxu0 %vm1262_vm14, %v1243_v59 }
 0x251   : > { %1429 = vmatpush1.bf16.msra.mxu1 %v1286_v53 }
 0x254   : > { %1618 = vmatmul.mubr.msk.bf16.vlgmr.msra.gmra.mxu1 %vm1262_vm14, %v1243_v59 }
 0x2d8   : > { %v1366_v5 = vpop.f32.mrf.mxu1 }
 0x2d9   : > { %v1367_v50 = vadd.f32 %v1366_v5, %v1261_v45 }
 0x2da   : > { %v1368_v14 = vpop.f32.mrf.mxu1 }
 0x2db   : > { %v1325_v18 = vpop.f32.mrf.mxu0  ;;  %v1369_v15 = vadd.f32 %v1368_v14, %v1261_v45 }
 0x2dc   : > { %v1370_v32 = vpop.f32.mrf.mxu1  ;;  %v1326_v11 = vadd.f32 %v1325_v18, %v1261_v45 }
 0x2dd   : > { %v1327_v19 = vpop.f32.mrf.mxu0  ;;  %v1464_v9 = vcombine.low %v1367_v50, %v1369_v15 }
 0x2de   : > { %v1371_v38 = vpop.f32.mrf.mxu1  ;;  %v1328_v20 = vadd.f32 %v1327_v19, %v1261_v45 }
 0x2df   : > { %v1329_v31 = vpop.f32.mrf.mxu0  ;;  %v1480_v35 = vrot.slane %v1464_v9, %v1472_v48 }
 0x2e0   : > { %v1463_v52 = vcombine.low %v1326_v11, %v1328_v20 }
 0x2e1   : > { %v1330_v39 = vpop.f32.mrf.mxu0 }
 0x2e2   : > { %v1473_v2 = vrot.slane %v1463_v52, %v1472_v48 }
 0x2e4   : > { %v1495_v23 = vcombine.low %v1473_v2, %v1480_v35 }
 0x2e6   : > { %v1503_v58 = vrot.slane %v1495_v23, %v1472_v48 }
 0x310   : > { %v1407_v7 = vpop.f32.mrf.mxu0 }
 0x311   : > { %v1408_v49 = vadd.f32 %v1407_v7, %v1261_v45 }
 0x312   : > { %v1409_v41 = vpop.f32.mrf.mxu0 }
 0x313   : > { %v1410_v10 = vadd.f32 %v1409_v41, %v1261_v45 }
 0x314   : > { %v1448_v54 = vpop.f32.mrf.mxu1  ;;  %v1411_v1 = vpop.f32.mrf.mxu0 }
 0x315   : > { %v1449_v57 = vadd.f32 %v1448_v54, %v1261_v45  ;;  %v1465_v61 = vcombine.low %v1408_v49, %v1410_v10 }
 0x316   : > { %v1450_v55 = vpop.f32.mrf.mxu1  ;;  %v1412_v56 = vpop.f32.mrf.mxu0 }
 0x317   : > { %v1451_v59 = vadd.f32 %v1450_v55, %v1261_v45  ;;  %v1487_v0 = vrot.slane %v1465_v61, %v1472_v48 }
 0x318   : > { %v1452_v12 = vpop.f32.mrf.mxu1 }
 0x319   : > { %v1466_v29 = vcombine.low %v1449_v57, %v1451_v59 }
 0x31a   : > { %v1453_v16 = vpop.f32.mrf.mxu1 }
 0x31b   : > { %v1494_v17 = vrot.slane %v1466_v29, %v1472_v48 }
 0x31d   : > { %v1496_v44 = vcombine.low %v1487_v0, %v1494_v17 }
 0x31f   : > { %v1510_v62 = vrot.slane %v1496_v44, %v1472_v48 }
 0x321   : > { %v1511_v60 = vcombine.low %v1503_v58, %v1510_v62 }
 0x323   : > { %1513 = vst [vmem:[%s271_s30] sm:$0xff] %v1511_v60 }
 0x324 PF: > { %s18_s23 = sadd.s32 1, %s1656_s23  }
 0x325   : > { %p15_p4 = scmp.ge.s32.totalorder %s18_s23, 4  }
 0x327   :  { %17 = sbr.rel (!%p15_p4) target bundleno = 3 (0x3), region = 77 }

</bundles_post_ra>
